<compile_context>
chip_gen: v5e
topology: v5e:2x2
jax: 0.10.0
libtpu: 0.0.40
codegen_flags: <defaults>
</compile_context>

<pallas_src>
import functools
import math

import jax
import jax.numpy as jnp
from jax import lax
from jax.experimental import pallas as pl
from jax.experimental.pallas import tpu as pltpu

EMBED_DIM = 32
NUM_HEADS = 4
REDUCTION = 4
WINDOW = 7
LN_EPS = 1e-5


# ---------------------------------------------------------------------------
# Fused Pallas kernel: one grid step = `wpc` attention windows.
# ---------------------------------------------------------------------------

def _block_kernel(x_ref, wq_ref, wk_ref, wv_ref, bq_ref, bk_ref, bv_ref,
                  wo_ref, bo_ref, g1_ref, be1_ref,
                  wc1_ref, bc1_ref, wc2_ref, bc2_ref, g2_ref, be2_ref,
                  o_ref, *, wpc, tpad, t_real, nh, hd):
    C = nh * hd
    scale = 1.0 / math.sqrt(hd)

    x = x_ref[...]                                              # [M, C], M = wpc*Tp

    # ---- token-parallel QKV projections, batched over all windows in this block
    q = jnp.dot(x, wq_ref[...], preferred_element_type=jnp.float32) + bq_ref[...]
    k = jnp.dot(x, wk_ref[...], preferred_element_type=jnp.float32) + bk_ref[...]
    v = jnp.dot(x, wv_ref[...], preferred_element_type=jnp.float32) + bv_ref[...]

    # ---- per-head channel masks (VPU selects; avoids sub-128-lane head slices)
    lane = lax.broadcasted_iota(jnp.int32, (1, C), 1)
    q_heads, v_heads = [], []
    for h in range(nh):
        in_head = jnp.logical_and(lane >= h * hd, lane < (h + 1) * hd)
        q_heads.append(q * jnp.where(in_head, scale, 0.0))       # softmax scale folded in
        v_heads.append(v * jnp.where(in_head, 1.0, 0.0))

    # key-padding mask (lane axis of the head-stacked scores = key position)
    if tpad != t_real:
        key_pos = lax.broadcasted_iota(jnp.int32, (nh * tpad, tpad), 1)
        key_valid = key_pos < t_real

    # ---- attention: per-window loop (small, unrolled); heads batched along sublanes
    ctx_blocks = []
    for w in range(wpc):
        lo, hi = w * tpad, (w + 1) * tpad                        # 8-aligned row range
        k_w = k[lo:hi, :]                                        # [Tp, C]
        q_cat = jnp.concatenate([qh[lo:hi, :] for qh in q_heads], axis=0)  # [nh*Tp, C]
        s = lax.dot_general(q_cat, k_w, (((1,), (1,)), ((), ())),
                            preferred_element_type=jnp.float32)  # [nh*Tp, Tp]
        if tpad != t_real:
            s = jnp.where(key_valid, s, -1e30)
        s = s - jnp.max(s, axis=-1, keepdims=True)
        p = jnp.exp(s)
        p = p / jnp.sum(p, axis=-1, keepdims=True)               # exact softmax

        # per-head PV matmuls accumulate into one lane-dense [Tp, C] context tile
        ctx = jnp.dot(p[0:tpad, :], v_heads[0][lo:hi, :],
                      preferred_element_type=jnp.float32)
        for h in range(1, nh):
            ctx = ctx + jnp.dot(p[h * tpad:(h + 1) * tpad, :],
                                v_heads[h][lo:hi, :],
                                preferred_element_type=jnp.float32)
        ctx_blocks.append(ctx)
    ctx_all = jnp.concatenate(ctx_blocks, axis=0)                # [M, C], lane-dense

    # ---- hoisted tail: out-proj, residual+LN1, 1x1 conv MLP + Mish, residual+LN2
    def layernorm(t, g, b):
        mu = jnp.mean(t, axis=-1, keepdims=True)
        d = t - mu
        var = jnp.mean(d * d, axis=-1, keepdims=True)
        return d * lax.rsqrt(var + LN_EPS) * g + b

    attn = jnp.dot(ctx_all, wo_ref[...], preferred_element_type=jnp.float32) + bo_ref[...]
    y = layernorm(x + attn, g1_ref[...], be1_ref[...])

    h1 = jnp.dot(y, wc1_ref[...], preferred_element_type=jnp.float32) + bc1_ref[...]
    sp = jnp.maximum(h1, 0.0) + jnp.log(1.0 + jnp.exp(-jnp.abs(h1)))   # softplus
    h1 = h1 * jnp.tanh(sp)                                             # Mish
    h2 = jnp.dot(h1, wc2_ref[...], preferred_element_type=jnp.float32) + bc2_ref[...]

    o_ref[...] = layernorm(y + h2, g2_ref[...], be2_ref[...])


# ---------------------------------------------------------------------------
# Block forward: window partition/reverse (+token padding) in plain JAX,
# everything else fused in the kernel.
# ---------------------------------------------------------------------------

def efficient_transformer_block(x, params):
    """x: [B, C, H, W] float32 (NCHW). Returns NCHW, same shape."""
    B, C, H, W = x.shape
    w = WINDOW
    if H < w or W < w:
        w = min(H, W)
    # TODO(synk): the PyTorch try/except full-attention fallback (H or W not divisible
    # by the window) is Python control flow; this implementation requires divisibility.
    nh = NUM_HEADS
    hd = C // nh
    Cr = C // REDUCTION
    Hn, Wn = H // w, W // w
    T = w * w
    Tp = ((T + 7) // 8) * 8           # pad window tokens to a sublane multiple
    Nw = B * Hn * Wn

    # windows per grid step: batch token-parallel matmuls over several windows,
    # but keep >= 2 grid steps when possible (v7x megacore + DMA double-buffering).
    if Nw % 4 == 0 and Nw >= 8:
        wpc = 4
    elif Nw % 2 == 0 and Nw >= 4:
        wpc = 2
    else:
        wpc = Nw
    m_blk = wpc * Tp

    # window partition: [B, C, H, W] -> [Nw, T, C]; pad tokens; flatten to [Nw*Tp, C]
    xw = (x.reshape(B, C, Hn, w, Wn, w)
            .transpose(0, 2, 4, 1, 3, 5)
            .reshape(Nw, C, T)
            .transpose(0, 2, 1))
    if Tp != T:
        xw = jnp.pad(xw, ((0, 0), (0, Tp - T), (0, 0)))
    x_flat = xw.reshape(Nw * Tp, C)

    # split packed in-projection into lane-dense per-tensor weights (wrapper side)
    w_in, b_in = params["w_in_t"], params["b_in"]
    wq, wk, wv = w_in[:, :C], w_in[:, C:2 * C], w_in[:, 2 * C:]
    bq = b_in[:C].reshape(1, C)
    bk = b_in[C:2 * C].reshape(1, C)
    bv = b_in[2 * C:].reshape(1, C)

    kernel = functools.partial(_block_kernel, wpc=wpc, tpad=Tp, t_real=T,
                               nh=nh, hd=hd)

    def wspec(shape):
        return pl.BlockSpec(shape, lambda i: (0, 0))

    out = pl.pallas_call(
        kernel,
        out_shape=jax.ShapeDtypeStruct((Nw * Tp, C), jnp.float32),
        grid=(Nw // wpc,),
        in_specs=[
            pl.BlockSpec((m_blk, C), lambda i: (i, 0)),          # x token slab
            wspec((C, C)), wspec((C, C)), wspec((C, C)),         # Wq, Wk, Wv
            wspec((1, C)), wspec((1, C)), wspec((1, C)),         # bq, bk, bv
            wspec((C, C)), wspec((1, C)),                        # out-proj
            wspec((1, C)), wspec((1, C)),                        # LN1
            wspec((C, Cr)), wspec((1, Cr)),                      # conv1
            wspec((Cr, C)), wspec((1, C)),                       # conv2
            wspec((1, C)), wspec((1, C)),                        # LN2
        ],
        out_specs=pl.BlockSpec((m_blk, C), lambda i: (i, 0)),
        compiler_params=pltpu.CompilerParams(
            dimension_semantics=("parallel",)),
    )(x_flat,
      wq, wk, wv, bq, bk, bv,
      params["w_out_t"], params["b_out"].reshape(1, C),
      params["ln1_g"].reshape(1, C), params["ln1_b"].reshape(1, C),
      params["w_c1_t"], params["b_c1"].reshape(1, Cr),
      params["w_c2_t"], params["b_c2"].reshape(1, C),
      params["ln2_g"].reshape(1, C), params["ln2_b"].reshape(1, C))

    # drop token padding + window reverse: [Nw*Tp, C] -> [B, C, H, W]
    out = out.reshape(Nw, Tp, C)[:, :T, :]
    return (out.reshape(B, Hn, Wn, w, w, C)
               .transpose(0, 5, 1, 3, 2, 4)
               .reshape(B, C, H, W))


# ---------------------------------------------------------------------------
# Pure-JAX reference mirroring the PyTorch forward (for verification)
# ---------------------------------------------------------------------------

def reference_block(x, params):
    B, C, H, W = x.shape
    w = WINDOW
    nh, hd = NUM_HEADS, C // NUM_HEADS
    Hn, Wn = H // w, W // w
    T = w * w
    Nw = B * Hn * Wn

    xw = (x.reshape(B, C, Hn, w, Wn, w).transpose(0, 2, 4, 1, 3, 5)
            .reshape(Nw, C, T).transpose(0, 2, 1))      # [Nw, T, C]
    qkv = xw @ params["w_in_t"] + params["b_in"]
    q, k, v = jnp.split(qkv, 3, axis=-1)
    sh = lambda a: a.reshape(Nw, T, nh, hd).transpose(0, 2, 1, 3)
    q, k, v = sh(q), sh(k), sh(v)
    s = jnp.einsum("bhtd,bhsd->bhts", q, k) / math.sqrt(hd)
    p = jax.nn.softmax(s, axis=-1)
    ctx = jnp.einsum("bhts,bhsd->bhtd", p, v)
    ctx = ctx.transpose(0, 2, 1, 3).reshape(Nw, T, C)
    attn_win = ctx @ params["w_out_t"] + params["b_out"]
    attn_sp = (attn_win.reshape(B, Hn, Wn, w, w, C)
                       .transpose(0, 5, 1, 3, 2, 4).reshape(B, C, H, W))

    def ln(a, g, b):
        m = a.mean(-1, keepdims=True)
        vv = ((a - m) ** 2).mean(-1, keepdims=True)
        return (a - m) / jnp.sqrt(vv + LN_EPS) * g + b

    x1 = x + attn_sp
    x1 = ln(x1.transpose(0, 2, 3, 1), params["ln1_g"], params["ln1_b"]).transpose(0, 3, 1, 2)
    h = jnp.einsum("bchw,oc->bohw", x1, params["w_c1_t"].T) + params["b_c1"][None, :, None, None]
    h = h * jnp.tanh(jax.nn.softplus(h))
    h = jnp.einsum("bchw,oc->bohw", h, params["w_c2_t"].T) + params["b_c2"][None, :, None, None]
    x2 = x1 + h
    x2 = ln(x2.transpose(0, 2, 3, 1), params["ln2_g"], params["ln2_b"]).transpose(0, 3, 1, 2)
    return x2


if __name__ == "__main__":
    B, C, H, W = 2, EMBED_DIM, 14, 14       # H, W divisible by local_window=7
    Cr = C // REDUCTION
    keys = jax.random.split(jax.random.PRNGKey(0), 13)
    x = jax.random.normal(keys[0], (B, C, H, W), jnp.float32)

    def init(k, shape, fan_in):
        return jax.random.normal(k, shape, jnp.float32) / math.sqrt(fan_in)

    params = {
        # nn.MultiheadAttention: in_proj_weight [3C, C] (stored transposed), in_proj_bias [3C]
        "w_in_t": init(keys[1], (C, 3 * C), C),
        "b_in": init(keys[2], (3 * C,), C),
        # out_proj: weight [C, C] (stored transposed), bias [C]
        "w_out_t": init(keys[3], (C, C), C),
        "b_out": init(keys[4], (C,), C),
        # Conv2d(C, C//4, 1) weight [C//4, C, 1, 1] -> transposed matrix [C, C//4]
        "w_c1_t": init(keys[5], (C, Cr), C),
        "b_c1": init(keys[6], (Cr,), C),
        # Conv2d(C//4, C, 1) weight [C, C//4, 1, 1] -> transposed matrix [C//4, C]
        "w_c2_t": init(keys[7], (Cr, C), Cr),
        "b_c2": init(keys[8], (C,), Cr),
        # LayerNorms
        "ln1_g": jnp.ones((C,), jnp.float32) + 0.1 * jax.random.normal(keys[9], (C,)),
        "ln1_b": 0.1 * jax.random.normal(keys[10], (C,), jnp.float32),
        "ln2_g": jnp.ones((C,), jnp.float32) + 0.1 * jax.random.normal(keys[11], (C,)),
        "ln2_b": 0.1 * jax.random.normal(keys[12], (C,), jnp.float32),
    }

    out = jax.jit(efficient_transformer_block)(x, params)
    out = jax.block_until_ready(out)
    assert out.shape == (B, C, H, W)

    ref = reference_block(x, params)
    err = float(jnp.max(jnp.abs(out - ref)))
    assert err < 2e-2, f"max abs err vs reference = {err}"
    print("KERNEL_OK")
</pallas_src>

<mosaic_0001>
module attributes {stable_mosaic.version = 11 : i64} {
  func.func @_block_kernel(%arg0: i32, %arg1: memref<224x32xf32, #tpu.memory_space<vmem>>, %arg2: memref<32x32xf32, #tpu.memory_space<vmem>>, %arg3: memref<32x32xf32, #tpu.memory_space<vmem>>, %arg4: memref<32x32xf32, #tpu.memory_space<vmem>>, %arg5: memref<1x32xf32, #tpu.memory_space<vmem>>, %arg6: memref<1x32xf32, #tpu.memory_space<vmem>>, %arg7: memref<1x32xf32, #tpu.memory_space<vmem>>, %arg8: memref<32x32xf32, #tpu.memory_space<vmem>>, %arg9: memref<1x32xf32, #tpu.memory_space<vmem>>, %arg10: memref<1x32xf32, #tpu.memory_space<vmem>>, %arg11: memref<1x32xf32, #tpu.memory_space<vmem>>, %arg12: memref<32x8xf32, #tpu.memory_space<vmem>>, %arg13: memref<1x8xf32, #tpu.memory_space<vmem>>, %arg14: memref<8x32xf32, #tpu.memory_space<vmem>>, %arg15: memref<1x32xf32, #tpu.memory_space<vmem>>, %arg16: memref<1x32xf32, #tpu.memory_space<vmem>>, %arg17: memref<1x32xf32, #tpu.memory_space<vmem>>, %arg18: memref<224x32xf32, #tpu.memory_space<vmem>>) attributes {dimension_semantics = [#tpu.dimension_semantics<parallel>], iteration_bounds = array<i64: 2>, scalar_prefetch = 0 : i64, scratch_operands = 0 : i64, tpu.core_type = #tpu.core_type<tc>, window_params = [{transform_indices = @transform_0, window_bounds = array<i64: 224, 32>}, {pipeline_mode = #tpu.pipeline_mode<synchronous>, transform_indices = @transform_1, window_bounds = array<i64: 32, 32>}, {pipeline_mode = #tpu.pipeline_mode<synchronous>, transform_indices = @transform_2, window_bounds = array<i64: 32, 32>}, {pipeline_mode = #tpu.pipeline_mode<synchronous>, transform_indices = @transform_3, window_bounds = array<i64: 32, 32>}, {pipeline_mode = #tpu.pipeline_mode<synchronous>, transform_indices = @transform_4, window_bounds = array<i64: 1, 32>}, {pipeline_mode = #tpu.pipeline_mode<synchronous>, transform_indices = @transform_5, window_bounds = array<i64: 1, 32>}, {pipeline_mode = #tpu.pipeline_mode<synchronous>, transform_indices = @transform_6, window_bounds = array<i64: 1, 32>}, {pipeline_mode = #tpu.pipeline_mode<synchronous>, transform_indices = @transform_7, window_bounds = array<i64: 32, 32>}, {pipeline_mode = #tpu.pipeline_mode<synchronous>, transform_indices = @transform_8, window_bounds = array<i64: 1, 32>}, {pipeline_mode = #tpu.pipeline_mode<synchronous>, transform_indices = @transform_9, window_bounds = array<i64: 1, 32>}, {pipeline_mode = #tpu.pipeline_mode<synchronous>, transform_indices = @transform_10, window_bounds = array<i64: 1, 32>}, {pipeline_mode = #tpu.pipeline_mode<synchronous>, transform_indices = @transform_11, window_bounds = array<i64: 32, 8>}, {pipeline_mode = #tpu.pipeline_mode<synchronous>, transform_indices = @transform_12, window_bounds = array<i64: 1, 8>}, {pipeline_mode = #tpu.pipeline_mode<synchronous>, transform_indices = @transform_13, window_bounds = array<i64: 8, 32>}, {pipeline_mode = #tpu.pipeline_mode<synchronous>, transform_indices = @transform_14, window_bounds = array<i64: 1, 32>}, {pipeline_mode = #tpu.pipeline_mode<synchronous>, transform_indices = @transform_15, window_bounds = array<i64: 1, 32>}, {pipeline_mode = #tpu.pipeline_mode<synchronous>, transform_indices = @transform_16, window_bounds = array<i64: 1, 32>}, {transform_indices = @transform_17, window_bounds = array<i64: 224, 32>}]} {
    %c0 = arith.constant 0 : index
    %c0_0 = arith.constant 0 : index
    %0 = vector.load %arg1[%c0, %c0_0] : memref<224x32xf32, #tpu.memory_space<vmem>>, vector<224x32xf32>
    %c0_1 = arith.constant 0 : index
    %c0_2 = arith.constant 0 : index
    %1 = vector.load %arg2[%c0_1, %c0_2] : memref<32x32xf32, #tpu.memory_space<vmem>>, vector<32x32xf32>
    %cst = arith.constant dense<0.000000e+00> : vector<224x32xf32>
    %2 = tpu.matmul %0, %1, %cst {dimension_numbers = #tpu.dot_dimension_numbers<[1], [0], [0], [1], [0, 0, 1, 1], [], []>} : vector<224x32xf32>, vector<32x32xf32>, vector<224x32xf32> -> vector<224x32xf32>
    %c0_3 = arith.constant 0 : index
    %c0_4 = arith.constant 0 : index
    %3 = vector.load %arg5[%c0_3, %c0_4] : memref<1x32xf32, #tpu.memory_space<vmem>>, vector<1x32xf32>
    %4 = vector.broadcast %3 : vector<1x32xf32> to vector<224x32xf32>
    %5 = arith.addf %2, %4 : vector<224x32xf32>
    %c0_5 = arith.constant 0 : index
    %c0_6 = arith.constant 0 : index
    %6 = vector.load %arg3[%c0_5, %c0_6] : memref<32x32xf32, #tpu.memory_space<vmem>>, vector<32x32xf32>
    %cst_7 = arith.constant dense<0.000000e+00> : vector<224x32xf32>
    %7 = tpu.matmul %0, %6, %cst_7 {dimension_numbers = #tpu.dot_dimension_numbers<[1], [0], [0], [1], [0, 0, 1, 1], [], []>} : vector<224x32xf32>, vector<32x32xf32>, vector<224x32xf32> -> vector<224x32xf32>
    %c0_8 = arith.constant 0 : index
    %c0_9 = arith.constant 0 : index
    %8 = vector.load %arg6[%c0_8, %c0_9] : memref<1x32xf32, #tpu.memory_space<vmem>>, vector<1x32xf32>
    %9 = vector.broadcast %8 : vector<1x32xf32> to vector<224x32xf32>
    %10 = arith.addf %7, %9 : vector<224x32xf32>
    %c0_10 = arith.constant 0 : index
    %c0_11 = arith.constant 0 : index
    %11 = vector.load %arg4[%c0_10, %c0_11] : memref<32x32xf32, #tpu.memory_space<vmem>>, vector<32x32xf32>
    %cst_12 = arith.constant dense<0.000000e+00> : vector<224x32xf32>
    %12 = tpu.matmul %0, %11, %cst_12 {dimension_numbers = #tpu.dot_dimension_numbers<[1], [0], [0], [1], [0, 0, 1, 1], [], []>} : vector<224x32xf32>, vector<32x32xf32>, vector<224x32xf32> -> vector<224x32xf32>
    %c0_13 = arith.constant 0 : index
    %c0_14 = arith.constant 0 : index
    %13 = vector.load %arg7[%c0_13, %c0_14] : memref<1x32xf32, #tpu.memory_space<vmem>>, vector<1x32xf32>
    %14 = vector.broadcast %13 : vector<1x32xf32> to vector<224x32xf32>
    %15 = arith.addf %12, %14 : vector<224x32xf32>
    %16 = tpu.iota {dimensions = array<i32: 1>} : vector<1x32xi32>
    %c0_i32 = arith.constant 0 : i32
    %17 = vector.broadcast %c0_i32 : i32 to vector<1x32xi32>
    %18 = arith.cmpi sge, %16, %17 : vector<1x32xi32>
    %c8_i32 = arith.constant 8 : i32
    %19 = vector.broadcast %c8_i32 : i32 to vector<1x32xi32>
    %20 = arith.cmpi slt, %16, %19 : vector<1x32xi32>
    %21 = arith.andi %18, %20 : vector<1x32xi1>
    %cst_15 = arith.constant 0.353553385 : f32
    %cst_16 = arith.constant 0.000000e+00 : f32
    %22 = vector.broadcast %cst_15 : f32 to vector<1x32xf32>
    %23 = vector.broadcast %cst_16 : f32 to vector<1x32xf32>
    %24 = arith.select %21, %22, %23 : vector<1x32xi1>, vector<1x32xf32>
    %25 = vector.broadcast %24 : vector<1x32xf32> to vector<224x32xf32>
    %26 = arith.mulf %5, %25 : vector<224x32xf32>
    %cst_17 = arith.constant 1.000000e+00 : f32
    %cst_18 = arith.constant 0.000000e+00 : f32
    %27 = vector.broadcast %cst_17 : f32 to vector<1x32xf32>
    %28 = vector.broadcast %cst_18 : f32 to vector<1x32xf32>
    %29 = arith.select %21, %27, %28 : vector<1x32xi1>, vector<1x32xf32>
    %30 = vector.broadcast %29 : vector<1x32xf32> to vector<224x32xf32>
    %31 = arith.mulf %15, %30 : vector<224x32xf32>
    %c8_i32_19 = arith.constant 8 : i32
    %32 = vector.broadcast %c8_i32_19 : i32 to vector<1x32xi32>
    %33 = arith.cmpi sge, %16, %32 : vector<1x32xi32>
    %c16_i32 = arith.constant 16 : i32
    %34 = vector.broadcast %c16_i32 : i32 to vector<1x32xi32>
    %35 = arith.cmpi slt, %16, %34 : vector<1x32xi32>
    %36 = arith.andi %33, %35 : vector<1x32xi1>
    %cst_20 = arith.constant 0.353553385 : f32
    %cst_21 = arith.constant 0.000000e+00 : f32
    %37 = vector.broadcast %cst_20 : f32 to vector<1x32xf32>
    %38 = vector.broadcast %cst_21 : f32 to vector<1x32xf32>
    %39 = arith.select %36, %37, %38 : vector<1x32xi1>, vector<1x32xf32>
    %40 = vector.broadcast %39 : vector<1x32xf32> to vector<224x32xf32>
    %41 = arith.mulf %5, %40 : vector<224x32xf32>
    %cst_22 = arith.constant 1.000000e+00 : f32
    %cst_23 = arith.constant 0.000000e+00 : f32
    %42 = vector.broadcast %cst_22 : f32 to vector<1x32xf32>
    %43 = vector.broadcast %cst_23 : f32 to vector<1x32xf32>
    %44 = arith.select %36, %42, %43 : vector<1x32xi1>, vector<1x32xf32>
    %45 = vector.broadcast %44 : vector<1x32xf32> to vector<224x32xf32>
    %46 = arith.mulf %15, %45 : vector<224x32xf32>
    %c16_i32_24 = arith.constant 16 : i32
    %47 = vector.broadcast %c16_i32_24 : i32 to vector<1x32xi32>
    %48 = arith.cmpi sge, %16, %47 : vector<1x32xi32>
    %c24_i32 = arith.constant 24 : i32
    %49 = vector.broadcast %c24_i32 : i32 to vector<1x32xi32>
    %50 = arith.cmpi slt, %16, %49 : vector<1x32xi32>
    %51 = arith.andi %48, %50 : vector<1x32xi1>
    %cst_25 = arith.constant 0.353553385 : f32
    %cst_26 = arith.constant 0.000000e+00 : f32
    %52 = vector.broadcast %cst_25 : f32 to vector<1x32xf32>
    %53 = vector.broadcast %cst_26 : f32 to vector<1x32xf32>
    %54 = arith.select %51, %52, %53 : vector<1x32xi1>, vector<1x32xf32>
    %55 = vector.broadcast %54 : vector<1x32xf32> to vector<224x32xf32>
    %56 = arith.mulf %5, %55 : vector<224x32xf32>
    %cst_27 = arith.constant 1.000000e+00 : f32
    %cst_28 = arith.constant 0.000000e+00 : f32
    %57 = vector.broadcast %cst_27 : f32 to vector<1x32xf32>
    %58 = vector.broadcast %cst_28 : f32 to vector<1x32xf32>
    %59 = arith.select %51, %57, %58 : vector<1x32xi1>, vector<1x32xf32>
    %60 = vector.broadcast %59 : vector<1x32xf32> to vector<224x32xf32>
    %61 = arith.mulf %15, %60 : vector<224x32xf32>
    %c24_i32_29 = arith.constant 24 : i32
    %62 = vector.broadcast %c24_i32_29 : i32 to vector<1x32xi32>
    %63 = arith.cmpi sge, %16, %62 : vector<1x32xi32>
    %c32_i32 = arith.constant 32 : i32
    %64 = vector.broadcast %c32_i32 : i32 to vector<1x32xi32>
    %65 = arith.cmpi slt, %16, %64 : vector<1x32xi32>
    %66 = arith.andi %63, %65 : vector<1x32xi1>
    %cst_30 = arith.constant 0.353553385 : f32
    %cst_31 = arith.constant 0.000000e+00 : f32
    %67 = vector.broadcast %cst_30 : f32 to vector<1x32xf32>
    %68 = vector.broadcast %cst_31 : f32 to vector<1x32xf32>
    %69 = arith.select %66, %67, %68 : vector<1x32xi1>, vector<1x32xf32>
    %70 = vector.broadcast %69 : vector<1x32xf32> to vector<224x32xf32>
    %71 = arith.mulf %5, %70 : vector<224x32xf32>
    %cst_32 = arith.constant 1.000000e+00 : f32
    %cst_33 = arith.constant 0.000000e+00 : f32
    %72 = vector.broadcast %cst_32 : f32 to vector<1x32xf32>
    %73 = vector.broadcast %cst_33 : f32 to vector<1x32xf32>
    %74 = arith.select %66, %72, %73 : vector<1x32xi1>, vector<1x32xf32>
    %75 = vector.broadcast %74 : vector<1x32xf32> to vector<224x32xf32>
    %76 = arith.mulf %15, %75 : vector<224x32xf32>
    %77 = tpu.iota {dimensions = array<i32: 1>} : vector<224x56xi32>
    %c49_i32 = arith.constant 49 : i32
    %78 = vector.broadcast %c49_i32 : i32 to vector<224x56xi32>
    %79 = arith.cmpi slt, %77, %78 : vector<224x56xi32>
    %80 = vector.extract_strided_slice %10 {offsets = [0, 0], sizes = [56, 32], strides = [1, 1]} : vector<224x32xf32> to vector<56x32xf32>
    %81 = vector.extract_strided_slice %26 {offsets = [0, 0], sizes = [56, 32], strides = [1, 1]} : vector<224x32xf32> to vector<56x32xf32>
    %82 = vector.extract_strided_slice %41 {offsets = [0, 0], sizes = [56, 32], strides = [1, 1]} : vector<224x32xf32> to vector<56x32xf32>
    %83 = vector.extract_strided_slice %56 {offsets = [0, 0], sizes = [56, 32], strides = [1, 1]} : vector<224x32xf32> to vector<56x32xf32>
    %84 = vector.extract_strided_slice %71 {offsets = [0, 0], sizes = [56, 32], strides = [1, 1]} : vector<224x32xf32> to vector<56x32xf32>
    %85 = tpu.concatenate %81, %82, %83, %84 in 0 : vector<56x32xf32>, vector<56x32xf32>, vector<56x32xf32>, vector<56x32xf32> -> vector<224x32xf32>
    %cst_34 = arith.constant dense<0.000000e+00> : vector<224x56xf32>
    %86 = tpu.matmul %85, %80, %cst_34 {dimension_numbers = #tpu.dot_dimension_numbers<[1], [1], [0], [0], [0, 0, 1, 0], [], []>} : vector<224x32xf32>, vector<56x32xf32>, vector<224x56xf32> -> vector<224x56xf32>
    %cst_35 = arith.constant -1.000000e+30 : f32
    %87 = vector.broadcast %cst_35 : f32 to vector<224x56xf32>
    %88 = arith.select %79, %86, %87 : vector<224x56xi1>, vector<224x56xf32>
    %cst_36 = arith.constant dense<0xFF800000> : vector<224xf32>
    %89 = vector.multi_reduction <maximumf>, %88, %cst_36 [1] : vector<224x56xf32> to vector<224xf32>
    %90 = vector.shape_cast %89 : vector<224xf32> to vector<224x1xf32>
    %91 = vector.broadcast %90 : vector<224x1xf32> to vector<224x56xf32>
    %92 = arith.subf %88, %91 : vector<224x56xf32>
    %93 = math.exp %92 : vector<224x56xf32>
    %cst_37 = arith.constant dense<0.000000e+00> : vector<224xf32>
    %94 = vector.multi_reduction <add>, %93, %cst_37 [1] : vector<224x56xf32> to vector<224xf32>
    %95 = vector.shape_cast %94 : vector<224xf32> to vector<224x1xf32>
    %96 = vector.broadcast %95 : vector<224x1xf32> to vector<224x56xf32>
    %97 = arith.divf %93, %96 : vector<224x56xf32>
    %98 = vector.extract_strided_slice %97 {offsets = [0, 0], sizes = [56, 56], strides = [1, 1]} : vector<224x56xf32> to vector<56x56xf32>
    %99 = vector.extract_strided_slice %31 {offsets = [0, 0], sizes = [56, 32], strides = [1, 1]} : vector<224x32xf32> to vector<56x32xf32>
    %cst_38 = arith.constant dense<0.000000e+00> : vector<56x32xf32>
    %100 = tpu.matmul %98, %99, %cst_38 {dimension_numbers = #tpu.dot_dimension_numbers<[1], [0], [0], [1], [0, 0, 1, 1], [], []>} : vector<56x56xf32>, vector<56x32xf32>, vector<56x32xf32> -> vector<56x32xf32>
    %101 = vector.extract_strided_slice %97 {offsets = [56, 0], sizes = [56, 56], strides = [1, 1]} : vector<224x56xf32> to vector<56x56xf32>
    %102 = vector.extract_strided_slice %46 {offsets = [0, 0], sizes = [56, 32], strides = [1, 1]} : vector<224x32xf32> to vector<56x32xf32>
    %cst_39 = arith.constant dense<0.000000e+00> : vector<56x32xf32>
    %103 = tpu.matmul %101, %102, %cst_39 {dimension_numbers = #tpu.dot_dimension_numbers<[1], [0], [0], [1], [0, 0, 1, 1], [], []>} : vector<56x56xf32>, vector<56x32xf32>, vector<56x32xf32> -> vector<56x32xf32>
    %104 = arith.addf %100, %103 : vector<56x32xf32>
    %105 = vector.extract_strided_slice %97 {offsets = [112, 0], sizes = [56, 56], strides = [1, 1]} : vector<224x56xf32> to vector<56x56xf32>
    %106 = vector.extract_strided_slice %61 {offsets = [0, 0], sizes = [56, 32], strides = [1, 1]} : vector<224x32xf32> to vector<56x32xf32>
    %cst_40 = arith.constant dense<0.000000e+00> : vector<56x32xf32>
    %107 = tpu.matmul %105, %106, %cst_40 {dimension_numbers = #tpu.dot_dimension_numbers<[1], [0], [0], [1], [0, 0, 1, 1], [], []>} : vector<56x56xf32>, vector<56x32xf32>, vector<56x32xf32> -> vector<56x32xf32>
    %108 = arith.addf %104, %107 : vector<56x32xf32>
    %109 = vector.extract_strided_slice %97 {offsets = [168, 0], sizes = [56, 56], strides = [1, 1]} : vector<224x56xf32> to vector<56x56xf32>
    %110 = vector.extract_strided_slice %76 {offsets = [0, 0], sizes = [56, 32], strides = [1, 1]} : vector<224x32xf32> to vector<56x32xf32>
    %cst_41 = arith.constant dense<0.000000e+00> : vector<56x32xf32>
    %111 = tpu.matmul %109, %110, %cst_41 {dimension_numbers = #tpu.dot_dimension_numbers<[1], [0], [0], [1], [0, 0, 1, 1], [], []>} : vector<56x56xf32>, vector<56x32xf32>, vector<56x32xf32> -> vector<56x32xf32>
    %112 = arith.addf %108, %111 : vector<56x32xf32>
    %113 = vector.extract_strided_slice %10 {offsets = [56, 0], sizes = [56, 32], strides = [1, 1]} : vector<224x32xf32> to vector<56x32xf32>
    %114 = vector.extract_strided_slice %26 {offsets = [56, 0], sizes = [56, 32], strides = [1, 1]} : vector<224x32xf32> to vector<56x32xf32>
    %115 = vector.extract_strided_slice %41 {offsets = [56, 0], sizes = [56, 32], strides = [1, 1]} : vector<224x32xf32> to vector<56x32xf32>
    %116 = vector.extract_strided_slice %56 {offsets = [56, 0], sizes = [56, 32], strides = [1, 1]} : vector<224x32xf32> to vector<56x32xf32>
    %117 = vector.extract_strided_slice %71 {offsets = [56, 0], sizes = [56, 32], strides = [1, 1]} : vector<224x32xf32> to vector<56x32xf32>
    %118 = tpu.concatenate %114, %115, %116, %117 in 0 : vector<56x32xf32>, vector<56x32xf32>, vector<56x32xf32>, vector<56x32xf32> -> vector<224x32xf32>
    %cst_42 = arith.constant dense<0.000000e+00> : vector<224x56xf32>
    %119 = tpu.matmul %118, %113, %cst_42 {dimension_numbers = #tpu.dot_dimension_numbers<[1], [1], [0], [0], [0, 0, 1, 0], [], []>} : vector<224x32xf32>, vector<56x32xf32>, vector<224x56xf32> -> vector<224x56xf32>
    %cst_43 = arith.constant -1.000000e+30 : f32
    %120 = vector.broadcast %cst_43 : f32 to vector<224x56xf32>
    %121 = arith.select %79, %119, %120 : vector<224x56xi1>, vector<224x56xf32>
    %cst_44 = arith.constant dense<0xFF800000> : vector<224xf32>
    %122 = vector.multi_reduction <maximumf>, %121, %cst_44 [1] : vector<224x56xf32> to vector<224xf32>
    %123 = vector.shape_cast %122 : vector<224xf32> to vector<224x1xf32>
    %124 = vector.broadcast %123 : vector<224x1xf32> to vector<224x56xf32>
    %125 = arith.subf %121, %124 : vector<224x56xf32>
    %126 = math.exp %125 : vector<224x56xf32>
    %cst_45 = arith.constant dense<0.000000e+00> : vector<224xf32>
    %127 = vector.multi_reduction <add>, %126, %cst_45 [1] : vector<224x56xf32> to vector<224xf32>
    %128 = vector.shape_cast %127 : vector<224xf32> to vector<224x1xf32>
    %129 = vector.broadcast %128 : vector<224x1xf32> to vector<224x56xf32>
    %130 = arith.divf %126, %129 : vector<224x56xf32>
    %131 = vector.extract_strided_slice %130 {offsets = [0, 0], sizes = [56, 56], strides = [1, 1]} : vector<224x56xf32> to vector<56x56xf32>
    %132 = vector.extract_strided_slice %31 {offsets = [56, 0], sizes = [56, 32], strides = [1, 1]} : vector<224x32xf32> to vector<56x32xf32>
    %cst_46 = arith.constant dense<0.000000e+00> : vector<56x32xf32>
    %133 = tpu.matmul %131, %132, %cst_46 {dimension_numbers = #tpu.dot_dimension_numbers<[1], [0], [0], [1], [0, 0, 1, 1], [], []>} : vector<56x56xf32>, vector<56x32xf32>, vector<56x32xf32> -> vector<56x32xf32>
    %134 = vector.extract_strided_slice %130 {offsets = [56, 0], sizes = [56, 56], strides = [1, 1]} : vector<224x56xf32> to vector<56x56xf32>
    %135 = vector.extract_strided_slice %46 {offsets = [56, 0], sizes = [56, 32], strides = [1, 1]} : vector<224x32xf32> to vector<56x32xf32>
    %cst_47 = arith.constant dense<0.000000e+00> : vector<56x32xf32>
    %136 = tpu.matmul %134, %135, %cst_47 {dimension_numbers = #tpu.dot_dimension_numbers<[1], [0], [0], [1], [0, 0, 1, 1], [], []>} : vector<56x56xf32>, vector<56x32xf32>, vector<56x32xf32> -> vector<56x32xf32>
    %137 = arith.addf %133, %136 : vector<56x32xf32>
    %138 = vector.extract_strided_slice %130 {offsets = [112, 0], sizes = [56, 56], strides = [1, 1]} : vector<224x56xf32> to vector<56x56xf32>
    %139 = vector.extract_strided_slice %61 {offsets = [56, 0], sizes = [56, 32], strides = [1, 1]} : vector<224x32xf32> to vector<56x32xf32>
    %cst_48 = arith.constant dense<0.000000e+00> : vector<56x32xf32>
    %140 = tpu.matmul %138, %139, %cst_48 {dimension_numbers = #tpu.dot_dimension_numbers<[1], [0], [0], [1], [0, 0, 1, 1], [], []>} : vector<56x56xf32>, vector<56x32xf32>, vector<56x32xf32> -> vector<56x32xf32>
    %141 = arith.addf %137, %140 : vector<56x32xf32>
    %142 = vector.extract_strided_slice %130 {offsets = [168, 0], sizes = [56, 56], strides = [1, 1]} : vector<224x56xf32> to vector<56x56xf32>
    %143 = vector.extract_strided_slice %76 {offsets = [56, 0], sizes = [56, 32], strides = [1, 1]} : vector<224x32xf32> to vector<56x32xf32>
    %cst_49 = arith.constant dense<0.000000e+00> : vector<56x32xf32>
    %144 = tpu.matmul %142, %143, %cst_49 {dimension_numbers = #tpu.dot_dimension_numbers<[1], [0], [0], [1], [0, 0, 1, 1], [], []>} : vector<56x56xf32>, vector<56x32xf32>, vector<56x32xf32> -> vector<56x32xf32>
    %145 = arith.addf %141, %144 : vector<56x32xf32>
    %146 = vector.extract_strided_slice %10 {offsets = [112, 0], sizes = [56, 32], strides = [1, 1]} : vector<224x32xf32> to vector<56x32xf32>
    %147 = vector.extract_strided_slice %26 {offsets = [112, 0], sizes = [56, 32], strides = [1, 1]} : vector<224x32xf32> to vector<56x32xf32>
    %148 = vector.extract_strided_slice %41 {offsets = [112, 0], sizes = [56, 32], strides = [1, 1]} : vector<224x32xf32> to vector<56x32xf32>
    %149 = vector.extract_strided_slice %56 {offsets = [112, 0], sizes = [56, 32], strides = [1, 1]} : vector<224x32xf32> to vector<56x32xf32>
    %150 = vector.extract_strided_slice %71 {offsets = [112, 0], sizes = [56, 32], strides = [1, 1]} : vector<224x32xf32> to vector<56x32xf32>
    %151 = tpu.concatenate %147, %148, %149, %150 in 0 : vector<56x32xf32>, vector<56x32xf32>, vector<56x32xf32>, vector<56x32xf32> -> vector<224x32xf32>
    %cst_50 = arith.constant dense<0.000000e+00> : vector<224x56xf32>
    %152 = tpu.matmul %151, %146, %cst_50 {dimension_numbers = #tpu.dot_dimension_numbers<[1], [1], [0], [0], [0, 0, 1, 0], [], []>} : vector<224x32xf32>, vector<56x32xf32>, vector<224x56xf32> -> vector<224x56xf32>
    %cst_51 = arith.constant -1.000000e+30 : f32
    %153 = vector.broadcast %cst_51 : f32 to vector<224x56xf32>
    %154 = arith.select %79, %152, %153 : vector<224x56xi1>, vector<224x56xf32>
    %cst_52 = arith.constant dense<0xFF800000> : vector<224xf32>
    %155 = vector.multi_reduction <maximumf>, %154, %cst_52 [1] : vector<224x56xf32> to vector<224xf32>
    %156 = vector.shape_cast %155 : vector<224xf32> to vector<224x1xf32>
    %157 = vector.broadcast %156 : vector<224x1xf32> to vector<224x56xf32>
    %158 = arith.subf %154, %157 : vector<224x56xf32>
    %159 = math.exp %158 : vector<224x56xf32>
    %cst_53 = arith.constant dense<0.000000e+00> : vector<224xf32>
    %160 = vector.multi_reduction <add>, %159, %cst_53 [1] : vector<224x56xf32> to vector<224xf32>
    %161 = vector.shape_cast %160 : vector<224xf32> to vector<224x1xf32>
    %162 = vector.broadcast %161 : vector<224x1xf32> to vector<224x56xf32>
    %163 = arith.divf %159, %162 : vector<224x56xf32>
    %164 = vector.extract_strided_slice %163 {offsets = [0, 0], sizes = [56, 56], strides = [1, 1]} : vector<224x56xf32> to vector<56x56xf32>
    %165 = vector.extract_strided_slice %31 {offsets = [112, 0], sizes = [56, 32], strides = [1, 1]} : vector<224x32xf32> to vector<56x32xf32>
    %cst_54 = arith.constant dense<0.000000e+00> : vector<56x32xf32>
    %166 = tpu.matmul %164, %165, %cst_54 {dimension_numbers = #tpu.dot_dimension_numbers<[1], [0], [0], [1], [0, 0, 1, 1], [], []>} : vector<56x56xf32>, vector<56x32xf32>, vector<56x32xf32> -> vector<56x32xf32>
    %167 = vector.extract_strided_slice %163 {offsets = [56, 0], sizes = [56, 56], strides = [1, 1]} : vector<224x56xf32> to vector<56x56xf32>
    %168 = vector.extract_strided_slice %46 {offsets = [112, 0], sizes = [56, 32], strides = [1, 1]} : vector<224x32xf32> to vector<56x32xf32>
    %cst_55 = arith.constant dense<0.000000e+00> : vector<56x32xf32>
    %169 = tpu.matmul %167, %168, %cst_55 {dimension_numbers = #tpu.dot_dimension_numbers<[1], [0], [0], [1], [0, 0, 1, 1], [], []>} : vector<56x56xf32>, vector<56x32xf32>, vector<56x32xf32> -> vector<56x32xf32>
    %170 = arith.addf %166, %169 : vector<56x32xf32>
    %171 = vector.extract_strided_slice %163 {offsets = [112, 0], sizes = [56, 56], strides = [1, 1]} : vector<224x56xf32> to vector<56x56xf32>
    %172 = vector.extract_strided_slice %61 {offsets = [112, 0], sizes = [56, 32], strides = [1, 1]} : vector<224x32xf32> to vector<56x32xf32>
    %cst_56 = arith.constant dense<0.000000e+00> : vector<56x32xf32>
    %173 = tpu.matmul %171, %172, %cst_56 {dimension_numbers = #tpu.dot_dimension_numbers<[1], [0], [0], [1], [0, 0, 1, 1], [], []>} : vector<56x56xf32>, vector<56x32xf32>, vector<56x32xf32> -> vector<56x32xf32>
    %174 = arith.addf %170, %173 : vector<56x32xf32>
    %175 = vector.extract_strided_slice %163 {offsets = [168, 0], sizes = [56, 56], strides = [1, 1]} : vector<224x56xf32> to vector<56x56xf32>
    %176 = vector.extract_strided_slice %76 {offsets = [112, 0], sizes = [56, 32], strides = [1, 1]} : vector<224x32xf32> to vector<56x32xf32>
    %cst_57 = arith.constant dense<0.000000e+00> : vector<56x32xf32>
    %177 = tpu.matmul %175, %176, %cst_57 {dimension_numbers = #tpu.dot_dimension_numbers<[1], [0], [0], [1], [0, 0, 1, 1], [], []>} : vector<56x56xf32>, vector<56x32xf32>, vector<56x32xf32> -> vector<56x32xf32>
    %178 = arith.addf %174, %177 : vector<56x32xf32>
    %179 = vector.extract_strided_slice %10 {offsets = [168, 0], sizes = [56, 32], strides = [1, 1]} : vector<224x32xf32> to vector<56x32xf32>
    %180 = vector.extract_strided_slice %26 {offsets = [168, 0], sizes = [56, 32], strides = [1, 1]} : vector<224x32xf32> to vector<56x32xf32>
    %181 = vector.extract_strided_slice %41 {offsets = [168, 0], sizes = [56, 32], strides = [1, 1]} : vector<224x32xf32> to vector<56x32xf32>
    %182 = vector.extract_strided_slice %56 {offsets = [168, 0], sizes = [56, 32], strides = [1, 1]} : vector<224x32xf32> to vector<56x32xf32>
    %183 = vector.extract_strided_slice %71 {offsets = [168, 0], sizes = [56, 32], strides = [1, 1]} : vector<224x32xf32> to vector<56x32xf32>
    %184 = tpu.concatenate %180, %181, %182, %183 in 0 : vector<56x32xf32>, vector<56x32xf32>, vector<56x32xf32>, vector<56x32xf32> -> vector<224x32xf32>
    %cst_58 = arith.constant dense<0.000000e+00> : vector<224x56xf32>
    %185 = tpu.matmul %184, %179, %cst_58 {dimension_numbers = #tpu.dot_dimension_numbers<[1], [1], [0], [0], [0, 0, 1, 0], [], []>} : vector<224x32xf32>, vector<56x32xf32>, vector<224x56xf32> -> vector<224x56xf32>
    %cst_59 = arith.constant -1.000000e+30 : f32
    %186 = vector.broadcast %cst_59 : f32 to vector<224x56xf32>
    %187 = arith.select %79, %185, %186 : vector<224x56xi1>, vector<224x56xf32>
    %cst_60 = arith.constant dense<0xFF800000> : vector<224xf32>
    %188 = vector.multi_reduction <maximumf>, %187, %cst_60 [1] : vector<224x56xf32> to vector<224xf32>
    %189 = vector.shape_cast %188 : vector<224xf32> to vector<224x1xf32>
    %190 = vector.broadcast %189 : vector<224x1xf32> to vector<224x56xf32>
    %191 = arith.subf %187, %190 : vector<224x56xf32>
    %192 = math.exp %191 : vector<224x56xf32>
    %cst_61 = arith.constant dense<0.000000e+00> : vector<224xf32>
    %193 = vector.multi_reduction <add>, %192, %cst_61 [1] : vector<224x56xf32> to vector<224xf32>
    %194 = vector.shape_cast %193 : vector<224xf32> to vector<224x1xf32>
    %195 = vector.broadcast %194 : vector<224x1xf32> to vector<224x56xf32>
    %196 = arith.divf %192, %195 : vector<224x56xf32>
    %197 = vector.extract_strided_slice %196 {offsets = [0, 0], sizes = [56, 56], strides = [1, 1]} : vector<224x56xf32> to vector<56x56xf32>
    %198 = vector.extract_strided_slice %31 {offsets = [168, 0], sizes = [56, 32], strides = [1, 1]} : vector<224x32xf32> to vector<56x32xf32>
    %cst_62 = arith.constant dense<0.000000e+00> : vector<56x32xf32>
    %199 = tpu.matmul %197, %198, %cst_62 {dimension_numbers = #tpu.dot_dimension_numbers<[1], [0], [0], [1], [0, 0, 1, 1], [], []>} : vector<56x56xf32>, vector<56x32xf32>, vector<56x32xf32> -> vector<56x32xf32>
    %200 = vector.extract_strided_slice %196 {offsets = [56, 0], sizes = [56, 56], strides = [1, 1]} : vector<224x56xf32> to vector<56x56xf32>
    %201 = vector.extract_strided_slice %46 {offsets = [168, 0], sizes = [56, 32], strides = [1, 1]} : vector<224x32xf32> to vector<56x32xf32>
    %cst_63 = arith.constant dense<0.000000e+00> : vector<56x32xf32>
    %202 = tpu.matmul %200, %201, %cst_63 {dimension_numbers = #tpu.dot_dimension_numbers<[1], [0], [0], [1], [0, 0, 1, 1], [], []>} : vector<56x56xf32>, vector<56x32xf32>, vector<56x32xf32> -> vector<56x32xf32>
    %203 = arith.addf %199, %202 : vector<56x32xf32>
    %204 = vector.extract_strided_slice %196 {offsets = [112, 0], sizes = [56, 56], strides = [1, 1]} : vector<224x56xf32> to vector<56x56xf32>
    %205 = vector.extract_strided_slice %61 {offsets = [168, 0], sizes = [56, 32], strides = [1, 1]} : vector<224x32xf32> to vector<56x32xf32>
    %cst_64 = arith.constant dense<0.000000e+00> : vector<56x32xf32>
    %206 = tpu.matmul %204, %205, %cst_64 {dimension_numbers = #tpu.dot_dimension_numbers<[1], [0], [0], [1], [0, 0, 1, 1], [], []>} : vector<56x56xf32>, vector<56x32xf32>, vector<56x32xf32> -> vector<56x32xf32>
    %207 = arith.addf %203, %206 : vector<56x32xf32>
    %208 = vector.extract_strided_slice %196 {offsets = [168, 0], sizes = [56, 56], strides = [1, 1]} : vector<224x56xf32> to vector<56x56xf32>
    %209 = vector.extract_strided_slice %76 {offsets = [168, 0], sizes = [56, 32], strides = [1, 1]} : vector<224x32xf32> to vector<56x32xf32>
    %cst_65 = arith.constant dense<0.000000e+00> : vector<56x32xf32>
    %210 = tpu.matmul %208, %209, %cst_65 {dimension_numbers = #tpu.dot_dimension_numbers<[1], [0], [0], [1], [0, 0, 1, 1], [], []>} : vector<56x56xf32>, vector<56x32xf32>, vector<56x32xf32> -> vector<56x32xf32>
    %211 = arith.addf %207, %210 : vector<56x32xf32>
    %212 = tpu.concatenate %112, %145, %178, %211 in 0 : vector<56x32xf32>, vector<56x32xf32>, vector<56x32xf32>, vector<56x32xf32> -> vector<224x32xf32>
    %c0_66 = arith.constant 0 : index
    %c0_67 = arith.constant 0 : index
    %213 = vector.load %arg8[%c0_66, %c0_67] : memref<32x32xf32, #tpu.memory_space<vmem>>, vector<32x32xf32>
    %cst_68 = arith.constant dense<0.000000e+00> : vector<224x32xf32>
    %214 = tpu.matmul %212, %213, %cst_68 {dimension_numbers = #tpu.dot_dimension_numbers<[1], [0], [0], [1], [0, 0, 1, 1], [], []>} : vector<224x32xf32>, vector<32x32xf32>, vector<224x32xf32> -> vector<224x32xf32>
    %c0_69 = arith.constant 0 : index
    %c0_70 = arith.constant 0 : index
    %215 = vector.load %arg9[%c0_69, %c0_70] : memref<1x32xf32, #tpu.memory_space<vmem>>, vector<1x32xf32>
    %216 = vector.broadcast %215 : vector<1x32xf32> to vector<224x32xf32>
    %217 = arith.addf %214, %216 : vector<224x32xf32>
    %218 = arith.addf %0, %217 : vector<224x32xf32>
    %c0_71 = arith.constant 0 : index
    %c0_72 = arith.constant 0 : index
    %219 = vector.load %arg10[%c0_71, %c0_72] : memref<1x32xf32, #tpu.memory_space<vmem>>, vector<1x32xf32>
    %c0_73 = arith.constant 0 : index
    %c0_74 = arith.constant 0 : index
    %220 = vector.load %arg11[%c0_73, %c0_74] : memref<1x32xf32, #tpu.memory_space<vmem>>, vector<1x32xf32>
    %cst_75 = arith.constant dense<0.000000e+00> : vector<224xf32>
    %221 = vector.multi_reduction <add>, %218, %cst_75 [1] : vector<224x32xf32> to vector<224xf32>
    %222 = vector.shape_cast %221 : vector<224xf32> to vector<224x1xf32>
    %cst_76 = arith.constant 3.200000e+01 : f32
    %223 = vector.broadcast %cst_76 : f32 to vector<224x1xf32>
    %224 = arith.divf %222, %223 : vector<224x1xf32>
    %225 = vector.broadcast %224 : vector<224x1xf32> to vector<224x32xf32>
    %226 = arith.subf %218, %225 : vector<224x32xf32>
    %227 = arith.mulf %226, %226 : vector<224x32xf32>
    %cst_77 = arith.constant dense<0.000000e+00> : vector<224xf32>
    %228 = vector.multi_reduction <add>, %227, %cst_77 [1] : vector<224x32xf32> to vector<224xf32>
    %229 = vector.shape_cast %228 : vector<224xf32> to vector<224x1xf32>
    %cst_78 = arith.constant 3.200000e+01 : f32
    %230 = vector.broadcast %cst_78 : f32 to vector<224x1xf32>
    %231 = arith.divf %229, %230 : vector<224x1xf32>
    %cst_79 = arith.constant 9.99999974E-6 : f32
    %232 = vector.broadcast %cst_79 : f32 to vector<224x1xf32>
    %233 = arith.addf %231, %232 : vector<224x1xf32>
    %234 = math.rsqrt %233 : vector<224x1xf32>
    %235 = vector.broadcast %234 : vector<224x1xf32> to vector<224x32xf32>
    %236 = arith.mulf %226, %235 : vector<224x32xf32>
    %237 = vector.broadcast %219 : vector<1x32xf32> to vector<224x32xf32>
    %238 = arith.mulf %236, %237 : vector<224x32xf32>
    %239 = vector.broadcast %220 : vector<1x32xf32> to vector<224x32xf32>
    %240 = arith.addf %238, %239 : vector<224x32xf32>
    %c0_80 = arith.constant 0 : index
    %c0_81 = arith.constant 0 : index
    %241 = vector.load %arg12[%c0_80, %c0_81] : memref<32x8xf32, #tpu.memory_space<vmem>>, vector<32x8xf32>
    %cst_82 = arith.constant dense<0.000000e+00> : vector<224x8xf32>
    %242 = tpu.matmul %240, %241, %cst_82 {dimension_numbers = #tpu.dot_dimension_numbers<[1], [0], [0], [1], [0, 0, 1, 1], [], []>} : vector<224x32xf32>, vector<32x8xf32>, vector<224x8xf32> -> vector<224x8xf32>
    %c0_83 = arith.constant 0 : index
    %c0_84 = arith.constant 0 : index
    %243 = vector.load %arg13[%c0_83, %c0_84] : memref<1x8xf32, #tpu.memory_space<vmem>>, vector<1x8xf32>
    %244 = vector.broadcast %243 : vector<1x8xf32> to vector<224x8xf32>
    %245 = arith.addf %242, %244 : vector<224x8xf32>
    %cst_85 = arith.constant 0.000000e+00 : f32
    %246 = vector.broadcast %cst_85 : f32 to vector<224x8xf32>
    %247 = arith.maximumf %245, %246 : vector<224x8xf32>
    %248 = math.absf %245 : vector<224x8xf32>
    %cst_86 = arith.constant 0.000000e+00 : f32
    %249 = vector.broadcast %cst_86 : f32 to vector<224x8xf32>
    %250 = arith.subf %249, %248 : vector<224x8xf32>
    %251 = math.exp %250 : vector<224x8xf32>
    %cst_87 = arith.constant 1.000000e+00 : f32
    %252 = vector.broadcast %cst_87 : f32 to vector<224x8xf32>
    %253 = arith.addf %252, %251 : vector<224x8xf32>
    %254 = math.log %253 : vector<224x8xf32>
    %255 = arith.addf %247, %254 : vector<224x8xf32>
    %256 = math.tanh %255 : vector<224x8xf32>
    %257 = arith.mulf %245, %256 : vector<224x8xf32>
    %c0_88 = arith.constant 0 : index
    %c0_89 = arith.constant 0 : index
    %258 = vector.load %arg14[%c0_88, %c0_89] : memref<8x32xf32, #tpu.memory_space<vmem>>, vector<8x32xf32>
    %cst_90 = arith.constant dense<0.000000e+00> : vector<224x32xf32>
    %259 = tpu.matmul %257, %258, %cst_90 {dimension_numbers = #tpu.dot_dimension_numbers<[1], [0], [0], [1], [0, 0, 1, 1], [], []>} : vector<224x8xf32>, vector<8x32xf32>, vector<224x32xf32> -> vector<224x32xf32>
    %c0_91 = arith.constant 0 : index
    %c0_92 = arith.constant 0 : index
    %260 = vector.load %arg15[%c0_91, %c0_92] : memref<1x32xf32, #tpu.memory_space<vmem>>, vector<1x32xf32>
    %261 = vector.broadcast %260 : vector<1x32xf32> to vector<224x32xf32>
    %262 = arith.addf %259, %261 : vector<224x32xf32>
    %263 = arith.addf %240, %262 : vector<224x32xf32>
    %c0_93 = arith.constant 0 : index
    %c0_94 = arith.constant 0 : index
    %264 = vector.load %arg16[%c0_93, %c0_94] : memref<1x32xf32, #tpu.memory_space<vmem>>, vector<1x32xf32>
    %c0_95 = arith.constant 0 : index
    %c0_96 = arith.constant 0 : index
    %265 = vector.load %arg17[%c0_95, %c0_96] : memref<1x32xf32, #tpu.memory_space<vmem>>, vector<1x32xf32>
    %cst_97 = arith.constant dense<0.000000e+00> : vector<224xf32>
    %266 = vector.multi_reduction <add>, %263, %cst_97 [1] : vector<224x32xf32> to vector<224xf32>
    %267 = vector.shape_cast %266 : vector<224xf32> to vector<224x1xf32>
    %cst_98 = arith.constant 3.200000e+01 : f32
    %268 = vector.broadcast %cst_98 : f32 to vector<224x1xf32>
    %269 = arith.divf %267, %268 : vector<224x1xf32>
    %270 = vector.broadcast %269 : vector<224x1xf32> to vector<224x32xf32>
    %271 = arith.subf %263, %270 : vector<224x32xf32>
    %272 = arith.mulf %271, %271 : vector<224x32xf32>
    %cst_99 = arith.constant dense<0.000000e+00> : vector<224xf32>
    %273 = vector.multi_reduction <add>, %272, %cst_99 [1] : vector<224x32xf32> to vector<224xf32>
    %274 = vector.shape_cast %273 : vector<224xf32> to vector<224x1xf32>
    %cst_100 = arith.constant 3.200000e+01 : f32
    %275 = vector.broadcast %cst_100 : f32 to vector<224x1xf32>
    %276 = arith.divf %274, %275 : vector<224x1xf32>
    %cst_101 = arith.constant 9.99999974E-6 : f32
    %277 = vector.broadcast %cst_101 : f32 to vector<224x1xf32>
    %278 = arith.addf %276, %277 : vector<224x1xf32>
    %279 = math.rsqrt %278 : vector<224x1xf32>
    %280 = vector.broadcast %279 : vector<224x1xf32> to vector<224x32xf32>
    %281 = arith.mulf %271, %280 : vector<224x32xf32>
    %282 = vector.broadcast %264 : vector<1x32xf32> to vector<224x32xf32>
    %283 = arith.mulf %281, %282 : vector<224x32xf32>
    %284 = vector.broadcast %265 : vector<1x32xf32> to vector<224x32xf32>
    %285 = arith.addf %283, %284 : vector<224x32xf32>
    %c0_102 = arith.constant 0 : index
    %c0_103 = arith.constant 0 : index
    %286 = vector.load %arg18[%c0_102, %c0_103] : memref<224x32xf32, #tpu.memory_space<vmem>>, vector<224x32xf32>
    tpu.vector_store %arg18[%c0_102, %c0_103], %285 {strides = array<i32>} : memref<224x32xf32, #tpu.memory_space<vmem>>, vector<224x32xf32>,
    return
  }
  func.func @transform_0(%arg0: i32) -> (i32, i32) {
    %c0_i32 = arith.constant 0 : i32
    %c0_i32_0 = arith.constant 0 : i32
    return %arg0, %c0_i32 : i32, i32
  }
  func.func @transform_1(%arg0: i32) -> (i32, i32) {
    %c0_i32 = arith.constant 0 : i32
    %c0_i32_0 = arith.constant 0 : i32
    %c0_i32_1 = arith.constant 0 : i32
    return %c0_i32, %c0_i32_0 : i32, i32
  }
  func.func @transform_2(%arg0: i32) -> (i32, i32) {
    %c0_i32 = arith.constant 0 : i32
    %c0_i32_0 = arith.constant 0 : i32
    %c0_i32_1 = arith.constant 0 : i32
    return %c0_i32, %c0_i32_0 : i32, i32
  }
  func.func @transform_3(%arg0: i32) -> (i32, i32) {
    %c0_i32 = arith.constant 0 : i32
    %c0_i32_0 = arith.constant 0 : i32
    %c0_i32_1 = arith.constant 0 : i32
    return %c0_i32, %c0_i32_0 : i32, i32
  }
  func.func @transform_4(%arg0: i32) -> (i32, i32) {
    %c0_i32 = arith.constant 0 : i32
    %c0_i32_0 = arith.constant 0 : i32
    %c0_i32_1 = arith.constant 0 : i32
    return %c0_i32, %c0_i32_0 : i32, i32
  }
  func.func @transform_5(%arg0: i32) -> (i32, i32) {
    %c0_i32 = arith.constant 0 : i32
    %c0_i32_0 = arith.constant 0 : i32
    %c0_i32_1 = arith.constant 0 : i32
    return %c0_i32, %c0_i32_0 : i32, i32
  }
  func.func @transform_6(%arg0: i32) -> (i32, i32) {
    %c0_i32 = arith.constant 0 : i32
    %c0_i32_0 = arith.constant 0 : i32
    %c0_i32_1 = arith.constant 0 : i32
    return %c0_i32, %c0_i32_0 : i32, i32
  }
  func.func @transform_7(%arg0: i32) -> (i32, i32) {
    %c0_i32 = arith.constant 0 : i32
    %c0_i32_0 = arith.constant 0 : i32
    %c0_i32_1 = arith.constant 0 : i32
    return %c0_i32, %c0_i32_0 : i32, i32
  }
  func.func @transform_8(%arg0: i32) -> (i32, i32) {
    %c0_i32 = arith.constant 0 : i32
    %c0_i32_0 = arith.constant 0 : i32
    %c0_i32_1 = arith.constant 0 : i32
    return %c0_i32, %c0_i32_0 : i32, i32
  }
  func.func @transform_9(%arg0: i32) -> (i32, i32) {
    %c0_i32 = arith.constant 0 : i32
    %c0_i32_0 = arith.constant 0 : i32
    %c0_i32_1 = arith.constant 0 : i32
    return %c0_i32, %c0_i32_0 : i32, i32
  }
  func.func @transform_10(%arg0: i32) -> (i32, i32) {
    %c0_i32 = arith.constant 0 : i32
    %c0_i32_0 = arith.constant 0 : i32
    %c0_i32_1 = arith.constant 0 : i32
    return %c0_i32, %c0_i32_0 : i32, i32
  }
  func.func @transform_11(%arg0: i32) -> (i32, i32) {
    %c0_i32 = arith.constant 0 : i32
    %c0_i32_0 = arith.constant 0 : i32
    %c0_i32_1 = arith.constant 0 : i32
    return %c0_i32, %c0_i32_0 : i32, i32
  }
  func.func @transform_12(%arg0: i32) -> (i32, i32) {
    %c0_i32 = arith.constant 0 : i32
    %c0_i32_0 = arith.constant 0 : i32
    %c0_i32_1 = arith.constant 0 : i32
    return %c0_i32, %c0_i32_0 : i32, i32
  }
  func.func @transform_13(%arg0: i32) -> (i32, i32) {
    %c0_i32 = arith.constant 0 : i32
    %c0_i32_0 = arith.constant 0 : i32
    %c0_i32_1 = arith.constant 0 : i32
    return %c0_i32, %c0_i32_0 : i32, i32
  }
  func.func @transform_14(%arg0: i32) -> (i32, i32) {
    %c0_i32 = arith.constant 0 : i32
    %c0_i32_0 = arith.constant 0 : i32
    %c0_i32_1 = arith.constant 0 : i32
    return %c0_i32, %c0_i32_0 : i32, i32
  }
  func.func @transform_15(%arg0: i32) -> (i32, i32) {
    %c0_i32 = arith.constant 0 : i32
    %c0_i32_0 = arith.constant 0 : i32
    %c0_i32_1 = arith.constant 0 : i32
    return %c0_i32, %c0_i32_0 : i32, i32
  }
  func.func @transform_16(%arg0: i32) -> (i32, i32) {
    %c0_i32 = arith.constant 0 : i32
    %c0_i32_0 = arith.constant 0 : i32
    %c0_i32_1 = arith.constant 0 : i32
    return %c0_i32, %c0_i32_0 : i32, i32
  }
  func.func @transform_17(%arg0: i32) -> (i32, i32) {
    %c0_i32 = arith.constant 0 : i32
    %c0_i32_0 = arith.constant 0 : i32
    return %arg0, %c0_i32 : i32, i32
  }
}

</mosaic_0001>

<bundles_post_ra>
// kernel: efficient_transformer_block.1
= control target key start
LH: loop header
LB: loop body
LE: loop exit
PB: predicated region body
PF: predicated region fallthrough
CT: control target
= control target key end

     0   :  { %s9585_s24 = smov 0   ;;  %s15364_s0 = inlined_call_operand.vmem [shape: f32[448,32], index: 0, kind: input, shape index: {}]   ;;  %s15365_s1 = inlined_call_operand.vmem [shape: f32[32,32], index: 1, kind: input, shape index: {}]   ;;  %s15366_s2 = inlined_call_operand.vmem [shape: f32[32,32], index: 2, kind: input, shape index: {}]   ;;  %s15367_s3 = inlined_call_operand.vmem [shape: f32[32,32], index: 3, kind: input, shape index: {}]   ;;  %s15368_s4 = inlined_call_operand.vmem [shape: f32[1,32], index: 4, kind: input, shape index: {}]   ;;  %s15369_s5 = inlined_call_operand.vmem [shape: f32[1,32], index: 5, kind: input, shape index: {}]   ;;  %s15370_s6 = inlined_call_operand.vmem [shape: f32[1,32], index: 6, kind: input, shape index: {}]   ;;  %s15371_s7 = inlined_call_operand.vmem [shape: f32[32,32], index: 7, kind: input, shape index: {}]   ;;  %s15372_s8 = inlined_call_operand.vmem [shape: f32[1,32], index: 8, kind: input, shape index: {}]   ;;  %s15373_s9 = inlined_call_operand.vmem [shape: f32[1,32], index: 9, kind: input, shape index: {}]   ;;  %s15374_s10 = inlined_call_operand.vmem [shape: f32[1,32], index: 10, kind: input, shape index: {}]   ;;  %s15375_s11 = inlined_call_operand.vmem [shape: f32[32,8], index: 11, kind: input, shape index: {}]   ;;  %s15376_s12 = inlined_call_operand.vmem [shape: f32[1,8], index: 12, kind: input, shape index: {}]   ;;  %s15377_s13 = inlined_call_operand.vmem [shape: f32[8,32], index: 13, kind: input, shape index: {}]   ;;  %s15378_s14 = inlined_call_operand.vmem [shape: f32[1,32], index: 14, kind: input, shape index: {}]   ;;  %s15379_s15 = inlined_call_operand.vmem [shape: f32[1,32], index: 15, kind: input, shape index: {}]   ;;  %s15380_s16 = inlined_call_operand.vmem [shape: f32[1,32], index: 16, kind: input, shape index: {}]   ;;  %s15381_s17 = inlined_call_operand.vmem [shape: f32[448,32], index: 17, kind: output, shape index: {}]  }
   0x1   :  { %15411 = sst [smem:[#allocation66_spill]] %s15364_s0 }
   0x2   :  { %15412 = sst [smem:[#allocation67_spill]] %s15365_s1 }
   0x3 LB: > { %s8256_s25 = sadd.s32 4294967295, %s9491_s24   ;;  %p8260_p0 = scmp.ge.s32.totalorder %s9491_s24, 1  ;;  %s9491_s24 = sphi %s9585_s24, %s27_s24  }
   0x4   : > { %p488_p1 = scmp.lt.s32.totalorder %s9491_s24, 3 }
   0x6   : > { %p489_p2 = pnand %p8260_p0, %p488_p1 }
   0x8   : > { %492 = sbr.rel (%p489_p2) target bundleno = 3836 (0xefc), region = 88 }
   0xd   : > { %v777_v0 = vld [vmem:[%s15366_s2 + $0x18] sm:$0xff]  ;;  %v776_v1 = vld [vmem:[%s15366_s2 + $0x10] sm:$0xff]  ;;  %s540_s0 = smul.u32 28, %s8256_s25  ;;  %v775_v2 = vld [vmem:[%s15366_s2 + $0x8] sm:$0xff]  ;;  %vm588_vm0 = vcmask 261120   ;;  %s15413_s23 = sld [smem:[#allocation66_spill]]  ;;  %v992_v34 = vlaneseq }
   0xe   : > { %794 = vmatpush.msra.mxu1 %v777_v0  ;;  %v774_v3 = vld [vmem:[%s15366_s2] sm:$0xff]  ;;  %s15414_s28 = sld [smem:[#allocation67_spill]]  ;;  %v9493_v43 = vmov 0.0   ;;  %v886_v60 = vld [vmem:[%s15367_s3 + $0x18] sm:$0xff]  ;;  %vm1473_vm12 = vcmask 457728  }
   0xf   : > { %p541_p3 = scmp.lt.s32.totalorder %s540_s0, 55  ;;  %v9728_v28 = vld [vmem:[%s15369_s5] ss:$0 sm:$0xff]  ;;  %v9738_v36 = vand.u32 127, %v992_v34  ;;  %903 = vmatpush.msra.mxu2 %v886_v60 }
  0x10   : > { %795 = vmatpush.msra.mxu1 %v776_v1  ;;  %v8704_v39 = vld [vmem:[%s15368_s4] ss:$0 sm:$0xff] }
  0x11   : > { %s15698_s0 = smov (!%p541_p3, %s540_s0), 55  ;;  %vm995_vm1 = vcmp.lt.s32.totalorder %v9738_v36, 8  ;;  %vm1055_vm2 = vcmp.ge.s32.totalorder %v9738_v36, 8  ;;  %vm1056_vm3 = vcmp.lt.s32.totalorder %v9738_v36, 16  ;;  %vm1116_vm5 = vcmp.ge.s32.totalorder %v9738_v36, 16 }
  0x12   : > { %796 = vmatpush.msra.mxu1 %v775_v2  ;;  %s8261_s20 = sshll.u32 %s15698_s0, 3  ;;  %v9755_v44 = vsel %vm995_vm1, 0.35355338, %v9493_v43  ;;  %vm9820_vm4 = vmand %vm1055_vm2, %vm1056_vm3  ;;  %vm1117_vm6 = vcmp.lt.s32.totalorder %v9738_v36, 24  ;;  %vm1177_vm8 = vcmp.ge.s32.totalorder %v9738_v36, 24  ;;  %vm1178_vm9 = vcmp.lt.s32.totalorder %v9738_v36, 32 }
  0x13   : > { %s9613_s25 = scalar_lea.vmem %s15413_s23, %s8261_s20  ;;  %vm9874_vm7 = vmand %vm1116_vm5, %vm1117_vm6  ;;  %vm1238_vm11 = vcmp.lt.s32.totalorder %v9738_v36, 49  ;;  %s14915_s22 = scalar_lea.vmem %s15381_s17, %s8261_s20 }
  0x14   : > { %797 = vmatpush.msra.mxu1 %v774_v3  ;;  %v9616_v4 = vld [vmem:[%s9613_s25] sm:$0xff]  ;;  %v9621_v5 = vld [vmem:[%s9613_s25 + $0x8] sm:$0xff]  ;;  %v9626_v6 = vld [vmem:[%s9613_s25 + $0x10] sm:$0xff] }
  0x15   : > { %8291 = vmatmul.msk.f32.vlgmr.msra.gmra.mxu1 %vm588_vm0, %v9616_v4  ;;  %v583_v7 = vld [vmem:[%s15414_s28 + $0x18] sm:$0xff]  ;;  %v582_v8 = vld [vmem:[%s15414_s28 + $0x10] sm:$0xff]  ;;  %v581_v9 = vld [vmem:[%s15414_s28 + $0x8] sm:$0xff] }
  0x16   : > { %685 = vmatpush.msra.mxu0 %v583_v7  ;;  %8685 = vmatpush.msra.mxu3 %v583_v7  ;;  %v580_v10 = vld [vmem:[%s15414_s28] sm:$0xff]  ;;  %v9643_v11 = vld [vmem:[%s9613_s25 + $0x18] sm:$0xff]  ;;  %v9646_v12 = vld [vmem:[%s9613_s25 + $0xa8] sm:$0xff] }
  0x17   : > { %v9655_v13 = vld [vmem:[%s9613_s25 + $0x20] sm:$0xff]  ;;  %v9658_v14 = vld [vmem:[%s9613_s25 + $0xb0] sm:$0xff]  ;;  %v9667_v15 = vld [vmem:[%s9613_s25 + $0x28] sm:$0xff] }
  0x18   : > { %686 = vmatpush.msra.mxu0 %v582_v8  ;;  %8686 = vmatpush.msra.mxu3 %v582_v8  ;;  %v9670_v16 = vld [vmem:[%s9613_s25 + $0xb8] sm:$0xff]  ;;  %v9679_v17 = vld [vmem:[%s9613_s25 + $0x30] sm:$0xff]  ;;  %v9682_v18 = vld [vmem:[%s9613_s25 + $0xc0] sm:$0xff] }
  0x19   : > { %v9691_v19 = vld [vmem:[%s9613_s25 + $0xc8] sm:$0xff]  ;;  %v9702_v20 = vld [vmem:[%s9613_s25 + $0xd0] sm:$0xff]  ;;  %v9707_v21 = vld [vmem:[%s9613_s25 + $0xd8] sm:$0xff] }
  0x1a   : > { %687 = vmatpush.msra.mxu0 %v581_v9  ;;  %8687 = vmatpush.msra.mxu3 %v581_v9  ;;  %vm9918_vm10 = vmand %vm1177_vm8, %vm1178_vm9 }
  0x1c   : > { %688 = vmatpush.msra.mxu0 %v580_v10  ;;  %8688 = vmatpush.msra.mxu3 %v580_v10 }
  0x1d   : > { %8292 = vmatmul.msk.f32.gmra.mxu1 %vm588_vm0, %v9621_v5  ;;  %8263 = vmatmul.msk.f32.vlgmr.msra.gmra.mxu0 %vm588_vm0, %v9616_v4 }
  0x1e   : > { %8284 = vmatmul.msk.f32.vlgmr.msra.gmra.mxu3 %vm588_vm0, %v9646_v12 }
  0x1f   : > { %8689 = vmatpush.msrb.mxu3 %v777_v0 }
  0x21   : > { %8690 = vmatpush.msrb.mxu3 %v776_v1  ;;  %v885_v1 = vld [vmem:[%s15367_s3 + $0x10] sm:$0xff] }
  0x22   : > { %904 = vmatpush.msra.mxu2 %v885_v1 }
  0x23   : > { %8691 = vmatpush.msrb.mxu3 %v775_v2  ;;  %v884_v2 = vld [vmem:[%s15367_s3 + $0x8] sm:$0xff] }
  0x24   : > { %905 = vmatpush.msra.mxu2 %v884_v2 }
  0x25   : > { %8293 = vmatmul.msk.f32.gmra.mxu1 %vm588_vm0, %v9626_v6  ;;  %8264 = vmatmul.msk.f32.gmra.mxu0 %vm588_vm0, %v9621_v5 }
  0x26   : > { %8285 = vmatmul.msk.f32.gmra.mxu3 %vm588_vm0, %v9658_v14 }
  0x27   : > { %8692 = vmatpush.msrb.mxu3 %v774_v3  ;;  %v883_v3 = vld [vmem:[%s15367_s3] sm:$0xff] }
  0x28   : > { %906 = vmatpush.msra.mxu2 %v883_v3 }
  0x29   : > { %8319 = vmatmul.msk.f32.vlgmr.msra.gmra.mxu2 %vm588_vm0, %v9616_v4 }
  0x2d   : > { %8294 = vmatmul.msk.f32.gmra.mxu1 %vm588_vm0, %v9643_v11  ;;  %8265 = vmatmul.msk.f32.gmra.mxu0 %vm588_vm0, %v9626_v6 }
  0x2e   : > { %8286 = vmatmul.msk.f32.gmra.mxu3 %vm588_vm0, %v9670_v16 }
  0x31   : > { %8320 = vmatmul.msk.f32.gmra.mxu2 %vm588_vm0, %v9621_v5 }
  0x35   : > { %8295 = vmatmul.msk.f32.gmra.mxu1 %vm588_vm0, %v9655_v13  ;;  %8266 = vmatmul.msk.f32.gmra.mxu0 %vm588_vm0, %v9643_v11 }
  0x36   : > { %8287 = vmatmul.msk.f32.gmra.mxu3 %vm588_vm0, %v9682_v18 }
  0x39   : > { %8321 = vmatmul.msk.f32.gmra.mxu2 %vm588_vm0, %v9626_v6 }
  0x3d   : > { %8296 = vmatmul.msk.f32.gmra.mxu1 %vm588_vm0, %v9667_v15  ;;  %8267 = vmatmul.msk.f32.gmra.mxu0 %vm588_vm0, %v9655_v13 }
  0x3e   : > { %8288 = vmatmul.msk.f32.gmra.mxu3 %vm588_vm0, %v9691_v19 }
  0x41   : > { %8322 = vmatmul.msk.f32.gmra.mxu2 %vm588_vm0, %v9643_v11 }
  0x45   : > { %8297 = vmatmul.msk.f32.gmra.mxu1 %vm588_vm0, %v9679_v17  ;;  %8268 = vmatmul.msk.f32.gmra.mxu0 %vm588_vm0, %v9667_v15 }
  0x46   : > { %8289 = vmatmul.msk.f32.gmra.mxu3 %vm588_vm0, %v9702_v20 }
  0x49   : > { %8323 = vmatmul.msk.f32.gmra.mxu2 %vm588_vm0, %v9655_v13 }
  0x4d   : > { %8269 = vmatmul.msk.f32.gmra.mxu0 %vm588_vm0, %v9679_v17 }
  0x4e   : > { %8290 = vmatmul.msk.f32.gmra.mxu3 %vm588_vm0, %v9707_v21 }
  0x51   : > { %8324 = vmatmul.msk.f32.gmra.mxu2 %vm588_vm0, %v9667_v15 }
  0x56   : > { %8312 = vmatmul.msk.f32.vlgmr.msrb.gmra.mxu3 %vm588_vm0, %v9646_v12 }
  0x59   : > { %8325 = vmatmul.msk.f32.gmra.mxu2 %vm588_vm0, %v9679_v17 }
  0x5e   : > { %8313 = vmatmul.msk.f32.gmra.mxu3 %vm588_vm0, %v9658_v14 }
  0x66   : > { %8314 = vmatmul.msk.f32.gmra.mxu3 %vm588_vm0, %v9670_v16 }
  0x6e   : > { %8315 = vmatmul.msk.f32.gmra.mxu3 %vm588_vm0, %v9682_v18 }
  0x76   : > { %8316 = vmatmul.msk.f32.gmra.mxu3 %vm588_vm0, %v9691_v19 }
  0x7e   : > { %8317 = vmatmul.msk.f32.gmra.mxu3 %vm588_vm0, %v9702_v20 }
  0x86   : > { %8318 = vmatmul.msk.f32.gmra.mxu3 %vm588_vm0, %v9707_v21 }
  0x92   : > { %v799_v22 = vpop.f32.mrf.mxu1 }
  0x93   : > { %v800_v45 = vadd.f32 %v9728_v28, %v799_v22 }
  0x9a   : > { %v802_v23 = vpop.f32.mrf.mxu1  ;;  %v690_v32 = vpop.f32.mrf.mxu0 }
  0x9b   : > { %v803_v40 = vadd.f32 %v9728_v28, %v802_v23  ;;  %v9749_v42 = vadd.f32 %v8704_v39, %v690_v32  ;;  %v9827_v23 = vsel %vm9820_vm4, 0.35355338, %v9493_v43 }
  0x9c   : > { %15423 = vst [vmem:[#allocation8_spill] sm:$0xff] %v9827_v23 }
  0x9d   : > { %v998_v46 = vmul.f32 %v9755_v44, %v9749_v42 }
  0xa1   : > { %v9747_v41 = vpop.f32.mrf.mxu3 }
  0xa2   : > { %v805_v24 = vpop.f32.mrf.mxu1  ;;  %v693_v38 = vpop.f32.mrf.mxu0  ;;  %15415 = vst [vmem:[#allocation2_spill] sm:$0xff] %v9747_v41 }
  0xa3   : > { %v806_v37 = vadd.f32 %v9728_v28, %v805_v24  ;;  %v9762_v48 = vadd.f32 %v8704_v39, %v693_v38 }
  0xa5   : > { %v999_v50 = vmul.f32 %v9755_v44, %v9762_v48 }
  0xa9   : > { %v9764_v49 = vpop.f32.mrf.mxu3 }
  0xaa   : > { %v808_v25 = vpop.f32.mrf.mxu1  ;;  %v696_v47 = vpop.f32.mrf.mxu0  ;;  %15416 = vst [vmem:[#allocation3_spill] sm:$0xff] %v9764_v49 }
  0xab   : > { %v809_v35 = vadd.f32 %v9728_v28, %v808_v25  ;;  %v9769_v52 = vadd.f32 %v8704_v39, %v696_v47  ;;  %v1059_v25 = vmul.f32 %v9827_v23, %v9749_v42 }
  0xac   : > { %v9932_v1 = vpop.f32.mrf.mxu2 }
  0xad   : > { %v1000_v54 = vmul.f32 %v9755_v44, %v9769_v52 }
  0xb1   : > { %v9771_v53 = vpop.f32.mrf.mxu3 }
  0xb2   : > { %v811_v26 = vpop.f32.mrf.mxu1  ;;  %v699_v51 = vpop.f32.mrf.mxu0  ;;  %15417 = vst [vmem:[#allocation4_spill] sm:$0xff] %v9771_v53 }
  0xb3   : > { %v812_v33 = vadd.f32 %v9728_v28, %v811_v26  ;;  %v9776_v55 = vadd.f32 %v8704_v39, %v699_v51  ;;  %v1060_v26 = vmul.f32 %v9827_v23, %v9762_v48 }
  0xb5   : > { %v1001_v57 = vmul.f32 %v9755_v44, %v9776_v55  ;;  %v1062_v6 = vmul.f32 %v9827_v23, %v9776_v55 }
  0xb9   : > { %v9780_v58 = vpop.f32.mrf.mxu3 }
  0xba   : > { %v814_v27 = vpop.f32.mrf.mxu1  ;;  %v702_v56 = vpop.f32.mrf.mxu0  ;;  %15418 = vst [vmem:[#allocation5_spill] sm:$0xff] %v9780_v58 }
  0xbb   : > { %v815_v31 = vadd.f32 %v9728_v28, %v814_v27  ;;  %v9783_v59 = vadd.f32 %v8704_v39, %v702_v56  ;;  %v1061_v27 = vmul.f32 %v9827_v23, %v9769_v52 }
  0xbd   : > { %v1002_v62 = vmul.f32 %v9755_v44, %v9783_v59 }
  0xc1   : > { %v9790_v63 = vpop.f32.mrf.mxu3 }
  0xc2   : > { %v817_v29 = vpop.f32.mrf.mxu1  ;;  %v705_v61 = vpop.f32.mrf.mxu0  ;;  %15419 = vst [vmem:[#allocation6_spill] sm:$0xff] %v9790_v63 }
  0xc3   : > { %v818_v30 = vadd.f32 %v9728_v28, %v817_v29  ;;  %v9793_v0 = vadd.f32 %v8704_v39, %v705_v61  ;;  %v9927_v61 = vsel %vm9918_vm10, 0.35355338, %v9493_v43 }
  0xc4   : > { %v1182_v3 = vmul.f32 %v9927_v61, %v9762_v48 }
  0xc5   : > { %8347 = vmatpush.xpose.msk.msra.mxu3 %vm588_vm0, %v818_v30  ;;  %v1003_v7 = vmul.f32 %v9755_v44, %v9793_v0  ;;  %v1063_v30 = vmul.f32 %v9827_v23, %v9783_v59 }
  0xc9   : > { %8348 = vmatpush.xpose.msk.msra.mxu3 %vm588_vm0, %v815_v31  ;;  %v9811_v10 = vpop.f32.mrf.mxu3  ;;  %v1064_v31 = vmul.f32 %v9827_v23, %v9793_v0 }
  0xca   : > { %v708_v8 = vpop.f32.mrf.mxu0  ;;  %15420 = vst [vmem:[#allocation7_spill] sm:$0xff] %v9811_v10 }
  0xcb   : > { %v9809_v9 = vadd.f32 %v8704_v39, %v708_v8 }
  0xcd   : > { %8349 = vmatpush.xpose.msk.msra.mxu3 %vm588_vm0, %v812_v33  ;;  %v1004_v22 = vmul.f32 %v9755_v44, %v9809_v9  ;;  %v1065_v32 = vmul.f32 %v9827_v23, %v9809_v9  ;;  %v9881_v33 = vsel %vm9874_vm7, 0.35355338, %v9493_v43 }
  0xce   : > { %v1120_v34 = vmul.f32 %v9881_v33, %v9749_v42  ;;  %v1122_v39 = vmul.f32 %v9881_v33, %v9769_v52  ;;  %v1124_v47 = vmul.f32 %v9881_v33, %v9783_v59  ;;  %v1125_v51 = vmul.f32 %v9881_v33, %v9793_v0 }
  0xcf   : > { %v1126_v56 = vmul.f32 %v9881_v33, %v9809_v9 }
  0xd1   : > { %8350 = vmatpush.xpose.msk.msra.mxu3 %vm588_vm0, %v809_v35  ;;  %v9829_v24 = vpop.f32.mrf.mxu3 }
  0xd2   : > { %15424 = vst [vmem:[#allocation9_spill] sm:$0xff] %v9829_v24 }
  0xd5   : > { %8351 = vmatpush.xpose.msk.msra.mxu3 %vm588_vm0, %v806_v37  ;;  %v1121_v37 = vmul.f32 %v9881_v33, %v9762_v48 }
  0xd9   : > { %8352 = vmatpush.xpose.msk.msra.mxu3 %vm588_vm0, %v803_v40  ;;  %v9836_v5 = vpop.f32.mrf.mxu3 }
  0xda   : > { %15425 = vst [vmem:[#allocation10_spill] sm:$0xff] %v9836_v5 }
  0xdd   : > { %8353 = vmatpush.xpose.msk.msra.mxu3 %vm588_vm0, %v800_v45  ;;  %v1123_v45 = vmul.f32 %v9881_v33, %v9776_v55 }
  0xe0   : > { %8354 = vmatmul.msk.f32.vlgmr.msra.gmra.mxu3 %vm588_vm0, %v998_v46 }
  0xe1   : > { %v9847_v29 = vpop.f32.mrf.mxu3 }
  0xe2   : > { %15426 = vst [vmem:[#allocation11_spill] sm:$0xff] %v9847_v29 }
  0xe8   : > { %8355 = vmatmul.msk.f32.gmra.mxu3 %vm588_vm0, %v999_v50 }
  0xe9   : > { %v9855_v11 = vpop.f32.mrf.mxu3 }
  0xea   : > { %15427 = vst [vmem:[#allocation12_spill] sm:$0xff] %v9855_v11 }
  0xf0   : > { %8356 = vmatmul.msk.f32.gmra.mxu3 %vm588_vm0, %v1000_v54 }
  0xf1   : > { %v9862_v13 = vpop.f32.mrf.mxu3 }
  0xf8   : > { %8357 = vmatmul.msk.f32.gmra.mxu3 %vm588_vm0, %v1001_v57 }
  0xf9   : > { %v9867_v15 = vpop.f32.mrf.mxu3 }
 0x100   : > { %8358 = vmatmul.msk.f32.gmra.mxu3 %vm588_vm0, %v1002_v62  ;;  %v1181_v62 = vmul.f32 %v9927_v61, %v9749_v42 }
 0x101   : > { %v9885_v35 = vpop.f32.mrf.mxu3 }
 0x108   : > { %8359 = vmatmul.msk.f32.gmra.mxu3 %vm588_vm0, %v1003_v7  ;;  %v9939_v7 = vpop.f32.mrf.mxu2 }
 0x109   : > { %v9891_v38 = vpop.f32.mrf.mxu3 }
 0x110   : > { %8360 = vmatmul.msk.f32.gmra.mxu3 %vm588_vm0, %v1004_v22  ;;  %v1183_v22 = vmul.f32 %v9927_v61, %v9769_v52  ;;  %v9946_v42 = vpop.f32.mrf.mxu2  ;;  %v1184_v52 = vmul.f32 %v9927_v61, %v9776_v55 }
 0x118   : > { %8361 = vmatmul.msk.f32.gmra.mxu3 %vm588_vm0, %v1059_v25 }
 0x120   : > { %8362 = vmatmul.msk.f32.gmra.mxu3 %vm588_vm0, %v1060_v26 }
 0x128   : > { %8363 = vmatmul.msk.f32.gmra.mxu3 %vm588_vm0, %v1061_v27  ;;  %v917_v27 = vpop.f32.mrf.mxu2 }
 0x130   : > { %8364 = vmatmul.msk.f32.gmra.mxu3 %vm588_vm0, %v1062_v6  ;;  %v920_v55 = vpop.f32.mrf.mxu2 }
 0x138   : > { %8365 = vmatmul.msk.f32.gmra.mxu3 %vm588_vm0, %v1063_v30 }
 0x140   : > { %8366 = vmatmul.msk.f32.gmra.mxu3 %vm588_vm0, %v1064_v31 }
 0x148   : > { %8367 = vmatmul.msk.f32.gmra.mxu3 %vm588_vm0, %v1065_v32  ;;  %v1185_v32 = vmul.f32 %v9927_v61, %v9783_v59  ;;  %v1186_v59 = vmul.f32 %v9927_v61, %v9793_v0  ;;  %v8705_v0 = vld [vmem:[%s15370_s6] ss:$0 sm:$0xff] }
 0x150   : > { %8368 = vmatmul.msk.f32.gmra.mxu3 %vm588_vm0, %v1120_v34  ;;  %v559_v34 = vld [vmem:[%s9613_s25 + $0x38] sm:$0xff] }
 0x151   : > { %8298 = vmatmul.msk.f32.gmra.mxu1 %vm588_vm0, %v559_v34  ;;  %8270 = vmatmul.msk.f32.gmra.mxu0 %vm588_vm0, %v559_v34 }
 0x152   : > { %8326 = vmatmul.msk.f32.gmra.mxu2 %vm588_vm0, %v559_v34  ;;  %v10003_v34 = vsel %vm9820_vm4, 1.0, %v9493_v43 }
 0x158   : > { %8369 = vmatmul.msk.f32.gmra.mxu3 %vm588_vm0, %v1121_v37 }
 0x160   : > { %8370 = vmatmul.msk.f32.gmra.mxu3 %vm588_vm0, %v1122_v39 }
 0x163   : > { %v9896_v40 = vpop.f32.mrf.mxu3 }
 0x164   : > { %15430 = vst [vmem:[#allocation13_spill] sm:$0xff] %v9896_v40 }
 0x168   : > { %8371 = vmatmul.msk.f32.gmra.mxu3 %vm588_vm0, %v1123_v45 }
 0x16b   : > { %v9901_v46 = vpop.f32.mrf.mxu3 }
 0x16c   : > { %15431 = vst [vmem:[#allocation14_spill] sm:$0xff] %v9901_v46 }
 0x170   : > { %8372 = vmatmul.msk.f32.gmra.mxu3 %vm588_vm0, %v1124_v47  ;;  %v560_v47 = vld [vmem:[%s9613_s25 + $0x40] sm:$0xff] }
 0x171   : > { %8299 = vmatmul.msk.f32.gmra.mxu1 %vm588_vm0, %v560_v47  ;;  %8271 = vmatmul.msk.f32.gmra.mxu0 %vm588_vm0, %v560_v47 }
 0x172   : > { %8327 = vmatmul.msk.f32.gmra.mxu2 %vm588_vm0, %v560_v47 }
 0x173   : > { %v9906_v50 = vpop.f32.mrf.mxu3 }
 0x174   : > { %15432 = vst [vmem:[#allocation15_spill] sm:$0xff] %v9906_v50 }
 0x178   : > { %8373 = vmatmul.msk.f32.gmra.mxu3 %vm588_vm0, %v1125_v51  ;;  %v923_v51 = vpop.f32.mrf.mxu2 }
 0x17b   : > { %v9911_v54 = vpop.f32.mrf.mxu3 }
 0x17c   : > { %15433 = vst [vmem:[#allocation16_spill] sm:$0xff] %v9911_v54 }
 0x180   : > { %8374 = vmatmul.msk.f32.gmra.mxu3 %vm588_vm0, %v1126_v56 }
 0x183   : > { %v9922_v60 = vpop.f32.mrf.mxu3 }
 0x184   : > { %15436 = vst [vmem:[#allocation17_spill] sm:$0xff] %v9922_v60 }
 0x188   : > { %8375 = vmatmul.msk.f32.gmra.mxu3 %vm588_vm0, %v1181_v62 }
 0x18b   : > { %v9934_v2 = vpop.f32.mrf.mxu3 }
 0x18c   : > { %15437 = vst [vmem:[#allocation18_spill] sm:$0xff] %v9934_v2 }
 0x190   : > { %8376 = vmatmul.msk.f32.gmra.mxu3 %vm588_vm0, %v1182_v3  ;;  %v561_v3 = vld [vmem:[%s9613_s25 + $0x48] sm:$0xff] }
 0x191   : > { %8300 = vmatmul.msk.f32.gmra.mxu1 %vm588_vm0, %v561_v3  ;;  %8272 = vmatmul.msk.f32.gmra.mxu0 %vm588_vm0, %v561_v3 }
 0x192   : > { %8328 = vmatmul.msk.f32.gmra.mxu2 %vm588_vm0, %v561_v3 }
 0x193   : > { %v9941_v8 = vpop.f32.mrf.mxu3 }
 0x194   : > { %15438 = vst [vmem:[#allocation19_spill] sm:$0xff] %v9941_v8 }
 0x198   : > { %8377 = vmatmul.msk.f32.gmra.mxu3 %vm588_vm0, %v1183_v22 }
 0x19b   : > { %v1382_v25 = vpop.f32.mrf.mxu3 }
 0x19c   : > { %v9951_v48 = vsel %vm1238_vm11, %v1382_v25, -1e+30  ;;  %v1187_v25 = vmul.f32 %v9927_v61, %v9809_v9  ;;  %v10008_v9 = vsel %vm995_vm1, 1.0, %v9493_v43 }
 0x19d   : > { %v1495_v26 = vsel %vm1473_vm12, %v9951_v48, -inf  ;;  %15439 = vst [vmem:[#allocation20_spill] sm:$0xff] %v10008_v9 }
 0x19e   : > { %1496 = vmax.xlane.f32.xlu0 %v1495_v26  ;;  %v924_v26 = vadd.f32 %v8705_v0, %v923_v51 }
 0x1a0   : > { %8378 = vmatmul.msk.f32.gmra.mxu3 %vm588_vm0, %v1184_v52  ;;  %v926_v52 = vpop.f32.mrf.mxu2  ;;  %v1093_v57 = vmul.f32 %v10003_v34, %v924_v26 }
 0x1a3   : > { %v1385_v6 = vpop.f32.mrf.mxu3 }
 0x1a4   : > { %v9960_v30 = vsel %vm1238_vm11, %v1385_v6, -1e+30  ;;  %v921_v6 = vadd.f32 %v8705_v0, %v920_v55  ;;  %v10018_v55 = vsel %vm9918_vm10, 1.0, %v9493_v43 }
 0x1a5   : > { %v1498_v31 = vsel %vm1473_vm12, %v9960_v30, -inf  ;;  %15440 = vst [vmem:[#allocation21_spill] sm:$0xff] %v10018_v55  ;;  %v1215_v3 = vmul.f32 %v10018_v55, %v924_v26 }
 0x1a6   : > { %1499 = vmax.xlane.f32.xlu0 %v1498_v31  ;;  %v927_v31 = vadd.f32 %v8705_v0, %v926_v52  ;;  %v1092_v52 = vmul.f32 %v10003_v34, %v921_v6 }
 0x1a8   : > { %8379 = vmatmul.msk.f32.gmra.mxu3 %vm588_vm0, %v1185_v32  ;;  %v1216_v51 = vmul.f32 %v10018_v55, %v927_v31 }
 0x1aa   : > { %2360 = vmatpush.msrb.mxu3 %v1216_v51 }
 0x1ab   : > { %v1388_v37 = vpop.f32.mrf.mxu3 }
 0x1ac   : > { %v9973_v39 = vsel %vm1238_vm11, %v1388_v37, -1e+30  ;;  %v10013_v37 = vsel %vm9874_vm7, 1.0, %v9493_v43  ;;  %v1032_v43 = vmul.f32 %v10008_v9, %v924_v26  ;;  %2361 = vmatpush.msrb.mxu3 %v1215_v3 }
 0x1ad   : > { %v1501_v45 = vsel %vm1473_vm12, %v9973_v39, -inf  ;;  %v1155_v47 = vmul.f32 %v10013_v37, %v927_v31  ;;  %v1153_v24 = vmul.f32 %v10013_v37, %v921_v6 }
 0x1ae   : > { %1502 = vmax.xlane.f32.xlu1 %v1501_v45  ;;  %v1094_v45 = vmul.f32 %v10003_v34, %v927_v31 }
 0x1af   : > { %2294 = vmatpush.msrb.mxu2 %v1155_v47 }
 0x1b0   : > { %8380 = vmatmul.msk.f32.gmra.mxu3 %vm588_vm0, %v1186_v59  ;;  %v1033_v59 = vmul.f32 %v10008_v9, %v927_v31  ;;  %2176 = vmatpush.msrb.mxu0 %v1094_v45  ;;  %v915_v31 = vadd.f32 %v8705_v0, %v9946_v42  ;;  %v1214_v45 = vmul.f32 %v10018_v55, %v921_v6 }
 0x1b2   : > { %2235 = vmatpush.msrb.mxu1 %v1033_v59  ;;  %2177 = vmatpush.msrb.mxu0 %v1093_v57  ;;  %v1151_v57 = vmul.f32 %v10013_v37, %v915_v31 }
 0x1b3   : > { %v1391_v56 = vpop.f32.mrf.mxu3  ;;  %2362 = vmatpush.msrb.mxu3 %v1214_v45 }
 0x1b4   : > { %v9986_v62 = vsel %vm1238_vm11, %v1391_v56, -1e+30  ;;  %v1154_v56 = vmul.f32 %v10013_v37, %v924_v26  ;;  %2236 = vmatpush.msrb.mxu1 %v1032_v43  ;;  %2178 = vmatpush.msrb.mxu0 %v1092_v52  ;;  %v1212_v43 = vmul.f32 %v10018_v55, %v915_v31  ;;  %v563_v52 = vld [vmem:[%s9613_s25 + $0x58] sm:$0xff] }
 0x1b5   : > { %v1504_v22 = vsel %vm1473_vm12, %v9986_v62, -inf }
 0x1b6   : > { %1505 = vmax.xlane.f32.xlu1 %v1504_v22  ;;  %v918_v22 = vadd.f32 %v8705_v0, %v917_v27  ;;  %2295 = vmatpush.msrb.mxu2 %v1154_v56  ;;  %v909_v27 = vadd.f32 %v8705_v0, %v9932_v1 }
 0x1b8   : > { %8381 = vmatmul.msk.f32.gmra.mxu3 %vm588_vm0, %v1187_v25  ;;  %v562_v25 = vld [vmem:[%s9613_s25 + $0x50] sm:$0xff]  ;;  %v1091_v42 = vmul.f32 %v10003_v34, %v918_v22  ;;  %v1030_v59 = vmul.f32 %v10008_v9, %v918_v22  ;;  %v1152_v47 = vmul.f32 %v10013_v37, %v918_v22  ;;  %2296 = vmatpush.msrb.mxu2 %v1153_v24 }
 0x1b9   : > { %8301 = vmatmul.msk.f32.gmra.mxu1 %vm588_vm0, %v562_v25  ;;  %v1213_v1 = vmul.f32 %v10018_v55, %v918_v22  ;;  %v1027_v45 = vmul.f32 %v10008_v9, %v909_v27  ;;  %8273 = vmatmul.msk.f32.gmra.mxu0 %vm588_vm0, %v562_v25 }
 0x1ba   : > { %2179 = vmatpush.msrb.mxu0 %v1091_v42  ;;  %2297 = vmatpush.msrb.mxu2 %v1152_v47  ;;  %v565_v47 = vld [vmem:[%s9613_s25 + $0x68] sm:$0xff] }
 0x1bb   : > { %v1394_v32 = vpop.f32.mrf.mxu3  ;;  %2363 = vmatpush.msrb.mxu3 %v1213_v1  ;;  %8329 = vmatmul.msk.f32.gmra.mxu2 %vm588_vm0, %v562_v25 }
 0x1bc   : > { %v10022_v4 = vsel %vm1238_vm11, %v1394_v32, -1e+30  ;;  %v1031_v32 = vmul.f32 %v10008_v9, %v921_v6  ;;  %2298 = vmatpush.msrb.mxu2 %v1151_v57 }
 0x1bd   : > { %v1507_v17 = vsel %vm1473_vm12, %v10022_v4, -inf  ;;  %2364 = vmatpush.msrb.mxu3 %v1212_v43 }
 0x1be   : > { %1508 = vmax.xlane.f32.xlu2 %v1507_v17  ;;  %v912_v17 = vadd.f32 %v8705_v0, %v9939_v7  ;;  %2237 = vmatpush.msrb.mxu1 %v1031_v32  ;;  %v1090_v7 = vmul.f32 %v10003_v34, %v915_v31  ;;  %v1029_v0 = vmul.f32 %v10008_v9, %v915_v31 }
 0x1bf   : > { %v1088_v32 = vmul.f32 %v10003_v34, %v909_v27  ;;  %v1149_v31 = vmul.f32 %v10013_v37, %v909_v27 }
 0x1c0   : > { %2238 = vmatpush.msrb.mxu1 %v1030_v59  ;;  %v1089_v56 = vmul.f32 %v10003_v34, %v912_v17  ;;  %v1028_v24 = vmul.f32 %v10008_v9, %v912_v17  ;;  %v1150_v3 = vmul.f32 %v10013_v37, %v912_v17  ;;  %2180 = vmatpush.msrb.mxu0 %v1090_v7 }
 0x1c1   : > { %v1211_v22 = vmul.f32 %v10018_v55, %v912_v17  ;;  %8302 = vmatmul.msk.f32.gmra.mxu1 %vm588_vm0, %v563_v52  ;;  %8274 = vmatmul.msk.f32.gmra.mxu0 %vm588_vm0, %v563_v52 }
 0x1c2   : > { %2239 = vmatpush.msrb.mxu1 %v1029_v0  ;;  %2181 = vmatpush.msrb.mxu0 %v1089_v56 }
 0x1c3   : > { %v1397_v26 = vpop.f32.mrf.mxu3  ;;  %2299 = vmatpush.msrb.mxu2 %v1150_v3  ;;  %2365 = vmatpush.msrb.mxu3 %v1211_v22 }
 0x1c4   : > { %v10048_v6 = vsel %vm1238_vm11, %v1397_v26, -1e+30  ;;  %v1210_v26 = vmul.f32 %v10018_v55, %v909_v27  ;;  %2240 = vmatpush.msrb.mxu1 %v1028_v24  ;;  %2182 = vmatpush.msrb.mxu0 %v1088_v32  ;;  %v564_v27 = vld [vmem:[%s9613_s25 + $0x60] sm:$0xff] }
 0x1c5   : > { %v1510_v51 = vsel %vm1473_vm12, %v10048_v6, -inf  ;;  %2300 = vmatpush.msrb.mxu2 %v1149_v31 }
 0x1c6   : > { %1511 = vmax.xlane.f32.xlu2 %v1510_v51  ;;  %2241 = vmatpush.msrb.mxu1 %v1027_v45 }
 0x1c7   : > { %2366 = vmatpush.msrb.mxu3 %v1210_v26  ;;  %8330 = vmatmul.msk.f32.gmra.mxu2 %vm588_vm0, %v563_v52 }
 0x1c9   : > { %8303 = vmatmul.msk.f32.gmra.mxu1 %vm588_vm0, %v564_v27  ;;  %8275 = vmatmul.msk.f32.gmra.mxu0 %vm588_vm0, %v564_v27 }
 0x1cb   : > { %v1400_v42 = vpop.f32.mrf.mxu3 }
 0x1cc   : > { %v10069_v17 = vsel %vm1238_vm11, %v1400_v42, -1e+30 }
 0x1cd   : > { %v1513_v59 = vsel %vm1473_vm12, %v10069_v17, -inf }
 0x1ce   : > { %1514 = vmax.xlane.f32.xlu0 %v1513_v59 }
 0x1cf   : > { %8331 = vmatmul.msk.f32.gmra.mxu2 %vm588_vm0, %v564_v27 }
 0x1d1   : > { %8304 = vmatmul.msk.f32.gmra.mxu1 %vm588_vm0, %v565_v47  ;;  %8276 = vmatmul.msk.f32.gmra.mxu0 %vm588_vm0, %v565_v47 }
 0x1d3   : > { %v1403_v7 = vpop.f32.mrf.mxu3 }
 0x1d7   : > { %8332 = vmatmul.msk.f32.gmra.mxu2 %vm588_vm0, %v565_v47 }
 0x1db   : > { %v1406_v3 = vpop.f32.mrf.mxu3 }
 0x1e3   : > { %v1409_v31 = vpop.f32.mrf.mxu3 }
 0x211   : > { %v1497_v1 = vpop.xlane.xlu0 %1496 }
 0x212   : > { %v1565_v25 = vsub.f32 %v9951_v48, %v1497_v1 }
 0x214   : > { %v1600_v0 = vmul.f32 1.442695, %v1565_v25  ;;  %v1412_v25 = vpop.f32.mrf.mxu3 }
 0x216   : > { %8713 = vpow2.f32 %v1600_v0 }
 0x219   : > { %v1500_v51 = vpop.xlane.xlu0 %1499 }
 0x21a   : > { %v1566_v57 = vsub.f32 %v9960_v30, %v1500_v51  ;;  %v10096_v30 = vpop.f32.mrf.mxu1 }
 0x21c   : > { %v10087_v43 = vpop.eup %8713  ;;  %v1602_v56 = vmul.f32 1.442695, %v1566_v57 }
 0x21d   : > { %v1663_v24 = vsel %vm1473_vm12, %v10087_v43, 0.0 }
 0x21e   : > { %8715 = vpow2.f32 %v1602_v56  ;;  %1664 = vadd.xlane.f32.xlu1 %v1663_v24 }
 0x221   : > { %v1503_v22 = vpop.xlane.xlu1 %1502 }
 0x222   : > { %v1567_v52 = vsub.f32 %v9973_v39, %v1503_v22  ;;  %v10103_v47 = vpop.f32.mrf.mxu1 }
 0x224   : > { %v10092_v32 = vpop.eup %8715  ;;  %v1604_v48 = vmul.f32 1.442695, %v1567_v52 }
 0x225   : > { %v1666_v45 = vsel %vm1473_vm12, %v10092_v32, 0.0 }
 0x226   : > { %8717 = vpow2.f32 %v1604_v48  ;;  %1667 = vadd.xlane.f32.xlu2 %v1666_v45  ;;  %v1415_v48 = vpop.f32.mrf.mxu3 }
 0x229   : > { %v1506_v26 = vpop.xlane.xlu1 %1505 }
 0x22a   : > { %v1568_v42 = vsub.f32 %v9986_v62, %v1506_v26  ;;  %v10110_v56 = vpop.f32.mrf.mxu1  ;;  %v566_v26 = vld [vmem:[%s9613_s25 + $0x70] sm:$0xff] }
 0x22b   : > { %8277 = vmatmul.msk.f32.gmra.mxu0 %vm588_vm0, %v566_v26  ;;  %8333 = vmatmul.msk.f32.gmra.mxu2 %vm588_vm0, %v566_v26 }
 0x22c   : > { %v10099_v59 = vpop.eup %8717  ;;  %v1606_v27 = vmul.f32 1.442695, %v1568_v42  ;;  %8305 = vmatmul.msk.f32.gmra.mxu1 %vm588_vm0, %v566_v26  ;;  %v568_v26 = vld [vmem:[%s9613_s25 + $0x80] sm:$0xff] }
 0x22d   : > { %v1669_v39 = vsel %vm1473_vm12, %v10099_v59, 0.0 }
 0x22e   : > { %8719 = vpow2.f32 %v1606_v27  ;;  %1670 = vadd.xlane.f32.xlu0 %v1669_v39  ;;  %v10124_v39 = vsel %vm1238_vm11, %v1403_v7, -1e+30  ;;  %v10138_v7 = vsel %vm1238_vm11, %v1406_v3, -1e+30 }
 0x231   : > { %v1509_v1 = vpop.xlane.xlu2 %1508 }
 0x232   : > { %v1569_v0 = vsub.f32 %v10022_v4, %v1509_v1 }
 0x234   : > { %v10106_v51 = vpop.eup %8719  ;;  %v1608_v57 = vmul.f32 1.442695, %v1569_v0 }
 0x235   : > { %v1672_v62 = vsel %vm1473_vm12, %v10106_v51, 0.0 }
 0x236   : > { %8721 = vpow2.f32 %v1608_v57  ;;  %1673 = vadd.xlane.f32.xlu1 %v1672_v62  ;;  %v829_v42 = vpop.f32.mrf.mxu1  ;;  %v567_v57 = vld [vmem:[%s9613_s25 + $0x78] sm:$0xff] }
 0x237   : > { %8278 = vmatmul.msk.f32.gmra.mxu0 %vm588_vm0, %v567_v57  ;;  %8334 = vmatmul.msk.f32.gmra.mxu2 %vm588_vm0, %v567_v57 }
 0x238   : > { %8306 = vmatmul.msk.f32.gmra.mxu1 %vm588_vm0, %v567_v57  ;;  %v10158_v57 = vsel %vm1238_vm11, %v1409_v31, -1e+30 }
 0x239   : > { %v1512_v24 = vpop.xlane.xlu2 %1511 }
 0x23a   : > { %v1570_v22 = vsub.f32 %v10048_v6, %v1512_v24  ;;  %v1516_v24 = vsel %vm1473_vm12, %v10124_v39, -inf }
 0x23c   : > { %v10113_v52 = vpop.eup %8721  ;;  %v1610_v45 = vmul.f32 1.442695, %v1570_v22  ;;  %v1418_v22 = vpop.f32.mrf.mxu3 }
 0x23d   : > { %v1675_v4 = vsel %vm1473_vm12, %v10113_v52, 0.0 }
 0x23e   : > { %8723 = vpow2.f32 %v1610_v45  ;;  %1676 = vadd.xlane.f32.xlu2 %v1675_v4  ;;  %v10142_v45 = vsel %vm1238_vm11, %v1412_v25, -1e+30 }
 0x23f   : > { %v1525_v3 = vsel %vm1473_vm12, %v10142_v45, -inf  ;;  %8279 = vmatmul.msk.f32.gmra.mxu0 %vm588_vm0, %v568_v26  ;;  %8335 = vmatmul.msk.f32.gmra.mxu2 %vm588_vm0, %v568_v26 }
 0x240   : > { %8307 = vmatmul.msk.f32.gmra.mxu1 %vm588_vm0, %v568_v26 }
 0x241   : > { %v1515_v27 = vpop.xlane.xlu0 %1514 }
 0x242   : > { %v1571_v6 = vsub.f32 %v10069_v17, %v1515_v27  ;;  %v832_v17 = vpop.f32.mrf.mxu1 }
 0x243   : > { %v833_v55 = vadd.f32 %v9728_v28, %v832_v17  ;;  %v824_v17 = vadd.f32 %v9728_v28, %v10103_v47 }
 0x244   : > { %v10126_v1 = vpop.eup %8723  ;;  %v1612_v0 = vmul.f32 1.442695, %v1571_v6  ;;  %v1519_v6 = vsel %vm1473_vm12, %v10138_v7, -inf  ;;  %v1421_v25 = vpop.f32.mrf.mxu3 }
 0x245   : > { %v1678_v62 = vsel %vm1473_vm12, %v10126_v1, 0.0 }
 0x246   : > { %8725 = vpow2.f32 %v1612_v0  ;;  %1679 = vadd.xlane.f32.xlu0 %v1678_v62  ;;  %1517 = vmax.xlane.f32.xlu2 %v1516_v24  ;;  %v10162_v62 = vsel %vm1238_vm11, %v1415_v48, -1e+30  ;;  %v10166_v24 = vsel %vm1238_vm11, %v1421_v25, -1e+30  ;;  %v10181_v25 = vsel %vm1238_vm11, %v1418_v22, -1e+30 }
 0x247   : > { %v1528_v26 = vsel %vm1473_vm12, %v10162_v62, -inf  ;;  %v1534_v31 = vsel %vm1473_vm12, %v10166_v24, -inf  ;;  %v830_v22 = vadd.f32 %v9728_v28, %v829_v42  ;;  %v571_v42 = vld [vmem:[%s9613_s25 + $0x98] sm:$0xff] }
 0x24a   : > { %v835_v0 = vpop.f32.mrf.mxu1 }
 0x24c   : > { %v10144_v4 = vpop.eup %8725 }
 0x24d   : > { %v1681_v27 = vsel %vm1473_vm12, %v10144_v4, 0.0 }
 0x24e   : > { %1682 = vadd.xlane.f32.xlu1 %v1681_v27  ;;  %1520 = vmax.xlane.f32.xlu0 %v1519_v6  ;;  %v569_v27 = vld [vmem:[%s9613_s25 + $0x88] sm:$0xff]  ;;  %v1522_v6 = vsel %vm1473_vm12, %v10158_v57, -inf }
 0x24f   : > { %1526 = vmax.xlane.f32.xlu2 %v1525_v3  ;;  %8280 = vmatmul.msk.f32.gmra.mxu0 %vm588_vm0, %v569_v27 }
 0x250   : > { %8336 = vmatmul.msk.f32.gmra.mxu2 %vm588_vm0, %v569_v27  ;;  %8308 = vmatmul.msk.f32.gmra.mxu1 %vm588_vm0, %v569_v27  ;;  %v821_v27 = vadd.f32 %v9728_v28, %v10096_v30  ;;  %v10217_v30 = vpop.f32.mrf.mxu0 }
 0x252   : > { %v838_v48 = vpop.f32.mrf.mxu1 }
 0x253   : > { %v839_v3 = vadd.f32 %v9728_v28, %v838_v48 }
 0x255   : > { %8410 = vmatpush.xpose.msk.msra.mxu0 %vm588_vm0, %v839_v3 }
 0x256   : > { %1523 = vmax.xlane.f32.xlu1 %v1522_v6  ;;  %1529 = vmax.xlane.f32.xlu0 %v1528_v26  ;;  %v836_v6 = vadd.f32 %v9728_v28, %v835_v0  ;;  %v1531_v26 = vsel %vm1473_vm12, %v10181_v25, -inf  ;;  %v827_v0 = vadd.f32 %v9728_v28, %v10110_v56 }
 0x257   : > { %1535 = vmax.xlane.f32.xlu2 %v1534_v31  ;;  %v570_v31 = vld [vmem:[%s9613_s25 + $0x90] sm:$0xff] }
 0x258   : > { %8281 = vmatmul.msk.f32.gmra.mxu0 %vm588_vm0, %v570_v31  ;;  %8337 = vmatmul.msk.f32.gmra.mxu2 %vm588_vm0, %v570_v31 }
 0x259   : > { %8411 = vmatpush.xpose.msk.msra.mxu0 %vm588_vm0, %v836_v6  ;;  %8309 = vmatmul.msk.f32.gmra.mxu1 %vm588_vm0, %v570_v31 }
 0x25d   : > { %8412 = vmatpush.xpose.msk.msra.mxu0 %vm588_vm0, %v833_v55  ;;  %v572_v55 = vld [vmem:[%s9613_s25 + $0xa0] sm:$0xff] }
 0x25e   : > { %1532 = vmax.xlane.f32.xlu1 %v1531_v26 }
 0x260   : > { %8282 = vmatmul.msk.f32.gmra.mxu0 %vm588_vm0, %v571_v42  ;;  %8338 = vmatmul.msk.f32.gmra.mxu2 %vm588_vm0, %v571_v42 }
 0x261   : > { %8413 = vmatpush.xpose.msk.msra.mxu0 %vm588_vm0, %v830_v22  ;;  %8310 = vmatmul.msk.f32.gmra.mxu1 %vm588_vm0, %v571_v42 }
 0x265   : > { %8414 = vmatpush.xpose.msk.msra.mxu0 %vm588_vm0, %v827_v0  ;;  %v10223_v0 = vpop.f32.mrf.mxu0 }
 0x268   : > { %8283 = vmatmul.msk.f32.gmra.mxu0 %vm588_vm0, %v572_v55  ;;  %8339 = vmatmul.msk.f32.gmra.mxu2 %vm588_vm0, %v572_v55 }
 0x269   : > { %8415 = vmatpush.xpose.msk.msra.mxu0 %vm588_vm0, %v824_v17  ;;  %8311 = vmatmul.msk.f32.gmra.mxu1 %vm588_vm0, %v572_v55 }
 0x26d   : > { %8416 = vmatpush.xpose.msk.msra.mxu0 %vm588_vm0, %v821_v27 }
 0x270   : > { %8340 = vmatmul.msk.f32.gmra.mxu2 %vm588_vm0, %v9646_v12 }
 0x278   : > { %8341 = vmatmul.msk.f32.gmra.mxu2 %vm588_vm0, %v9658_v14 }
 0x280   : > { %8342 = vmatmul.msk.f32.gmra.mxu2 %vm588_vm0, %v9670_v16 }
 0x288   : > { %8343 = vmatmul.msk.f32.gmra.mxu2 %vm588_vm0, %v9682_v18 }
 0x290   : > { %8344 = vmatmul.msk.f32.gmra.mxu2 %vm588_vm0, %v9691_v19 }
 0x291   : > { %v1665_v28 = vpop.xlane.xlu1 %1664 }
 0x292   : > { %8727 = vrcp.f32 %v1665_v28  ;;  %v1842_v6 = vand.u32 2147483648, %v1665_v28  ;;  %v1840_v31 = vand.u32 2147483647, %v1665_v28  ;;  %vm1836_vm14 = vweird.f32 %v1665_v28 }
 0x294   : > { %v1843_v22 = vor.u32 1.1754944e-38, %v1842_v6  ;;  %vm1841_vm1 = vcmp.eq.f32.partialorder %v1840_v31, 8.507059e+37 }
 0x298   : > { %v8728_v47 = vpop.eup %8727  ;;  %8345 = vmatmul.msk.f32.gmra.mxu2 %vm588_vm0, %v9702_v20 }
 0x299   : > { %v1832_v56 = vmul.f32 %v8728_v47, %v1665_v28  ;;  %v1668_v48 = vpop.xlane.xlu2 %1667  ;;  %vm1837_vm13 = vweird.f32 %v8728_v47 }
 0x29a   : > { %8729 = vrcp.f32 %v1668_v48  ;;  %vm1838_vm15 = vmor %vm1836_vm14, %vm1837_vm13  ;;  %v1855_v28 = vand.u32 2147483647, %v1668_v48  ;;  %vm1851_vm3 = vweird.f32 %v1668_v48 }
 0x29b   : > { %v1833_v3 = vsub.f32 1.0, %v1832_v56 }
 0x29c   : > { %vm1856_vm5 = vcmp.eq.f32.partialorder %v1855_v28, 8.507059e+37 }
 0x29d   : > { %v1834_v26 = vmul.f32 %v8728_v47, %v1833_v3  ;;  %v1857_v3 = vand.u32 2147483648, %v1668_v48 }
 0x29f   : > { %v1835_v12 = vadd.f32 %v8728_v47, %v1834_v26 }
 0x2a0   : > { %v8730_v14 = vpop.eup %8729  ;;  %8346 = vmatmul.msk.f32.gmra.mxu2 %vm588_vm0, %v9707_v21 }
 0x2a1   : > { %v1847_v16 = vmul.f32 %v8730_v14, %v1668_v48  ;;  %v1671_v17 = vpop.xlane.xlu0 %1670  ;;  %v1839_v27 = vsel %vm1838_vm15, %v8728_v47, %v1835_v12  ;;  %vm1852_vm2 = vweird.f32 %v8730_v14  ;;  %v1858_v47 = vor.u32 1.1754944e-38, %v1857_v3 }
 0x2a2   : > { %8731 = vrcp.f32 %v1671_v17  ;;  %v1844_v42 = vsel %vm1841_vm1, %v1843_v22, %v1839_v27  ;;  %vm1853_vm4 = vmor %vm1851_vm3, %vm1852_vm2  ;;  %v1870_v48 = vand.u32 2147483647, %v1671_v17  ;;  %vm1866_vm7 = vweird.f32 %v1671_v17 }
 0x2a3   : > { %v1848_v55 = vsub.f32 1.0, %v1847_v16  ;;  %v1845_v56 = vmul.f32 %v10087_v43, %v1844_v42  ;;  %v10229_v16 = vpop.f32.mrf.mxu0 }
 0x2a4   : > { %vm1871_vm9 = vcmp.eq.f32.partialorder %v1870_v48, 8.507059e+37 }
 0x2a5   : > { %8382 = vmatmul.msk.f32.vlgmr.msrb.gmra.mxu0 %vm1473_vm12, %v1845_v56  ;;  %v1849_v18 = vmul.f32 %v8730_v14, %v1848_v55  ;;  %v1872_v55 = vand.u32 2147483648, %v1671_v17 }
 0x2a7   : > { %v1850_v6 = vadd.f32 %v8730_v14, %v1849_v18  ;;  %v1873_v3 = vor.u32 1.1754944e-38, %v1872_v55 }
 0x2a8   : > { %v8732_v26 = vpop.eup %8731 }
 0x2a9   : > { %v1862_v31 = vmul.f32 %v8732_v26, %v1671_v17  ;;  %v1674_v12 = vpop.xlane.xlu1 %1673  ;;  %v1854_v22 = vsel %vm1853_vm4, %v8730_v14, %v1850_v6  ;;  %vm1867_vm6 = vweird.f32 %v8732_v26 }
 0x2aa   : > { %8733 = vrcp.f32 %v1674_v12  ;;  %v1859_v43 = vsel %vm1856_vm5, %v1858_v47, %v1854_v22  ;;  %vm1868_vm8 = vmor %vm1866_vm7, %vm1867_vm6  ;;  %v1885_v20 = vand.u32 2147483647, %v1674_v12  ;;  %vm1881_vm13 = vweird.f32 %v1674_v12 }
 0x2ab   : > { %v1863_v27 = vsub.f32 1.0, %v1862_v31  ;;  %v1860_v42 = vmul.f32 %v10092_v32, %v1859_v43  ;;  %v10236_v22 = vpop.f32.mrf.mxu0 }
 0x2ac   : > { %vm1886_vm15 = vcmp.eq.f32.partialorder %v1885_v20, 8.507059e+37 }
 0x2ad   : > { %8383 = vmatmul.msk.f32.gmra.mxu0 %vm1473_vm12, %v1860_v42  ;;  %v1864_v19 = vmul.f32 %v8732_v26, %v1863_v27  ;;  %v1887_v27 = vand.u32 2147483648, %v1674_v12 }
 0x2af   : > { %v1865_v56 = vadd.f32 %v8732_v26, %v1864_v19  ;;  %v1888_v42 = vor.u32 1.1754944e-38, %v1887_v27 }
 0x2b0   : > { %v8734_v14 = vpop.eup %8733 }
 0x2b1   : > { %v1877_v18 = vmul.f32 %v8734_v14, %v1674_v12  ;;  %v1677_v28 = vpop.xlane.xlu2 %1676  ;;  %v1869_v6 = vsel %vm1868_vm8, %v8732_v26, %v1865_v56  ;;  %vm1882_vm10 = vweird.f32 %v8734_v14 }
 0x2b2   : > { %8735 = vrcp.f32 %v1677_v28  ;;  %v1874_v32 = vsel %vm1871_vm9, %v1873_v3, %v1869_v6  ;;  %vm1883_vm14 = vmor %vm1881_vm13, %vm1882_vm10  ;;  %v1902_v21 = vand.u32 2147483648, %v1677_v28  ;;  %v1900_v12 = vand.u32 2147483647, %v1677_v28 }
 0x2b3   : > { %v1878_v47 = vsub.f32 1.0, %v1877_v18  ;;  %v1875_v31 = vmul.f32 %v10099_v59, %v1874_v32  ;;  %vm1896_vm2 = vweird.f32 %v1677_v28 }
 0x2b4   : > { %vm1901_vm4 = vcmp.eq.f32.partialorder %v1900_v12, 8.507059e+37 }
 0x2b5   : > { %v1879_v43 = vmul.f32 %v8734_v14, %v1878_v47  ;;  %8384 = vmatmul.msk.f32.gmra.mxu0 %vm1473_vm12, %v1875_v31  ;;  %v10244_v31 = vpop.f32.mrf.mxu0 }
 0x2b7   : > { %v1880_v17 = vadd.f32 %v8734_v14, %v1879_v43 }
 0x2b8   : > { %v8736_v26 = vpop.eup %8735 }
 0x2b9   : > { %v1892_v55 = vmul.f32 %v8736_v26, %v1677_v28  ;;  %v1680_v19 = vpop.xlane.xlu0 %1679  ;;  %v1518_v48 = vpop.xlane.xlu2 %1517  ;;  %v1884_v59 = vsel %vm1883_vm14, %v8734_v14, %v1880_v17  ;;  %vm1897_vm1 = vweird.f32 %v8736_v26 }
 0x2ba   : > { %8737 = vrcp.f32 %v1680_v19  ;;  %v1572_v56 = vsub.f32 %v10124_v39, %v1518_v48  ;;  %v1889_v18 = vsel %vm1886_vm15, %v1888_v42, %v1884_v59  ;;  %vm1898_vm3 = vmor %vm1896_vm2, %vm1897_vm1  ;;  %v1903_v39 = vor.u32 1.1754944e-38, %v1902_v21 }
 0x2bb   : > { %v1893_v3 = vsub.f32 1.0, %v1892_v55  ;;  %v1890_v32 = vmul.f32 %v10106_v51, %v1889_v18  ;;  %vm1911_vm6 = vweird.f32 %v1680_v19 }
 0x2bc   : > { %v1614_v6 = vmul.f32 1.442695, %v1572_v56  ;;  %v1917_v56 = vand.u32 2147483648, %v1680_v19 }
 0x2bd   : > { %v1894_v47 = vmul.f32 %v8736_v26, %v1893_v3  ;;  %8385 = vmatmul.msk.f32.gmra.mxu0 %vm1473_vm12, %v1890_v32  ;;  %v1915_v32 = vand.u32 2147483647, %v1680_v19  ;;  %v726_v21 = vpop.f32.mrf.mxu0 }
 0x2be   : > { %8739 = vpow2.f32 %v1614_v6 }
 0x2bf   : > { %v1895_v14 = vadd.f32 %v8736_v26, %v1894_v47  ;;  %v1918_v47 = vor.u32 1.1754944e-38, %v1917_v56  ;;  %vm1916_vm8 = vcmp.eq.f32.partialorder %v1915_v32, 8.507059e+37 }
 0x2c0   : > { %v8738_v43 = vpop.eup %8737 }
 0x2c1   : > { %v1907_v27 = vmul.f32 %v8738_v43, %v1680_v19  ;;  %v1683_v20 = vpop.xlane.xlu1 %1682  ;;  %v1521_v17 = vpop.xlane.xlu0 %1520  ;;  %v1899_v42 = vsel %vm1898_vm3, %v8736_v26, %v1895_v14  ;;  %vm1912_vm5 = vweird.f32 %v8738_v43 }
 0x2c2   : > { %8741 = vrcp.f32 %v1683_v20  ;;  %v1573_v51 = vsub.f32 %v10138_v7, %v1521_v17  ;;  %v1904_v48 = vsel %vm1901_vm4, %v1903_v39, %v1899_v42  ;;  %vm1913_vm7 = vmor %vm1911_vm6, %vm1912_vm5  ;;  %v1932_v42 = vand.u32 2147483648, %v1683_v20 }
 0x2c3   : > { %v1908_v55 = vsub.f32 1.0, %v1907_v27  ;;  %v1905_v28 = vmul.f32 %v10113_v52, %v1904_v48  ;;  %vm1926_vm10 = vweird.f32 %v1683_v20 }
 0x2c4   : > { %v10247_v59 = vpop.eup %8739  ;;  %v1616_v3 = vmul.f32 1.442695, %v1573_v51 }
 0x2c5   : > { %v1909_v18 = vmul.f32 %v8738_v43, %v1908_v55  ;;  %v1684_v6 = vsel %vm1473_vm12, %v10247_v59, 0.0  ;;  %8386 = vmatmul.msk.f32.gmra.mxu0 %vm1473_vm12, %v1905_v28  ;;  %v1930_v55 = vand.u32 2147483647, %v1683_v20 }
 0x2c6   : > { %8743 = vpow2.f32 %v1616_v3  ;;  %1685 = vadd.xlane.f32.xlu0 %v1684_v6 }
 0x2c7   : > { %v1910_v7 = vadd.f32 %v8738_v43, %v1909_v18  ;;  %vm1931_vm14 = vcmp.eq.f32.partialorder %v1930_v55, 8.507059e+37  ;;  %v9443_v18 = vld [vmem:[%s15368_s4] ss:$0 sm:$0xff] }
 0x2c8   : > { %v8742_v26 = vpop.eup %8741  ;;  %v10265_v6 = vadd.f32 %v9443_v18, %v10217_v30  ;;  %v10281_v30 = vadd.f32 %v9443_v18, %v10229_v16 }
 0x2c9   : > { %v1922_v12 = vmul.f32 %v8742_v26, %v1683_v20  ;;  %v1914_v14 = vsel %vm1913_vm7, %v8738_v43, %v1910_v7  ;;  %vm1927_vm9 = vweird.f32 %v8742_v26  ;;  %v1933_v43 = vor.u32 1.1754944e-38, %v1932_v42 }
 0x2ca   : > { %v1919_v52 = vsel %vm1916_vm8, %v1918_v47, %v1914_v14  ;;  %vm1928_vm13 = vmor %vm1926_vm10, %vm1927_vm9  ;;  %v1005_v20 = vmul.f32 %v9755_v44, %v10265_v6  ;;  %v10273_v7 = vadd.f32 %v9443_v18, %v10223_v0  ;;  %v1007_v47 = vmul.f32 %v9755_v44, %v10281_v30 }
 0x2cb   : > { %v1923_v39 = vsub.f32 1.0, %v1922_v12  ;;  %v1920_v27 = vmul.f32 %v10126_v1, %v1919_v52  ;;  %v729_v1 = vpop.f32.mrf.mxu0  ;;  %v10287_v12 = vadd.f32 %v9443_v18, %v10236_v22  ;;  %v10295_v52 = vadd.f32 %v9443_v18, %v10244_v31 }
 0x2cc   : > { %v10254_v17 = vpop.eup %8743 }
 0x2cd   : > { %v1924_v51 = vmul.f32 %v8742_v26, %v1923_v39  ;;  %v1687_v19 = vsel %vm1473_vm12, %v10254_v17, 0.0  ;;  %8387 = vmatmul.msk.f32.gmra.mxu0 %vm1473_vm12, %v1920_v27  ;;  %v1008_v14 = vmul.f32 %v9755_v44, %v10287_v12  ;;  %v1009_v39 = vmul.f32 %v9755_v44, %v10295_v52 }
 0x2ce   : > { %1688 = vadd.xlane.f32.xlu2 %v1687_v19  ;;  %v10302_v27 = vadd.f32 %v9443_v18, %v726_v21  ;;  %v1066_v21 = vmul.f32 %v9827_v23, %v10265_v6 }
 0x2cf   : > { %v1925_v48 = vadd.f32 %v8742_v26, %v1924_v51  ;;  %v10309_v51 = vadd.f32 %v9443_v18, %v729_v1  ;;  %v1069_v1 = vmul.f32 %v9827_v23, %v10287_v12  ;;  %v10336_v18 = vpop.xlane.xlu0 %1529 }
 0x2d0   : > { %v1010_v22 = vmul.f32 %v9755_v44, %v10302_v27 }
 0x2d1   : > { %v1929_v56 = vsel %vm1928_vm13, %v8742_v26, %v1925_v48  ;;  %v1011_v31 = vmul.f32 %v9755_v44, %v10309_v51  ;;  %v1067_v48 = vmul.f32 %v9827_v23, %v10273_v7 }
 0x2d2   : > { %v1934_v3 = vsel %vm1931_vm14, %v1933_v43, %v1929_v56  ;;  %v1068_v56 = vmul.f32 %v9827_v23, %v10281_v30 }
 0x2d3   : > { %v1935_v28 = vmul.f32 %v10144_v4, %v1934_v3  ;;  %v10269_v32 = vpop.f32.mrf.mxu0  ;;  %v1006_v4 = vmul.f32 %v9755_v44, %v10273_v7 }
 0x2d5   : > { %8388 = vmatmul.msk.f32.gmra.mxu0 %vm1473_vm12, %v1935_v28  ;;  %v10334_v28 = vpop.xlane.xlu2 %1526 }
 0x2db   : > { %v10278_v26 = vpop.f32.mrf.mxu0 }
 0x2dd   : > { %8417 = vmatmul.msk.f32.vlgmr.msra.gmra.mxu0 %vm588_vm0, %v1005_v20 }
 0x2e3   : > { %v10289_v0 = vpop.f32.mrf.mxu0 }
 0x2e5   : > { %8418 = vmatmul.msk.f32.gmra.mxu0 %vm588_vm0, %v1006_v4  ;;  %v1070_v4 = vmul.f32 %v9827_v23, %v10295_v52 }
 0x2eb   : > { %v10297_v16 = vpop.f32.mrf.mxu0 }
 0x2ed   : > { %8419 = vmatmul.msk.f32.gmra.mxu0 %vm588_vm0, %v1007_v47  ;;  %v10343_v47 = vpop.xlane.xlu2 %1535 }
 0x2f3   : > { %v10306_v42 = vpop.f32.mrf.mxu0 }
 0x2f5   : > { %8420 = vmatmul.msk.f32.gmra.mxu0 %vm588_vm0, %v1008_v14 }
 0x2fb   : > { %v10314_v19 = vpop.f32.mrf.mxu0 }
 0x2fd   : > { %8421 = vmatmul.msk.f32.gmra.mxu0 %vm588_vm0, %v1009_v39 }
 0x303   : > { %v10319_v55 = vpop.f32.mrf.mxu0 }
 0x305   : > { %8422 = vmatmul.msk.f32.gmra.mxu0 %vm588_vm0, %v1010_v22  ;;  %v1071_v22 = vmul.f32 %v9827_v23, %v10302_v27 }
 0x30d   : > { %8423 = vmatmul.msk.f32.gmra.mxu0 %vm588_vm0, %v1011_v31 }
 0x315   : > { %8424 = vmatmul.msk.f32.gmra.mxu0 %vm588_vm0, %v1066_v21 }
 0x31d   : > { %8425 = vmatmul.msk.f32.gmra.mxu0 %vm588_vm0, %v1067_v48 }
 0x322   : > { %v10324_v43 = vpop.f32.mrf.mxu0 }
 0x323   : > { %15441 = vst [vmem:[#allocation22_spill] sm:$0xff] %v10324_v43 }
 0x325   : > { %8426 = vmatmul.msk.f32.gmra.mxu0 %vm588_vm0, %v1068_v56 }
 0x32a   : > { %v10329_v3 = vpop.f32.mrf.mxu0 }
 0x32b   : > { %15442 = vst [vmem:[#allocation23_spill] sm:$0xff] %v10329_v3 }
 0x32d   : > { %8427 = vmatmul.msk.f32.gmra.mxu0 %vm588_vm0, %v1069_v1 }
 0x332   : > { %v10338_v20 = vpop.f32.mrf.mxu0 }
 0x333   : > { %15443 = vst [vmem:[#allocation24_spill] sm:$0xff] %v10338_v20 }
 0x335   : > { %8428 = vmatmul.msk.f32.gmra.mxu0 %vm588_vm0, %v1070_v4  ;;  %v1072_v4 = vmul.f32 %v9827_v23, %v10309_v51 }
 0x339   : > { %v1686_v14 = vpop.xlane.xlu0 %1685 }
 0x33a   : > { %8745 = vrcp.f32 %v1686_v14  ;;  %v10345_v39 = vpop.f32.mrf.mxu0  ;;  %v1947_v20 = vand.u32 2147483648, %v1686_v14  ;;  %v1945_v43 = vand.u32 2147483647, %v1686_v14  ;;  %vm1941_vm1 = vweird.f32 %v1686_v14 }
 0x33b   : > { %15444 = vst [vmem:[#allocation25_spill] sm:$0xff] %v10345_v39 }
 0x33c   : > { %vm1946_vm3 = vcmp.eq.f32.partialorder %v1945_v43, 8.507059e+37 }
 0x33d   : > { %8429 = vmatmul.msk.f32.gmra.mxu0 %vm588_vm0, %v1071_v22  ;;  %v1948_v22 = vor.u32 1.1754944e-38, %v1947_v20  ;;  %v1524_v20 = vpop.xlane.xlu1 %1523 }
 0x340   : > { %v8746_v31 = vpop.eup %8745 }
 0x341   : > { %v1937_v21 = vmul.f32 %v8746_v31, %v1686_v14  ;;  %v1689_v48 = vpop.xlane.xlu2 %1688  ;;  %vm1942_vm15 = vweird.f32 %v8746_v31 }
 0x342   : > { %8747 = vrcp.f32 %v1689_v48  ;;  %v10350_v1 = vpop.f32.mrf.mxu0  ;;  %vm1943_vm2 = vmor %vm1941_vm1, %vm1942_vm15  ;;  %v1962_v41 = vand.u32 2147483648, %v1689_v48  ;;  %vm1956_vm5 = vweird.f32 %v1689_v48 }
 0x343   : > { %v1938_v56 = vsub.f32 1.0, %v1937_v21  ;;  %15445 = vst [vmem:[#allocation26_spill] sm:$0xff] %v10350_v1 }
 0x345   : > { %v1939_v3 = vmul.f32 %v8746_v31, %v1938_v56  ;;  %8430 = vmatmul.msk.f32.gmra.mxu0 %vm588_vm0, %v1072_v4  ;;  %v1127_v56 = vmul.f32 %v9881_v33, %v10265_v6 }
 0x347   : > { %v1940_v39 = vadd.f32 %v8746_v31, %v1939_v3  ;;  %v1960_v3 = vand.u32 2147483647, %v1689_v48 }
 0x348   : > { %v8748_v10 = vpop.eup %8747 }
 0x349   : > { %v1944_v63 = vsel %vm1943_vm2, %v8746_v31, %v1940_v39  ;;  %v1952_v58 = vmul.f32 %v8748_v10, %v1689_v48  ;;  %vm1957_vm4 = vweird.f32 %v8748_v10  ;;  %vm1961_vm7 = vcmp.eq.f32.partialorder %v1960_v3, 8.507059e+37 }
 0x34a   : > { %v1949_v21 = vsel %vm1946_vm3, %v1948_v22, %v1944_v63  ;;  %v10355_v1 = vpop.f32.mrf.mxu0  ;;  %vm1958_vm6 = vmor %vm1956_vm5, %vm1957_vm4  ;;  %v1963_v63 = vor.u32 1.1754944e-38, %v1962_v41  ;;  %v1575_v41 = vsub.f32 %v10142_v45, %v10334_v28  ;;  %v1130_v45 = vmul.f32 %v9881_v33, %v10287_v12 }
 0x34b   : > { %v1953_v53 = vsub.f32 1.0, %v1952_v58  ;;  %15446 = vst [vmem:[#allocation27_spill] sm:$0xff] %v10355_v1  ;;  %v1950_v49 = vmul.f32 %v10247_v59, %v1949_v21  ;;  %v1576_v21 = vsub.f32 %v10162_v62, %v10336_v18 }
 0x34c   : > { %v1620_v48 = vmul.f32 1.442695, %v1575_v41  ;;  %v1132_v41 = vmul.f32 %v9881_v33, %v10302_v27 }
 0x34d   : > { %v1954_v2 = vmul.f32 %v8748_v10, %v1953_v53  ;;  %8396 = vmatmul.msk.f32.vlgmr.msrb.gmra.mxu2 %vm1473_vm12, %v1950_v49  ;;  %8431 = vmatmul.msk.f32.gmra.mxu0 %vm588_vm0, %v1127_v56  ;;  %v1128_v53 = vmul.f32 %v9881_v33, %v10273_v7  ;;  %v1574_v49 = vsub.f32 %v10158_v57, %v1524_v20 }
 0x34f   : > { %v1955_v43 = vadd.f32 %v8748_v10, %v1954_v2  ;;  %v1618_v2 = vmul.f32 1.442695, %v1574_v49 }
 0x351   : > { %v1959_v58 = vsel %vm1958_vm6, %v8748_v10, %v1955_v43  ;;  %v1129_v10 = vmul.f32 %v9881_v33, %v10281_v30  ;;  %8749 = vpow2.f32 %v1618_v2  ;;  %v1622_v43 = vmul.f32 1.442695, %v1576_v21 }
 0x352   : > { %v1964_v14 = vsel %vm1961_vm7, %v1963_v63, %v1959_v58  ;;  %v10362_v59 = vpop.f32.mrf.mxu0  ;;  %8751 = vpow2.f32 %v1620_v48  ;;  %v1533_v58 = vpop.xlane.xlu1 %1532 }
 0x353   : > { %15447 = vst [vmem:[#allocation28_spill] sm:$0xff] %v10362_v59  ;;  %v1965_v39 = vmul.f32 %v10254_v17, %v1964_v14  ;;  %v1131_v14 = vmul.f32 %v9881_v33, %v10295_v52  ;;  %8753 = vpow2.f32 %v1622_v43  ;;  %v1577_v18 = vsub.f32 %v10181_v25, %v1533_v58 }
 0x355   : > { %8397 = vmatmul.msk.f32.gmra.mxu2 %vm1473_vm12, %v1965_v39  ;;  %8432 = vmatmul.msk.f32.gmra.mxu0 %vm588_vm0, %v1128_v53  ;;  %v1624_v49 = vmul.f32 1.442695, %v1577_v18  ;;  %v1188_v18 = vmul.f32 %v9927_v61, %v10265_v6 }
 0x357   : > { %v10381_v4 = vpop.eup %8749  ;;  %8755 = vpow2.f32 %v1624_v49 }
 0x358   : > { %v1690_v3 = vsel %vm1473_vm12, %v10381_v4, 0.0  ;;  %v10396_v63 = vpop.eup %8751 }
 0x359   : > { %v1693_v39 = vsel %vm1473_vm12, %v10396_v63, 0.0  ;;  %v10410_v2 = vpop.eup %8753 }
 0x35a   : > { %v2518_v31 = vpop.f32.mrf.mxu0  ;;  %v1696_v48 = vsel %vm1473_vm12, %v10410_v2, 0.0 }
 0x35b   : > { %v10376_v17 = vsel %vm1238_vm11, %v2518_v31, -1e+30 }
 0x35c   : > { %v2630_v57 = vsel %vm1473_vm12, %v10376_v17, -inf }
 0x35d   : > { %8433 = vmatmul.msk.f32.gmra.mxu0 %vm588_vm0, %v1129_v10  ;;  %2631 = vmax.xlane.f32.xlu1 %v2630_v57  ;;  %v1578_v10 = vsub.f32 %v10166_v24, %v10343_v47  ;;  %v10427_v21 = vpop.eup %8755  ;;  %v1133_v24 = vmul.f32 %v9881_v33, %v10309_v51 }
 0x35e   : > { %v1699_v43 = vsel %vm1473_vm12, %v10427_v21, 0.0 }
 0x362   : > { %v2521_v22 = vpop.f32.mrf.mxu0 }
 0x363   : > { %v10387_v28 = vsel %vm1238_vm11, %v2521_v22, -1e+30  ;;  %v10425_v22 = vpop.f32.mrf.mxu2 }
 0x364   : > { %v2633_v56 = vsel %vm1473_vm12, %v10387_v28, -inf }
 0x365   : > { %8434 = vmatmul.msk.f32.gmra.mxu0 %vm588_vm0, %v1130_v45  ;;  %2634 = vmax.xlane.f32.xlu0 %v2633_v56  ;;  %v1626_v45 = vmul.f32 1.442695, %v1578_v10  ;;  %v1189_v10 = vmul.f32 %v9927_v61, %v10273_v7 }
 0x366   : > { %1691 = vadd.xlane.f32.xlu1 %v1690_v3 }
 0x367   : > { %8757 = vpow2.f32 %v1626_v45 }
 0x36a   : > { %v2524_v20 = vpop.f32.mrf.mxu0 }
 0x36b   : > { %v10402_v62 = vsel %vm1238_vm11, %v2524_v20, -1e+30  ;;  %v10440_v58 = vpop.f32.mrf.mxu2 }
 0x36c   : > { %v2636_v53 = vsel %vm1473_vm12, %v10402_v62, -inf }
 0x36d   : > { %8435 = vmatmul.msk.f32.gmra.mxu0 %vm588_vm0, %v1131_v14  ;;  %1694 = vadd.xlane.f32.xlu0 %v1693_v39  ;;  %v10442_v20 = vpop.eup %8757 }
 0x36e   : > { %2637 = vmax.xlane.f32.xlu2 %v2636_v53  ;;  %v1702_v49 = vsel %vm1473_vm12, %v10442_v20, 0.0 }
 0x372   : > { %v2527_v31 = vpop.f32.mrf.mxu0 }
 0x373   : > { %v10416_v25 = vsel %vm1238_vm11, %v2527_v31, -1e+30  ;;  %v935_v31 = vpop.f32.mrf.mxu2 }
 0x374   : > { %v2639_v57 = vsel %vm1473_vm12, %v10416_v25, -inf }
 0x375   : > { %8436 = vmatmul.msk.f32.gmra.mxu0 %vm588_vm0, %v1132_v41  ;;  %2640 = vmax.xlane.f32.xlu1 %v2639_v57 }
 0x376   : > { %1697 = vadd.xlane.f32.xlu2 %v1696_v48  ;;  %v1190_v48 = vmul.f32 %v9927_v61, %v10281_v30 }
 0x37a   : > { %v2530_v56 = vpop.f32.mrf.mxu0 }
 0x37b   : > { %v10433_v47 = vsel %vm1238_vm11, %v2530_v56, -1e+30  ;;  %v938_v45 = vpop.f32.mrf.mxu2  ;;  %v1191_v56 = vmul.f32 %v9927_v61, %v10287_v12 }
 0x37c   : > { %v2642_v3 = vsel %vm1473_vm12, %v10433_v47, -inf }
 0x37d   : > { %8437 = vmatmul.msk.f32.gmra.mxu0 %vm588_vm0, %v1133_v24  ;;  %2643 = vmax.xlane.f32.xlu0 %v2642_v3  ;;  %v1192_v24 = vmul.f32 %v9927_v61, %v10295_v52 }
 0x37e   : > { %1700 = vadd.xlane.f32.xlu1 %v1699_v43  ;;  %v1193_v43 = vmul.f32 %v9927_v61, %v10302_v27 }
 0x382   : > { %v2533_v14 = vpop.f32.mrf.mxu0 }
 0x383   : > { %v10448_v39 = vsel %vm1238_vm11, %v2533_v14, -1e+30  ;;  %v941_v7 = vpop.f32.mrf.mxu2  ;;  %v1194_v14 = vmul.f32 %v9927_v61, %v10309_v51 }
 0x384   : > { %v2645_v53 = vsel %vm1473_vm12, %v10448_v39, -inf }
 0x385   : > { %8438 = vmatmul.msk.f32.gmra.mxu0 %vm588_vm0, %v1188_v18  ;;  %2646 = vmax.xlane.f32.xlu2 %v2645_v53 }
 0x386   : > { %1703 = vadd.xlane.f32.xlu0 %v1702_v49 }
 0x38a   : > { %v2536_v41 = vpop.f32.mrf.mxu0 }
 0x38b   : > { %v10459_v6 = vsel %vm1238_vm11, %v2536_v41, -1e+30  ;;  %v944_v3 = vpop.f32.mrf.mxu2  ;;  %v10486_v41 = vpop.f32.mrf.mxu3 }
 0x38c   : > { %v2648_v57 = vsel %vm1473_vm12, %v10459_v6, -inf }
 0x38d   : > { %8439 = vmatmul.msk.f32.gmra.mxu0 %vm588_vm0, %v1189_v10  ;;  %2649 = vmax.xlane.f32.xlu1 %v2648_v57 }
 0x392   : > { %v10488_v10 = vpop.f32.mrf.mxu0 }
 0x393   : > { %v947_v30 = vpop.f32.mrf.mxu2  ;;  %15448 = vst [vmem:[#allocation29_spill] sm:$0xff] %v10488_v10 }
 0x395   : > { %8440 = vmatmul.msk.f32.gmra.mxu0 %vm588_vm0, %v1190_v48 }
 0x39a   : > { %v10532_v10 = vpop.f32.mrf.mxu0 }
 0x39b   : > { %v10479_v12 = vpop.f32.mrf.mxu2  ;;  %15453 = vst [vmem:[#allocation34_spill] sm:$0xff] %v10532_v10 }
 0x39d   : > { %8441 = vmatmul.msk.f32.gmra.mxu0 %vm588_vm0, %v1191_v56 }
 0x3a3   : > { %v10481_v18 = vpop.f32.mrf.mxu2 }
 0x3a5   : > { %8442 = vmatmul.msk.f32.gmra.mxu0 %vm588_vm0, %v1192_v24 }
 0x3ab   : > { %v10483_v53 = vpop.f32.mrf.mxu2 }
 0x3ad   : > { %8443 = vmatmul.msk.f32.gmra.mxu0 %vm588_vm0, %v1193_v43 }
 0x3b3   : > { %v10493_v56 = vpop.f32.mrf.mxu2 }
 0x3b5   : > { %8444 = vmatmul.msk.f32.gmra.mxu0 %vm588_vm0, %v1194_v14 }
 0x3bb   : > { %v10546_v54 = vpop.f32.mrf.mxu2 }
 0x3d0   : > { %v2632_v52 = vpop.xlane.xlu1 %2631 }
 0x3d1   : > { %v2714_v49 = vsub.f32 %v10376_v17, %v2632_v52  ;;  %v10501_v17 = vld [vmem:[%s15370_s6] ss:$0 sm:$0xff]  ;;  %v10508_v52 = vpop.f32.mrf.mxu3 }
 0x3d2   : > { %v10504_v14 = vadd.f32 %v10501_v17, %v947_v30  ;;  %v10524_v1 = vadd.f32 %v10501_v17, %v941_v7  ;;  %v10540_v8 = vadd.f32 %v10501_v17, %v935_v31  ;;  %v10572_v46 = vadd.f32 %v10501_v17, %v10440_v58 }
 0x3d3   : > { %v2742_v27 = vmul.f32 1.442695, %v2714_v49  ;;  %v10511_v49 = vadd.f32 %v10501_v17, %v944_v3 }
 0x3d4   : > { %15449 = vst [vmem:[#allocation30_spill] sm:$0xff] %v10504_v14  ;;  %v1040_v30 = vmul.f32 %v10008_v9, %v10504_v14  ;;  %v1162_v59 = vmul.f32 %v10013_v37, %v10504_v14  ;;  %v1096_v40 = vmul.f32 %v10003_v34, %v10572_v46 }
 0x3d5   : > { %8759 = vpow2.f32 %v2742_v27  ;;  %15450 = vst [vmem:[#allocation31_spill] sm:$0xff] %v10511_v49  ;;  %v1161_v10 = vmul.f32 %v10013_v37, %v10511_v49 }
 0x3d6   : > { %15451 = vst [vmem:[#allocation32_spill] sm:$0xff] %v10524_v1  ;;  %3391 = vmatpush.msra.mxu2 %v1040_v30  ;;  %3450 = vmatpush.msra.mxu3 %v1162_v59  ;;  %v1099_v59 = vmul.f32 %v10003_v34, %v10524_v1 }
 0x3d7   : > { %15454 = vst [vmem:[#allocation35_spill] sm:$0xff] %v10540_v8 }
 0x3d8   : > { %v2635_v57 = vpop.xlane.xlu0 %2634  ;;  %3451 = vmatpush.msra.mxu3 %v1161_v10  ;;  %15455 = vst [vmem:[#allocation36_spill] sm:$0xff] %v10572_v46 }
 0x3d9   : > { %v2715_v51 = vsub.f32 %v10387_v28, %v2635_v57  ;;  %v10491_v48 = vpop.xlane.xlu1 %1691 }
 0x3da   : > { %8761 = vrcp.f32 %v10491_v48  ;;  %vm1971_vm9 = vweird.f32 %v10491_v48 }
 0x3db   : > { %v10496_v24 = vpop.eup %8759  ;;  %v2744_v43 = vmul.f32 1.442695, %v2715_v51  ;;  %v1101_v51 = vmul.f32 %v10003_v34, %v10504_v14  ;;  %v1100_v14 = vmul.f32 %v10003_v34, %v10511_v49 }
 0x3dc   : > { %v2798_v28 = vsel %vm1473_vm12, %v10496_v24, 0.0 }
 0x3dd   : > { %8763 = vpow2.f32 %v2744_v43  ;;  %2799 = vadd.xlane.f32.xlu2 %v2798_v28  ;;  %v10530_v28 = vadd.f32 %v10501_v17, %v938_v45  ;;  %3332 = vmatpush.msra.mxu1 %v1101_v51  ;;  %v1039_v45 = vmul.f32 %v10008_v9, %v10511_v49  ;;  %v1160_v49 = vmul.f32 %v10013_v37, %v10524_v1 }
 0x3df   : > { %15452 = vst [vmem:[#allocation33_spill] sm:$0xff] %v10530_v28  ;;  %3333 = vmatpush.msra.mxu1 %v1100_v14  ;;  %3392 = vmatpush.msra.mxu2 %v1039_v45  ;;  %v1037_v14 = vmul.f32 %v10008_v9, %v10530_v28 }
 0x3e0   : > { %v10513_v27 = vpop.eup %8761  ;;  %v10515_v57 = vpop.xlane.xlu0 %1694  ;;  %3452 = vmatpush.msra.mxu3 %v1160_v49  ;;  %v1158_v49 = vmul.f32 %v10013_v37, %v10540_v8 }
 0x3e1   : > { %v1967_v3 = vmul.f32 %v10513_v27, %v10491_v48  ;;  %8765 = vrcp.f32 %v10515_v57  ;;  %v2638_v43 = vpop.xlane.xlu2 %2637  ;;  %vm1972_vm8 = vweird.f32 %v10513_v27  ;;  %3334 = vmatpush.msra.mxu1 %v1099_v59  ;;  %v1036_v59 = vmul.f32 %v10008_v9, %v10540_v8 }
 0x3e2   : > { %v2716_v60 = vsub.f32 %v10402_v62, %v2638_v43  ;;  %v1977_v62 = vand.u32 2147483648, %v10491_v48  ;;  %v1975_v43 = vand.u32 2147483647, %v10491_v48  ;;  %vm10584_vm10 = vmor %vm1971_vm9, %vm1972_vm8  ;;  %v1992_v11 = vand.u32 2147483648, %v10515_v57 }
 0x3e3   : > { %v10537_v7 = vpop.eup %8763  ;;  %v1968_v50 = vsub.f32 1.0, %v1967_v3  ;;  %v1038_v3 = vmul.f32 %v10008_v9, %v10524_v1  ;;  %v10580_v1 = vadd.f32 %v10501_v17, %v10425_v22  ;;  %vm1986_vm15 = vweird.f32 %v10515_v57 }
 0x3e4   : > { %v2746_v51 = vmul.f32 1.442695, %v2716_v60  ;;  %v2801_v30 = vsel %vm1473_vm12, %v10537_v7, 0.0  ;;  %v10558_v60 = vpop.f32.mrf.mxu1  ;;  %vm1976_vm13 = vcmp.eq.f32.partialorder %v1975_v43, 8.507059e+37 }
 0x3e5   : > { %v1969_v31 = vmul.f32 %v10513_v27, %v1968_v50  ;;  %2802 = vadd.xlane.f32.xlu0 %v2801_v30  ;;  %v1098_v50 = vmul.f32 %v10003_v34, %v10530_v28  ;;  %v10568_v30 = vpop.f32.mrf.mxu3  ;;  %3393 = vmatpush.msra.mxu2 %v1038_v3  ;;  %15456 = vst [vmem:[#allocation37_spill] sm:$0xff] %v10580_v1  ;;  %v1978_v3 = vor.u32 1.1754944e-38, %v1977_v62 }
 0x3e6   : > { %8767 = vpow2.f32 %v2746_v51  ;;  %v1159_v51 = vmul.f32 %v10013_v37, %v10530_v28 }
 0x3e7   : > { %v10566_v45 = vpop.eup %8765  ;;  %v1970_v10 = vadd.f32 %v10513_v27, %v1969_v31  ;;  %v1097_v31 = vmul.f32 %v10003_v34, %v10540_v8  ;;  %3335 = vmatpush.msra.mxu1 %v1098_v50  ;;  %3394 = vmatpush.msra.mxu2 %v1037_v14  ;;  %v10609_v50 = vpop.f32.mrf.mxu0 }
 0x3e8   : > { %v1982_v58 = vmul.f32 %v10566_v45, %v10515_v57  ;;  %v2641_v48 = vpop.xlane.xlu1 %2640  ;;  %3453 = vmatpush.msra.mxu3 %v1159_v51  ;;  %vm1987_vm14 = vweird.f32 %v10566_v45  ;;  %v1157_v51 = vmul.f32 %v10013_v37, %v10572_v46 }
 0x3e9   : > { %v2717_v22 = vsub.f32 %v10416_v25, %v2641_v48  ;;  %v10595_v28 = vpop.xlane.xlu2 %1697  ;;  %v1974_v5 = vsel %vm10584_vm10, %v10513_v27, %v1970_v10  ;;  %v1990_v48 = vand.u32 2147483647, %v10515_v57  ;;  %3336 = vmatpush.msra.mxu1 %v1097_v31  ;;  %3395 = vmatpush.msra.mxu2 %v1036_v59  ;;  %v1095_v31 = vmul.f32 %v10003_v34, %v10580_v1  ;;  %vm1988_vm1 = vmor %vm1986_vm15, %vm1987_vm14 }
 0x3ea   : > { %v1983_v29 = vsub.f32 1.0, %v1982_v58  ;;  %8769 = vrcp.f32 %v10595_v28  ;;  %v1979_v25 = vsel %vm1976_vm13, %v1978_v3, %v1974_v5  ;;  %3454 = vmatpush.msra.mxu3 %v1158_v49  ;;  %v1035_v5 = vmul.f32 %v10008_v9, %v10572_v46  ;;  %v10620_v58 = vpop.f32.mrf.mxu2 }
 0x3eb   : > { %v2748_v62 = vmul.f32 1.442695, %v2717_v22  ;;  %v1980_v43 = vmul.f32 %v10381_v4, %v1979_v25  ;;  %3337 = vmatpush.msra.mxu1 %v1096_v40  ;;  %v1034_v59 = vmul.f32 %v10008_v9, %v10580_v1  ;;  %v1993_v3 = vor.u32 1.1754944e-38, %v1992_v11 }
 0x3ec   : > { %v10607_v27 = vpop.eup %8767  ;;  %v1984_v14 = vmul.f32 %v10566_v45, %v1983_v29  ;;  %v10625_v4 = vpop.f32.mrf.mxu1  ;;  %3396 = vmatpush.msra.mxu2 %v1035_v5  ;;  %3455 = vmatpush.msra.mxu3 %v1157_v51  ;;  %v1156_v57 = vmul.f32 %v10013_v37, %v10580_v1  ;;  %vm1991_vm2 = vcmp.eq.f32.partialorder %v1990_v48, 8.507059e+37  ;;  %vm2001_vm4 = vweird.f32 %v10595_v28 }
 0x3ed   : > { %8771 = vpow2.f32 %v2748_v62  ;;  %v2804_v10 = vsel %vm1473_vm12, %v10607_v27, 0.0  ;;  %8398 = vmatmul.msk.f32.gmra.mxu2 %vm1473_vm12, %v1980_v43  ;;  %3338 = vmatpush.msra.mxu1 %v1095_v31  ;;  %v10636_v25 = vpop.f32.mrf.mxu3 }
 0x3ee   : > { %2805 = vadd.xlane.f32.xlu1 %v2804_v10  ;;  %v1985_v29 = vadd.f32 %v10566_v45, %v1984_v14  ;;  %3397 = vmatpush.msra.mxu2 %v1034_v59 }
 0x3ef   : > { %3456 = vmatpush.msra.mxu3 %v1156_v57  ;;  %v10647_v31 = vpop.f32.mrf.mxu0 }
 0x3f0   : > { %v8770_v22 = vpop.eup %8769  ;;  %v2644_v49 = vpop.xlane.xlu0 %2643  ;;  %v1989_v62 = vsel %vm1988_vm1, %v10566_v45, %v1985_v29  ;;  %v2007_v45 = vand.u32 2147483648, %v10595_v28  ;;  %15459 = vst [vmem:[#allocation38_spill] sm:$0xff] %v10647_v31 }
 0x3f1   : > { %v1997_v40 = vmul.f32 %v8770_v22, %v10595_v28  ;;  %v2718_v14 = vsub.f32 %v10433_v47, %v2644_v49  ;;  %v1701_v43 = vpop.xlane.xlu1 %1700  ;;  %v1994_v10 = vsel %vm1991_vm2, %v1993_v3, %v1989_v62  ;;  %vm2002_vm3 = vweird.f32 %v8770_v22 }
 0x3f2   : > { %8773 = vrcp.f32 %v1701_v43  ;;  %v1995_v11 = vmul.f32 %v10396_v63, %v1994_v10  ;;  %v2005_v47 = vand.u32 2147483647, %v10595_v28  ;;  %v10653_v57 = vpop.f32.mrf.mxu2  ;;  %vm2003_vm5 = vmor %vm2001_vm4, %vm2002_vm3  ;;  %v2008_v49 = vor.u32 1.1754944e-38, %v2007_v45 }
 0x3f3   : > { %v10641_v5 = vpop.eup %8771  ;;  %v1998_v51 = vsub.f32 1.0, %v1997_v40  ;;  %v2750_v9 = vmul.f32 1.442695, %v2718_v14  ;;  %v2022_v46 = vand.u32 2147483648, %v1701_v43  ;;  %vm2016_vm8 = vweird.f32 %v1701_v43 }
 0x3f4   : > { %v2807_v48 = vsel %vm1473_vm12, %v10641_v5, 0.0  ;;  %v10650_v63 = vpop.f32.mrf.mxu1  ;;  %vm2006_vm6 = vcmp.eq.f32.partialorder %v2005_v47, 8.507059e+37 }
 0x3f5   : > { %v1999_v29 = vmul.f32 %v8770_v22, %v1998_v51  ;;  %8775 = vpow2.f32 %v2750_v9  ;;  %2808 = vadd.xlane.f32.xlu2 %v2807_v48  ;;  %8399 = vmatmul.msk.f32.gmra.mxu2 %vm1473_vm12, %v1995_v11  ;;  %v10658_v48 = vpop.f32.mrf.mxu3 }
 0x3f7   : > { %v2000_v59 = vadd.f32 %v8770_v22, %v1999_v29 }
 0x3f8   : > { %v8774_v3 = vpop.eup %8773  ;;  %v2647_v62 = vpop.xlane.xlu2 %2646 }
 0x3f9   : > { %v2012_v40 = vmul.f32 %v8774_v3, %v1701_v43  ;;  %v1704_v9 = vpop.xlane.xlu0 %1703  ;;  %v2719_v14 = vsub.f32 %v10448_v39, %v2647_v62  ;;  %v2004_v10 = vsel %vm2003_vm5, %v8770_v22, %v2000_v59  ;;  %vm2017_vm7 = vweird.f32 %v8774_v3 }
 0x3fa   : > { %8777 = vrcp.f32 %v1704_v9  ;;  %v2009_v51 = vsel %vm2006_vm6, %v2008_v49, %v2004_v10  ;;  %v2020_v39 = vand.u32 2147483647, %v1701_v43  ;;  %v10666_v49 = vpop.f32.mrf.mxu0  ;;  %vm2018_vm9 = vmor %vm2016_vm8, %vm2017_vm7  ;;  %vm2031_vm14 = vweird.f32 %v1704_v9 }
 0x3fb   : > { %v10656_v11 = vpop.eup %8775  ;;  %v2013_v28 = vsub.f32 1.0, %v2012_v40  ;;  %v2752_v29 = vmul.f32 1.442695, %v2719_v14  ;;  %v2010_v1 = vmul.f32 %v10410_v2, %v2009_v51  ;;  %15460 = vst [vmem:[#allocation39_spill] sm:$0xff] %v10666_v49  ;;  %v2023_v2 = vor.u32 1.1754944e-38, %v2022_v46 }
 0x3fc   : > { %v2810_v45 = vsel %vm1473_vm12, %v10656_v11, 0.0  ;;  %v10664_v22 = vpop.f32.mrf.mxu1  ;;  %v10671_v40 = vsel %vm1238_vm11, %v10486_v41, -1e+30  ;;  %vm2021_vm10 = vcmp.eq.f32.partialorder %v2020_v39, 8.507059e+37 }
 0x3fd   : > { %v2014_v8 = vmul.f32 %v8774_v3, %v2013_v28  ;;  %8779 = vpow2.f32 %v2752_v29  ;;  %2811 = vadd.xlane.f32.xlu0 %v2810_v45  ;;  %8400 = vmatmul.msk.f32.gmra.mxu2 %vm1473_vm12, %v2010_v1  ;;  %v10674_v1 = vpop.f32.mrf.mxu2  ;;  %v2037_v45 = vand.u32 2147483648, %v1704_v9  ;;  %v1537_v41 = vsel %vm1473_vm12, %v10671_v40, -inf  ;;  %v1439_v31 = vpop.f32.mrf.mxu3 }
 0x3ff   : > { %v2015_v47 = vadd.f32 %v8774_v3, %v2014_v8 }
 0x400   : > { %v8778_v59 = vpop.eup %8777  ;;  %v2650_v62 = vpop.xlane.xlu1 %2649 }
 0x401   : > { %v2027_v14 = vmul.f32 %v8778_v59, %v1704_v9  ;;  %v2720_v10 = vsub.f32 %v10459_v6, %v2650_v62  ;;  %v2019_v51 = vsel %vm2018_vm9, %v8774_v3, %v2015_v47  ;;  %vm2032_vm13 = vweird.f32 %v8778_v59 }
 0x402   : > { %v2024_v43 = vsel %vm2021_vm10, %v2023_v2, %v2019_v51  ;;  %v2035_v3 = vand.u32 2147483647, %v1704_v9  ;;  %vm2033_vm15 = vmor %vm2031_vm14, %vm2032_vm13  ;;  %v10687_v62 = vsel %vm1238_vm11, %v10508_v52, -1e+30 }
 0x403   : > { %v10676_v8 = vpop.eup %8779  ;;  %v2028_v28 = vsub.f32 1.0, %v2027_v14  ;;  %v2754_v29 = vmul.f32 1.442695, %v2720_v10  ;;  %v2025_v46 = vmul.f32 %v10427_v21, %v2024_v43  ;;  %v2038_v21 = vor.u32 1.1754944e-38, %v2037_v45  ;;  %v10689_v14 = vpop.f32.mrf.mxu0 }
 0x404   : > { %v2813_v49 = vsel %vm1473_vm12, %v10676_v8, 0.0  ;;  %v853_v39 = vpop.f32.mrf.mxu1  ;;  %vm2036_vm1 = vcmp.eq.f32.partialorder %v2035_v3, 8.507059e+37  ;;  %v1540_v52 = vsel %vm1473_vm12, %v10687_v62, -inf }
 0x405   : > { %v2029_v6 = vmul.f32 %v8778_v59, %v2028_v28  ;;  %8781 = vpow2.f32 %v2754_v29  ;;  %2814 = vadd.xlane.f32.xlu1 %v2813_v49  ;;  %1538 = vmax.xlane.f32.xlu0 %v1537_v41  ;;  %v10694_v49 = vsel %vm1238_vm11, %v10636_v25, -1e+30  ;;  %v974_v43 = vpop.f32.mrf.mxu2  ;;  %v1442_v29 = vpop.f32.mrf.mxu3 }
 0x406   : > { %8401 = vmatmul.msk.f32.gmra.mxu2 %vm1473_vm12, %v2025_v46  ;;  %v1546_v28 = vsel %vm1473_vm12, %v10694_v49, -inf  ;;  %v10714_v46 = vsel %vm1238_vm11, %v10658_v48, -1e+30  ;;  %v10718_v45 = vsel %vm1238_vm11, %v1442_v29, -1e+30 }
 0x407   : > { %v2030_v47 = vadd.f32 %v8778_v59, %v2029_v6  ;;  %v1549_v3 = vsel %vm1473_vm12, %v10714_v46, -inf }
 0x409   : > { %v2034_v2 = vsel %vm2033_vm15, %v8778_v59, %v2030_v47 }
 0x40a   : > { %v2039_v10 = vsel %vm2036_vm1, %v2038_v21, %v2034_v2  ;;  %v9445_v21 = vld [vmem:[%s15369_s5] ss:$0 sm:$0xff] }
 0x40b   : > { %v10696_v51 = vpop.eup %8781  ;;  %v2040_v9 = vmul.f32 %v10442_v20, %v2039_v10  ;;  %v10709_v20 = vsel %vm1238_vm11, %v10568_v30, -1e+30  ;;  %v10720_v41 = vpop.f32.mrf.mxu0  ;;  %v1555_v30 = vsel %vm1473_vm12, %v10718_v45, -inf  ;;  %v10733_v10 = vsel %vm1238_vm11, %v1439_v31, -1e+30 }
 0x40c   : > { %v2816_v59 = vsel %vm1473_vm12, %v10696_v51, 0.0  ;;  %v856_v25 = vpop.f32.mrf.mxu1  ;;  %15461 = vst [vmem:[#allocation40_spill] sm:$0xff] %v10720_v41  ;;  %v1543_v6 = vsel %vm1473_vm12, %v10709_v20, -inf }
 0x40d   : > { %2817 = vadd.xlane.f32.xlu2 %v2816_v59  ;;  %1541 = vmax.xlane.f32.xlu1 %v1540_v52  ;;  %v977_v47 = vpop.f32.mrf.mxu2  ;;  %v1552_v59 = vsel %vm1473_vm12, %v10733_v10, -inf  ;;  %v854_v52 = vadd.f32 %v9445_v21, %v853_v39  ;;  %v845_v39 = vadd.f32 %v9445_v21, %v10625_v4 }
 0x40e   : > { %8402 = vmatmul.msk.f32.gmra.mxu2 %vm1473_vm12, %v2040_v9  ;;  %1547 = vmax.xlane.f32.xlu0 %v1546_v28  ;;  %v857_v9 = vadd.f32 %v9445_v21, %v856_v25  ;;  %v848_v25 = vadd.f32 %v9445_v21, %v10650_v63 }
 0x413   : > { %v2560_v28 = vpop.f32.mrf.mxu0 }
 0x414   : > { %v859_v48 = vpop.f32.mrf.mxu1 }
 0x415   : > { %1544 = vmax.xlane.f32.xlu2 %v1543_v6  ;;  %1550 = vmax.xlane.f32.xlu1 %v1549_v3  ;;  %v860_v2 = vadd.f32 %v9445_v21, %v859_v48  ;;  %v980_v29 = vpop.f32.mrf.mxu2  ;;  %v851_v6 = vadd.f32 %v9445_v21, %v10664_v22  ;;  %v10742_v3 = vsel %vm1238_vm11, %v2560_v28, -1e+30  ;;  %v842_v22 = vadd.f32 %v9445_v21, %v10558_v60 }
 0x416   : > { %1556 = vmax.xlane.f32.xlu0 %v1555_v30  ;;  %v2672_v31 = vsel %vm1473_vm12, %v10742_v3, -inf  ;;  %v10766_v60 = vadd.f32 %v10501_v17, %v980_v29  ;;  %v10782_v29 = vadd.f32 %v10501_v17, %v10674_v1 }
 0x417   : > { %8473 = vmatpush.xpose.msk.msrb.mxu2 %vm588_vm0, %v860_v2 }
 0x418   : > { %15465 = vst [vmem:[#allocation44_spill] sm:$0xff] %v10766_v60 }
 0x419   : > { %15468 = vst [vmem:[#allocation47_spill] sm:$0xff] %v10782_v29 }
 0x41b   : > { %8474 = vmatpush.xpose.msk.msrb.mxu2 %vm588_vm0, %v857_v9 }
 0x41d   : > { %1553 = vmax.xlane.f32.xlu2 %v1552_v59  ;;  %v983_v30 = vpop.f32.mrf.mxu2 }
 0x41e   : > { %v10761_v59 = vadd.f32 %v10501_v17, %v983_v30 }
 0x41f   : > { %8475 = vmatpush.xpose.msk.msrb.mxu2 %vm588_vm0, %v854_v52  ;;  %v10771_v52 = vadd.f32 %v10501_v17, %v977_v47 }
 0x420   : > { %15464 = vst [vmem:[#allocation43_spill] sm:$0xff] %v10761_v59  ;;  %v1113_v28 = vmul.f32 %v10003_v34, %v10761_v59  ;;  %v1174_v1 = vmul.f32 %v10013_v37, %v10761_v59 }
 0x421   : > { %15466 = vst [vmem:[#allocation45_spill] sm:$0xff] %v10771_v52  ;;  %v1111_v47 = vmul.f32 %v10003_v34, %v10771_v52 }
 0x423   : > { %8476 = vmatpush.xpose.msk.msrb.mxu2 %vm588_vm0, %v851_v6  ;;  %v10776_v6 = vadd.f32 %v10501_v17, %v974_v43  ;;  %v1109_v43 = vmul.f32 %v10003_v34, %v10782_v29 }
 0x425   : > { %2673 = vmax.xlane.f32.xlu2 %v2672_v31  ;;  %v986_v48 = vpop.f32.mrf.mxu2  ;;  %15467 = vst [vmem:[#allocation46_spill] sm:$0xff] %v10776_v6  ;;  %v1112_v31 = vmul.f32 %v10003_v34, %v10766_v60 }
 0x426   : > { %v10758_v63 = vadd.f32 %v10501_v17, %v986_v48 }
 0x427   : > { %8477 = vmatpush.xpose.msk.msrb.mxu2 %vm588_vm0, %v848_v25  ;;  %v1110_v25 = vmul.f32 %v10003_v34, %v10776_v6 }
 0x428   : > { %15463 = vst [vmem:[#allocation42_spill] sm:$0xff] %v10758_v63  ;;  %v1114_v21 = vmul.f32 %v10003_v34, %v10758_v63 }
 0x42b   : > { %8478 = vmatpush.xpose.msk.msrb.mxu2 %vm588_vm0, %v845_v39 }
 0x42d   : > { %v989_v2 = vpop.f32.mrf.mxu2 }
 0x42e   : > { %v10755_v9 = vadd.f32 %v10501_v17, %v989_v2  ;;  %v1175_v17 = vmul.f32 %v10013_v37, %v10758_v63 }
 0x42f   : > { %8479 = vmatpush.xpose.msk.msrb.mxu2 %vm588_vm0, %v842_v22  ;;  %v1173_v22 = vmul.f32 %v10013_v37, %v10766_v60 }
 0x430   : > { %15462 = vst [vmem:[#allocation41_spill] sm:$0xff] %v10755_v9  ;;  %v1115_v4 = vmul.f32 %v10003_v34, %v10755_v9  ;;  %v1176_v30 = vmul.f32 %v10013_v37, %v10755_v9 }
 0x432   : > { %5644 = vmatpush.msrb.mxu0 %v1115_v4 }
 0x434   : > { %5645 = vmatpush.msrb.mxu0 %v1114_v21  ;;  %v1172_v21 = vmul.f32 %v10013_v37, %v10771_v52 }
 0x436   : > { %5646 = vmatpush.msrb.mxu0 %v1113_v28 }
 0x438   : > { %5647 = vmatpush.msrb.mxu0 %v1112_v31  ;;  %v1171_v31 = vmul.f32 %v10013_v37, %v10776_v6 }
 0x43a   : > { %5648 = vmatpush.msrb.mxu0 %v1111_v47 }
 0x43c   : > { %5649 = vmatpush.msrb.mxu0 %v1110_v25 }
 0x43e   : > { %5650 = vmatpush.msrb.mxu0 %v1109_v43 }
 0x440   : > { %5762 = vmatpush.msra.mxu0 %v1176_v30  ;;  %v1170_v30 = vmul.f32 %v10013_v37, %v10782_v29 }
 0x442   : > { %5763 = vmatpush.msra.mxu0 %v1175_v17 }
 0x444   : > { %5764 = vmatpush.msra.mxu0 %v1174_v1 }
 0x446   : > { %5765 = vmatpush.msra.mxu0 %v1173_v22 }
 0x448   : > { %5766 = vmatpush.msra.mxu0 %v1172_v21 }
 0x44a   : > { %5767 = vmatpush.msra.mxu0 %v1171_v31 }
 0x44c   : > { %5768 = vmatpush.msra.mxu0 %v1170_v30 }
 0x450   : > { %v2800_v39 = vpop.xlane.xlu2 %2799 }
 0x451   : > { %8783 = vrcp.f32 %v2800_v39  ;;  %v2893_v47 = vand.u32 2147483648, %v2800_v39  ;;  %v2891_v43 = vand.u32 2147483647, %v2800_v39  ;;  %vm2887_vm3 = vweird.f32 %v2800_v39 }
 0x453   : > { %v2894_v22 = vor.u32 1.1754944e-38, %v2893_v47  ;;  %vm2892_vm5 = vcmp.eq.f32.partialorder %v2891_v43, 8.507059e+37 }
 0x457   : > { %v8784_v48 = vpop.eup %8783 }
 0x458   : > { %v2883_v2 = vmul.f32 %v8784_v48, %v2800_v39  ;;  %v2803_v4 = vpop.xlane.xlu0 %2802  ;;  %vm2888_vm2 = vweird.f32 %v8784_v48 }
 0x459   : > { %8785 = vrcp.f32 %v2803_v4  ;;  %vm2889_vm4 = vmor %vm2887_vm3, %vm2888_vm2  ;;  %v2908_v31 = vand.u32 2147483648, %v2803_v4  ;;  %vm2902_vm7 = vweird.f32 %v2803_v4 }
 0x45a   : > { %v2884_v28 = vsub.f32 1.0, %v2883_v2 }
 0x45b   : > { %v2909_v47 = vor.u32 1.1754944e-38, %v2908_v31 }
 0x45c   : > { %v2885_v25 = vmul.f32 %v8784_v48, %v2884_v28 }
 0x45e   : > { %v2886_v17 = vadd.f32 %v8784_v48, %v2885_v25  ;;  %v2906_v25 = vand.u32 2147483647, %v2803_v4 }
 0x45f   : > { %v8786_v1 = vpop.eup %8785 }
 0x460   : > { %v2890_v52 = vsel %vm2889_vm4, %v8784_v48, %v2886_v17  ;;  %v2898_v2 = vmul.f32 %v8786_v1, %v2803_v4  ;;  %vm2903_vm6 = vweird.f32 %v8786_v1  ;;  %vm2907_vm9 = vcmp.eq.f32.partialorder %v2906_v25, 8.507059e+37 }
 0x461   : > { %v2895_v21 = vsel %vm2892_vm5, %v2894_v22, %v2890_v52  ;;  %v2806_v60 = vpop.xlane.xlu1 %2805  ;;  %vm2904_vm8 = vmor %vm2902_vm7, %vm2903_vm6 }
 0x462   : > { %v2896_v6 = vmul.f32 %v10496_v24, %v2895_v21  ;;  %v2899_v28 = vsub.f32 1.0, %v2898_v2  ;;  %8787 = vrcp.f32 %v2806_v60  ;;  %v2923_v2 = vand.u32 2147483648, %v2806_v60 }
 0x463   : > { %vm2917_vm13 = vweird.f32 %v2806_v60 }
 0x464   : > { %v2900_v59 = vmul.f32 %v8786_v1, %v2899_v28  ;;  %8452 = vmatmul.msk.f32.vlgmr.msra.gmra.mxu2 %vm1473_vm12, %v2896_v6  ;;  %v2921_v6 = vand.u32 2147483647, %v2806_v60  ;;  %v2924_v28 = vor.u32 1.1754944e-38, %v2923_v2 }
 0x466   : > { %v2901_v39 = vadd.f32 %v8786_v1, %v2900_v59  ;;  %vm2922_vm15 = vcmp.eq.f32.partialorder %v2921_v6, 8.507059e+37 }
 0x468   : > { %v8788_v30 = vpop.eup %8787  ;;  %v2809_v48 = vpop.xlane.xlu2 %2808  ;;  %v2905_v43 = vsel %vm2904_vm8, %v8786_v1, %v2901_v39 }
 0x469   : > { %v2913_v17 = vmul.f32 %v8788_v30, %v2806_v60  ;;  %8789 = vrcp.f32 %v2809_v48  ;;  %v2910_v52 = vsel %vm2907_vm9, %v2909_v47, %v2905_v43  ;;  %vm2918_vm10 = vweird.f32 %v8788_v30 }
 0x46a   : > { %v2911_v22 = vmul.f32 %v10537_v7, %v2910_v52  ;;  %vm2919_vm14 = vmor %vm2917_vm13, %vm2918_vm10  ;;  %v2563_v52 = vpop.f32.mrf.mxu0  ;;  %vm2932_vm2 = vweird.f32 %v2809_v48 }
 0x46b   : > { %v2914_v24 = vsub.f32 1.0, %v2913_v17  ;;  %v2938_v17 = vand.u32 2147483648, %v2809_v48 }
 0x46c   : > { %8453 = vmatmul.msk.f32.gmra.mxu2 %vm1473_vm12, %v2911_v22 }
 0x46d   : > { %v2915_v21 = vmul.f32 %v8788_v30, %v2914_v24  ;;  %v2936_v24 = vand.u32 2147483647, %v2809_v48  ;;  %v2939_v2 = vor.u32 1.1754944e-38, %v2938_v17 }
 0x46f   : > { %v8790_v4 = vpop.eup %8789  ;;  %v2916_v59 = vadd.f32 %v8788_v30, %v2915_v21  ;;  %vm2937_vm4 = vcmp.eq.f32.partialorder %v2936_v24, 8.507059e+37 }
 0x470   : > { %v2928_v31 = vmul.f32 %v8790_v4, %v2809_v48  ;;  %v2812_v1 = vpop.xlane.xlu0 %2811  ;;  %vm2933_vm1 = vweird.f32 %v8790_v4 }
 0x471   : > { %8791 = vrcp.f32 %v2812_v1  ;;  %v2920_v39 = vsel %vm2919_vm14, %v8788_v30, %v2916_v59  ;;  %vm2934_vm3 = vmor %vm2932_vm2, %vm2933_vm1  ;;  %v2953_v48 = vand.u32 2147483648, %v2812_v1  ;;  %vm2947_vm6 = vweird.f32 %v2812_v1 }
 0x472   : > { %v2929_v25 = vsub.f32 1.0, %v2928_v31  ;;  %v2925_v47 = vsel %vm2922_vm15, %v2924_v28, %v2920_v39 }
 0x473   : > { %v2926_v7 = vmul.f32 %v10607_v27, %v2925_v47  ;;  %v2951_v47 = vand.u32 2147483647, %v2812_v1 }
 0x474   : > { %v2930_v43 = vmul.f32 %v8790_v4, %v2929_v25 }
 0x475   : > { %8454 = vmatmul.msk.f32.gmra.mxu2 %vm1473_vm12, %v2926_v7  ;;  %vm2952_vm8 = vcmp.eq.f32.partialorder %v2951_v47, 8.507059e+37 }
 0x476   : > { %v2931_v60 = vadd.f32 %v8790_v4, %v2930_v43 }
 0x477   : > { %v8792_v22 = vpop.eup %8791 }
 0x478   : > { %v2943_v21 = vmul.f32 %v8792_v22, %v2812_v1  ;;  %v2815_v29 = vpop.xlane.xlu1 %2814  ;;  %v1539_v30 = vpop.xlane.xlu0 %1538  ;;  %v2935_v6 = vsel %vm2934_vm3, %v8790_v4, %v2931_v60  ;;  %vm2948_vm5 = vweird.f32 %v8792_v22 }
 0x479   : > { %8793 = vrcp.f32 %v2815_v29  ;;  %v1579_v59 = vsub.f32 %v10671_v40, %v1539_v30  ;;  %v2940_v28 = vsel %vm2937_vm4, %v2939_v2, %v2935_v6  ;;  %v10813_v4 = vpop.f32.mrf.mxu0  ;;  %vm2949_vm7 = vmor %vm2947_vm6, %vm2948_vm5  ;;  %v2954_v40 = vor.u32 1.1754944e-38, %v2953_v48 }
 0x47a   : > { %v2944_v27 = vsub.f32 1.0, %v2943_v21  ;;  %v2941_v39 = vmul.f32 %v10641_v5, %v2940_v28  ;;  %v2968_v1 = vand.u32 2147483648, %v2815_v29  ;;  %vm2962_vm10 = vweird.f32 %v2815_v29 }
 0x47b   : > { %v1628_v31 = vmul.f32 1.442695, %v1579_v59 }
 0x47c   : > { %v2945_v25 = vmul.f32 %v8792_v22, %v2944_v27  ;;  %v2969_v47 = vor.u32 1.1754944e-38, %v2968_v1 }
 0x47d   : > { %8795 = vpow2.f32 %v1628_v31  ;;  %8455 = vmatmul.msk.f32.gmra.mxu2 %vm1473_vm12, %v2941_v39 }
 0x47e   : > { %v2946_v7 = vadd.f32 %v8792_v22, %v2945_v25  ;;  %v2966_v25 = vand.u32 2147483647, %v2815_v29 }
 0x47f   : > { %v8794_v43 = vpop.eup %8793 }
 0x480   : > { %v2958_v17 = vmul.f32 %v8794_v43, %v2815_v29  ;;  %v2818_v24 = vpop.xlane.xlu2 %2817  ;;  %v1542_v60 = vpop.xlane.xlu1 %1541  ;;  %v2950_v2 = vsel %vm2949_vm7, %v8792_v22, %v2946_v7  ;;  %vm2963_vm9 = vweird.f32 %v8794_v43  ;;  %vm2967_vm14 = vcmp.eq.f32.partialorder %v2966_v25, 8.507059e+37 }
 0x481   : > { %8797 = vrcp.f32 %v2818_v24  ;;  %v1580_v5 = vsub.f32 %v10687_v62, %v1542_v60  ;;  %v1548_v21 = vpop.xlane.xlu0 %1547  ;;  %v2955_v6 = vsel %vm2952_vm8, %v2954_v40, %v2950_v2  ;;  %vm2964_vm13 = vmor %vm2962_vm10, %vm2963_vm9  ;;  %v2569_v60 = vpop.f32.mrf.mxu0  ;;  %vm2977_vm1 = vweird.f32 %v2818_v24 }
 0x482   : > { %v2959_v30 = vsub.f32 1.0, %v2958_v17  ;;  %v1582_v28 = vsub.f32 %v10694_v49, %v1548_v21  ;;  %v2956_v31 = vmul.f32 %v10656_v11, %v2955_v6  ;;  %v10825_v49 = vsel %vm1238_vm11, %v2563_v52, -1e+30 }
 0x483   : > { %v10816_v59 = vpop.eup %8795  ;;  %v1630_v27 = vmul.f32 1.442695, %v1580_v5  ;;  %v2675_v6 = vsel %vm1473_vm12, %v10825_v49, -inf }
 0x484   : > { %v2960_v39 = vmul.f32 %v8794_v43, %v2959_v30  ;;  %v1705_v22 = vsel %vm1473_vm12, %v10816_v59, 0.0  ;;  %v1634_v7 = vmul.f32 1.442695, %v1582_v28  ;;  %v2981_v28 = vand.u32 2147483647, %v2818_v24 }
 0x485   : > { %8799 = vpow2.f32 %v1630_v27  ;;  %8456 = vmatmul.msk.f32.gmra.mxu2 %vm1473_vm12, %v2956_v31  ;;  %1706 = vadd.xlane.f32.xlu1 %v1705_v22  ;;  %v2983_v27 = vand.u32 2147483648, %v2818_v24 }
 0x486   : > { %v2961_v62 = vadd.f32 %v8794_v43, %v2960_v39  ;;  %8801 = vpow2.f32 %v1634_v7  ;;  %vm2982_vm3 = vcmp.eq.f32.partialorder %v2981_v28, 8.507059e+37 }
 0x487   : > { %v8798_v48 = vpop.eup %8797  ;;  %v2984_v39 = vor.u32 1.1754944e-38, %v2983_v27 }
 0x488   : > { %v2973_v11 = vmul.f32 %v8798_v48, %v2818_v24  ;;  %v1545_v40 = vpop.xlane.xlu2 %1544  ;;  %v2965_v17 = vsel %vm2964_vm13, %v8794_v43, %v2961_v62  ;;  %v1551_v5 = vpop.xlane.xlu1 %1550  ;;  %vm2978_vm15 = vweird.f32 %v8798_v48 }
 0x489   : > { %v1581_v2 = vsub.f32 %v10709_v20, %v1545_v40  ;;  %v2970_v21 = vsel %vm2967_vm14, %v2969_v47, %v2965_v17  ;;  %v1583_v43 = vsub.f32 %v10714_v46, %v1551_v5  ;;  %vm2979_vm2 = vmor %vm2977_vm1, %vm2978_vm15  ;;  %v1557_v25 = vpop.xlane.xlu0 %1556  ;;  %v10843_v40 = vsel %vm1238_vm11, %v10813_v4, -1e+30  ;;  %v2572_v17 = vpop.f32.mrf.mxu0 }
 0x48a   : > { %v2974_v30 = vsub.f32 1.0, %v2973_v11  ;;  %v2971_v29 = vmul.f32 %v10676_v8, %v2970_v21 }
 0x48b   : > { %v10831_v1 = vpop.eup %8799  ;;  %v1632_v52 = vmul.f32 1.442695, %v1581_v2  ;;  %v1636_v22 = vmul.f32 1.442695, %v1583_v43  ;;  %v1585_v2 = vsub.f32 %v10718_v45, %v1557_v25  ;;  %v9446_v45 = vld [vmem:[%s15368_s4] ss:$0 sm:$0xff] }
 0x48c   : > { %v2975_v31 = vmul.f32 %v8798_v48, %v2974_v30  ;;  %v1708_v20 = vsel %vm1473_vm12, %v10831_v1, 0.0  ;;  %v10837_v7 = vpop.eup %8801 }
 0x48d   : > { %8803 = vpow2.f32 %v1632_v52  ;;  %8457 = vmatmul.msk.f32.gmra.mxu2 %vm1473_vm12, %v2971_v29  ;;  %2676 = vmax.xlane.f32.xlu1 %v2675_v6  ;;  %v1640_v4 = vmul.f32 1.442695, %v1585_v2  ;;  %v10864_v6 = vsel %vm1238_vm11, %v2572_v17, -1e+30  ;;  %v10870_v52 = vsel %vm1238_vm11, %v2569_v60, -1e+30 }
 0x48e   : > { %1709 = vadd.xlane.f32.xlu0 %v1708_v20  ;;  %v2976_v8 = vadd.f32 %v8798_v48, %v2975_v31  ;;  %8805 = vpow2.f32 %v1636_v22  ;;  %v2684_v31 = vsel %vm1473_vm12, %v10864_v6, -inf  ;;  %v2681_v20 = vsel %vm1473_vm12, %v10870_v52, -inf }
 0x48f   : > { %8807 = vpow2.f32 %v1640_v4  ;;  %v10905_v17 = vadd.f32 %v9446_v45, %v10289_v0  ;;  %v10921_v0 = vadd.f32 %v9446_v45, %v10297_v16  ;;  %v10937_v16 = vadd.f32 %v9446_v45, %v10314_v19 }
 0x490   : > { %v1554_v62 = vpop.xlane.xlu2 %1553  ;;  %v2980_v47 = vsel %vm2979_vm2, %v8798_v48, %v2976_v8  ;;  %v1714_v48 = vsel %vm1473_vm12, %v10837_v7, 0.0  ;;  %v10883_v8 = vadd.f32 %v9446_v45, %v10278_v26 }
 0x491   : > { %v2985_v46 = vsel %vm2982_vm3, %v2984_v39, %v2980_v47  ;;  %v1584_v5 = vsub.f32 %v10733_v10, %v1554_v62  ;;  %v10860_v10 = vadd.f32 %v9446_v45, %v10269_v32  ;;  %v2575_v43 = vpop.f32.mrf.mxu0 }
 0x492   : > { %v2986_v11 = vmul.f32 %v10696_v51, %v2985_v46  ;;  %v2678_v51 = vsel %vm1473_vm12, %v10843_v40, -inf  ;;  %v10891_v25 = vsel %vm1238_vm11, %v2575_v43, -1e+30  ;;  %v1013_v62 = vmul.f32 %v9755_v44, %v10883_v8  ;;  %v10897_v46 = vpop.f32.mrf.mxu2 }
 0x493   : > { %v10845_v24 = vpop.eup %8803  ;;  %v1638_v30 = vmul.f32 1.442695, %v1584_v5  ;;  %v1012_v28 = vmul.f32 %v9755_v44, %v10860_v10  ;;  %15469 = vst [vmem:[#allocation48_spill] sm:$0xff] %v10897_v46  ;;  %v1073_v19 = vmul.f32 %v9827_v23, %v10860_v10 }
 0x494   : > { %v1711_v21 = vsel %vm1473_vm12, %v10845_v24, 0.0  ;;  %v10866_v27 = vpop.eup %8805 }
 0x495   : > { %8458 = vmatmul.msk.f32.gmra.mxu2 %vm1473_vm12, %v2986_v11  ;;  %1715 = vadd.xlane.f32.xlu1 %v1714_v48  ;;  %8809 = vpow2.f32 %v1638_v30  ;;  %v1717_v60 = vsel %vm1473_vm12, %v10866_v27, 0.0  ;;  %v2687_v11 = vsel %vm1473_vm12, %v10891_v25, -inf }
 0x496   : > { %1712 = vadd.xlane.f32.xlu2 %v1711_v21  ;;  %2679 = vmax.xlane.f32.xlu0 %v2678_v51  ;;  %v1014_v21 = vmul.f32 %v9755_v44, %v10905_v17 }
 0x498   : > { %v2674_v29 = vpop.xlane.xlu2 %2673 }
 0x499   : > { %v2728_v32 = vsub.f32 %v10742_v3, %v2674_v29  ;;  %v10885_v3 = vpop.eup %8807  ;;  %v2578_v2 = vpop.f32.mrf.mxu0  ;;  %v1015_v29 = vmul.f32 %v9755_v44, %v10921_v0 }
 0x49a   : > { %v1723_v47 = vsel %vm1473_vm12, %v10885_v3, 0.0  ;;  %v10911_v48 = vsel %vm1238_vm11, %v2578_v2, -1e+30  ;;  %v10923_v30 = vpop.f32.mrf.mxu2 }
 0x49b   : > { %v2770_v39 = vmul.f32 1.442695, %v2728_v32  ;;  %v10887_v22 = vpop.eup %8809  ;;  %v2690_v51 = vsel %vm1473_vm12, %v10911_v48, -inf  ;;  %15470 = vst [vmem:[#allocation49_spill] sm:$0xff] %v10923_v30 }
 0x49c   : > { %v1720_v26 = vsel %vm1473_vm12, %v10887_v22, 0.0 }
 0x49d   : > { %8480 = vmatmul.msk.f32.vlgmr.msrb.gmra.mxu2 %vm588_vm0, %v1012_v28  ;;  %2685 = vmax.xlane.f32.xlu1 %v2684_v31  ;;  %8811 = vpow2.f32 %v2770_v39  ;;  %v10929_v28 = vadd.f32 %v9446_v45, %v10306_v42  ;;  %v10945_v42 = vadd.f32 %v9446_v45, %v10319_v55  ;;  %v1075_v45 = vmul.f32 %v9827_v23, %v10905_v17 }
 0x49e   : > { %2682 = vmax.xlane.f32.xlu2 %v2681_v20  ;;  %1718 = vadd.xlane.f32.xlu0 %v1717_v60  ;;  %v1017_v20 = vmul.f32 %v9755_v44, %v10937_v16 }
 0x49f   : > { %v1016_v31 = vmul.f32 %v9755_v44, %v10929_v28  ;;  %v1018_v39 = vmul.f32 %v9755_v44, %v10945_v42  ;;  %v1079_v63 = vmul.f32 %v9827_v23, %v10945_v42 }
 0x4a2   : > { %v10931_v32 = vpop.f32.mrf.mxu2 }
 0x4a3   : > { %v10907_v5 = vpop.eup %8811  ;;  %15471 = vst [vmem:[#allocation50_spill] sm:$0xff] %v10931_v32 }
 0x4a4   : > { %v2840_v4 = vsel %vm1473_vm12, %v10907_v5, 0.0 }
 0x4a5   : > { %8481 = vmatmul.msk.f32.gmra.mxu2 %vm588_vm0, %v1013_v62  ;;  %1724 = vadd.xlane.f32.xlu1 %v1723_v47  ;;  %v1074_v47 = vmul.f32 %v9827_v23, %v10883_v8 }
 0x4a6   : > { %1721 = vadd.xlane.f32.xlu2 %v1720_v26  ;;  %2688 = vmax.xlane.f32.xlu0 %v2687_v11  ;;  %v1076_v11 = vmul.f32 %v9827_v23, %v10921_v0 }
 0x4aa   : > { %v10939_v43 = vpop.f32.mrf.mxu2 }
 0x4ab   : > { %15472 = vst [vmem:[#allocation51_spill] sm:$0xff] %v10939_v43 }
 0x4ad   : > { %8482 = vmatmul.msk.f32.gmra.mxu2 %vm588_vm0, %v1014_v21  ;;  %v1077_v21 = vmul.f32 %v9827_v23, %v10929_v28 }
 0x4ae   : > { %2691 = vmax.xlane.f32.xlu2 %v2690_v51  ;;  %2841 = vadd.xlane.f32.xlu0 %v2840_v4 }
 0x4b2   : > { %v10947_v60 = vpop.f32.mrf.mxu2 }
 0x4b3   : > { %15473 = vst [vmem:[#allocation52_spill] sm:$0xff] %v10947_v60 }
 0x4b5   : > { %8483 = vmatmul.msk.f32.gmra.mxu2 %vm588_vm0, %v1015_v29  ;;  %v1078_v29 = vmul.f32 %v9827_v23, %v10937_v16 }
 0x4ba   : > { %v10954_v62 = vpop.f32.mrf.mxu2 }
 0x4bb   : > { %15474 = vst [vmem:[#allocation53_spill] sm:$0xff] %v10954_v62 }
 0x4bd   : > { %8484 = vmatmul.msk.f32.gmra.mxu2 %vm588_vm0, %v1016_v31 }
 0x4c2   : > { %v10960_v55 = vpop.f32.mrf.mxu2 }
 0x4c3   : > { %15475 = vst [vmem:[#allocation54_spill] sm:$0xff] %v10960_v55 }
 0x4c5   : > { %8485 = vmatmul.msk.f32.gmra.mxu2 %vm588_vm0, %v1017_v20 }
 0x4cd   : > { %8486 = vmatmul.msk.f32.gmra.mxu2 %vm588_vm0, %v1018_v39 }
 0x4d5   : > { %8487 = vmatmul.msk.f32.gmra.mxu2 %vm588_vm0, %v1073_v19 }
 0x4dd   : > { %8488 = vmatmul.msk.f32.gmra.mxu2 %vm588_vm0, %v1074_v47 }
 0x4e5   : > { %8489 = vmatmul.msk.f32.gmra.mxu2 %vm588_vm0, %v1075_v45 }
 0x4e7   : > { %v10965_v26 = vpop.f32.mrf.mxu2 }
 0x4e8   : > { %15476 = vst [vmem:[#allocation55_spill] sm:$0xff] %v10965_v26 }
 0x4ed   : > { %8490 = vmatmul.msk.f32.gmra.mxu2 %vm588_vm0, %v1076_v11 }
 0x4ef   : > { %v10970_v2 = vpop.f32.mrf.mxu2 }
 0x4f0   : > { %15477 = vst [vmem:[#allocation56_spill] sm:$0xff] %v10970_v2 }
 0x4f5   : > { %8491 = vmatmul.msk.f32.gmra.mxu2 %vm588_vm0, %v1077_v21 }
 0x4f8   : > { %v10975_v51 = vpop.f32.mrf.mxu2  ;;  %v1707_v4 = vpop.xlane.xlu1 %1706 }
 0x4f9   : > { %15478 = vst [vmem:[#allocation57_spill] sm:$0xff] %v10975_v51  ;;  %8813 = vrcp.f32 %v1707_v4  ;;  %v2052_v21 = vand.u32 2147483648, %v1707_v4  ;;  %vm2046_vm5 = vweird.f32 %v1707_v4 }
 0x4fd   : > { %8492 = vmatmul.msk.f32.gmra.mxu2 %vm588_vm0, %v1078_v29  ;;  %v2050_v29 = vand.u32 2147483647, %v1707_v4 }
 0x4ff   : > { %v8814_v31 = vpop.eup %8813  ;;  %vm2051_vm7 = vcmp.eq.f32.partialorder %v2050_v29, 8.507059e+37 }
 0x500   : > { %v2042_v20 = vmul.f32 %v8814_v31, %v1707_v4  ;;  %v10980_v39 = vpop.f32.mrf.mxu2  ;;  %v2677_v19 = vpop.xlane.xlu1 %2676  ;;  %vm2047_vm4 = vweird.f32 %v8814_v31 }
 0x501   : > { %15479 = vst [vmem:[#allocation58_spill] sm:$0xff] %v10980_v39  ;;  %v2729_v47 = vsub.f32 %v10825_v49, %v2677_v19  ;;  %v10983_v45 = vpop.xlane.xlu0 %1709  ;;  %v9447_v49 = vld [vmem:[%s15370_s6] ss:$0 sm:$0xff]  ;;  %vm2048_vm6 = vmor %vm2046_vm5, %vm2047_vm4  ;;  %v2053_v19 = vor.u32 1.1754944e-38, %v2052_v21 }
 0x502   : > { %v2043_v11 = vsub.f32 1.0, %v2042_v20  ;;  %8815 = vrcp.f32 %v10983_v45  ;;  %v10993_v20 = vadd.f32 %v9447_v49, %v10653_v57  ;;  %vm2061_vm9 = vweird.f32 %v10983_v45 }
 0x503   : > { %v2772_v51 = vmul.f32 1.442695, %v2729_v47  ;;  %v11062_v30 = vadd.f32 %v9447_v49, %v10479_v12 }
 0x504   : > { %v2044_v9 = vmul.f32 %v8814_v31, %v2043_v11  ;;  %v1108_v29 = vmul.f32 %v10003_v34, %v10993_v20 }
 0x505   : > { %8817 = vpow2.f32 %v2772_v51  ;;  %8493 = vmatmul.msk.f32.gmra.mxu2 %vm588_vm0, %v1079_v63  ;;  %v11000_v63 = vadd.f32 %v9447_v49, %v10620_v58 }
 0x506   : > { %v2045_v39 = vadd.f32 %v8814_v31, %v2044_v9 }
 0x508   : > { %v8816_v47 = vpop.eup %8815  ;;  %v2049_v2 = vsel %vm2048_vm6, %v8814_v31, %v2045_v39  ;;  %v10995_v11 = vpop.f32.mrf.mxu2  ;;  %v11013_v39 = vadd.f32 %v9447_v49, %v10546_v54  ;;  %v2067_v54 = vand.u32 2147483648, %v10983_v45 }
 0x509   : > { %15480 = vst [vmem:[#allocation59_spill] sm:$0xff] %v10995_v11  ;;  %v10997_v26 = vpop.xlane.xlu1 %1715  ;;  %v2054_v9 = vsel %vm2051_vm7, %v2053_v19, %v2049_v2  ;;  %v2057_v51 = vmul.f32 %v8816_v47, %v10983_v45  ;;  %v11004_v4 = vpop.xlane.xlu2 %1712  ;;  %v1134_v2 = vmul.f32 %v9881_v33, %v10860_v10  ;;  %v11020_v19 = vadd.f32 %v9447_v49, %v10493_v56 }
 0x50a   : > { %8819 = vrcp.f32 %v10997_v26  ;;  %v11006_v57 = vpop.xlane.xlu0 %2679  ;;  %v2055_v21 = vmul.f32 %v10816_v59, %v2054_v9  ;;  %vm2062_vm8 = vweird.f32 %v8816_v47  ;;  %v2065_v11 = vand.u32 2147483647, %v10983_v45 }
 0x50b   : > { %8821 = vrcp.f32 %v11004_v4  ;;  %v11010_v31 = vpop.eup %8817  ;;  %v2058_v58 = vsub.f32 1.0, %v2057_v51  ;;  %v1107_v51 = vmul.f32 %v10003_v34, %v11000_v63  ;;  %vm11042_vm10 = vmor %vm2061_vm9, %vm2062_vm8  ;;  %v1105_v43 = vmul.f32 %v10003_v34, %v11020_v19 }
 0x50c   : > { %8403 = vmatmul.msk.f32.vlgmr.msrb.gmra.mxu3 %vm1473_vm12, %v2055_v21  ;;  %v2843_v59 = vsel %vm1473_vm12, %v11010_v31, 0.0  ;;  %v11033_v21 = vadd.f32 %v9447_v49, %v10483_v53  ;;  %vm2066_vm13 = vcmp.eq.f32.partialorder %v2065_v11, 8.507059e+37  ;;  %vm2076_vm15 = vweird.f32 %v11004_v4 }
 0x50d   : > { %v2059_v9 = vmul.f32 %v8816_v47, %v2058_v58  ;;  %8494 = vmatmul.msk.f32.gmra.mxu2 %vm588_vm0, %v1134_v2  ;;  %4488 = vmatpush.msrb.mxu3 %v1108_v29  ;;  %v1106_v58 = vmul.f32 %v10003_v34, %v11013_v39  ;;  %v11039_v29 = vadd.f32 %v9447_v49, %v10481_v18  ;;  %vm2091_vm4 = vweird.f32 %v10997_v26 }
 0x50e   : > { %2844 = vadd.xlane.f32.xlu2 %v2843_v59  ;;  %v1104_v23 = vmul.f32 %v10003_v34, %v11033_v21 }
 0x50f   : > { %4489 = vmatpush.msrb.mxu3 %v1107_v51  ;;  %v2060_v55 = vadd.f32 %v8816_v47, %v2059_v9  ;;  %v2068_v51 = vor.u32 1.1754944e-38, %v2067_v54  ;;  %v1135_v54 = vmul.f32 %v9881_v33, %v10883_v8  ;;  %v1103_v12 = vmul.f32 %v10003_v34, %v11039_v29 }
 0x510   : > { %v11030_v56 = vpop.eup %8819  ;;  %v11048_v62 = vpop.f32.mrf.mxu2 }
 0x511   : > { %v8822_v2 = vpop.eup %8821  ;;  %v2087_v53 = vmul.f32 %v11030_v56, %v10997_v26  ;;  %15483 = vst [vmem:[#allocation60_spill] sm:$0xff] %v11048_v62  ;;  %v11050_v45 = vpop.xlane.xlu1 %2685  ;;  %4490 = vmatpush.msrb.mxu3 %v1106_v58  ;;  %v2064_v32 = vsel %vm11042_vm10, %v8816_v47, %v2060_v55  ;;  %v2082_v55 = vand.u32 2147483648, %v11004_v4  ;;  %vm2092_vm3 = vweird.f32 %v11030_v56 }
 0x512   : > { %v2072_v60 = vmul.f32 %v8822_v2, %v11004_v4  ;;  %v11053_v9 = vpop.xlane.xlu2 %2682  ;;  %v11055_v18 = vpop.xlane.xlu0 %1718  ;;  %v2069_v46 = vsel %vm2066_vm13, %v2068_v51, %v2064_v32  ;;  %vm2077_vm14 = vweird.f32 %v8822_v2  ;;  %vm2093_vm5 = vmor %vm2091_vm4, %vm2092_vm3 }
 0x513   : > { %8823 = vrcp.f32 %v11055_v18  ;;  %v2088_v58 = vsub.f32 1.0, %v2087_v53  ;;  %4491 = vmatpush.msrb.mxu3 %v1105_v43  ;;  %v2070_v41 = vmul.f32 %v10831_v1, %v2069_v46  ;;  %v1102_v1 = vmul.f32 %v10003_v34, %v11062_v30  ;;  %vm2078_vm1 = vmor %vm2076_vm15, %vm2077_vm14 }
 0x514   : > { %v2073_v62 = vsub.f32 1.0, %v2072_v60  ;;  %v2080_v60 = vand.u32 2147483647, %v11004_v4  ;;  %v2083_v47 = vor.u32 1.1754944e-38, %v2082_v55  ;;  %v1136_v34 = vmul.f32 %v9881_v33, %v10905_v17 }
 0x515   : > { %8495 = vmatmul.msk.f32.gmra.mxu2 %vm588_vm0, %v1135_v54  ;;  %4492 = vmatpush.msrb.mxu3 %v1104_v23  ;;  %v2089_v32 = vmul.f32 %v11030_v56, %v2088_v58  ;;  %v2097_v54 = vand.u32 2147483648, %v10997_v26  ;;  %vm2106_vm8 = vweird.f32 %v11055_v18 }
 0x516   : > { %v2074_v59 = vmul.f32 %v8822_v2, %v2073_v62  ;;  %8404 = vmatmul.msk.f32.gmra.mxu3 %vm1473_vm12, %v2070_v41  ;;  %vm2081_vm2 = vcmp.eq.f32.partialorder %v2080_v60, 8.507059e+37 }
 0x517   : > { %4493 = vmatpush.msrb.mxu3 %v1103_v12  ;;  %v2090_v51 = vadd.f32 %v11030_v56, %v2089_v32  ;;  %v2095_v12 = vand.u32 2147483647, %v10997_v26  ;;  %v2098_v32 = vor.u32 1.1754944e-38, %v2097_v54  ;;  %v1137_v26 = vmul.f32 %v9881_v33, %v10921_v0 }
 0x518   : > { %v2075_v46 = vadd.f32 %v8822_v2, %v2074_v59  ;;  %v11079_v62 = vpop.f32.mrf.mxu2 }
 0x519   : > { %v8824_v43 = vpop.eup %8823  ;;  %15484 = vst [vmem:[#allocation61_spill] sm:$0xff] %v11079_v62  ;;  %4494 = vmatpush.msrb.mxu3 %v1102_v1  ;;  %v11091_v53 = vpop.xlane.xlu1 %1724  ;;  %vm2096_vm6 = vcmp.eq.f32.partialorder %v2095_v12, 8.507059e+37 }
 0x51a   : > { %v2102_v23 = vmul.f32 %v8824_v43, %v11055_v18  ;;  %v11083_v49 = vpop.xlane.xlu2 %1721  ;;  %v11085_v41 = vpop.xlane.xlu0 %2688  ;;  %v2079_v4 = vsel %vm2078_vm1, %v8822_v2, %v2075_v46  ;;  %v2094_v2 = vsel %vm2093_vm5, %v11030_v56, %v2090_v51  ;;  %vm2107_vm7 = vweird.f32 %v8824_v43 }
 0x51b   : > { %8825 = vrcp.f32 %v11083_v49  ;;  %v2084_v58 = vsel %vm2081_vm2, %v2083_v47, %v2079_v4  ;;  %v2112_v4 = vand.u32 2147483648, %v11055_v18  ;;  %v2110_v51 = vand.u32 2147483647, %v11055_v18  ;;  %vm2108_vm9 = vmor %vm2106_vm8, %vm2107_vm7 }
 0x51c   : > { %v2103_v11 = vsub.f32 1.0, %v2102_v23  ;;  %v2085_v59 = vmul.f32 %v10845_v24, %v2084_v58  ;;  %8827 = vrcp.f32 %v11091_v53  ;;  %v2099_v24 = vsel %vm2096_vm6, %v2098_v32, %v2094_v2 }
 0x51d   : > { %8496 = vmatmul.msk.f32.gmra.mxu2 %vm588_vm0, %v1136_v34  ;;  %v2100_v56 = vmul.f32 %v10837_v7, %v2099_v24  ;;  %v2113_v12 = vor.u32 1.1754944e-38, %v2112_v4  ;;  %vm2111_vm10 = vcmp.eq.f32.partialorder %v2110_v51, 8.507059e+37  ;;  %v1138_v32 = vmul.f32 %v9881_v33, %v10929_v28 }
 0x51e   : > { %v2104_v55 = vmul.f32 %v8824_v43, %v2103_v11  ;;  %8405 = vmatmul.msk.f32.gmra.mxu3 %vm1473_vm12, %v2085_v59  ;;  %v2127_v24 = vand.u32 2147483648, %v11083_v49  ;;  %vm2121_vm14 = vweird.f32 %v11083_v49  ;;  %vm2136_vm3 = vweird.f32 %v11091_v53 }
 0x520   : > { %v11102_v1 = vpop.f32.mrf.mxu2  ;;  %v2105_v34 = vadd.f32 %v8824_v43, %v2104_v55 }
 0x521   : > { %v8826_v60 = vpop.eup %8825 }
 0x522   : > { %v2117_v46 = vmul.f32 %v8826_v60, %v11083_v49  ;;  %v11105_v47 = vpop.xlane.xlu0 %2841  ;;  %v8828_v11 = vpop.eup %8827  ;;  %v2109_v59 = vsel %vm2108_vm9, %v8824_v43, %v2105_v34  ;;  %vm2122_vm13 = vweird.f32 %v8826_v60  ;;  %v2125_v43 = vand.u32 2147483647, %v11083_v49 }
 0x523   : > { %8829 = vrcp.f32 %v11105_v47  ;;  %v2132_v58 = vmul.f32 %v8828_v11, %v11091_v53  ;;  %v2114_v2 = vsel %vm2111_vm10, %v2113_v12, %v2109_v59  ;;  %vm2123_vm15 = vmor %vm2121_vm14, %vm2122_vm13  ;;  %vm2137_vm2 = vweird.f32 %v8828_v11 }
 0x524   : > { %v2118_v23 = vsub.f32 1.0, %v2117_v46  ;;  %vm2126_vm1 = vcmp.eq.f32.partialorder %v2125_v43, 8.507059e+37  ;;  %v2142_v49 = vand.u32 2147483648, %v11091_v53  ;;  %vm2138_vm4 = vmor %vm2136_vm3, %vm2137_vm2  ;;  %v1140_v43 = vmul.f32 %v9881_v33, %v10945_v42 }
 0x525   : > { %8497 = vmatmul.msk.f32.gmra.mxu2 %vm588_vm0, %v1137_v26  ;;  %v2133_v7 = vsub.f32 1.0, %v2132_v58  ;;  %vm3097_vm7 = vweird.f32 %v11105_v47 }
 0x526   : > { %v2119_v54 = vmul.f32 %v8826_v60, %v2118_v23  ;;  %8406 = vmatmul.msk.f32.gmra.mxu3 %vm1473_vm12, %v2100_v56  ;;  %v2115_v23 = vmul.f32 %v10866_v27, %v2114_v2  ;;  %v2128_v56 = vor.u32 1.1754944e-38, %v2127_v24  ;;  %v1139_v27 = vmul.f32 %v9881_v33, %v10937_v16 }
 0x527   : > { %v2134_v26 = vmul.f32 %v8828_v11, %v2133_v7 }
 0x528   : > { %v11117_v55 = vpop.f32.mrf.mxu2  ;;  %v2120_v18 = vadd.f32 %v8826_v60, %v2119_v54 }
 0x529   : > { %v8830_v46 = vpop.eup %8829  ;;  %v2135_v59 = vadd.f32 %v8828_v11, %v2134_v26 }
 0x52a   : > { %v3093_v34 = vmul.f32 %v8830_v46, %v11105_v47  ;;  %v2124_v4 = vsel %vm2123_vm15, %v8826_v60, %v2120_v18  ;;  %v2140_v60 = vand.u32 2147483647, %v11091_v53  ;;  %vm3098_vm6 = vweird.f32 %v8830_v46 }
 0x52b   : > { %v2129_v54 = vsel %vm2126_vm1, %v2128_v56, %v2124_v4  ;;  %v2139_v7 = vsel %vm2138_vm4, %v8828_v11, %v2135_v59  ;;  %v3101_v53 = vand.u32 2147483647, %v11105_v47  ;;  %vm3099_vm8 = vmor %vm3097_vm7, %vm3098_vm6  ;;  %v1165_v59 = vmul.f32 %v10013_v37, %v11033_v21 }
 0x52c   : > { %v3094_v58 = vsub.f32 1.0, %v3093_v34  ;;  %v2130_v12 = vmul.f32 %v10887_v22, %v2129_v54  ;;  %vm2141_vm5 = vcmp.eq.f32.partialorder %v2140_v60, 8.507059e+37  ;;  %v3103_v22 = vand.u32 2147483648, %v11105_v47 }
 0x52d   : > { %8498 = vmatmul.msk.f32.gmra.mxu2 %vm588_vm0, %v1138_v32  ;;  %v2143_v32 = vor.u32 1.1754944e-38, %v2142_v49  ;;  %vm3102_vm9 = vcmp.eq.f32.partialorder %v3101_v53, 8.507059e+37  ;;  %v1195_v54 = vmul.f32 %v9927_v61, %v10860_v10  ;;  %v1168_v47 = vmul.f32 %v10013_v37, %v11000_v63 }
 0x52e   : > { %8407 = vmatmul.msk.f32.gmra.mxu3 %vm1473_vm12, %v2115_v23  ;;  %v3095_v2 = vmul.f32 %v8830_v46, %v3094_v58  ;;  %v3104_v34 = vor.u32 1.1754944e-38, %v3103_v22  ;;  %v1196_v10 = vmul.f32 %v9927_v61, %v10883_v8  ;;  %v1164_v49 = vmul.f32 %v10013_v37, %v11039_v29 }
 0x52f   : > { %v2144_v24 = vsel %vm2141_vm5, %v2143_v32, %v2139_v7  ;;  %v2730_v60 = vsub.f32 %v10843_v40, %v11006_v57  ;;  %v1163_v8 = vmul.f32 %v10013_v37, %v11062_v30  ;;  %v1199_v53 = vmul.f32 %v9927_v61, %v10929_v28 }
 0x530   : > { %v11128_v51 = vpop.f32.mrf.mxu2  ;;  %v3096_v23 = vadd.f32 %v8830_v46, %v3095_v2  ;;  %v2145_v26 = vmul.f32 %v10885_v3, %v2144_v24  ;;  %v1169_v3 = vmul.f32 %v10013_v37, %v10993_v20  ;;  %v1197_v2 = vmul.f32 %v9927_v61, %v10905_v17 }
 0x531   : > { %v2774_v7 = vmul.f32 1.442695, %v2730_v60  ;;  %v2731_v24 = vsub.f32 %v10870_v52, %v11053_v9  ;;  %v2732_v52 = vsub.f32 %v10864_v6, %v11050_v45 }
 0x532   : > { %v3100_v11 = vsel %vm3099_vm8, %v8830_v46, %v3096_v23 }
 0x533   : > { %v3105_v56 = vsel %vm3102_vm9, %v3104_v34, %v3100_v11  ;;  %8831 = vpow2.f32 %v2774_v7  ;;  %v2776_v17 = vmul.f32 1.442695, %v2731_v24  ;;  %v2733_v11 = vsub.f32 %v10891_v25, %v11085_v41 }
 0x534   : > { %v3106_v58 = vmul.f32 %v10907_v5, %v3105_v56  ;;  %v1166_v5 = vmul.f32 %v10013_v37, %v11020_v19 }
 0x535   : > { %8499 = vmatmul.msk.f32.gmra.mxu2 %vm588_vm0, %v1139_v27  ;;  %v1167_v27 = vmul.f32 %v10013_v37, %v11013_v39  ;;  %v1198_v37 = vmul.f32 %v9927_v61, %v10921_v0  ;;  %8833 = vpow2.f32 %v2776_v17 }
 0x536   : > { %8408 = vmatmul.msk.f32.gmra.mxu3 %vm1473_vm12, %v2130_v12 }
 0x538   : > { %v11138_v18 = vpop.f32.mrf.mxu2 }
 0x539   : > { %15485 = vst [vmem:[#allocation62_spill] sm:$0xff] %v11138_v18  ;;  %v11192_v57 = vpop.eup %8831 }
 0x53a   : > { %v2846_v0 = vsel %vm1473_vm12, %v11192_v57, 0.0 }
 0x53b   : > { %v11207_v6 = vpop.eup %8833 }
 0x53c   : > { %v2849_v28 = vsel %vm1473_vm12, %v11207_v6, 0.0 }
 0x53d   : > { %8500 = vmatmul.msk.f32.gmra.mxu2 %vm588_vm0, %v1140_v43 }
 0x53e   : > { %8409 = vmatmul.msk.f32.gmra.mxu3 %vm1473_vm12, %v2145_v26  ;;  %v2778_v26 = vmul.f32 1.442695, %v2732_v52 }
 0x540   : > { %v11148_v4 = vpop.f32.mrf.mxu2  ;;  %8835 = vpow2.f32 %v2778_v26 }
 0x541   : > { %15486 = vst [vmem:[#allocation63_spill] sm:$0xff] %v11148_v4 }
 0x545   : > { %8501 = vmatmul.msk.f32.gmra.mxu2 %vm588_vm0, %v1195_v54  ;;  %v1200_v54 = vmul.f32 %v9927_v61, %v10937_v16 }
 0x546   : > { %8459 = vmatmul.msk.f32.vlgmr.msra.gmra.mxu3 %vm1473_vm12, %v3106_v58  ;;  %v2780_v58 = vmul.f32 1.442695, %v2733_v11  ;;  %v11222_v25 = vpop.eup %8835 }
 0x547   : > { %4606 = vmatpush.msra.mxu3 %v1169_v3  ;;  %v2692_v3 = vpop.xlane.xlu2 %2691 }
 0x548   : > { %v11159_v46 = vpop.f32.mrf.mxu2  ;;  %8837 = vpow2.f32 %v2780_v58 }
 0x549   : > { %15487 = vst [vmem:[#allocation64_spill] sm:$0xff] %v11159_v46  ;;  %4607 = vmatpush.msra.mxu3 %v1168_v47  ;;  %v2734_v47 = vsub.f32 %v10911_v48, %v2692_v3 }
 0x54b   : > { %4608 = vmatpush.msra.mxu3 %v1167_v27 }
 0x54d   : > { %8502 = vmatmul.msk.f32.gmra.mxu2 %vm588_vm0, %v1196_v10  ;;  %4609 = vmatpush.msra.mxu3 %v1166_v5  ;;  %v2852_v10 = vsel %vm1473_vm12, %v11222_v25, 0.0  ;;  %v1201_v5 = vmul.f32 %v9927_v61, %v10945_v42 }
 0x54f   : > { %4610 = vmatpush.msra.mxu3 %v1165_v59  ;;  %v2782_v59 = vmul.f32 1.442695, %v2734_v47 }
 0x550   : > { %v11172_v12 = vpop.f32.mrf.mxu2 }
 0x551   : > { %15488 = vst [vmem:[#allocation65_spill] sm:$0xff] %v11172_v12  ;;  %4611 = vmatpush.msra.mxu3 %v1164_v49  ;;  %v11236_v49 = vpop.eup %8837  ;;  %8839 = vpow2.f32 %v2782_v59 }
 0x553   : > { %4612 = vmatpush.msra.mxu3 %v1163_v8 }
 0x555   : > { %8503 = vmatmul.msk.f32.gmra.mxu2 %vm588_vm0, %v1197_v2  ;;  %v2855_v2 = vsel %vm1473_vm12, %v11236_v49, 0.0 }
 0x557   : > { %v11246_v42 = vpop.eup %8839 }
 0x558   : > { %v3695_v32 = vpop.f32.mrf.mxu2 }
 0x559   : > { %v11185_v23 = vsel %vm1238_vm11, %v3695_v32, -1e+30 }
 0x55a   : > { %v3807_v40 = vsel %vm1473_vm12, %v11185_v23, -inf }
 0x55b   : > { %3808 = vmax.xlane.f32.xlu1 %v3807_v40 }
 0x55d   : > { %8504 = vmatmul.msk.f32.gmra.mxu2 %vm588_vm0, %v1198_v37  ;;  %v2858_v37 = vsel %vm1473_vm12, %v11246_v42, 0.0 }
 0x560   : > { %v3698_v43 = vpop.f32.mrf.mxu2 }
 0x561   : > { %v11198_v9 = vsel %vm1238_vm11, %v3698_v43, -1e+30 }
 0x562   : > { %v3810_v22 = vsel %vm1473_vm12, %v11198_v9, -inf }
 0x563   : > { %3811 = vmax.xlane.f32.xlu0 %v3810_v22  ;;  %2847 = vadd.xlane.f32.xlu1 %v2846_v0 }
 0x565   : > { %8505 = vmatmul.msk.f32.gmra.mxu2 %vm588_vm0, %v1199_v53 }
 0x568   : > { %v3701_v45 = vpop.f32.mrf.mxu2 }
 0x569   : > { %v11213_v34 = vsel %vm1238_vm11, %v3701_v45, -1e+30 }
 0x56a   : > { %v3813_v56 = vsel %vm1473_vm12, %v11213_v34, -inf }
 0x56b   : > { %3814 = vmax.xlane.f32.xlu2 %v3813_v56  ;;  %2850 = vadd.xlane.f32.xlu0 %v2849_v28 }
 0x56d   : > { %8506 = vmatmul.msk.f32.gmra.mxu2 %vm588_vm0, %v1200_v54 }
 0x570   : > { %v3704_v41 = vpop.f32.mrf.mxu2 }
 0x571   : > { %v11227_v27 = vsel %vm1238_vm11, %v3704_v41, -1e+30 }
 0x572   : > { %v3816_v16 = vsel %vm1473_vm12, %v11227_v27, -inf }
 0x573   : > { %2853 = vadd.xlane.f32.xlu2 %v2852_v10  ;;  %3817 = vmax.xlane.f32.xlu1 %v3816_v16 }
 0x575   : > { %8507 = vmatmul.msk.f32.gmra.mxu2 %vm588_vm0, %v1201_v5 }
 0x578   : > { %v3707_v48 = vpop.f32.mrf.mxu2 }
 0x579   : > { %v11240_v60 = vsel %vm1238_vm11, %v3707_v48, -1e+30 }
 0x57a   : > { %v3819_v8 = vsel %vm1473_vm12, %v11240_v60, -inf }
 0x57b   : > { %3820 = vmax.xlane.f32.xlu0 %v3819_v8  ;;  %2856 = vadd.xlane.f32.xlu1 %v2855_v2 }
 0x580   : > { %v3710_v7 = vpop.f32.mrf.mxu2 }
 0x581   : > { %v2845_v32 = vpop.xlane.xlu2 %2844  ;;  %v11250_v24 = vsel %vm1238_vm11, %v3710_v7, -1e+30 }
 0x582   : > { %8841 = vrcp.f32 %v2845_v32  ;;  %v3822_v40 = vsel %vm1473_vm12, %v11250_v24, -inf  ;;  %v3118_v26 = vand.u32 2147483648, %v2845_v32  ;;  %v3116_v11 = vand.u32 2147483647, %v2845_v32 }
 0x583   : > { %3823 = vmax.xlane.f32.xlu2 %v3822_v40  ;;  %2859 = vadd.xlane.f32.xlu0 %v2858_v37  ;;  %vm3112_vm13 = vweird.f32 %v2845_v32 }
 0x584   : > { %v3119_v28 = vor.u32 1.1754944e-38, %v3118_v26  ;;  %vm3117_vm15 = vcmp.eq.f32.partialorder %v3116_v11, 8.507059e+37 }
 0x588   : > { %v8842_v17 = vpop.eup %8841  ;;  %v3713_v43 = vpop.f32.mrf.mxu2 }
 0x589   : > { %v3108_v52 = vmul.f32 %v8842_v17, %v2845_v32  ;;  %v11258_v22 = vsel %vm1238_vm11, %v3713_v43, -1e+30  ;;  %vm3113_vm10 = vweird.f32 %v8842_v17 }
 0x58a   : > { %v3825_v0 = vsel %vm1473_vm12, %v11258_v22, -inf  ;;  %vm3114_vm14 = vmor %vm3112_vm13, %vm3113_vm10 }
 0x58b   : > { %v3109_v53 = vsub.f32 1.0, %v3108_v52  ;;  %3826 = vmax.xlane.f32.xlu1 %v3825_v0 }
 0x58d   : > { %v3110_v45 = vmul.f32 %v8842_v17, %v3109_v53 }
 0x58f   : > { %v3111_v56 = vadd.f32 %v8842_v17, %v3110_v45 }
 0x590   : > { %v3716_v54 = vpop.f32.mrf.mxu2 }
 0x591   : > { %v11264_v58 = vsel %vm1238_vm11, %v3716_v54, -1e+30  ;;  %v3115_v3 = vsel %vm3114_vm14, %v8842_v17, %v3111_v56 }
 0x592   : > { %v3828_v41 = vsel %vm1473_vm12, %v11264_v58, -inf  ;;  %v3120_v47 = vsel %vm3117_vm15, %v3119_v28, %v3115_v3 }
 0x593   : > { %3829 = vmax.xlane.f32.xlu0 %v3828_v41  ;;  %v3121_v10 = vmul.f32 %v11010_v31, %v3120_v47 }
 0x595   : > { %8460 = vmatmul.msk.f32.gmra.mxu3 %vm1473_vm12, %v3121_v10 }
 0x598   : > { %v3719_v59 = vpop.f32.mrf.mxu2 }
 0x599   : > { %v11278_v0 = vsel %vm1238_vm11, %v3719_v59, -1e+30 }
 0x59a   : > { %v3831_v11 = vsel %vm1473_vm12, %v11278_v0, -inf }
 0x5a0   : > { %v3722_v31 = vpop.f32.mrf.mxu2 }
 0x5a8   : > { %v3725_v47 = vpop.f32.mrf.mxu2 }
 0x5ce   : > { %v3809_v16 = vpop.xlane.xlu1 %3808 }
 0x5cf   : > { %v3877_v5 = vsub.f32 %v11185_v23, %v3809_v16 }
 0x5d1   : > { %v3912_v48 = vmul.f32 1.442695, %v3877_v5 }
 0x5d3   : > { %8843 = vpow2.f32 %v3912_v48 }
 0x5d6   : > { %v2848_v8 = vpop.xlane.xlu1 %2847  ;;  %v3812_v2 = vpop.xlane.xlu0 %3811 }
 0x5d7   : > { %8845 = vrcp.f32 %v2848_v8  ;;  %v3878_v7 = vsub.f32 %v11198_v9, %v3812_v2  ;;  %v3133_v28 = vand.u32 2147483648, %v2848_v8  ;;  %v3131_v3 = vand.u32 2147483647, %v2848_v8 }
 0x5d8   : > { %vm3127_vm2 = vweird.f32 %v2848_v8 }
 0x5d9   : > { %v11272_v32 = vpop.eup %8843  ;;  %v3914_v40 = vmul.f32 1.442695, %v3878_v7  ;;  %v3134_v10 = vor.u32 1.1754944e-38, %v3133_v28  ;;  %vm3132_vm4 = vcmp.eq.f32.partialorder %v3131_v3, 8.507059e+37 }
 0x5da   : > { %v3975_v37 = vsel %vm1473_vm12, %v11272_v32, 0.0 }
 0x5db   : > { %8847 = vpow2.f32 %v3914_v40  ;;  %3976 = vadd.xlane.f32.xlu2 %v3975_v37  ;;  %v11290_v37 = vsel %vm1238_vm11, %v3722_v31, -1e+30 }
 0x5dd   : > { %v8846_v17 = vpop.eup %8845 }
 0x5de   : > { %v3123_v43 = vmul.f32 %v8846_v17, %v2848_v8  ;;  %v3815_v23 = vpop.xlane.xlu2 %3814  ;;  %v2851_v52 = vpop.xlane.xlu0 %2850  ;;  %vm3128_vm1 = vweird.f32 %v8846_v17 }
 0x5df   : > { %v3879_v53 = vsub.f32 %v11213_v34, %v3815_v23  ;;  %8849 = vrcp.f32 %v2851_v52  ;;  %vm3129_vm3 = vmor %vm3127_vm2, %vm3128_vm1  ;;  %v3146_v31 = vand.u32 2147483647, %v2851_v52  ;;  %vm3142_vm6 = vweird.f32 %v2851_v52 }
 0x5e0   : > { %v3124_v9 = vsub.f32 1.0, %v3123_v43 }
 0x5e1   : > { %v11281_v26 = vpop.eup %8847  ;;  %v3916_v45 = vmul.f32 1.442695, %v3879_v53  ;;  %vm3147_vm8 = vcmp.eq.f32.partialorder %v3146_v31, 8.507059e+37 }
 0x5e2   : > { %v3125_v56 = vmul.f32 %v8846_v17, %v3124_v9  ;;  %v3978_v54 = vsel %vm1473_vm12, %v11281_v26, 0.0  ;;  %v3148_v9 = vand.u32 2147483648, %v2851_v52 }
 0x5e3   : > { %8851 = vpow2.f32 %v3916_v45  ;;  %3832 = vmax.xlane.f32.xlu2 %v3831_v11  ;;  %3979 = vadd.xlane.f32.xlu1 %v3978_v54 }
 0x5e4   : > { %v3126_v34 = vadd.f32 %v8846_v17, %v3125_v56 }
 0x5e5   : > { %v8850_v41 = vpop.eup %8849 }
 0x5e6   : > { %v3138_v16 = vmul.f32 %v8850_v41, %v2851_v52  ;;  %v2854_v5 = vpop.xlane.xlu2 %2853  ;;  %v3818_v59 = vpop.xlane.xlu1 %3817  ;;  %v3130_v48 = vsel %vm3129_vm3, %v8846_v17, %v3126_v34  ;;  %vm3143_vm5 = vweird.f32 %v8850_v41  ;;  %v11302_v34 = vsel %vm1238_vm11, %v3725_v47, -1e+30 }
 0x5e7   : > { %8853 = vrcp.f32 %v2854_v5  ;;  %v3880_v2 = vsub.f32 %v11227_v27, %v3818_v59  ;;  %v3135_v40 = vsel %vm3132_vm4, %v3134_v10, %v3130_v48  ;;  %v3834_v27 = vsel %vm1473_vm12, %v11290_v37, -inf  ;;  %vm3144_vm7 = vmor %vm3142_vm6, %vm3143_vm5 }
 0x5e8   : > { %v3139_v7 = vsub.f32 1.0, %v3138_v16  ;;  %v3136_v23 = vmul.f32 %v11192_v57, %v3135_v40  ;;  %v3149_v57 = vor.u32 1.1754944e-38, %v3148_v9  ;;  %v3728_v16 = vpop.f32.mrf.mxu2  ;;  %v3837_v40 = vsel %vm1473_vm12, %v11302_v34, -inf }
 0x5e9   : > { %v11292_v8 = vpop.eup %8851  ;;  %v3918_v43 = vmul.f32 1.442695, %v3880_v2  ;;  %vm3157_vm10 = vweird.f32 %v2854_v5 }
 0x5ea   : > { %v3140_v53 = vmul.f32 %v8850_v41, %v3139_v7  ;;  %v3981_v17 = vsel %vm1473_vm12, %v11292_v8, 0.0  ;;  %8461 = vmatmul.msk.f32.gmra.mxu3 %vm1473_vm12, %v3136_v23 }
 0x5eb   : > { %8855 = vpow2.f32 %v3918_v43  ;;  %3982 = vadd.xlane.f32.xlu0 %v3981_v17  ;;  %3835 = vmax.xlane.f32.xlu1 %v3834_v27  ;;  %v3163_v43 = vand.u32 2147483648, %v2854_v5 }
 0x5ec   : > { %v3141_v45 = vadd.f32 %v8850_v41, %v3140_v53 }
 0x5ed   : > { %v8854_v11 = vpop.eup %8853 }
 0x5ee   : > { %v3153_v56 = vmul.f32 %v8854_v11, %v2854_v5  ;;  %v2857_v28 = vpop.xlane.xlu1 %2856  ;;  %v3821_v54 = vpop.xlane.xlu0 %3820  ;;  %v3145_v3 = vsel %vm3144_vm7, %v8850_v41, %v3141_v45  ;;  %vm3158_vm9 = vweird.f32 %v8854_v11 }
 0x5ef   : > { %8857 = vrcp.f32 %v2857_v28  ;;  %v3881_v10 = vsub.f32 %v11240_v60, %v3821_v54  ;;  %v3150_v52 = vsel %vm3147_vm8, %v3149_v57, %v3145_v3  ;;  %v3161_v60 = vand.u32 2147483647, %v2854_v5  ;;  %vm3159_vm13 = vmor %vm3157_vm10, %vm3158_vm9 }
 0x5f0   : > { %v3154_v59 = vsub.f32 1.0, %v3153_v56  ;;  %v3151_v7 = vmul.f32 %v11207_v6, %v3150_v52  ;;  %v3164_v6 = vor.u32 1.1754944e-38, %v3163_v43  ;;  %v11316_v54 = vsel %vm1238_vm11, %v3728_v16, -1e+30  ;;  %v3731_v52 = vpop.f32.mrf.mxu2 }
 0x5f1   : > { %v11305_v48 = vpop.eup %8855  ;;  %v3920_v2 = vmul.f32 1.442695, %v3881_v10  ;;  %vm3162_vm14 = vcmp.eq.f32.partialorder %v3161_v60, 8.507059e+37  ;;  %v3178_v3 = vand.u32 2147483648, %v2857_v28  ;;  %v3840_v16 = vsel %vm1473_vm12, %v11316_v54, -inf }
 0x5f2   : > { %v3155_v41 = vmul.f32 %v8854_v11, %v3154_v59  ;;  %v3984_v47 = vsel %vm1473_vm12, %v11305_v48, 0.0  ;;  %8462 = vmatmul.msk.f32.gmra.mxu3 %vm1473_vm12, %v3151_v7  ;;  %vm3172_vm1 = vweird.f32 %v2857_v28 }
 0x5f3   : > { %8859 = vpow2.f32 %v3920_v2  ;;  %3838 = vmax.xlane.f32.xlu0 %v3837_v40  ;;  %3985 = vadd.xlane.f32.xlu2 %v3984_v47 }
 0x5f4   : > { %v3156_v23 = vadd.f32 %v8854_v11, %v3155_v41 }
 0x5f5   : > { %v8858_v53 = vpop.eup %8857 }
 0x5f6   : > { %v3168_v9 = vmul.f32 %v8858_v53, %v2857_v28  ;;  %v3824_v17 = vpop.xlane.xlu2 %3823  ;;  %v2860_v27 = vpop.xlane.xlu0 %2859  ;;  %v3160_v31 = vsel %vm3159_vm13, %v8854_v11, %v3156_v23  ;;  %vm3173_vm15 = vweird.f32 %v8858_v53  ;;  %v3176_v11 = vand.u32 2147483647, %v2857_v28 }
 0x5f7   : > { %v3882_v45 = vsub.f32 %v11250_v24, %v3824_v17  ;;  %8861 = vrcp.f32 %v2860_v27  ;;  %v3165_v56 = vsel %vm3162_vm14, %v3164_v6, %v3160_v31  ;;  %vm3174_vm2 = vmor %vm3172_vm1, %vm3173_vm15  ;;  %v11330_v17 = vsel %vm1238_vm11, %v3731_v52, -1e+30 }
 0x5f8   : > { %v3169_v57 = vsub.f32 1.0, %v3168_v9  ;;  %v3166_v59 = vmul.f32 %v11222_v25, %v3165_v56  ;;  %v3179_v25 = vor.u32 1.1754944e-38, %v3178_v3  ;;  %vm3177_vm3 = vcmp.eq.f32.partialorder %v3176_v11, 8.507059e+37 }
 0x5f9   : > { %v11318_v5 = vpop.eup %8859  ;;  %v3922_v10 = vmul.f32 1.442695, %v3882_v45  ;;  %v3193_v31 = vand.u32 2147483648, %v2860_v27  ;;  %v3191_v56 = vand.u32 2147483647, %v2860_v27  ;;  %vm3187_vm5 = vweird.f32 %v2860_v27 }
 0x5fa   : > { %v3170_v2 = vmul.f32 %v8858_v53, %v3169_v57  ;;  %v3987_v24 = vsel %vm1473_vm12, %v11318_v5, 0.0  ;;  %8463 = vmatmul.msk.f32.gmra.mxu3 %vm1473_vm12, %v3166_v59 }
 0x5fb   : > { %8863 = vpow2.f32 %v3922_v10  ;;  %3988 = vadd.xlane.f32.xlu1 %v3987_v24  ;;  %3841 = vmax.xlane.f32.xlu2 %v3840_v16  ;;  %v3194_v10 = vor.u32 1.1754944e-38, %v3193_v31  ;;  %vm3192_vm7 = vcmp.eq.f32.partialorder %v3191_v56, 8.507059e+37 }
 0x5fc   : > { %v3171_v7 = vadd.f32 %v8858_v53, %v3170_v2 }
 0x5fd   : > { %v8862_v40 = vpop.eup %8861 }
 0x5fe   : > { %v3183_v41 = vmul.f32 %v8862_v40, %v2860_v27  ;;  %v3827_v43 = vpop.xlane.xlu1 %3826  ;;  %v3175_v47 = vsel %vm3174_vm2, %v8858_v53, %v3171_v7  ;;  %vm3188_vm4 = vweird.f32 %v8862_v40 }
 0x5ff   : > { %v3883_v60 = vsub.f32 %v11258_v22, %v3827_v43  ;;  %v3180_v23 = vsel %vm3177_vm3, %v3179_v25, %v3175_v47  ;;  %v3734_v22 = vpop.f32.mrf.mxu2  ;;  %vm3189_vm6 = vmor %vm3187_vm5, %vm3188_vm4 }
 0x600   : > { %v3184_v6 = vsub.f32 1.0, %v3183_v41  ;;  %v3181_v9 = vmul.f32 %v11236_v49, %v3180_v23  ;;  %v3843_v49 = vsel %vm1473_vm12, %v11330_v17, -inf  ;;  %v11342_v11 = vsel %vm1238_vm11, %v3734_v22, -1e+30 }
 0x601   : > { %v11332_v28 = vpop.eup %8863  ;;  %v3924_v45 = vmul.f32 1.442695, %v3883_v60  ;;  %v3846_v27 = vsel %vm1473_vm12, %v11342_v11, -inf }
 0x602   : > { %v3185_v57 = vmul.f32 %v8862_v40, %v3184_v6  ;;  %v3990_v53 = vsel %vm1473_vm12, %v11332_v28, 0.0  ;;  %8464 = vmatmul.msk.f32.gmra.mxu3 %vm1473_vm12, %v3181_v9 }
 0x603   : > { %8865 = vpow2.f32 %v3924_v45  ;;  %3991 = vadd.xlane.f32.xlu0 %v3990_v53  ;;  %3844 = vmax.xlane.f32.xlu1 %v3843_v49 }
 0x604   : > { %v3186_v3 = vadd.f32 %v8862_v40, %v3185_v57 }
 0x606   : > { %v3830_v59 = vpop.xlane.xlu0 %3829  ;;  %v3190_v52 = vsel %vm3189_vm6, %v8862_v40, %v3186_v3 }
 0x607   : > { %v3884_v2 = vsub.f32 %v11264_v58, %v3830_v59  ;;  %v3195_v24 = vsel %vm3192_vm7, %v3194_v10, %v3190_v52 }
 0x608   : > { %v3196_v16 = vmul.f32 %v11246_v42, %v3195_v24 }
 0x609   : > { %v11345_v7 = vpop.eup %8865  ;;  %v3926_v25 = vmul.f32 1.442695, %v3884_v2 }
 0x60a   : > { %v3993_v41 = vsel %vm1473_vm12, %v11345_v7, 0.0  ;;  %8465 = vmatmul.msk.f32.gmra.mxu3 %vm1473_vm12, %v3196_v16 }
 0x60b   : > { %8867 = vpow2.f32 %v3926_v25  ;;  %3847 = vmax.xlane.f32.xlu0 %v3846_v27  ;;  %3994 = vadd.xlane.f32.xlu2 %v3993_v41  ;;  %v11364_v27 = vld [vmem:[%s15369_s5] ss:$0 sm:$0xff] }
 0x60c   : > { %v881_v41 = vadd.f32 %v11364_v27, %v9891_v38  ;;  %v878_v38 = vadd.f32 %v11364_v27, %v9885_v35  ;;  %v875_v35 = vadd.f32 %v11364_v27, %v9867_v15  ;;  %v872_v15 = vadd.f32 %v11364_v27, %v9862_v13 }
 0x611   : > { %v11352_v58 = vpop.eup %8867 }
 0x612   : > { %v3996_v40 = vsel %vm1473_vm12, %v11352_v58, 0.0 }
 0x613   : > { %3997 = vadd.xlane.f32.xlu1 %v3996_v40 }
 0x64e   : > { %v3977_v42 = vpop.xlane.xlu2 %3976 }
 0x64f   : > { %8869 = vrcp.f32 %v3977_v42  ;;  %v4154_v31 = vand.u32 2147483648, %v3977_v42  ;;  %v4152_v53 = vand.u32 2147483647, %v3977_v42  ;;  %vm4148_vm9 = vweird.f32 %v3977_v42 }
 0x651   : > { %v4155_v22 = vor.u32 1.1754944e-38, %v4154_v31  ;;  %vm4153_vm13 = vcmp.eq.f32.partialorder %v4152_v53, 8.507059e+37 }
 0x655   : > { %v8870_v43 = vpop.eup %8869 }
 0x656   : > { %v4144_v47 = vmul.f32 %v8870_v43, %v3977_v42  ;;  %v3833_v60 = vpop.xlane.xlu2 %3832  ;;  %v3980_v23 = vpop.xlane.xlu1 %3979  ;;  %vm4149_vm8 = vweird.f32 %v8870_v43 }
 0x657   : > { %v3885_v6 = vsub.f32 %v11278_v0, %v3833_v60  ;;  %8871 = vrcp.f32 %v3980_v23  ;;  %vm4150_vm10 = vmor %vm4148_vm9, %vm4149_vm8  ;;  %v4169_v40 = vand.u32 2147483648, %v3980_v23  ;;  %v4167_v42 = vand.u32 2147483647, %v3980_v23 }
 0x658   : > { %v4145_v9 = vsub.f32 1.0, %v4144_v47  ;;  %vm4163_vm15 = vweird.f32 %v3980_v23 }
 0x659   : > { %v3928_v45 = vmul.f32 1.442695, %v3885_v6  ;;  %v4170_v6 = vor.u32 1.1754944e-38, %v4169_v40  ;;  %vm4168_vm2 = vcmp.eq.f32.partialorder %v4167_v42, 8.507059e+37 }
 0x65a   : > { %v4146_v57 = vmul.f32 %v8870_v43, %v4145_v9 }
 0x65b   : > { %8873 = vpow2.f32 %v3928_v45 }
 0x65c   : > { %v4147_v56 = vadd.f32 %v8870_v43, %v4146_v57 }
 0x65d   : > { %v8872_v49 = vpop.eup %8871 }
 0x65e   : > { %v4151_v3 = vsel %vm4150_vm10, %v8870_v43, %v4147_v56  ;;  %v4159_v10 = vmul.f32 %v8872_v49, %v3980_v23  ;;  %v3983_v59 = vpop.xlane.xlu0 %3982  ;;  %v3836_v2 = vpop.xlane.xlu1 %3835  ;;  %vm4164_vm14 = vweird.f32 %v8872_v49 }
 0x65f   : > { %v4156_v52 = vsel %vm4153_vm13, %v4155_v22, %v4151_v3  ;;  %8875 = vrcp.f32 %v3983_v59  ;;  %v3886_v16 = vsub.f32 %v11290_v37, %v3836_v2  ;;  %vm4165_vm1 = vmor %vm4163_vm15, %vm4164_vm14  ;;  %v4182_v2 = vand.u32 2147483647, %v3983_v59 }
 0x660   : > { %v4157_v0 = vmul.f32 %v11272_v32, %v4156_v52  ;;  %v4160_v24 = vsub.f32 1.0, %v4159_v10  ;;  %vm4178_vm4 = vweird.f32 %v3983_v59 }
 0x661   : > { %v11359_v25 = vpop.eup %8873  ;;  %v3930_v47 = vmul.f32 1.442695, %v3886_v16  ;;  %vm4183_vm6 = vcmp.eq.f32.partialorder %v4182_v2, 8.507059e+37 }
 0x662   : > { %v4161_v43 = vmul.f32 %v8872_v49, %v4160_v24  ;;  %8508 = vmatmul.msk.f32.vlgmr.msrb.gmra.mxu3 %vm1473_vm12, %v4157_v0  ;;  %v3999_v32 = vsel %vm1473_vm12, %v11359_v25, 0.0 }
 0x663   : > { %8536 = vmatpush.xpose.msk.msrb.mxu3 %vm588_vm0, %v881_v41  ;;  %4000 = vadd.xlane.f32.xlu2 %v3999_v32  ;;  %8877 = vpow2.f32 %v3930_v47 }
 0x664   : > { %v4162_v37 = vadd.f32 %v8872_v49, %v4161_v43 }
 0x665   : > { %v8876_v60 = vpop.eup %8875 }
 0x666   : > { %v4174_v9 = vmul.f32 %v8876_v60, %v3983_v59  ;;  %v3839_v31 = vpop.xlane.xlu0 %3838  ;;  %v4166_v45 = vsel %vm4165_vm1, %v8872_v49, %v4162_v37  ;;  %v3986_v57 = vpop.xlane.xlu2 %3985  ;;  %vm4179_vm3 = vweird.f32 %v8876_v60  ;;  %v4184_v49 = vand.u32 2147483648, %v3983_v59 }
 0x667   : > { %8537 = vmatpush.xpose.msk.msrb.mxu3 %vm588_vm0, %v878_v38  ;;  %v3887_v53 = vsub.f32 %v11302_v34, %v3839_v31  ;;  %v4171_v56 = vsel %vm4168_vm2, %v4170_v6, %v4166_v45  ;;  %8879 = vrcp.f32 %v3986_v57  ;;  %vm4180_vm5 = vmor %vm4178_vm4, %vm4179_vm3  ;;  %v15489_v38 = vld [vmem:[#allocation12_spill] sm:$0xff]  ;;  %v4199_v6 = vand.u32 2147483648, %v3986_v57 }
 0x668   : > { %v4175_v22 = vsub.f32 1.0, %v4174_v9  ;;  %v4172_v3 = vmul.f32 %v11281_v26, %v4171_v56  ;;  %v4185_v24 = vor.u32 1.1754944e-38, %v4184_v49  ;;  %v869_v13 = vadd.f32 %v11364_v27, %v15489_v38 }
 0x669   : > { %v3932_v23 = vmul.f32 1.442695, %v3887_v53  ;;  %v11377_v10 = vpop.eup %8877  ;;  %vm4193_vm8 = vweird.f32 %v3986_v57  ;;  %v15490_v53 = vld [vmem:[#allocation11_spill] sm:$0xff] }
 0x66a   : > { %v4176_v52 = vmul.f32 %v8876_v60, %v4175_v22  ;;  %8509 = vmatmul.msk.f32.gmra.mxu3 %vm1473_vm12, %v4172_v3  ;;  %v4002_v34 = vsel %vm1473_vm12, %v11377_v10, 0.0  ;;  %v866_v56 = vadd.f32 %v11364_v27, %v15490_v53  ;;  %v4200_v22 = vor.u32 1.1754944e-38, %v4199_v6 }
 0x66b   : > { %8881 = vpow2.f32 %v3932_v23  ;;  %8538 = vmatpush.xpose.msk.msrb.mxu3 %vm588_vm0, %v875_v35  ;;  %4003 = vadd.xlane.f32.xlu0 %v4002_v34 }
 0x66c   : > { %v4177_v26 = vadd.f32 %v8876_v60, %v4176_v52 }
 0x66d   : > { %v8880_v0 = vpop.eup %8879 }
 0x66e   : > { %v3989_v16 = vpop.xlane.xlu1 %3988  ;;  %v4181_v41 = vsel %vm4180_vm5, %v8876_v60, %v4177_v26  ;;  %v4189_v40 = vmul.f32 %v8880_v0, %v3986_v57  ;;  %v3842_v42 = vpop.xlane.xlu2 %3841  ;;  %vm4194_vm7 = vweird.f32 %v8880_v0  ;;  %v15491_v26 = vld [vmem:[#allocation10_spill] sm:$0xff] }
 0x66f   : > { %8883 = vrcp.f32 %v3989_v16  ;;  %v3888_v43 = vsub.f32 %v11316_v54, %v3842_v42  ;;  %8539 = vmatpush.xpose.msk.msrb.mxu3 %vm588_vm0, %v872_v15  ;;  %v4186_v59 = vsel %vm4183_vm6, %v4185_v24, %v4181_v41  ;;  %v4197_v54 = vand.u32 2147483647, %v3986_v57  ;;  %vm4195_vm9 = vmor %vm4193_vm8, %vm4194_vm7 }
 0x670   : > { %v4190_v32 = vsub.f32 1.0, %v4189_v40  ;;  %v4187_v37 = vmul.f32 %v11292_v8, %v4186_v59  ;;  %v863_v57 = vadd.f32 %v11364_v27, %v15491_v26  ;;  %v4214_v15 = vand.u32 2147483648, %v3989_v16 }
 0x671   : > { %v11389_v47 = vpop.eup %8881  ;;  %v3934_v9 = vmul.f32 1.442695, %v3888_v43  ;;  %vm4198_vm10 = vcmp.eq.f32.partialorder %v4197_v54, 8.507059e+37  ;;  %v4212_v43 = vand.u32 2147483647, %v3989_v16  ;;  %vm4208_vm14 = vweird.f32 %v3989_v16 }
 0x672   : > { %v4005_v60 = vsel %vm1473_vm12, %v11389_v47, 0.0  ;;  %v4191_v31 = vmul.f32 %v8880_v0, %v4190_v32  ;;  %8510 = vmatmul.msk.f32.gmra.mxu3 %vm1473_vm12, %v4187_v37 }
 0x673   : > { %4006 = vadd.xlane.f32.xlu1 %v4005_v60  ;;  %8885 = vpow2.f32 %v3934_v9  ;;  %8540 = vmatpush.xpose.msk.msrb.mxu3 %vm588_vm0, %v869_v13  ;;  %vm4213_vm1 = vcmp.eq.f32.partialorder %v4212_v43, 8.507059e+37  ;;  %v15492_v60 = vld [vmem:[#allocation13_spill] sm:$0xff] }
 0x674   : > { %v4192_v8 = vadd.f32 %v8880_v0, %v4191_v31 }
 0x675   : > { %v8884_v45 = vpop.eup %8883 }
 0x676   : > { %v4204_v23 = vmul.f32 %v8884_v45, %v3989_v16  ;;  %v3992_v3 = vpop.xlane.xlu0 %3991  ;;  %v3845_v35 = vpop.xlane.xlu1 %3844  ;;  %v4196_v52 = vsel %vm4195_vm9, %v8880_v0, %v4192_v8  ;;  %vm4209_vm13 = vweird.f32 %v8884_v45  ;;  %v11415_v16 = vsel %vm1238_vm11, %v15492_v60, -1e+30 }
 0x677   : > { %8887 = vrcp.f32 %v3992_v3  ;;  %v3889_v34 = vsub.f32 %v11330_v17, %v3845_v35  ;;  %8541 = vmatpush.xpose.msk.msrb.mxu3 %vm588_vm0, %v866_v56  ;;  %v4201_v2 = vsel %vm4198_vm10, %v4200_v22, %v4196_v52  ;;  %vm4210_vm15 = vmor %vm4208_vm14, %vm4209_vm13  ;;  %v4227_v22 = vand.u32 2147483647, %v3992_v3 }
 0x678   : > { %v4205_v49 = vsub.f32 1.0, %v4204_v23  ;;  %v4202_v24 = vmul.f32 %v11305_v48, %v4201_v2  ;;  %v4215_v48 = vor.u32 1.1754944e-38, %v4214_v15  ;;  %vm4223_vm3 = vweird.f32 %v3992_v3  ;;  %v15493_v2 = vld [vmem:[#allocation14_spill] sm:$0xff]  ;;  %v15494_v15 = vld [vmem:[#allocation16_spill] sm:$0xff] }
 0x679   : > { %v11405_v41 = vpop.eup %8885  ;;  %v3936_v42 = vmul.f32 1.442695, %v3889_v34  ;;  %vm4228_vm5 = vcmp.eq.f32.partialorder %v4227_v22, 8.507059e+37  ;;  %v11428_v26 = vsel %vm1238_vm11, %v15493_v2, -1e+30 }
 0x67a   : > { %v4206_v40 = vmul.f32 %v8884_v45, %v4205_v49  ;;  %8511 = vmatmul.msk.f32.gmra.mxu3 %vm1473_vm12, %v4202_v24  ;;  %v4008_v17 = vsel %vm1473_vm12, %v11405_v41, 0.0 }
 0x67b   : > { %8889 = vpow2.f32 %v3936_v42  ;;  %8542 = vmatpush.xpose.msk.msrb.mxu3 %vm588_vm0, %v863_v57  ;;  %4009 = vadd.xlane.f32.xlu2 %v4008_v17  ;;  %v1477_v17 = vsel %vm1473_vm12, %v11428_v26, -inf }
 0x67c   : > { %v4207_v27 = vadd.f32 %v8884_v45, %v4206_v40 }
 0x67d   : > { %v8888_v0 = vpop.eup %8887 }
 0x67e   : > { %v4219_v59 = vmul.f32 %v8888_v0, %v3992_v3  ;;  %v3848_v32 = vpop.xlane.xlu0 %3847  ;;  %v4211_v37 = vsel %vm4210_vm15, %v8884_v45, %v4207_v27  ;;  %v3995_v38 = vpop.xlane.xlu2 %3994  ;;  %vm4224_vm2 = vweird.f32 %v8888_v0  ;;  %v4229_v45 = vand.u32 2147483648, %v3992_v3 }
 0x67f   : > { %v3890_v13 = vsub.f32 %v11342_v11, %v3848_v32  ;;  %v4216_v6 = vsel %vm4213_vm1, %v4215_v48, %v4211_v37  ;;  %8891 = vrcp.f32 %v3995_v38  ;;  %v1474_v11 = vsel %vm1473_vm12, %v11415_v16, -inf  ;;  %vm4225_vm4 = vmor %vm4223_vm3, %vm4224_vm2 }
 0x680   : > { %v4220_v9 = vsub.f32 1.0, %v4219_v59  ;;  %v4217_v54 = vmul.f32 %v11318_v5, %v4216_v6  ;;  %v4230_v35 = vor.u32 1.1754944e-38, %v4229_v45  ;;  %v11433_v3 = vsel %vm1238_vm11, %v15494_v15, -1e+30 }
 0x681   : > { %v3938_v31 = vmul.f32 1.442695, %v3890_v13  ;;  %v11418_v8 = vpop.eup %8889  ;;  %v4244_v43 = vand.u32 2147483648, %v3995_v38  ;;  %v1483_v48 = vsel %vm1473_vm12, %v11433_v3, -inf  ;;  %v4242_v59 = vand.u32 2147483647, %v3995_v38 }
 0x682   : > { %v4221_v53 = vmul.f32 %v8888_v0, %v4220_v9  ;;  %8512 = vmatmul.msk.f32.gmra.mxu3 %vm1473_vm12, %v4217_v54  ;;  %v4011_v56 = vsel %vm1473_vm12, %v11418_v8, 0.0  ;;  %vm4238_vm7 = vweird.f32 %v3995_v38  ;;  %v15495_v9 = vld [vmem:[#allocation15_spill] sm:$0xff] }
 0x683   : > { %8893 = vpow2.f32 %v3938_v31  ;;  %1475 = vmax.xlane.f32.xlu2 %v1474_v11  ;;  %4012 = vadd.xlane.f32.xlu0 %v4011_v56  ;;  %v4245_v37 = vor.u32 1.1754944e-38, %v4244_v43  ;;  %vm4243_vm9 = vcmp.eq.f32.partialorder %v4242_v59, 8.507059e+37  ;;  %v11448_v60 = vsel %vm1238_vm11, %v15495_v9, -1e+30  ;;  %v15497_v11 = vld [vmem:[#allocation17_spill] sm:$0xff] }
 0x684   : > { %v4222_v23 = vadd.f32 %v8888_v0, %v4221_v53  ;;  %v15496_v53 = vld [vmem:[#allocation19_spill] sm:$0xff] }
 0x685   : > { %v8892_v5 = vpop.eup %8891  ;;  %v11453_v45 = vsel %vm1238_vm11, %v15496_v53, -1e+30 }
 0x686   : > { %v3998_v52 = vpop.xlane.xlu1 %3997  ;;  %v4226_v49 = vsel %vm4225_vm4, %v8888_v0, %v4222_v23  ;;  %v4234_v34 = vmul.f32 %v8892_v5, %v3995_v38  ;;  %vm4239_vm6 = vweird.f32 %v8892_v5  ;;  %v11458_v38 = vsel %vm1238_vm11, %v15497_v11, -1e+30 }
 0x687   : > { %8895 = vrcp.f32 %v3998_v52  ;;  %v4231_v57 = vsel %vm4228_vm5, %v4230_v35, %v4226_v49  ;;  %vm4240_vm8 = vmor %vm4238_vm7, %vm4239_vm6  ;;  %v4259_v56 = vand.u32 2147483648, %v3998_v52  ;;  %v1480_v35 = vsel %vm1473_vm12, %v11448_v60, -inf }
 0x688   : > { %v4235_v40 = vsub.f32 1.0, %v4234_v34  ;;  %v4232_v42 = vmul.f32 %v11332_v28, %v4231_v57  ;;  %v1492_v49 = vsel %vm1473_vm12, %v11453_v45, -inf  ;;  %v1486_v34 = vsel %vm1473_vm12, %v11458_v38, -inf }
 0x689   : > { %v11435_v24 = vpop.eup %8893  ;;  %vm4253_vm13 = vweird.f32 %v3998_v52 }
 0x68a   : > { %v4014_v27 = vsel %vm1473_vm12, %v11435_v24, 0.0  ;;  %v4236_v0 = vmul.f32 %v8892_v5, %v4235_v40  ;;  %8513 = vmatmul.msk.f32.gmra.mxu3 %vm1473_vm12, %v4232_v42  ;;  %v15498_v40 = vld [vmem:[#allocation18_spill] sm:$0xff] }
 0x68b   : > { %4015 = vadd.xlane.f32.xlu1 %v4014_v27  ;;  %1484 = vmax.xlane.f32.xlu2 %v1483_v48  ;;  %v11471_v42 = vsel %vm1238_vm11, %v15498_v40, -1e+30  ;;  %v11484_v48 = vpop.f32.mrf.mxu3 }
 0x68c   : > { %1478 = vmax.xlane.f32.xlu0 %v1477_v17  ;;  %v4237_v28 = vadd.f32 %v8892_v5, %v4236_v0  ;;  %v1489_v17 = vsel %vm1473_vm12, %v11471_v42, -inf }
 0x68d   : > { %v8896_v32 = vpop.eup %8895 }
 0x68e   : > { %v4249_v13 = vmul.f32 %v8896_v32, %v3998_v52  ;;  %v4241_v6 = vsel %vm4240_vm8, %v8892_v5, %v4237_v28  ;;  %vm4254_vm10 = vweird.f32 %v8896_v32  ;;  %v4257_v5 = vand.u32 2147483647, %v3998_v52  ;;  %v15499_v52 = vld [vmem:[#allocation29_spill] sm:$0xff] }
 0x68f   : > { %v4246_v54 = vsel %vm4243_vm9, %v4245_v37, %v4241_v6  ;;  %vm4255_vm14 = vmor %vm4253_vm13, %vm4254_vm10  ;;  %v11480_v27 = vsel %vm1238_vm11, %v15499_v52, -1e+30 }
 0x690   : > { %v4250_v31 = vsub.f32 1.0, %v4249_v13  ;;  %v4247_v22 = vmul.f32 %v11345_v7, %v4246_v54  ;;  %v4260_v7 = vor.u32 1.1754944e-38, %v4259_v56  ;;  %vm4258_vm15 = vcmp.eq.f32.partialorder %v4257_v5, 8.507059e+37 }
 0x691   : > { %v2651_v0 = vsel %vm1473_vm12, %v11480_v27, -inf }
 0x692   : > { %v4251_v23 = vmul.f32 %v8896_v32, %v4250_v31  ;;  %8514 = vmatmul.msk.f32.gmra.mxu3 %vm1473_vm12, %v4247_v22 }
 0x693   : > { %1481 = vmax.xlane.f32.xlu1 %v1480_v35  ;;  %1493 = vmax.xlane.f32.xlu2 %v1492_v49  ;;  %v11486_v59 = vpop.f32.mrf.mxu3 }
 0x694   : > { %v4252_v2 = vadd.f32 %v8896_v32, %v4251_v23  ;;  %1487 = vmax.xlane.f32.xlu0 %v1486_v34 }
 0x696   : > { %v4256_v57 = vsel %vm4255_vm14, %v8896_v32, %v4252_v2 }
 0x697   : > { %v4261_v15 = vsel %vm4258_vm15, %v4260_v7, %v4256_v57 }
 0x698   : > { %v4262_v43 = vmul.f32 %v11352_v58, %v4261_v15 }
 0x69a   : > { %8522 = vmatmul.msk.f32.vlgmr.msra.gmra.mxu3 %vm1473_vm12, %v4262_v43 }
 0x69b   : > { %1490 = vmax.xlane.f32.xlu1 %v1489_v17  ;;  %v11488_v32 = vpop.f32.mrf.mxu3 }
 0x69c   : > { %15500 = vst [vmem:[#allocation12_spill] sm:$0xff] %v11488_v32 }
 0x6a3   : > { %2652 = vmax.xlane.f32.xlu1 %v2651_v0  ;;  %v11490_v53 = vpop.f32.mrf.mxu3 }
 0x6a4   : > { %15501 = vst [vmem:[#allocation11_spill] sm:$0xff] %v11490_v53 }
 0x6ab   : > { %v11494_v17 = vpop.f32.mrf.mxu3 }
 0x6ac   : > { %15502 = vst [vmem:[#allocation10_spill] sm:$0xff] %v11494_v17  ;;  %v15532_v17 = vld [vmem:[#allocation21_spill] sm:$0xff] }
 0x6d6   : > { %v4001_v58 = vpop.xlane.xlu2 %4000 }
 0x6d7   : > { %8897 = vrcp.f32 %v4001_v58  ;;  %v4274_v31 = vand.u32 2147483648, %v4001_v58  ;;  %v4272_v54 = vand.u32 2147483647, %v4001_v58  ;;  %vm4268_vm2 = vweird.f32 %v4001_v58 }
 0x6d9   : > { %v4275_v22 = vor.u32 1.1754944e-38, %v4274_v31  ;;  %vm4273_vm4 = vcmp.eq.f32.partialorder %v4272_v54, 8.507059e+37 }
 0x6dd   : > { %v8898_v28 = vpop.eup %8897 }
 0x6de   : > { %v4264_v37 = vmul.f32 %v8898_v28, %v4001_v58  ;;  %v4004_v13 = vpop.xlane.xlu0 %4003  ;;  %vm4269_vm1 = vweird.f32 %v8898_v28 }
 0x6df   : > { %8899 = vrcp.f32 %v4004_v13  ;;  %vm4270_vm3 = vmor %vm4268_vm2, %vm4269_vm1  ;;  %v4289_v57 = vand.u32 2147483648, %v4004_v13  ;;  %v4287_v15 = vand.u32 2147483647, %v4004_v13  ;;  %vm4283_vm6 = vweird.f32 %v4004_v13 }
 0x6e0   : > { %v4265_v6 = vsub.f32 1.0, %v4264_v37 }
 0x6e1   : > { %v4290_v0 = vor.u32 1.1754944e-38, %v4289_v57  ;;  %vm4288_vm8 = vcmp.eq.f32.partialorder %v4287_v15, 8.507059e+37 }
 0x6e2   : > { %v4266_v9 = vmul.f32 %v8898_v28, %v4265_v6 }
 0x6e4   : > { %v4267_v11 = vadd.f32 %v8898_v28, %v4266_v9 }
 0x6e5   : > { %v8900_v56 = vpop.eup %8899 }
 0x6e6   : > { %v4007_v23 = vpop.xlane.xlu1 %4006  ;;  %v4271_v5 = vsel %vm4270_vm3, %v8898_v28, %v4267_v11  ;;  %v4279_v35 = vmul.f32 %v8900_v56, %v4004_v13  ;;  %vm4284_vm5 = vweird.f32 %v8900_v56 }
 0x6e7   : > { %8901 = vrcp.f32 %v4007_v23  ;;  %v4276_v49 = vsel %vm4273_vm4, %v4275_v22, %v4271_v5  ;;  %vm4285_vm7 = vmor %vm4283_vm6, %vm4284_vm5  ;;  %v4302_v54 = vand.u32 2147483647, %v4007_v23  ;;  %vm4298_vm10 = vweird.f32 %v4007_v23 }
 0x6e8   : > { %v4280_v34 = vsub.f32 1.0, %v4279_v35  ;;  %v4277_v2 = vmul.f32 %v11359_v25, %v4276_v49  ;;  %v4304_v25 = vand.u32 2147483648, %v4007_v23 }
 0x6e9   : > { %vm4303_vm14 = vcmp.eq.f32.partialorder %v4302_v54, 8.507059e+37 }
 0x6ea   : > { %v4281_v7 = vmul.f32 %v8900_v56, %v4280_v34  ;;  %8523 = vmatmul.msk.f32.gmra.mxu3 %vm1473_vm12, %v4277_v2  ;;  %v4305_v11 = vor.u32 1.1754944e-38, %v4304_v25  ;;  %v11498_v2 = vpop.f32.mrf.mxu3 }
 0x6eb   : > { %15503 = vst [vmem:[#allocation13_spill] sm:$0xff] %v11498_v2  ;;  %v15531_v2 = vld [vmem:[#allocation30_spill] sm:$0xff] }
 0x6ec   : > { %v4282_v43 = vadd.f32 %v8900_v56, %v4281_v7  ;;  %v1223_v12 = vmul.f32 %v15532_v17, %v15531_v2  ;;  %v15533_v2 = vld [vmem:[#allocation31_spill] sm:$0xff] }
 0x6ed   : > { %v8902_v40 = vpop.eup %8901 }
 0x6ee   : > { %v4294_v52 = vmul.f32 %v8902_v40, %v4007_v23  ;;  %v4010_v58 = vpop.xlane.xlu2 %4009  ;;  %v4286_v28 = vsel %vm4285_vm7, %v8900_v56, %v4282_v43  ;;  %vm4299_vm9 = vweird.f32 %v8902_v40 }
 0x6ef   : > { %8903 = vrcp.f32 %v4010_v58  ;;  %v4291_v6 = vsel %vm4288_vm8, %v4290_v0, %v4286_v28  ;;  %vm4300_vm13 = vmor %vm4298_vm10, %vm4299_vm9  ;;  %v4319_v43 = vand.u32 2147483648, %v4010_v58  ;;  %vm4313_vm1 = vweird.f32 %v4010_v58 }
 0x6f0   : > { %v4295_v37 = vsub.f32 1.0, %v4294_v52  ;;  %v4292_v31 = vmul.f32 %v11377_v10, %v4291_v6 }
 0x6f2   : > { %v4296_v9 = vmul.f32 %v8902_v40, %v4295_v37  ;;  %8524 = vmatmul.msk.f32.gmra.mxu3 %vm1473_vm12, %v4292_v31  ;;  %v4320_v37 = vor.u32 1.1754944e-38, %v4319_v43 }
 0x6f4   : > { %v4297_v13 = vadd.f32 %v8902_v40, %v4296_v9 }
 0x6f5   : > { %v8904_v22 = vpop.eup %8903 }
 0x6f6   : > { %v4301_v5 = vsel %vm4300_vm13, %v8902_v40, %v4297_v13  ;;  %v4309_v56 = vmul.f32 %v8904_v22, %v4010_v58  ;;  %v1476_v35 = vpop.xlane.xlu2 %1475  ;;  %v4013_v49 = vpop.xlane.xlu0 %4012  ;;  %vm4314_vm15 = vweird.f32 %v8904_v22  ;;  %v4317_v40 = vand.u32 2147483647, %v4010_v58 }
 0x6f7   : > { %v4306_v34 = vsel %vm4303_vm14, %v4305_v11, %v4301_v5  ;;  %v1558_v7 = vsub.f32 %v11415_v16, %v1476_v35  ;;  %8905 = vrcp.f32 %v4013_v49  ;;  %vm4315_vm2 = vmor %vm4313_vm1, %vm4314_vm15  ;;  %v11509_v11 = vpop.f32.mrf.mxu3  ;;  %v4334_v58 = vand.u32 2147483648, %v4013_v49 }
 0x6f8   : > { %v4310_v10 = vsub.f32 1.0, %v4309_v56  ;;  %v4307_v23 = vmul.f32 %v11389_v47, %v4306_v34  ;;  %vm4318_vm3 = vcmp.eq.f32.partialorder %v4317_v40, 8.507059e+37  ;;  %15504 = vst [vmem:[#allocation14_spill] sm:$0xff] %v11509_v11  ;;  %vm4328_vm5 = vweird.f32 %v4013_v49 }
 0x6f9   : > { %v1586_v57 = vmul.f32 1.442695, %v1558_v7 }
 0x6fa   : > { %v4311_v15 = vmul.f32 %v8904_v22, %v4310_v10  ;;  %8525 = vmatmul.msk.f32.gmra.mxu3 %vm1473_vm12, %v4307_v23  ;;  %v4335_v23 = vor.u32 1.1754944e-38, %v4334_v58 }
 0x6fb   : > { %8907 = vpow2.f32 %v1586_v57 }
 0x6fc   : > { %v4312_v52 = vadd.f32 %v8904_v22, %v4311_v15 }
 0x6fd   : > { %v8906_v0 = vpop.eup %8905 }
 0x6fe   : > { %v11503_v28 = vpop.xlane.xlu1 %4015  ;;  %v4324_v16 = vmul.f32 %v8906_v0, %v4013_v49  ;;  %v1485_v25 = vpop.xlane.xlu2 %1484  ;;  %v4316_v9 = vsel %vm4315_vm2, %v8904_v22, %v4312_v52  ;;  %vm4329_vm4 = vweird.f32 %v8906_v0 }
 0x6ff   : > { %8909 = vrcp.f32 %v11503_v28  ;;  %v1479_v47 = vpop.xlane.xlu0 %1478  ;;  %v4321_v54 = vsel %vm4318_vm3, %v4320_v37, %v4316_v9  ;;  %v1561_v5 = vsub.f32 %v11433_v3, %v1485_v25  ;;  %vm4330_vm6 = vmor %vm4328_vm5, %vm4329_vm4  ;;  %v11531_v58 = vpop.f32.mrf.mxu3  ;;  %vm4343_vm9 = vweird.f32 %v11503_v28 }
 0x700   : > { %v1559_v6 = vsub.f32 %v11428_v26, %v1479_v47  ;;  %v4325_v31 = vsub.f32 1.0, %v4324_v16  ;;  %v4322_v35 = vmul.f32 %v11405_v41, %v4321_v54  ;;  %v4332_v26 = vand.u32 2147483647, %v4013_v49  ;;  %v15505_v16 = vld [vmem:[#allocation34_spill] sm:$0xff]  ;;  %15506 = vst [vmem:[#allocation16_spill] sm:$0xff] %v11531_v58 }
 0x701   : > { %v11507_v13 = vpop.eup %8907  ;;  %v1592_v57 = vmul.f32 1.442695, %v1561_v5  ;;  %v11521_v25 = vsel %vm1238_vm11, %v15505_v16, -1e+30  ;;  %v4349_v49 = vand.u32 2147483648, %v11503_v28 }
 0x702   : > { %v1588_v56 = vmul.f32 1.442695, %v1559_v6  ;;  %v4326_v34 = vmul.f32 %v8906_v0, %v4325_v31  ;;  %v1642_v7 = vsel %vm1473_vm12, %v11507_v13, 0.0  ;;  %8526 = vmatmul.msk.f32.gmra.mxu3 %vm1473_vm12, %v4322_v35  ;;  %vm4333_vm7 = vcmp.eq.f32.partialorder %v4332_v26, 8.507059e+37 }
 0x703   : > { %1643 = vadd.xlane.f32.xlu0 %v1642_v7  ;;  %v2654_v54 = vsel %vm1473_vm12, %v11521_v25, -inf }
 0x704   : > { %8911 = vpow2.f32 %v1588_v56  ;;  %v4327_v10 = vadd.f32 %v8906_v0, %v4326_v34  ;;  %v4350_v56 = vor.u32 1.1754944e-38, %v4349_v49 }
 0x705   : > { %v8910_v22 = vpop.eup %8909  ;;  %8913 = vpow2.f32 %v1592_v57 }
 0x706   : > { %v4339_v3 = vmul.f32 %v8910_v22, %v11503_v28  ;;  %v1482_v15 = vpop.xlane.xlu1 %1481  ;;  %v4331_v43 = vsel %vm4330_vm6, %v8906_v0, %v4327_v10  ;;  %vm4344_vm8 = vweird.f32 %v8910_v22 }
 0x707   : > { %v1560_v41 = vsub.f32 %v11448_v60, %v1482_v15  ;;  %v1488_v52 = vpop.xlane.xlu0 %1487  ;;  %v4336_v37 = vsel %vm4333_vm7, %v4335_v23, %v4331_v43  ;;  %v4347_v60 = vand.u32 2147483647, %v11503_v28  ;;  %vm4345_vm10 = vmor %vm4343_vm9, %vm4344_vm8  ;;  %v15508_v43 = vld [vmem:[#allocation2_spill] sm:$0xff] }
 0x708   : > { %v4340_v40 = vsub.f32 1.0, %v4339_v3  ;;  %v4337_v6 = vmul.f32 %v11418_v8, %v4336_v37  ;;  %v1562_v31 = vsub.f32 %v11458_v38, %v1488_v52  ;;  %v1494_v38 = vpop.xlane.xlu2 %1493  ;;  %v11546_v3 = vsel %vm1238_vm11, %v10609_v50, -1e+30  ;;  %v15509_v37 = vld [vmem:[#allocation38_spill] sm:$0xff] }
 0x709   : > { %v1590_v47 = vmul.f32 1.442695, %v1560_v41  ;;  %vm4348_vm13 = vcmp.eq.f32.partialorder %v4347_v60, 8.507059e+37  ;;  %v1564_v15 = vsub.f32 %v11453_v45, %v1494_v38  ;;  %v11561_v45 = vld [vmem:[%s15368_s4] ss:$0 sm:$0xff] }
 0x70a   : > { %v4341_v9 = vmul.f32 %v8910_v22, %v4340_v40  ;;  %v11526_v0 = vpop.eup %8911  ;;  %8527 = vmatmul.msk.f32.gmra.mxu3 %vm1473_vm12, %v4337_v6  ;;  %v1594_v7 = vmul.f32 1.442695, %v1562_v31  ;;  %v11565_v40 = vadd.f32 %v11561_v45, %v15508_v43  ;;  %v11570_v16 = vsel %vm1238_vm11, %v15509_v37, -1e+30  ;;  %v15515_v43 = vld [vmem:[#allocation40_spill] sm:$0xff] }
 0x70b   : > { %8915 = vpow2.f32 %v1590_v47  ;;  %2655 = vmax.xlane.f32.xlu0 %v2654_v54  ;;  %v1645_v8 = vsel %vm1473_vm12, %v11526_v0, 0.0  ;;  %v11537_v10 = vpop.eup %8913  ;;  %v1598_v52 = vmul.f32 1.442695, %v1564_v15  ;;  %v15510_v47 = vld [vmem:[#allocation39_spill] sm:$0xff]  ;;  %v2660_v31 = vsel %vm1473_vm12, %v11570_v16, -inf }
 0x70c   : > { %v4342_v5 = vadd.f32 %v8910_v22, %v4341_v9  ;;  %1646 = vadd.xlane.f32.xlu2 %v1645_v8  ;;  %8917 = vpow2.f32 %v1594_v7  ;;  %v1651_v41 = vsel %vm1473_vm12, %v11537_v10, 0.0  ;;  %v11575_v6 = vsel %vm1238_vm11, %v15510_v47, -1e+30 }
 0x70d   : > { %v1019_v60 = vmul.f32 %v9755_v44, %v11565_v40  ;;  %v2663_v8 = vsel %vm1473_vm12, %v11575_v6, -inf }
 0x70e   : > { %v1491_v35 = vpop.xlane.xlu1 %1490  ;;  %v4346_v34 = vsel %vm4345_vm10, %v8910_v22, %v4342_v5 }
 0x70f   : > { %v4351_v26 = vsel %vm4348_vm13, %v4350_v56, %v4346_v34  ;;  %v1563_v57 = vsub.f32 %v11471_v42, %v1491_v35  ;;  %v2657_v42 = vsel %vm1473_vm12, %v11546_v3, -inf  ;;  %v15512_v35 = vld [vmem:[#allocation3_spill] sm:$0xff] }
 0x710   : > { %v4352_v28 = vmul.f32 %v11435_v24, %v4351_v26  ;;  %v11553_v24 = vpop.f32.mrf.mxu3  ;;  %v11593_v34 = vadd.f32 %v11561_v45, %v15512_v35  ;;  %v11602_v26 = vsel %vm1238_vm11, %v10689_v14, -1e+30  ;;  %v15513_v14 = vld [vmem:[#allocation4_spill] sm:$0xff] }
 0x711   : > { %v11540_v23 = vpop.eup %8915  ;;  %15507 = vst [vmem:[#allocation15_spill] sm:$0xff] %v11553_v24  ;;  %v1596_v50 = vmul.f32 1.442695, %v1563_v57 }
 0x712   : > { %v1648_v22 = vsel %vm1473_vm12, %v11540_v23, 0.0  ;;  %8528 = vmatmul.msk.f32.gmra.mxu3 %vm1473_vm12, %v4352_v28  ;;  %v11577_v9 = vpop.eup %8917  ;;  %v1020_v28 = vmul.f32 %v9755_v44, %v11593_v34 }
 0x713   : > { %1649 = vadd.xlane.f32.xlu1 %v1648_v22  ;;  %1652 = vadd.xlane.f32.xlu0 %v1651_v41  ;;  %8919 = vpow2.f32 %v1596_v50  ;;  %v1654_v56 = vsel %vm1473_vm12, %v11577_v9, 0.0  ;;  %v2581_v22 = vpop.f32.mrf.mxu0  ;;  %v2666_v41 = vsel %vm1473_vm12, %v11602_v26, -inf }
 0x714   : > { %2658 = vmax.xlane.f32.xlu2 %v2657_v42  ;;  %8921 = vpow2.f32 %v1598_v52  ;;  %v11615_v42 = vadd.f32 %v11561_v45, %v15513_v14  ;;  %v11622_v52 = vsel %vm1238_vm11, %v15515_v43, -1e+30  ;;  %v11626_v37 = vsel %vm1238_vm11, %v2581_v22, -1e+30  ;;  %v15518_v22 = vld [vmem:[#allocation6_spill] sm:$0xff] }
 0x716   : > { %v2653_v49 = vpop.xlane.xlu1 %2652  ;;  %v1021_v47 = vmul.f32 %v9755_v44, %v11615_v42 }
 0x717   : > { %v2721_v54 = vsub.f32 %v11480_v27, %v2653_v49 }
 0x718   : > { %v11586_v5 = vpop.f32.mrf.mxu3 }
 0x719   : > { %15511 = vst [vmem:[#allocation19_spill] sm:$0xff] %v11586_v5  ;;  %v11595_v38 = vpop.eup %8919  ;;  %v2756_v27 = vmul.f32 1.442695, %v2721_v54 }
 0x71a   : > { %8543 = vmatmul.msk.f32.vlgmr.msrb.gmra.mxu3 %vm588_vm0, %v1019_v60  ;;  %v11597_v7 = vpop.eup %8921  ;;  %v1657_v57 = vsel %vm1473_vm12, %v11595_v38, 0.0  ;;  %v2669_v60 = vsel %vm1473_vm12, %v11622_v52, -inf }
 0x71b   : > { %2661 = vmax.xlane.f32.xlu1 %v2660_v31  ;;  %2664 = vmax.xlane.f32.xlu0 %v2663_v8  ;;  %8923 = vpow2.f32 %v2756_v27  ;;  %v1660_v15 = vsel %vm1473_vm12, %v11597_v7, 0.0  ;;  %v2693_v31 = vsel %vm1473_vm12, %v11626_v37, -inf  ;;  %v15516_v8 = vld [vmem:[#allocation5_spill] sm:$0xff]  ;;  %v2584_v35 = vpop.f32.mrf.mxu0 }
 0x71c   : > { %1655 = vadd.xlane.f32.xlu2 %v1654_v56  ;;  %v11641_v56 = vadd.f32 %v11561_v45, %v15516_v8  ;;  %v15522_v8 = vld [vmem:[#allocation9_spill] sm:$0xff] }
 0x720   : > { %v11617_v50 = vpop.f32.mrf.mxu3 }
 0x721   : > { %15514 = vst [vmem:[#allocation17_spill] sm:$0xff] %v11617_v50  ;;  %v11628_v49 = vpop.eup %8923 }
 0x722   : > { %8544 = vmatmul.msk.f32.gmra.mxu3 %vm588_vm0, %v1020_v28  ;;  %v2819_v54 = vsel %vm1473_vm12, %v11628_v49, 0.0  ;;  %v11647_v28 = vsel %vm1238_vm11, %v2584_v35, -1e+30  ;;  %v11674_v35 = vadd.f32 %v11561_v45, %v15522_v8 }
 0x723   : > { %1658 = vadd.xlane.f32.xlu1 %v1657_v57  ;;  %1661 = vadd.xlane.f32.xlu0 %v1660_v15  ;;  %v1022_v57 = vmul.f32 %v9755_v44, %v11641_v56  ;;  %v2696_v15 = vsel %vm1473_vm12, %v11647_v28, -inf }
 0x724   : > { %2667 = vmax.xlane.f32.xlu2 %v2666_v41  ;;  %v11656_v41 = vadd.f32 %v11561_v45, %v15518_v22  ;;  %v15524_v22 = vld [vmem:[#allocation8_spill] sm:$0xff] }
 0x726   : > { %v1023_v43 = vmul.f32 %v9755_v44, %v11656_v41 }
 0x728   : > { %v11643_v27 = vpop.f32.mrf.mxu3 }
 0x729   : > { %15517 = vst [vmem:[#allocation18_spill] sm:$0xff] %v11643_v27 }
 0x72a   : > { %8545 = vmatmul.msk.f32.gmra.mxu3 %vm588_vm0, %v1021_v47  ;;  %v15520_v47 = vld [vmem:[#allocation7_spill] sm:$0xff] }
 0x72b   : > { %2670 = vmax.xlane.f32.xlu1 %v2669_v60  ;;  %2694 = vmax.xlane.f32.xlu0 %v2693_v31  ;;  %v11665_v60 = vadd.f32 %v11561_v45, %v15520_v47 }
 0x72c   : > { %2820 = vadd.xlane.f32.xlu2 %v2819_v54 }
 0x72d   : > { %v1024_v31 = vmul.f32 %v9755_v44, %v11665_v60 }
 0x730   : > { %v11658_v14 = vpop.f32.mrf.mxu3 }
 0x731   : > { %15519 = vst [vmem:[#allocation29_spill] sm:$0xff] %v11658_v14 }
 0x732   : > { %8546 = vmatmul.msk.f32.gmra.mxu3 %vm588_vm0, %v1022_v57  ;;  %v1025_v57 = vmul.f32 %v9755_v44, %v11674_v35  ;;  %v1082_v44 = vmul.f32 %v15524_v22, %v11615_v42 }
 0x734   : > { %2697 = vmax.xlane.f32.xlu2 %v2696_v15 }
 0x738   : > { %v11669_v54 = vpop.f32.mrf.mxu3 }
 0x739   : > { %15521 = vst [vmem:[#allocation34_spill] sm:$0xff] %v11669_v54 }
 0x73a   : > { %8547 = vmatmul.msk.f32.gmra.mxu3 %vm588_vm0, %v1023_v43  ;;  %v1080_v43 = vmul.f32 %v15524_v22, %v11565_v40 }
 0x740   : > { %v11678_v15 = vpop.f32.mrf.mxu3 }
 0x741   : > { %15523 = vst [vmem:[#allocation2_spill] sm:$0xff] %v11678_v15 }
 0x742   : > { %8548 = vmatmul.msk.f32.gmra.mxu3 %vm588_vm0, %v1024_v31  ;;  %v1081_v31 = vmul.f32 %v15524_v22, %v11593_v34 }
 0x748   : > { %v11684_v47 = vpop.f32.mrf.mxu3 }
 0x749   : > { %15525 = vst [vmem:[#allocation38_spill] sm:$0xff] %v11684_v47 }
 0x74a   : > { %8549 = vmatmul.msk.f32.gmra.mxu3 %vm588_vm0, %v1025_v57  ;;  %v1083_v57 = vmul.f32 %v15524_v22, %v11641_v56 }
 0x750   : > { %v11689_v45 = vpop.f32.mrf.mxu3 }
 0x751   : > { %15526 = vst [vmem:[#allocation39_spill] sm:$0xff] %v11689_v45  ;;  %v1085_v45 = vmul.f32 %v15524_v22, %v11665_v60 }
 0x752   : > { %8550 = vmatmul.msk.f32.gmra.mxu3 %vm588_vm0, %v1080_v43  ;;  %v1084_v43 = vmul.f32 %v15524_v22, %v11656_v41 }
 0x758   : > { %v11694_v8 = vpop.f32.mrf.mxu3 }
 0x759   : > { %15527 = vst [vmem:[#allocation3_spill] sm:$0xff] %v11694_v8 }
 0x75a   : > { %8551 = vmatmul.msk.f32.gmra.mxu3 %vm588_vm0, %v1081_v31 }
 0x760   : > { %v11701_v47 = vpop.f32.mrf.mxu3 }
 0x761   : > { %15528 = vst [vmem:[#allocation4_spill] sm:$0xff] %v11701_v47 }
 0x762   : > { %8552 = vmatmul.msk.f32.gmra.mxu3 %vm588_vm0, %v1082_v44  ;;  %v2587_v44 = vpop.f32.mrf.mxu0 }
 0x768   : > { %v11707_v15 = vpop.f32.mrf.mxu3 }
 0x769   : > { %15529 = vst [vmem:[#allocation40_spill] sm:$0xff] %v11707_v15 }
 0x76a   : > { %8553 = vmatmul.msk.f32.gmra.mxu3 %vm588_vm0, %v1083_v57 }
 0x772   : > { %8554 = vmatmul.msk.f32.gmra.mxu3 %vm588_vm0, %v1084_v43  ;;  %v1086_v43 = vmul.f32 %v15524_v22, %v11674_v35  ;;  %v11720_v22 = vpop.f32.mrf.mxu3 }
 0x773   : > { %15530 = vst [vmem:[#allocation5_spill] sm:$0xff] %v11720_v22 }
 0x776   : > { %v1644_v31 = vpop.xlane.xlu0 %1643 }
 0x777   : > { %8925 = vrcp.f32 %v1644_v31  ;;  %v1737_v5 = vand.u32 2147483648, %v1644_v31  ;;  %vm1731_vm15 = vweird.f32 %v1644_v31 }
 0x77a   : > { %8555 = vmatmul.msk.f32.gmra.mxu3 %vm588_vm0, %v1085_v45  ;;  %v1735_v45 = vand.u32 2147483647, %v1644_v31 }
 0x77c   : > { %vm1736_vm2 = vcmp.eq.f32.partialorder %v1735_v45, 8.507059e+37 }
 0x77d   : > { %v8926_v8 = vpop.eup %8925 }
 0x77e   : > { %v1727_v54 = vmul.f32 %v8926_v8, %v1644_v31  ;;  %v2656_v57 = vpop.xlane.xlu0 %2655  ;;  %vm1732_vm14 = vweird.f32 %v8926_v8 }
 0x77f   : > { %v1647_v62 = vpop.xlane.xlu2 %1646  ;;  %v2722_v14 = vsub.f32 %v11521_v25, %v2656_v57  ;;  %vm1733_vm1 = vmor %vm1731_vm15, %vm1732_vm14  ;;  %v11715_v25 = vpop.f32.mrf.mxu0 }
 0x780   : > { %v1728_v27 = vsub.f32 1.0, %v1727_v54  ;;  %8927 = vrcp.f32 %v1647_v62  ;;  %v1738_v54 = vor.u32 1.1754944e-38, %v1737_v5  ;;  %v1750_v53 = vand.u32 2147483647, %v1647_v62 }
 0x781   : > { %v2758_v47 = vmul.f32 1.442695, %v2722_v14  ;;  %v1752_v45 = vand.u32 2147483648, %v1647_v62  ;;  %vm1746_vm4 = vweird.f32 %v1647_v62 }
 0x782   : > { %v1729_v50 = vmul.f32 %v8926_v8, %v1728_v27  ;;  %8556 = vmatmul.msk.f32.gmra.mxu3 %vm588_vm0, %v1086_v43  ;;  %vm1751_vm6 = vcmp.eq.f32.partialorder %v1750_v53, 8.507059e+37 }
 0x783   : > { %8929 = vpow2.f32 %v2758_v47 }
 0x784   : > { %v1730_v15 = vadd.f32 %v8926_v8, %v1729_v50 }
 0x786   : > { %v11713_v24 = vpop.xlane.xlu1 %1649  ;;  %v8928_v58 = vpop.eup %8927  ;;  %v1734_v27 = vsel %vm1733_vm1, %v8926_v8, %v1730_v15  ;;  %v1141_v15 = vmul.f32 %v9881_v33, %v11565_v40 }
 0x787   : > { %8931 = vrcp.f32 %v11713_v24  ;;  %v11718_v14 = vpop.xlane.xlu0 %1652  ;;  %v1742_v47 = vmul.f32 %v8928_v58, %v1647_v62  ;;  %v2659_v57 = vpop.xlane.xlu2 %2658  ;;  %v1739_v31 = vsel %vm1736_vm2, %v1738_v54, %v1734_v27  ;;  %vm1747_vm3 = vweird.f32 %v8928_v58 }
 0x788   : > { %8933 = vrcp.f32 %v11718_v14  ;;  %v2723_v50 = vsub.f32 %v11546_v3, %v2659_v57  ;;  %v1740_v5 = vmul.f32 %v11507_v13, %v1739_v31  ;;  %v1142_v13 = vmul.f32 %v9881_v33, %v11593_v34  ;;  %vm11757_vm5 = vmor %vm1746_vm4, %vm1747_vm3  ;;  %v11767_v32 = vpop.f32.mrf.mxu0 }
 0x789   : > { %v11724_v43 = vpop.eup %8929  ;;  %v1743_v11 = vsub.f32 1.0, %v1742_v47  ;;  %v1222_v27 = vmul.f32 %v15532_v17, %v15533_v2  ;;  %v15534_v47 = vld [vmem:[#allocation32_spill] sm:$0xff]  ;;  %v1767_v53 = vand.u32 2147483648, %v11713_v24  ;;  %vm1761_vm8 = vweird.f32 %v11713_v24 }
 0x78a   : > { %v2760_v8 = vmul.f32 1.442695, %v2723_v50  ;;  %v2822_v22 = vsel %vm1473_vm12, %v11724_v43, 0.0  ;;  %8389 = vmatmul.msk.f32.vlgmr.msrb.gmra.mxu1 %vm1473_vm12, %v1740_v5  ;;  %8557 = vmatmul.msk.f32.gmra.mxu3 %vm588_vm0, %v1141_v15  ;;  %v1221_v57 = vmul.f32 %v15532_v17, %v15534_v47  ;;  %v15535_v50 = vld [vmem:[#allocation33_spill] sm:$0xff]  ;;  %vm1776_vm14 = vweird.f32 %v11718_v14 }
 0x78b   : > { %v1744_v3 = vmul.f32 %v8928_v58, %v1743_v11  ;;  %3516 = vmatpush.msrb.mxu1 %v1223_v12  ;;  %2823 = vadd.xlane.f32.xlu1 %v2822_v22  ;;  %v1220_v31 = vmul.f32 %v15532_v17, %v15535_v50  ;;  %v11751_v12 = vsel %vm1238_vm11, %v2587_v44, -1e+30  ;;  %v1753_v50 = vor.u32 1.1754944e-38, %v1752_v45  ;;  %v11771_v45 = vpop.f32.mrf.mxu3 }
 0x78c   : > { %8935 = vpow2.f32 %v2760_v8  ;;  %15538 = vst [vmem:[#allocation6_spill] sm:$0xff] %v11771_v45 }
 0x78d   : > { %v11737_v54 = vpop.eup %8931  ;;  %v1745_v46 = vadd.f32 %v8928_v58, %v1744_v3  ;;  %3517 = vmatpush.msrb.mxu1 %v1222_v27  ;;  %v1765_v27 = vand.u32 2147483647, %v11713_v24 }
 0x78e   : > { %v11745_v5 = vpop.eup %8933  ;;  %v1757_v11 = vmul.f32 %v11737_v54, %v11713_v24  ;;  %v2662_v15 = vpop.xlane.xlu1 %2661  ;;  %vm1762_vm7 = vweird.f32 %v11737_v54 }
 0x78f   : > { %v1772_v22 = vmul.f32 %v11745_v5, %v11718_v14  ;;  %v2724_v8 = vsub.f32 %v11570_v16, %v2662_v15  ;;  %v2665_v2 = vpop.xlane.xlu0 %2664  ;;  %v11761_v62 = vpop.xlane.xlu2 %1655  ;;  %v1749_v4 = vsel %vm11757_vm5, %v8928_v58, %v1745_v46  ;;  %3518 = vmatpush.msrb.mxu1 %v1221_v57  ;;  %vm1763_vm9 = vmor %vm1761_vm8, %vm1762_vm7  ;;  %vm1766_vm10 = vcmp.eq.f32.partialorder %v1765_v27, 8.507059e+37 }
 0x790   : > { %v1758_v3 = vsub.f32 1.0, %v1757_v11  ;;  %v2725_v44 = vsub.f32 %v11575_v6, %v2665_v2  ;;  %8937 = vrcp.f32 %v11761_v62  ;;  %v1754_v18 = vsel %vm1751_vm6, %v1753_v50, %v1749_v4 }
 0x791   : > { %v1773_v16 = vsub.f32 1.0, %v1772_v22  ;;  %v2762_v15 = vmul.f32 1.442695, %v2724_v8  ;;  %3519 = vmatpush.msrb.mxu1 %v1220_v31  ;;  %v1755_v58 = vmul.f32 %v11526_v0, %v1754_v18  ;;  %v15539_v22 = vld [vmem:[#allocation35_spill] sm:$0xff]  ;;  %v2699_v18 = vsel %vm1473_vm12, %v11751_v12, -inf }
 0x792   : > { %v2764_v11 = vmul.f32 1.442695, %v2725_v44  ;;  %v1759_v6 = vmul.f32 %v11737_v54, %v1758_v3  ;;  %v11775_v46 = vpop.eup %8935  ;;  %v1219_v8 = vmul.f32 %v15532_v17, %v15539_v22  ;;  %8558 = vmatmul.msk.f32.gmra.mxu3 %vm588_vm0, %v1142_v13  ;;  %v1768_v0 = vor.u32 1.1754944e-38, %v1767_v53  ;;  %v15540_v13 = vld [vmem:[#allocation36_spill] sm:$0xff]  ;;  %v15541_v53 = vld [vmem:[#allocation37_spill] sm:$0xff] }
 0x793   : > { %8939 = vpow2.f32 %v2762_v15  ;;  %v2825_v57 = vsel %vm1473_vm12, %v11775_v46, 0.0  ;;  %v1774_v2 = vmul.f32 %v11745_v5, %v1773_v16  ;;  %8390 = vmatmul.msk.f32.gmra.mxu1 %vm1473_vm12, %v1755_v58  ;;  %2700 = vmax.xlane.f32.xlu1 %v2699_v18  ;;  %v1218_v31 = vmul.f32 %v15532_v17, %v15540_v13  ;;  %v2596_v13 = vpop.f32.mrf.mxu0 }
 0x794   : > { %8941 = vpow2.f32 %v2764_v11  ;;  %v1760_v4 = vadd.f32 %v11737_v54, %v1759_v6  ;;  %2826 = vadd.xlane.f32.xlu0 %v2825_v57  ;;  %3520 = vmatpush.msrb.mxu1 %v1219_v8  ;;  %v1217_v11 = vmul.f32 %v15532_v17, %v15541_v53  ;;  %vm1777_vm13 = vweird.f32 %v11745_v5  ;;  %v11818_v57 = vpop.f32.mrf.mxu3 }
 0x795   : > { %v1775_v22 = vadd.f32 %v11745_v5, %v1774_v2  ;;  %15542 = vst [vmem:[#allocation7_spill] sm:$0xff] %v11818_v57  ;;  %v1780_v2 = vand.u32 2147483647, %v11718_v14  ;;  %vm11831_vm15 = vmor %vm1776_vm14, %vm1777_vm13  ;;  %vm1791_vm3 = vweird.f32 %v11761_v62 }
 0x796   : > { %v11793_v47 = vpop.xlane.xlu1 %1658  ;;  %v1764_v24 = vsel %vm1763_vm9, %v11737_v54, %v1760_v4  ;;  %v11796_v50 = vpop.eup %8937  ;;  %3521 = vmatpush.msrb.mxu1 %v1218_v31  ;;  %v11808_v54 = vsel %vm1238_vm11, %v11715_v25, -1e+30  ;;  %v1782_v4 = vand.u32 2147483648, %v11718_v14  ;;  %v1143_v25 = vmul.f32 %v9881_v33, %v11615_v42 }
 0x797   : > { %8943 = vrcp.f32 %v11793_v47  ;;  %v11799_v3 = vpop.xlane.xlu0 %1661  ;;  %v1769_v44 = vsel %vm1766_vm10, %v1768_v0, %v1764_v24  ;;  %v1787_v16 = vmul.f32 %v11796_v50, %v11761_v62  ;;  %v2668_v15 = vpop.xlane.xlu2 %2667  ;;  %v2702_v24 = vsel %vm1473_vm12, %v11808_v54, -inf }
 0x798   : > { %v2726_v6 = vsub.f32 %v11602_v26, %v2668_v15  ;;  %v1770_v58 = vmul.f32 %v11540_v23, %v1769_v44  ;;  %3522 = vmatpush.msrb.mxu1 %v1217_v11  ;;  %8945 = vrcp.f32 %v11799_v3  ;;  %v1779_v14 = vsel %vm11831_vm15, %v11745_v5, %v1775_v22 }
 0x799   : > { %v11810_v27 = vpop.eup %8939  ;;  %v1788_v18 = vsub.f32 1.0, %v1787_v16  ;;  %v11849_v15 = vsel %vm1238_vm11, %v11767_v32, -1e+30  ;;  %v1783_v53 = vor.u32 1.1754944e-38, %v1782_v4  ;;  %vm1781_vm1 = vcmp.eq.f32.partialorder %v1780_v2, 8.507059e+37 }
 0x79a   : > { %v11816_v8 = vpop.eup %8941  ;;  %v2828_v0 = vsel %vm1473_vm12, %v11810_v27, 0.0  ;;  %v2766_v23 = vmul.f32 1.442695, %v2726_v6  ;;  %8559 = vmatmul.msk.f32.gmra.mxu3 %vm588_vm0, %v1143_v25  ;;  %v1144_v22 = vmul.f32 %v9881_v33, %v11641_v56  ;;  %v2705_v32 = vsel %vm1473_vm12, %v11849_v15, -inf }
 0x79b   : > { %2829 = vadd.xlane.f32.xlu2 %v2828_v0  ;;  %v2831_v26 = vsel %vm1473_vm12, %v11816_v8, 0.0  ;;  %v1789_v16 = vmul.f32 %v11796_v50, %v1788_v18  ;;  %8391 = vmatmul.msk.f32.gmra.mxu1 %vm1473_vm12, %v1770_v58  ;;  %v1784_v5 = vsel %vm1781_vm1, %v1783_v53, %v1779_v14  ;;  %vm1792_vm2 = vweird.f32 %v11796_v50 }
 0x79c   : > { %8947 = vpow2.f32 %v2766_v23  ;;  %2703 = vmax.xlane.f32.xlu0 %v2702_v24  ;;  %2832 = vadd.xlane.f32.xlu1 %v2831_v26  ;;  %v1797_v2 = vand.u32 2147483648, %v11761_v62  ;;  %v11869_v31 = vsel %vm1238_vm11, %v2596_v13, -1e+30  ;;  %v1785_v14 = vmul.f32 %v11537_v10, %v1784_v5  ;;  %v11876_v53 = vpop.f32.mrf.mxu3  ;;  %vm11880_vm4 = vmor %vm1791_vm3, %vm1792_vm2 }
 0x79d   : > { %v11839_v44 = vpop.eup %8943  ;;  %v1790_v26 = vadd.f32 %v11796_v50, %v1789_v16  ;;  %v1795_v16 = vand.u32 2147483647, %v11761_v62  ;;  %15545 = vst [vmem:[#allocation9_spill] sm:$0xff] %v11876_v53  ;;  %vm1806_vm7 = vweird.f32 %v11793_v47  ;;  %vm1821_vm13 = vweird.f32 %v11799_v3 }
 0x79e   : > { %v1802_v11 = vmul.f32 %v11839_v44, %v11793_v47  ;;  %v2671_v6 = vpop.xlane.xlu1 %2670  ;;  %vm1807_vm6 = vweird.f32 %v11839_v44 }
 0x79f   : > { %v2727_v18 = vsub.f32 %v11622_v52, %v2671_v6  ;;  %v2695_v25 = vpop.xlane.xlu0 %2694  ;;  %v11854_v58 = vpop.xlane.xlu2 %2820  ;;  %vm1796_vm5 = vcmp.eq.f32.partialorder %v1795_v16, 8.507059e+37  ;;  %v1145_v16 = vmul.f32 %v9881_v33, %v11656_v41  ;;  %vm1808_vm8 = vmor %vm1806_vm7, %vm1807_vm6 }
 0x7a0   : > { %v2735_v0 = vsub.f32 %v11626_v37, %v2695_v25  ;;  %v1803_v4 = vsub.f32 1.0, %v1802_v11  ;;  %v11863_v52 = vpop.eup %8945  ;;  %8949 = vrcp.f32 %v11854_v58  ;;  %v2599_v6 = vpop.f32.mrf.mxu0  ;;  %v1794_v25 = vsel %vm11880_vm4, %v11796_v50, %v1790_v26 }
 0x7a1   : > { %v2768_v23 = vmul.f32 1.442695, %v2727_v18  ;;  %v1817_v62 = vmul.f32 %v11863_v52, %v11799_v3  ;;  %v2708_v18 = vsel %vm1473_vm12, %v11869_v31, -inf  ;;  %vm1822_vm10 = vweird.f32 %v11863_v52 }
 0x7a2   : > { %v2784_v37 = vmul.f32 1.442695, %v2735_v0  ;;  %v11871_v24 = vpop.eup %8947  ;;  %8560 = vmatmul.msk.f32.gmra.mxu3 %vm588_vm0, %v1144_v22  ;;  %v1804_v10 = vmul.f32 %v11839_v44, %v1803_v4  ;;  %v1798_v0 = vor.u32 1.1754944e-38, %v1797_v2  ;;  %v11900_v4 = vsel %vm1238_vm11, %v2599_v6, -1e+30  ;;  %vm1823_vm14 = vmor %vm1821_vm13, %vm1822_vm10 }
 0x7a3   : > { %8951 = vpow2.f32 %v2768_v23  ;;  %2706 = vmax.xlane.f32.xlu2 %v2705_v32  ;;  %v2834_v13 = vsel %vm1473_vm12, %v11871_v24, 0.0  ;;  %8392 = vmatmul.msk.f32.gmra.mxu1 %vm1473_vm12, %v1785_v14  ;;  %v1812_v2 = vand.u32 2147483648, %v11793_v47  ;;  %vm2992_vm2 = vweird.f32 %v11854_v58 }
 0x7a4   : > { %8953 = vpow2.f32 %v2784_v37  ;;  %2835 = vadd.xlane.f32.xlu0 %v2834_v13  ;;  %2709 = vmax.xlane.f32.xlu1 %v2708_v18  ;;  %v1799_v32 = vsel %vm1796_vm5, %v1798_v0, %v1794_v25  ;;  %v1818_v37 = vsub.f32 1.0, %v1817_v62  ;;  %v1805_v50 = vadd.f32 %v11839_v44, %v1804_v10  ;;  %v11927_v0 = vpop.f32.mrf.mxu3 }
 0x7a5   : > { %v1800_v6 = vmul.f32 %v11577_v9, %v1799_v32  ;;  %v1810_v10 = vand.u32 2147483647, %v11793_v47  ;;  %v2711_v62 = vsel %vm1473_vm12, %v11900_v4, -inf  ;;  %15548 = vst [vmem:[#allocation8_spill] sm:$0xff] %v11927_v0  ;;  %v1813_v47 = vor.u32 1.1754944e-38, %v1812_v2 }
 0x7a6   : > { %v11896_v5 = vpop.eup %8949  ;;  %v1819_v18 = vmul.f32 %v11863_v52, %v1818_v37  ;;  %v1809_v9 = vsel %vm1808_vm8, %v11839_v44, %v1805_v50  ;;  %v1146_v44 = vmul.f32 %v9881_v33, %v11665_v60  ;;  %v11944_v2 = vsel %vm1238_vm11, %v11117_v55, -1e+30 }
 0x7a7   : > { %v2698_v22 = vpop.xlane.xlu2 %2697  ;;  %v2988_v25 = vmul.f32 %v11896_v5, %v11854_v58  ;;  %vm1811_vm9 = vcmp.eq.f32.partialorder %v1810_v10, 8.507059e+37  ;;  %v3789_v55 = vsel %vm1473_vm12, %v11944_v2, -inf  ;;  %vm2993_vm1 = vweird.f32 %v11896_v5 }
 0x7a8   : > { %v2736_v14 = vsub.f32 %v11647_v28, %v2698_v22  ;;  %v11932_v22 = vsel %vm1238_vm11, %v11102_v1, -1e+30  ;;  %v1814_v32 = vsel %vm1811_vm9, %v1813_v47, %v1809_v9  ;;  %v2998_v9 = vand.u32 2147483648, %v11854_v58  ;;  %vm2994_vm3 = vmor %vm2992_vm2, %vm2993_vm1 }
 0x7a9   : > { %v11902_v23 = vpop.eup %8951  ;;  %v2989_v37 = vsub.f32 1.0, %v2988_v25  ;;  %v3786_v50 = vsel %vm1473_vm12, %v11932_v22, -inf  ;;  %v11966_v25 = vsel %vm1238_vm11, %v11128_v51, -1e+30  ;;  %v2996_v47 = vand.u32 2147483647, %v11854_v58 }
 0x7aa   : > { %v11907_v26 = vpop.eup %8953  ;;  %v2837_v11 = vsel %vm1473_vm12, %v11902_v23, 0.0  ;;  %v2786_v13 = vmul.f32 1.442695, %v2736_v14  ;;  %8561 = vmatmul.msk.f32.gmra.mxu3 %vm588_vm0, %v1145_v16  ;;  %v1820_v14 = vadd.f32 %v11863_v52, %v1819_v18  ;;  %v1827_v16 = vand.u32 2147483648, %v11799_v3 }
 0x7ab   : > { %2838 = vadd.xlane.f32.xlu2 %v2837_v11  ;;  %v2861_v28 = vsel %vm1473_vm12, %v11907_v26, 0.0  ;;  %8393 = vmatmul.msk.f32.gmra.mxu1 %vm1473_vm12, %v1800_v6  ;;  %v1815_v11 = vmul.f32 %v11595_v38, %v1814_v32  ;;  %vm2997_vm4 = vcmp.eq.f32.partialorder %v2996_v47, 8.507059e+37  ;;  %v1202_v58 = vmul.f32 %v9927_v61, %v11565_v40 }
 0x7ac   : > { %8955 = vpow2.f32 %v2786_v13  ;;  %2712 = vmax.xlane.f32.xlu0 %v2711_v62  ;;  %2862 = vadd.xlane.f32.xlu1 %v2861_v28  ;;  %v1825_v13 = vand.u32 2147483647, %v11799_v3  ;;  %v2990_v28 = vmul.f32 %v11896_v5, %v2989_v37  ;;  %v1824_v10 = vsel %vm1823_vm14, %v11863_v52, %v1820_v14  ;;  %v11959_v3 = vpop.f32.mrf.mxu3 }
 0x7ad   : > { %v1828_v38 = vor.u32 1.1754944e-38, %v1827_v16  ;;  %15549 = vst [vmem:[#allocation30_spill] sm:$0xff] %v11959_v3  ;;  %v1147_v52 = vmul.f32 %v9881_v33, %v11674_v35  ;;  %v3792_v37 = vsel %vm1473_vm12, %v11966_v25, -inf  ;;  %v2999_v14 = vor.u32 1.1754944e-38, %v2998_v9 }
 0x7ae   : > { %vm1826_vm15 = vcmp.eq.f32.partialorder %v1825_v13, 8.507059e+37  ;;  %v2991_v18 = vadd.f32 %v11896_v5, %v2990_v28  ;;  %v1208_v47 = vmul.f32 %v9927_v61, %v11674_v35 }
 0x7af   : > { %v1829_v62 = vsel %vm1826_vm15, %v1828_v38, %v1824_v10  ;;  %v1205_v38 = vmul.f32 %v9927_v61, %v11641_v56  ;;  %v5866_v56 = vld [vmem:[%s15371_s7 + $0x10] sm:$0xff] }
 0x7b0   : > { %v1830_v32 = vmul.f32 %v11597_v7, %v1829_v62  ;;  %v2995_v51 = vsel %vm2994_vm3, %v11896_v5, %v2991_v18  ;;  %v1206_v18 = vmul.f32 %v9927_v61, %v11656_v41  ;;  %v5865_v41 = vld [vmem:[%s15371_s7 + $0x8] sm:$0xff] }
 0x7b1   : > { %v3000_v33 = vsel %vm2997_vm4, %v2999_v14, %v2995_v51 }
 0x7b2   : > { %v11946_v1 = vpop.eup %8955  ;;  %8562 = vmatmul.msk.f32.gmra.mxu3 %vm588_vm0, %v1146_v44  ;;  %v3001_v7 = vmul.f32 %v11628_v49, %v3000_v33  ;;  %v15551_v44 = vld [vmem:[#allocation20_spill] sm:$0xff]  ;;  %v1203_v49 = vmul.f32 %v9927_v61, %v11593_v34  ;;  %v1204_v34 = vmul.f32 %v9927_v61, %v11615_v42  ;;  %v1207_v42 = vmul.f32 %v9927_v61, %v11665_v60  ;;  %v5864_v60 = vld [vmem:[%s15371_s7] sm:$0xff] }
 0x7b3   : > { %3787 = vmax.xlane.f32.xlu2 %v3786_v50  ;;  %v2864_v6 = vsel %vm1473_vm12, %v11946_v1, 0.0  ;;  %8394 = vmatmul.msk.f32.gmra.mxu1 %vm1473_vm12, %v1815_v11  ;;  %v1047_v50 = vmul.f32 %v15551_v44, %v10993_v20  ;;  %v1046_v5 = vmul.f32 %v15551_v44, %v11000_v63  ;;  %v1045_v11 = vmul.f32 %v15551_v44, %v11013_v39 }
 0x7b4   : > { %2865 = vadd.xlane.f32.xlu0 %v2864_v6  ;;  %3790 = vmax.xlane.f32.xlu1 %v3789_v55  ;;  %v11979_v16 = vpop.f32.mrf.mxu3  ;;  %v1044_v40 = vmul.f32 %v15551_v44, %v11020_v19  ;;  %v1043_v6 = vmul.f32 %v15551_v44, %v11033_v21  ;;  %v1042_v28 = vmul.f32 %v15551_v44, %v11039_v29 }
 0x7b5   : > { %15550 = vst [vmem:[#allocation21_spill] sm:$0xff] %v11979_v16  ;;  %v1041_v55 = vmul.f32 %v15551_v44, %v11062_v30  ;;  %v15613_v16 = vld [vmem:[#allocation58_spill] sm:$0xff] }
 0x7ba   : > { %8563 = vmatmul.msk.f32.gmra.mxu3 %vm588_vm0, %v1147_v52  ;;  %v5867_v52 = vld [vmem:[%s15371_s7 + $0x18] sm:$0xff] }
 0x7bb   : > { %8395 = vmatmul.msk.f32.gmra.mxu1 %vm1473_vm12, %v1830_v32  ;;  %5968 = vmatpush.msra.mxu2 %v5867_v52 }
 0x7bc   : > { %3793 = vmax.xlane.f32.xlu0 %v3792_v37  ;;  %v11996_v13 = vpop.f32.mrf.mxu3 }
 0x7bd   : > { %15552 = vst [vmem:[#allocation31_spill] sm:$0xff] %v11996_v13  ;;  %5969 = vmatpush.msra.mxu2 %v5866_v56 }
 0x7bf   : > { %5970 = vmatpush.msra.mxu2 %v5865_v41 }
 0x7c1   : > { %5971 = vmatpush.msra.mxu2 %v5864_v60 }
 0x7c2   : > { %8564 = vmatmul.msk.f32.gmra.mxu3 %vm588_vm0, %v1202_v58 }
 0x7c3   : > { %8445 = vmatmul.msk.f32.vlgmr.msra.gmra.mxu1 %vm1473_vm12, %v3001_v7 }
 0x7c4   : > { %4547 = vmatpush.msra.mxu1 %v1047_v50  ;;  %v12008_v10 = vpop.f32.mrf.mxu3 }
 0x7c6   : > { %4548 = vmatpush.msra.mxu1 %v1046_v5 }
 0x7c8   : > { %4549 = vmatpush.msra.mxu1 %v1045_v11  ;;  %v15553_v11 = vld [vmem:[#allocation22_spill] sm:$0xff] }
 0x7ca   : > { %4550 = vmatpush.msra.mxu1 %v1044_v40  ;;  %8565 = vmatmul.msk.f32.gmra.mxu3 %vm588_vm0, %v1203_v49 }
 0x7cc   : > { %4551 = vmatpush.msra.mxu1 %v1043_v6  ;;  %v12013_v62 = vpop.f32.mrf.mxu3 }
 0x7ce   : > { %4552 = vmatpush.msra.mxu1 %v1042_v28  ;;  %v15554_v28 = vld [vmem:[#allocation48_spill] sm:$0xff] }
 0x7d0   : > { %4553 = vmatpush.msra.mxu1 %v1041_v55 }
 0x7d2   : > { %8566 = vmatmul.msk.f32.gmra.mxu3 %vm588_vm0, %v1204_v34 }
 0x7d4   : > { %v12018_v9 = vpop.f32.mrf.mxu3 }
 0x7da   : > { %8567 = vmatmul.msk.f32.gmra.mxu3 %vm588_vm0, %v1205_v38 }
 0x7dc   : > { %v12037_v32 = vpop.f32.mrf.mxu3 }
 0x7e2   : > { %8568 = vmatmul.msk.f32.gmra.mxu3 %vm588_vm0, %v1206_v18 }
 0x7ea   : > { %8569 = vmatmul.msk.f32.gmra.mxu3 %vm588_vm0, %v1207_v42 }
 0x7f2   : > { %8570 = vmatmul.msk.f32.gmra.mxu3 %vm588_vm0, %v1208_v47 }
 0x7fe   : > { %v2824_v37 = vpop.xlane.xlu1 %2823 }
 0x7ff   : > { %8957 = vrcp.f32 %v2824_v37  ;;  %v3013_v49 = vand.u32 2147483648, %v2824_v37  ;;  %v3011_v61 = vand.u32 2147483647, %v2824_v37  ;;  %vm3007_vm6 = vweird.f32 %v2824_v37 }
 0x801   : > { %v3014_v52 = vor.u32 1.1754944e-38, %v3013_v49  ;;  %vm3012_vm8 = vcmp.eq.f32.partialorder %v3011_v61, 8.507059e+37 }
 0x805   : > { %v8958_v51 = vpop.eup %8957 }
 0x806   : > { %v3003_v14 = vmul.f32 %v8958_v51, %v2824_v37  ;;  %v2701_v58 = vpop.xlane.xlu1 %2700  ;;  %vm3008_vm5 = vweird.f32 %v8958_v51 }
 0x807   : > { %v2827_v33 = vpop.xlane.xlu0 %2826  ;;  %v2243_v7 = vpop.f32.mrf.mxu1  ;;  %v2737_v5 = vsub.f32 %v11751_v12, %v2701_v58  ;;  %vm3009_vm7 = vmor %vm3007_vm6, %vm3008_vm5 }
 0x808   : > { %8959 = vrcp.f32 %v2827_v33  ;;  %v3004_v50 = vsub.f32 1.0, %v3003_v14  ;;  %v2244_v40 = vadd.f32 %v2243_v7, %v15553_v11  ;;  %v15555_v7 = vld [vmem:[#allocation23_spill] sm:$0xff]  ;;  %v3028_v49 = vand.u32 2147483648, %v2827_v33 }
 0x809   : > { %v2788_v6 = vmul.f32 1.442695, %v2737_v5  ;;  %vm3022_vm10 = vweird.f32 %v2827_v33 }
 0x80a   : > { %v3005_v35 = vmul.f32 %v8958_v51, %v3004_v50  ;;  %v2323_v55 = vadd.f32 %v15554_v28, %v2244_v40 }
 0x80b   : > { %8961 = vpow2.f32 %v2788_v6 }
 0x80c   : > { %v2389_v34 = vadd.f32 %v11484_v48, %v2323_v55  ;;  %v3006_v18 = vadd.f32 %v8958_v51, %v3005_v35  ;;  %v15556_v35 = vld [vmem:[#allocation49_spill] sm:$0xff] }
 0x80e   : > { %v12044_v38 = vpop.xlane.xlu2 %2829  ;;  %v8960_v42 = vpop.eup %8959  ;;  %8599 = vmatmul.msk.f32.vlgmr.msra.gmra.mxu2 %vm588_vm0, %v2389_v34  ;;  %v3010_v41 = vsel %vm3009_vm7, %v8958_v51, %v3006_v18  ;;  %v3026_v51 = vand.u32 2147483647, %v2827_v33 }
 0x80f   : > { %8963 = vrcp.f32 %v12044_v38  ;;  %v3018_v12 = vmul.f32 %v8960_v42, %v2827_v33  ;;  %v2704_v56 = vpop.xlane.xlu0 %2703  ;;  %v12048_v60 = vpop.xlane.xlu1 %2832  ;;  %v3015_v37 = vsel %vm3012_vm8, %v3014_v52, %v3010_v41  ;;  %vm3023_vm9 = vweird.f32 %v8960_v42  ;;  %v15557_v52 = vld [vmem:[#allocation62_spill] sm:$0xff] }
 0x810   : > { %v2738_v47 = vsub.f32 %v11808_v54, %v2704_v56  ;;  %8965 = vrcp.f32 %v12048_v60  ;;  %v2246_v14 = vpop.f32.mrf.mxu1  ;;  %v3016_v5 = vmul.f32 %v11724_v43, %v3015_v37  ;;  %vm12070_vm13 = vmor %vm3022_vm10, %vm3023_vm9  ;;  %vm3037_vm14 = vweird.f32 %v12044_v38 }
 0x811   : > { %v3019_v48 = vsub.f32 1.0, %v3018_v12  ;;  %v2247_v50 = vadd.f32 %v2246_v14, %v15555_v7  ;;  %v12054_v11 = vpop.eup %8961  ;;  %v12066_v12 = vsel %vm1238_vm11, %v15557_v52, -1e+30  ;;  %vm12077_vm15 = vcmp.eq.f32.partialorder %v3026_v51, 8.507059e+37 }
 0x812   : > { %v2790_v58 = vmul.f32 1.442695, %v2738_v47  ;;  %8446 = vmatmul.msk.f32.gmra.mxu1 %vm1473_vm12, %v3016_v5  ;;  %v2867_v6 = vsel %vm1473_vm12, %v12054_v11, 0.0  ;;  %v3029_v47 = vor.u32 1.1754944e-38, %v3028_v49  ;;  %v3795_v41 = vsel %vm1473_vm12, %v12066_v12, -inf }
 0x813   : > { %v3020_v40 = vmul.f32 %v8960_v42, %v3019_v48  ;;  %v2324_v54 = vadd.f32 %v15556_v35, %v2247_v50  ;;  %2868 = vadd.xlane.f32.xlu2 %v2867_v6  ;;  %v15562_v35 = vld [vmem:[#allocation24_spill] sm:$0xff]  ;;  %v3041_v6 = vand.u32 2147483647, %v12044_v38  ;;  %vm3052_vm5 = vweird.f32 %v12048_v60 }
 0x814   : > { %8967 = vpow2.f32 %v2790_v58 }
 0x815   : > { %v8964_v61 = vpop.eup %8963  ;;  %v3021_v43 = vadd.f32 %v8960_v42, %v3020_v40  ;;  %v2390_v34 = vadd.f32 %v11486_v59, %v2324_v54  ;;  %vm3042_vm3 = vcmp.eq.f32.partialorder %v3041_v6, 8.507059e+37 }
 0x816   : > { %v3033_v28 = vmul.f32 %v8964_v61, %v12044_v38  ;;  %v2707_v55 = vpop.xlane.xlu2 %2706  ;;  %v12068_v56 = vpop.eup %8965  ;;  %vm3038_vm1 = vweird.f32 %v8964_v61 }
 0x817   : > { %v2739_v18 = vsub.f32 %v11849_v15, %v2707_v55  ;;  %v12075_v33 = vpop.xlane.xlu0 %2835  ;;  %v3043_v15 = vand.u32 2147483648, %v12044_v38  ;;  %v3048_v48 = vmul.f32 %v12068_v56, %v12048_v60  ;;  %8600 = vmatmul.msk.f32.gmra.mxu2 %vm588_vm0, %v2390_v34  ;;  %v2710_v58 = vpop.xlane.xlu1 %2709  ;;  %v3025_v7 = vsel %vm12070_vm13, %v8960_v42, %v3021_v43  ;;  %vm12099_vm2 = vmor %vm3037_vm14, %vm3038_vm1  ;;  %v15565_v34 = vld [vmem:[#allocation50_spill] sm:$0xff] }
 0x818   : > { %v3034_v37 = vsub.f32 1.0, %v3033_v28  ;;  %v2740_v5 = vsub.f32 %v11869_v31, %v2710_v58  ;;  %8969 = vrcp.f32 %v12075_v33  ;;  %v2249_v40 = vpop.f32.mrf.mxu1  ;;  %v3030_v55 = vsel %vm12077_vm15, %v3029_v47, %v3025_v7 }
 0x819   : > { %v2792_v14 = vmul.f32 1.442695, %v2739_v18  ;;  %v3049_v51 = vsub.f32 1.0, %v3048_v48  ;;  %v2250_v54 = vadd.f32 %v2249_v40, %v15562_v35  ;;  %v3031_v52 = vmul.f32 %v11775_v46, %v3030_v55  ;;  %v15566_v48 = vld [vmem:[#allocation12_spill] sm:$0xff]  ;;  %v15567_v46 = vld [vmem:[#allocation63_spill] sm:$0xff] }
 0x81a   : > { %v3035_v50 = vmul.f32 %v8964_v61, %v3034_v37  ;;  %v12089_v49 = vpop.eup %8967  ;;  %v2794_v28 = vmul.f32 1.442695, %v2740_v5  ;;  %v3044_v37 = vor.u32 1.1754944e-38, %v3043_v15  ;;  %v12118_v15 = vsel %vm1238_vm11, %v15567_v46, -1e+30 }
 0x81b   : > { %8971 = vpow2.f32 %v2792_v14  ;;  %v2870_v42 = vsel %vm1473_vm12, %v12089_v49, 0.0  ;;  %v2325_v18 = vadd.f32 %v15565_v34, %v2250_v54  ;;  %v3050_v47 = vmul.f32 %v12068_v56, %v3049_v51  ;;  %3796 = vmax.xlane.f32.xlu2 %v3795_v41  ;;  %8447 = vmatmul.msk.f32.gmra.mxu1 %vm1473_vm12, %v3031_v52  ;;  %v12129_v51 = vpop.f32.mrf.mxu2 }
 0x81c   : > { %v3036_v43 = vadd.f32 %v8964_v61, %v3035_v50  ;;  %2871 = vadd.xlane.f32.xlu1 %v2870_v42  ;;  %8973 = vpow2.f32 %v2794_v28  ;;  %vm3053_vm4 = vweird.f32 %v12068_v56  ;;  %v3798_v54 = vsel %vm1473_vm12, %v12118_v15, -inf  ;;  %v15568_v42 = vld [vmem:[#allocation25_spill] sm:$0xff] }
 0x81d   : > { %v2391_v14 = vadd.f32 %v15566_v48, %v2325_v18  ;;  %v3051_v6 = vadd.f32 %v12068_v56, %v3050_v47  ;;  %v3058_v18 = vand.u32 2147483648, %v12048_v60  ;;  %v3056_v41 = vand.u32 2147483647, %v12048_v60  ;;  %vm12147_vm6 = vmor %vm3052_vm5, %vm3053_vm4 }
 0x81e   : > { %v12108_v59 = vpop.xlane.xlu2 %2838  ;;  %v3040_v38 = vsel %vm12099_vm2, %v8964_v61, %v3036_v43  ;;  %v12120_v58 = vpop.eup %8969  ;;  %vm3067_vm9 = vweird.f32 %v12075_v33 }
 0x81f   : > { %8975 = vrcp.f32 %v12108_v59  ;;  %v2713_v7 = vpop.xlane.xlu0 %2712  ;;  %v3045_v50 = vsel %vm3042_vm3, %v3044_v37, %v3040_v38  ;;  %v3063_v61 = vmul.f32 %v12120_v58, %v12075_v33  ;;  %8601 = vmatmul.msk.f32.gmra.mxu2 %vm588_vm0, %v2391_v14  ;;  %v12127_v40 = vpop.xlane.xlu1 %2862  ;;  %v3055_v46 = vsel %vm12147_vm6, %v12068_v56, %v3051_v6  ;;  %v15574_v6 = vld [vmem:[#allocation65_spill] sm:$0xff] }
 0x820   : > { %v2252_v35 = vpop.f32.mrf.mxu1  ;;  %v2741_v55 = vsub.f32 %v11900_v4, %v2713_v7  ;;  %v3046_v31 = vmul.f32 %v11810_v27, %v3045_v50  ;;  %8977 = vrcp.f32 %v12127_v40  ;;  %v15571_v4 = vld [vmem:[#allocation51_spill] sm:$0xff]  ;;  %v15572_v7 = vld [vmem:[#allocation64_spill] sm:$0xff]  ;;  %vm3057_vm7 = vcmp.eq.f32.partialorder %v3056_v41, 8.507059e+37 }
 0x821   : > { %v12122_v5 = vpop.eup %8971  ;;  %v3064_v28 = vsub.f32 1.0, %v3063_v61  ;;  %v2253_v43 = vadd.f32 %v2252_v35, %v15568_v42  ;;  %v12162_v50 = vsel %vm1238_vm11, %v15572_v7, -1e+30  ;;  %v15573_v35 = vld [vmem:[#allocation11_spill] sm:$0xff]  ;;  %vm3068_vm8 = vweird.f32 %v12120_v58 }
 0x822   : > { %v12138_v34 = vpop.eup %8973  ;;  %v2873_v52 = vsel %vm1473_vm12, %v12122_v5, 0.0  ;;  %v2796_v27 = vmul.f32 1.442695, %v2741_v55  ;;  %v3073_v7 = vand.u32 2147483648, %v12075_v33  ;;  %vm12197_vm10 = vmor %vm3067_vm9, %vm3068_vm8  ;;  %vm3082_vm15 = vweird.f32 %v12108_v59 }
 0x823   : > { %v2326_v38 = vadd.f32 %v15571_v4, %v2253_v43  ;;  %2874 = vadd.xlane.f32.xlu0 %v2873_v52  ;;  %v2876_v48 = vsel %vm1473_vm12, %v12138_v34, 0.0  ;;  %v3065_v14 = vmul.f32 %v12120_v58, %v3064_v28  ;;  %8448 = vmatmul.msk.f32.gmra.mxu1 %vm1473_vm12, %v3046_v31  ;;  %v3059_v28 = vor.u32 1.1754944e-38, %v3058_v18 }
 0x824   : > { %3799 = vmax.xlane.f32.xlu1 %v3798_v54  ;;  %2877 = vadd.xlane.f32.xlu2 %v2876_v48  ;;  %8979 = vpow2.f32 %v2796_v27  ;;  %v12175_v52 = vsel %vm1238_vm11, %v15574_v6, -1e+30  ;;  %vm3202_vm4 = vweird.f32 %v12127_v40 }
 0x825   : > { %v12145_v37 = vpop.eup %8975  ;;  %v2392_v55 = vadd.f32 %v15573_v35, %v2326_v38  ;;  %v3060_v27 = vsel %vm3057_vm7, %v3059_v28, %v3055_v46  ;;  %v15575_v38 = vld [vmem:[#allocation26_spill] sm:$0xff]  ;;  %v3066_v48 = vadd.f32 %v12120_v58, %v3065_v14  ;;  %v3071_v14 = vand.u32 2147483647, %v12075_v33  ;;  %v15581_v28 = vld [vmem:[#allocation53_spill] sm:$0xff] }
 0x826   : > { %v3788_v60 = vpop.xlane.xlu2 %3787  ;;  %v3078_v61 = vmul.f32 %v12145_v37, %v12108_v59  ;;  %v12181_v18 = vpop.eup %8977  ;;  %vm3083_vm14 = vweird.f32 %v12145_v37 }
 0x827   : > { %v3870_v54 = vsub.f32 %v11932_v22, %v3788_v60  ;;  %v12169_v42 = vpop.xlane.xlu0 %2865  ;;  %8602 = vmatmul.msk.f32.gmra.mxu2 %vm588_vm0, %v2392_v55  ;;  %v3791_v56 = vpop.xlane.xlu1 %3790  ;;  %v3801_v22 = vsel %vm1473_vm12, %v12162_v50, -inf  ;;  %v15576_v55 = vld [vmem:[#allocation52_spill] sm:$0xff]  ;;  %v3070_v33 = vsel %vm12197_vm10, %v12120_v58, %v3066_v48  ;;  %vm3072_vm13 = vcmp.eq.f32.partialorder %v3071_v14, 8.507059e+37  ;;  %v15580_v48 = vld [vmem:[#allocation27_spill] sm:$0xff]  ;;  %vm12236_vm1 = vmor %vm3082_vm15, %vm3083_vm14 }
 0x828   : > { %v3871_v47 = vsub.f32 %v11944_v2, %v3791_v56  ;;  %v2255_v31 = vpop.f32.mrf.mxu1  ;;  %v3079_v4 = vsub.f32 1.0, %v3078_v61  ;;  %v3740_v60 = vpop.f32.mrf.mxu2  ;;  %v3804_v2 = vsel %vm1473_vm12, %v12175_v52, -inf  ;;  %v12222_v58 = vsel %vm1238_vm11, %v12129_v51, -1e+30 }
 0x829   : > { %v3898_v43 = vmul.f32 1.442695, %v3870_v54  ;;  %v2256_v41 = vadd.f32 %v2255_v31, %v15575_v38  ;;  %v3061_v54 = vmul.f32 %v11816_v8, %v3060_v27  ;;  %v15579_v8 = vld [vmem:[#allocation10_spill] sm:$0xff]  ;;  %v3074_v31 = vor.u32 1.1754944e-38, %v3073_v7 }
 0x82a   : > { %v3900_v35 = vmul.f32 1.442695, %v3871_v47  ;;  %v12189_v46 = vpop.eup %8979  ;;  %v3080_v6 = vmul.f32 %v12145_v37, %v3079_v4  ;;  %vm3203_vm3 = vweird.f32 %v12181_v18  ;;  %vm3217_vm8 = vweird.f32 %v12169_v42 }
 0x82b   : > { %8981 = vpow2.f32 %v3898_v43  ;;  %v2327_v61 = vadd.f32 %v15576_v55, %v2256_v41  ;;  %3802 = vmax.xlane.f32.xlu0 %v3801_v22  ;;  %v3198_v43 = vmul.f32 %v12181_v18, %v12127_v40  ;;  %v2879_v56 = vsel %vm1473_vm12, %v12189_v46, 0.0  ;;  %8449 = vmatmul.msk.f32.gmra.mxu1 %vm1473_vm12, %v3061_v54  ;;  %vm3204_vm5 = vmor %vm3202_vm4, %vm3203_vm3 }
 0x82c   : > { %8983 = vrcp.f32 %v12169_v42  ;;  %3805 = vmax.xlane.f32.xlu2 %v3804_v2  ;;  %2880 = vadd.xlane.f32.xlu1 %v2879_v56 }
 0x82d   : > { %8985 = vpow2.f32 %v3900_v35  ;;  %v2393_v47 = vadd.f32 %v15579_v8, %v2327_v61  ;;  %v3199_v38 = vsub.f32 1.0, %v3198_v43  ;;  %v3075_v35 = vsel %vm3072_vm13, %v3074_v31, %v3070_v33 }
 0x82e   : > { %v3081_v61 = vadd.f32 %v12145_v37, %v3080_v6  ;;  %v3076_v56 = vmul.f32 %v11871_v24, %v3075_v35  ;;  %v3086_v8 = vand.u32 2147483647, %v12108_v59  ;;  %v3849_v31 = vsel %vm1473_vm12, %v12222_v58, -inf }
 0x82f   : > { %v3794_v27 = vpop.xlane.xlu0 %3793  ;;  %8603 = vmatmul.msk.f32.gmra.mxu2 %vm588_vm0, %v2393_v47  ;;  %v3200_v33 = vmul.f32 %v12181_v18, %v3199_v38  ;;  %v12252_v38 = vsel %vm1238_vm11, %v3740_v60, -1e+30  ;;  %v3208_v60 = vand.u32 2147483648, %v12127_v40 }
 0x830   : > { %v3872_v41 = vsub.f32 %v11966_v25, %v3794_v27  ;;  %v2258_v4 = vpop.f32.mrf.mxu1  ;;  %v3088_v25 = vand.u32 2147483648, %v12108_v59  ;;  %v3743_v47 = vpop.f32.mrf.mxu2  ;;  %v15584_v27 = vld [vmem:[#allocation13_spill] sm:$0xff]  ;;  %v3085_v59 = vsel %vm12236_vm1, %v12145_v37, %v3081_v61  ;;  %vm3087_vm2 = vcmp.eq.f32.partialorder %v3086_v8, 8.507059e+37  ;;  %v15585_v37 = vld [vmem:[#allocation28_spill] sm:$0xff] }
 0x831   : > { %v12211_v22 = vpop.eup %8981  ;;  %v2259_v7 = vadd.f32 %v2258_v4, %v15580_v48  ;;  %v12256_v35 = vsel %vm1238_vm11, %v3743_v47, -1e+30 }
 0x832   : > { %v3954_v2 = vsel %vm1473_vm12, %v12211_v22, 0.0  ;;  %v12217_v55 = vpop.eup %8983  ;;  %v3902_v14 = vmul.f32 1.442695, %v3872_v41  ;;  %v3089_v4 = vor.u32 1.1754944e-38, %v3088_v25 }
 0x833   : > { %v12227_v54 = vpop.eup %8985  ;;  %v2328_v43 = vadd.f32 %v15581_v28, %v2259_v7  ;;  %3955 = vadd.xlane.f32.xlu0 %v3954_v2  ;;  %v3213_v24 = vmul.f32 %v12217_v55, %v12169_v42  ;;  %8450 = vmatmul.msk.f32.gmra.mxu1 %vm1473_vm12, %v3076_v56  ;;  %v3201_v7 = vadd.f32 %v12181_v18, %v3200_v33  ;;  %v3852_v28 = vsel %vm1473_vm12, %v12252_v38, -inf }
 0x834   : > { %v3957_v51 = vsel %vm1473_vm12, %v12227_v54, 0.0  ;;  %8987 = vpow2.f32 %v3902_v14  ;;  %3850 = vmax.xlane.f32.xlu1 %v3849_v31  ;;  %v3090_v48 = vsel %vm3087_vm2, %v3089_v4, %v3085_v59  ;;  %v3206_v56 = vand.u32 2147483647, %v12127_v40 }
 0x835   : > { %3958 = vadd.xlane.f32.xlu2 %v3957_v51  ;;  %v2394_v41 = vadd.f32 %v15584_v27, %v2328_v43  ;;  %v3214_v14 = vsub.f32 1.0, %v3213_v24  ;;  %v3855_v43 = vsel %vm1473_vm12, %v12256_v35, -inf  ;;  %v15586_v51 = vld [vmem:[#allocation54_spill] sm:$0xff]  ;;  %v3091_v47 = vmul.f32 %v11902_v23, %v3090_v48 }
 0x836   : > { %v3205_v33 = vsel %vm3204_vm5, %v12181_v18, %v3201_v7  ;;  %v15587_v24 = vld [vmem:[#allocation14_spill] sm:$0xff]  ;;  %vm3207_vm6 = vcmp.eq.f32.partialorder %v3206_v56, 8.507059e+37  ;;  %vm3218_vm7 = vweird.f32 %v12217_v55  ;;  %v3223_v4 = vand.u32 2147483648, %v12169_v42 }
 0x837   : > { %8604 = vmatmul.msk.f32.gmra.mxu2 %vm588_vm0, %v2394_v41  ;;  %v3215_v31 = vmul.f32 %v12217_v55, %v3214_v14  ;;  %v3209_v41 = vor.u32 1.1754944e-38, %v3208_v60  ;;  %v3221_v48 = vand.u32 2147483647, %v12169_v42  ;;  %vm3219_vm9 = vmor %vm3217_vm8, %vm3218_vm7  ;;  %v1230_v7 = vmul.f32 %v15532_v17, %v10993_v20 }
 0x838   : > { %v2261_v2 = vpop.f32.mrf.mxu1  ;;  %v3746_v40 = vpop.f32.mrf.mxu2  ;;  %v1228_v42 = vmul.f32 %v15532_v17, %v11013_v39  ;;  %v1227_v20 = vmul.f32 %v15532_v17, %v11020_v19  ;;  %v1224_v39 = vmul.f32 %v15532_v17, %v11062_v30 }
 0x839   : > { %v2262_v61 = vadd.f32 %v2261_v2, %v15585_v37  ;;  %v3210_v23 = vsel %vm3207_vm6, %v3209_v41, %v3205_v33  ;;  %v12282_v59 = vsel %vm1238_vm11, %v3746_v40, -1e+30  ;;  %v3216_v18 = vadd.f32 %v12217_v55, %v3215_v31 }
 0x83a   : > { %v12262_v25 = vpop.eup %8987  ;;  %v3211_v2 = vmul.f32 %v11907_v26, %v3210_v23  ;;  %v3858_v14 = vsel %vm1473_vm12, %v12282_v59, -inf  ;;  %v1229_v26 = vmul.f32 %v15532_v17, %v11000_v63  ;;  %vm3222_vm10 = vcmp.eq.f32.partialorder %v3221_v48, 8.507059e+37 }
 0x83b   : > { %v2329_v8 = vadd.f32 %v15586_v51, %v2262_v61  ;;  %3853 = vmax.xlane.f32.xlu0 %v3852_v28  ;;  %v3960_v6 = vsel %vm1473_vm12, %v12262_v25, 0.0  ;;  %8451 = vmatmul.msk.f32.gmra.mxu1 %vm1473_vm12, %v3091_v47  ;;  %v3220_v37 = vsel %vm3219_vm9, %v12217_v55, %v3216_v18  ;;  %v3224_v61 = vor.u32 1.1754944e-38, %v3223_v4 }
 0x83c   : > { %3961 = vadd.xlane.f32.xlu1 %v3960_v6  ;;  %v1226_v55 = vmul.f32 %v15532_v17, %v11033_v21  ;;  %v1225_v63 = vmul.f32 %v15532_v17, %v11039_v29 }
 0x83d   : > { %3856 = vmax.xlane.f32.xlu2 %v3855_v43  ;;  %v2395_v27 = vadd.f32 %v15587_v24, %v2329_v8  ;;  %v3225_v60 = vsel %vm3222_vm10, %v3224_v61, %v3220_v37  ;;  %v12310_v43 = vpop.f32.mrf.mxu3 }
 0x83e   : > { %v3226_v28 = vmul.f32 %v11946_v1, %v3225_v60 }
 0x83f   : > { %8605 = vmatmul.msk.f32.gmra.mxu2 %vm588_vm0, %v2395_v27 }
 0x840   : > { %v12312_v56 = vpop.f32.mrf.mxu1 }
 0x843   : > { %8466 = vmatmul.msk.f32.vlgmr.msrb.gmra.mxu1 %vm1473_vm12, %v3211_v2 }
 0x844   : > { %3859 = vmax.xlane.f32.xlu1 %v3858_v14  ;;  %4672 = vmatpush.msrb.mxu1 %v1230_v7  ;;  %v3749_v14 = vpop.f32.mrf.mxu2 }
 0x845   : > { %v12314_v21 = vpop.f32.mrf.mxu3 }
 0x846   : > { %4673 = vmatpush.msrb.mxu1 %v1229_v26 }
 0x848   : > { %4674 = vmatpush.msrb.mxu1 %v1228_v42 }
 0x84a   : > { %4675 = vmatpush.msrb.mxu1 %v1227_v20 }
 0x84b   : > { %8467 = vmatmul.msk.f32.gmra.mxu1 %vm1473_vm12, %v3226_v28 }
 0x84c   : > { %4676 = vmatpush.msrb.mxu1 %v1226_v55 }
 0x84d   : > { %v12326_v37 = vpop.f32.mrf.mxu3 }
 0x84e   : > { %4677 = vmatpush.msrb.mxu1 %v1225_v63 }
 0x850   : > { %4678 = vmatpush.msrb.mxu1 %v1224_v39 }
 0x886   : > { %v2869_v19 = vpop.xlane.xlu2 %2868 }
 0x887   : > { %8989 = vrcp.f32 %v2869_v19  ;;  %v3238_v24 = vand.u32 2147483648, %v2869_v19  ;;  %v3236_v41 = vand.u32 2147483647, %v2869_v19  ;;  %vm3232_vm14 = vweird.f32 %v2869_v19 }
 0x889   : > { %v3239_v48 = vor.u32 1.1754944e-38, %v3238_v24  ;;  %vm3237_vm1 = vcmp.eq.f32.partialorder %v3236_v41, 8.507059e+37 }
 0x88d   : > { %v8990_v1 = vpop.eup %8989 }
 0x88e   : > { %v3228_v8 = vmul.f32 %v8990_v1, %v2869_v19  ;;  %v3797_v47 = vpop.xlane.xlu2 %3796  ;;  %vm3233_vm13 = vweird.f32 %v8990_v1 }
 0x88f   : > { %v2872_v51 = vpop.xlane.xlu1 %2871  ;;  %v3873_v29 = vsub.f32 %v12066_v12, %v3797_v47  ;;  %v12317_v6 = vpop.f32.mrf.mxu1  ;;  %vm3234_vm15 = vmor %vm3232_vm14, %vm3233_vm13 }
 0x890   : > { %8991 = vrcp.f32 %v2872_v51  ;;  %v3229_v33 = vsub.f32 1.0, %v3228_v8  ;;  %v3253_v61 = vand.u32 2147483648, %v2872_v51  ;;  %v3251_v55 = vand.u32 2147483647, %v2872_v51 }
 0x891   : > { %v3904_v30 = vmul.f32 1.442695, %v3873_v29  ;;  %vm3247_vm3 = vweird.f32 %v2872_v51 }
 0x892   : > { %v3230_v31 = vmul.f32 %v8990_v1, %v3229_v33  ;;  %vm3252_vm5 = vcmp.eq.f32.partialorder %v3251_v55, 8.507059e+37 }
 0x893   : > { %8993 = vpow2.f32 %v3904_v30 }
 0x894   : > { %v3231_v40 = vadd.f32 %v8990_v1, %v3230_v31 }
 0x896   : > { %v8992_v27 = vpop.eup %8991  ;;  %v12319_v4 = vpop.xlane.xlu0 %2874  ;;  %v3235_v42 = vsel %vm3234_vm15, %v8990_v1, %v3231_v40  ;;  %v3254_v1 = vor.u32 1.1754944e-38, %v3253_v61 }
 0x897   : > { %v3243_v23 = vmul.f32 %v8992_v27, %v2872_v51  ;;  %v3800_v18 = vpop.xlane.xlu1 %3799  ;;  %v12321_v2 = vpop.xlane.xlu2 %2877  ;;  %8995 = vrcp.f32 %v12319_v4  ;;  %vm3248_vm2 = vweird.f32 %v8992_v27  ;;  %vm3262_vm7 = vweird.f32 %v12319_v4 }
 0x898   : > { %v3874_v12 = vsub.f32 %v12118_v15, %v3800_v18  ;;  %8997 = vrcp.f32 %v12321_v2  ;;  %v12330_v28 = vpop.f32.mrf.mxu1  ;;  %v3240_v15 = vsel %vm3237_vm1, %v3239_v48, %v3235_v42  ;;  %vm3249_vm4 = vmor %vm3247_vm3, %vm3248_vm2  ;;  %v3752_v42 = vpop.f32.mrf.mxu2  ;;  %vm3277_vm13 = vweird.f32 %v12321_v2 }
 0x899   : > { %v3244_v7 = vsub.f32 1.0, %v3243_v23  ;;  %v12328_v60 = vpop.eup %8993  ;;  %v3241_v63 = vmul.f32 %v12054_v11, %v3240_v15 }
 0x89a   : > { %v3906_v26 = vmul.f32 1.442695, %v3874_v12  ;;  %v3963_v39 = vsel %vm1473_vm12, %v12328_v60, 0.0  ;;  %v12349_v12 = vsel %vm1238_vm11, %v3749_v14, -1e+30  ;;  %v3268_v14 = vand.u32 2147483648, %v12319_v4 }
 0x89b   : > { %v3245_v20 = vmul.f32 %v8992_v27, %v3244_v7  ;;  %8468 = vmatmul.msk.f32.gmra.mxu1 %vm1473_vm12, %v3241_v63  ;;  %3964 = vadd.xlane.f32.xlu0 %v3963_v39  ;;  %v3861_v15 = vsel %vm1473_vm12, %v12349_v12, -inf  ;;  %v12365_v63 = vsel %vm1238_vm11, %v3752_v42, -1e+30 }
 0x89c   : > { %8999 = vpow2.f32 %v3906_v26 }
 0x89d   : > { %v3246_v19 = vadd.f32 %v8992_v27, %v3245_v20  ;;  %v8996_v8 = vpop.eup %8995  ;;  %v4851_v20 = vpop.f32.mrf.mxu3 }
 0x89e   : > { %v12336_v47 = vpop.eup %8997  ;;  %v3258_v29 = vmul.f32 %v8996_v8, %v12319_v4  ;;  %v3803_v33 = vpop.xlane.xlu0 %3802  ;;  %vm3263_vm6 = vweird.f32 %v8996_v8 }
 0x89f   : > { %v3250_v30 = vsel %vm3249_vm4, %v8992_v27, %v3246_v19  ;;  %v3273_v11 = vmul.f32 %v12336_v47, %v12321_v2  ;;  %v3806_v51 = vpop.xlane.xlu2 %3805  ;;  %v3875_v31 = vsub.f32 %v12162_v50, %v3803_v33  ;;  %v12343_v23 = vpop.xlane.xlu1 %2880  ;;  %vm12368_vm8 = vmor %vm3262_vm7, %vm3263_vm6  ;;  %vm3278_vm10 = vweird.f32 %v12336_v47 }
 0x8a0   : > { %v3255_v24 = vsel %vm3252_vm5, %v3254_v1, %v3250_v30  ;;  %v3259_v40 = vsub.f32 1.0, %v3258_v29  ;;  %v3876_v41 = vsub.f32 %v12175_v52, %v3806_v51  ;;  %9001 = vrcp.f32 %v12343_v23  ;;  %v12353_v26 = vpop.f32.mrf.mxu1  ;;  %vm12407_vm14 = vmor %vm3277_vm13, %vm3278_vm10 }
 0x8a1   : > { %v3274_v27 = vsub.f32 1.0, %v3273_v11  ;;  %v3256_v48 = vmul.f32 %v12089_v49, %v3255_v24  ;;  %v3908_v50 = vmul.f32 1.442695, %v3875_v31  ;;  %v3266_v49 = vand.u32 2147483647, %v12319_v4 }
 0x8a2   : > { %v12345_v18 = vpop.eup %8999  ;;  %v3260_v7 = vmul.f32 %v8996_v8, %v3259_v40  ;;  %v3910_v61 = vmul.f32 1.442695, %v3876_v41  ;;  %v3269_v4 = vor.u32 1.1754944e-38, %v3268_v14  ;;  %v3864_v24 = vsel %vm1473_vm12, %v12365_v63, -inf }
 0x8a3   : > { %v3966_v52 = vsel %vm1473_vm12, %v12345_v18, 0.0  ;;  %8469 = vmatmul.msk.f32.gmra.mxu1 %vm1473_vm12, %v3256_v48  ;;  %3862 = vmax.xlane.f32.xlu0 %v3861_v15  ;;  %v3275_v39 = vmul.f32 %v12336_v47, %v3274_v27  ;;  %vm3267_vm9 = vcmp.eq.f32.partialorder %v3266_v49, 8.507059e+37  ;;  %vm3292_vm2 = vweird.f32 %v12343_v23 }
 0x8a4   : > { %3967 = vadd.xlane.f32.xlu2 %v3966_v52  ;;  %9003 = vpow2.f32 %v3910_v61  ;;  %v3261_v55 = vadd.f32 %v8996_v8, %v3260_v7  ;;  %v3296_v49 = vand.u32 2147483647, %v12343_v23  ;;  %v3409_v3 = vadd.f32 %v15613_v16, %v12353_v26 }
 0x8a5   : > { %9005 = vpow2.f32 %v3908_v50  ;;  %v3276_v48 = vadd.f32 %v12336_v47, %v3275_v39  ;;  %v3281_v50 = vand.u32 2147483647, %v12321_v2 }
 0x8a6   : > { %v12372_v1 = vpop.xlane.xlu0 %3955  ;;  %v12374_v29 = vpop.eup %9001  ;;  %v3265_v33 = vsel %vm12368_vm8, %v8996_v8, %v3261_v55  ;;  %vm3297_vm4 = vcmp.eq.f32.partialorder %v3296_v49, 8.507059e+37 }
 0x8a7   : > { %9007 = vrcp.f32 %v12372_v1  ;;  %v3288_v30 = vmul.f32 %v12374_v29, %v12343_v23  ;;  %v3851_v51 = vpop.xlane.xlu1 %3850  ;;  %v3270_v8 = vsel %vm3267_vm9, %v3269_v4, %v3265_v33  ;;  %v4854_v55 = vpop.f32.mrf.mxu3  ;;  %v3280_v33 = vsel %vm12407_vm14, %v12336_v47, %v3276_v48 }
 0x8a8   : > { %v12381_v11 = vpop.xlane.xlu2 %3958  ;;  %v3891_v31 = vsub.f32 %v12222_v58, %v3851_v51  ;;  %v12389_v27 = vpop.f32.mrf.mxu1  ;;  %v3283_v58 = vand.u32 2147483648, %v12321_v2  ;;  %v3271_v52 = vmul.f32 %v12122_v5, %v3270_v8  ;;  %v12421_v51 = vsel %vm1238_vm11, %v4851_v20, -1e+30 }
 0x8a9   : > { %v3289_v41 = vsub.f32 1.0, %v3288_v30  ;;  %9009 = vrcp.f32 %v12381_v11  ;;  %v3755_v2 = vpop.f32.mrf.mxu2  ;;  %vm3282_vm15 = vcmp.eq.f32.partialorder %v3281_v50, 8.507059e+37  ;;  %vm3293_vm1 = vweird.f32 %v12374_v29 }
 0x8aa   : > { %v12386_v40 = vpop.eup %9003  ;;  %v3940_v61 = vmul.f32 1.442695, %v3891_v31  ;;  %v3284_v4 = vor.u32 1.1754944e-38, %v3283_v58  ;;  %v12425_v31 = vsel %vm1238_vm11, %v3755_v2, -1e+30  ;;  %v4963_v50 = vsel %vm1473_vm12, %v12421_v51, -inf  ;;  %vm12446_vm3 = vmor %vm3292_vm2, %vm3293_vm1 }
 0x8ab   : > { %v12392_v7 = vpop.eup %9005  ;;  %v3972_v42 = vsel %vm1473_vm12, %v12386_v40, 0.0  ;;  %v3290_v5 = vmul.f32 %v12374_v29, %v3289_v41  ;;  %8470 = vmatmul.msk.f32.gmra.mxu1 %vm1473_vm12, %v3271_v52  ;;  %v3298_v52 = vand.u32 2147483648, %v12343_v23  ;;  %vm4043_vm6 = vweird.f32 %v12372_v1  ;;  %v15594_v2 = vld [vmem:[#allocation55_spill] sm:$0xff] }
 0x8ac   : > { %3865 = vmax.xlane.f32.xlu2 %v3864_v24  ;;  %v3969_v14 = vsel %vm1473_vm12, %v12392_v7, 0.0  ;;  %9011 = vpow2.f32 %v3940_v61  ;;  %3973 = vadd.xlane.f32.xlu0 %v3972_v42  ;;  %v3285_v41 = vsel %vm3282_vm15, %v3284_v4, %v3280_v33  ;;  %vm4058_vm10 = vweird.f32 %v12381_v11 }
 0x8ad   : > { %v12403_v15 = vpop.eup %9007  ;;  %3970 = vadd.xlane.f32.xlu1 %v3969_v14  ;;  %v3291_v20 = vadd.f32 %v12374_v29, %v3290_v5  ;;  %v3286_v42 = vmul.f32 %v12138_v34, %v3285_v41  ;;  %v3867_v34 = vsel %vm1473_vm12, %v12425_v31, -inf  ;;  %v3299_v4 = vor.u32 1.1754944e-38, %v3298_v52 }
 0x8ae   : > { %v4039_v39 = vmul.f32 %v12403_v15, %v12372_v1  ;;  %v3854_v19 = vpop.xlane.xlu0 %3853  ;;  %vm4044_vm5 = vweird.f32 %v12403_v15  ;;  %v4049_v52 = vand.u32 2147483648, %v12372_v1 }
 0x8af   : > { %v3892_v30 = vsub.f32 %v12252_v38, %v3854_v19  ;;  %v12427_v24 = vpop.xlane.xlu1 %3961  ;;  %v12429_v8 = vpop.eup %9009  ;;  %v3295_v23 = vsel %vm12446_vm3, %v12374_v29, %v3291_v20  ;;  %vm12488_vm7 = vmor %vm4043_vm6, %vm4044_vm5 }
 0x8b0   : > { %v4040_v47 = vsub.f32 1.0, %v4039_v39  ;;  %v3857_v48 = vpop.xlane.xlu2 %3856  ;;  %v12432_v38 = vpop.f32.mrf.mxu1  ;;  %9013 = vrcp.f32 %v12427_v24  ;;  %v4054_v5 = vmul.f32 %v12429_v8, %v12381_v11  ;;  %vm4059_vm9 = vweird.f32 %v12429_v8 }
 0x8b1   : > { %v3942_v58 = vmul.f32 1.442695, %v3892_v30  ;;  %v3893_v39 = vsub.f32 %v12256_v35, %v3857_v48  ;;  %v4857_v33 = vpop.f32.mrf.mxu3  ;;  %v12462_v35 = vsel %vm1238_vm11, %v4854_v55, -1e+30  ;;  %v3300_v48 = vsel %vm3297_vm4, %v3299_v4, %v3295_v23  ;;  %vm12523_vm13 = vmor %vm4058_vm10, %vm4059_vm9 }
 0x8b2   : > { %v12435_v61 = vpop.eup %9011  ;;  %v4041_v19 = vmul.f32 %v12403_v15, %v4040_v47  ;;  %v4055_v30 = vsub.f32 1.0, %v4054_v5  ;;  %v12469_v47 = vsel %vm1238_vm11, %v12008_v10, -1e+30  ;;  %v4966_v55 = vsel %vm1473_vm12, %v12462_v35, -inf }
 0x8b3   : > { %v4017_v14 = vsel %vm1473_vm12, %v12435_v61, 0.0  ;;  %9015 = vpow2.f32 %v3942_v58  ;;  %8471 = vmatmul.msk.f32.gmra.mxu1 %vm1473_vm12, %v3286_v42  ;;  %v3944_v41 = vmul.f32 1.442695, %v3893_v39  ;;  %v3301_v10 = vmul.f32 %v12189_v46, %v3300_v48  ;;  %v15597_v48 = vld [vmem:[#allocation16_spill] sm:$0xff] }
 0x8b4   : > { %4964 = vmax.xlane.f32.xlu0 %v4963_v50  ;;  %4018 = vadd.xlane.f32.xlu2 %v4017_v14  ;;  %v4042_v50 = vadd.f32 %v12403_v15, %v4041_v19  ;;  %v4047_v14 = vand.u32 2147483647, %v12372_v1  ;;  %v3400_v5 = vadd.f32 %v15594_v2, %v12312_v56  ;;  %v4056_v39 = vmul.f32 %v12429_v8, %v4055_v30 }
 0x8b5   : > { %3868 = vmax.xlane.f32.xlu1 %v3867_v34  ;;  %9017 = vpow2.f32 %v3944_v41  ;;  %v4942_v19 = vsel %vm1473_vm12, %v12469_v47, -inf  ;;  %v4050_v23 = vor.u32 1.1754944e-38, %v4049_v52  ;;  %v12504_v4 = vsel %vm1238_vm11, %v12013_v62, -1e+30 }
 0x8b6   : > { %v12464_v58 = vpop.eup %9013  ;;  %v4046_v46 = vsel %vm12488_vm7, %v12403_v15, %v4042_v50  ;;  %vm4048_vm8 = vcmp.eq.f32.partialorder %v4047_v14, 8.507059e+37  ;;  %v12508_v30 = vsel %vm1238_vm11, %v4857_v33, -1e+30  ;;  %v3479_v50 = vadd.f32 %v15597_v48, %v3400_v5  ;;  %v15598_v5 = vld [vmem:[#allocation56_spill] sm:$0xff]  ;;  %v15603_v48 = vld [vmem:[#allocation43_spill] sm:$0xff] }
 0x8b7   : > { %v3860_v42 = vpop.xlane.xlu1 %3859  ;;  %v4069_v1 = vmul.f32 %v12464_v58, %v12427_v24  ;;  %v4051_v41 = vsel %vm4048_vm8, %v4050_v23, %v4046_v46  ;;  %v4057_v52 = vadd.f32 %v12429_v8, %v4056_v39  ;;  %v4064_v62 = vand.u32 2147483648, %v12381_v11  ;;  %v15601_v39 = vld [vmem:[#allocation41_spill] sm:$0xff]  ;;  %v15602_v23 = vld [vmem:[#allocation42_spill] sm:$0xff] }
 0x8b8   : > { %v12473_v29 = vpop.f32.mrf.mxu1  ;;  %v3894_v56 = vsub.f32 %v12282_v59, %v3860_v42  ;;  %v4969_v33 = vsel %vm1473_vm12, %v12508_v30, -inf  ;;  %v4062_v2 = vand.u32 2147483647, %v12381_v11  ;;  %v3403_v34 = vadd.f32 %v15598_v5, %v12317_v6  ;;  %v15605_v5 = vld [vmem:[#allocation44_spill] sm:$0xff] }
 0x8b9   : > { %v12475_v20 = vpop.eup %9015  ;;  %v4860_v15 = vpop.f32.mrf.mxu3  ;;  %v4070_v59 = vsub.f32 1.0, %v4069_v1  ;;  %v1054_v46 = vmul.f32 %v15551_v44, %v15601_v39  ;;  %v4945_v1 = vsel %vm1473_vm12, %v12504_v4, -inf  ;;  %v4061_v11 = vsel %vm12523_vm13, %v12429_v8, %v4057_v52 }
 0x8ba   : > { %v4020_v49 = vsel %vm1473_vm12, %v12475_v20, 0.0  ;;  %vm4063_vm14 = vcmp.eq.f32.partialorder %v4062_v2, 8.507059e+37  ;;  %vm4074_vm15 = vweird.f32 %v12464_v58  ;;  %vm4073_vm1 = vweird.f32 %v12427_v24 }
 0x8bb   : > { %8472 = vmatmul.msk.f32.gmra.mxu1 %vm1473_vm12, %v3301_v10  ;;  %v12513_v14 = vpop.eup %9017  ;;  %vm12565_vm2 = vmor %vm4073_vm1, %vm4074_vm15 }
 0x8bc   : > { %4967 = vmax.xlane.f32.xlu0 %v4966_v55  ;;  %4021 = vadd.xlane.f32.xlu2 %v4020_v49  ;;  %v3946_v55 = vmul.f32 1.442695, %v3894_v56  ;;  %v4052_v49 = vmul.f32 %v12211_v22, %v4051_v41  ;;  %v4071_v22 = vmul.f32 %v12464_v58, %v4070_v59  ;;  %v4023_v6 = vsel %vm1473_vm12, %v12513_v14, 0.0  ;;  %v15604_v59 = vld [vmem:[#allocation15_spill] sm:$0xff] }
 0x8bd   : > { %4943 = vmax.xlane.f32.xlu1 %v4942_v19  ;;  %v4065_v56 = vor.u32 1.1754944e-38, %v4064_v62  ;;  %v1053_v41 = vmul.f32 %v15551_v44, %v15602_v23  ;;  %v12553_v62 = vsel %vm1238_vm11, %v12018_v9, -1e+30 }
 0x8be   : > { %9019 = vpow2.f32 %v3946_v55  ;;  %v3480_v55 = vadd.f32 %v15604_v59, %v3403_v34  ;;  %v4072_v52 = vadd.f32 %v12464_v58, %v4071_v22  ;;  %v1051_v34 = vmul.f32 %v15551_v44, %v15605_v5  ;;  %v15608_v22 = vld [vmem:[#allocation45_spill] sm:$0xff]  ;;  %v15610_v59 = vld [vmem:[#allocation47_spill] sm:$0xff] }
 0x8c0   : > { %v3524_v42 = vpop.f32.mrf.mxu1 }
 0x8c1   : > { %v3545_v10 = vadd.f32 %v3524_v42, %v3479_v50  ;;  %v1052_v50 = vmul.f32 %v15551_v44, %v15603_v48  ;;  %v4066_v42 = vsel %vm4063_vm14, %v4065_v56, %v4061_v11 }
 0x8c2   : > { %v4067_v19 = vmul.f32 %v12227_v54, %v4066_v42  ;;  %v4948_v54 = vsel %vm1473_vm12, %v12553_v62, -inf }
 0x8c3   : > { %8606 = vmatmul.msk.f32.gmra.mxu2 %vm588_vm0, %v3545_v10  ;;  %8515 = vmatmul.msk.f32.vlgmr.msra.gmra.mxu1 %vm1473_vm12, %v4052_v49  ;;  %v12546_v10 = vsel %vm1238_vm11, %v4860_v15, -1e+30  ;;  %v4079_v49 = vand.u32 2147483648, %v12427_v24 }
 0x8c4   : > { %4970 = vmax.xlane.f32.xlu0 %v4969_v33  ;;  %5703 = vmatpush.msra.mxu1 %v1054_v46  ;;  %v4863_v33 = vpop.f32.mrf.mxu3  ;;  %v12558_v15 = vpop.eup %9019  ;;  %v4077_v46 = vand.u32 2147483647, %v12427_v24  ;;  %v4972_v9 = vsel %vm1473_vm12, %v12546_v10, -inf  ;;  %v4076_v24 = vsel %vm12565_vm2, %v12464_v58, %v4072_v52  ;;  %v12591_v58 = vsel %vm1238_vm11, %v12037_v32, -1e+30 }
 0x8c5   : > { %4946 = vmax.xlane.f32.xlu1 %v4945_v1  ;;  %4024 = vadd.xlane.f32.xlu2 %v4023_v6  ;;  %v1050_v6 = vmul.f32 %v15551_v44, %v15608_v22  ;;  %v4080_v11 = vor.u32 1.1754944e-38, %v4079_v49  ;;  %v4026_v56 = vsel %vm1473_vm12, %v12558_v15, 0.0  ;;  %v12606_v32 = vsel %vm1238_vm11, %v12310_v43, -1e+30 }
 0x8c6   : > { %5704 = vmatpush.msra.mxu1 %v1053_v41  ;;  %v15609_v41 = vld [vmem:[#allocation46_spill] sm:$0xff]  ;;  %vm4078_vm3 = vcmp.eq.f32.partialorder %v4077_v46, 8.507059e+37 }
 0x8c7   : > { %v4081_v42 = vsel %vm4078_vm3, %v4080_v11, %v4076_v24 }
 0x8c8   : > { %v3527_v8 = vpop.f32.mrf.mxu1  ;;  %5705 = vmatpush.msra.mxu1 %v1052_v50  ;;  %v1049_v50 = vmul.f32 %v15551_v44, %v15609_v41  ;;  %v4082_v52 = vmul.f32 %v12262_v25, %v4081_v42 }
 0x8c9   : > { %v3546_v2 = vadd.f32 %v3527_v8, %v3480_v55  ;;  %v1048_v55 = vmul.f32 %v15551_v44, %v15610_v59  ;;  %v12586_v8 = vsel %vm1238_vm11, %v4863_v33, -1e+30  ;;  %v4951_v44 = vsel %vm1473_vm12, %v12591_v58, -inf }
 0x8ca   : > { %5706 = vmatpush.msra.mxu1 %v1051_v34  ;;  %v4975_v49 = vsel %vm1473_vm12, %v12586_v8, -inf  ;;  %v4954_v34 = vsel %vm1473_vm12, %v12606_v32, -inf }
 0x8cb   : > { %8607 = vmatmul.msk.f32.gmra.mxu2 %vm588_vm0, %v3546_v2  ;;  %8516 = vmatmul.msk.f32.gmra.mxu1 %vm1473_vm12, %v4067_v19 }
 0x8cc   : > { %4973 = vmax.xlane.f32.xlu0 %v4972_v9  ;;  %5707 = vmatpush.msra.mxu1 %v1050_v6  ;;  %v4866_v2 = vpop.f32.mrf.mxu3  ;;  %v12619_v9 = vsel %vm1238_vm11, %v12314_v21, -1e+30  ;;  %v12628_v6 = vsel %vm1238_vm11, %v12326_v37, -1e+30 }
 0x8cd   : > { %4949 = vmax.xlane.f32.xlu1 %v4948_v54  ;;  %4027 = vadd.xlane.f32.xlu2 %v4026_v56  ;;  %v12601_v33 = vsel %vm1238_vm11, %v4866_v2, -1e+30  ;;  %v4957_v1 = vsel %vm1473_vm12, %v12619_v9, -inf  ;;  %v4960_v24 = vsel %vm1473_vm12, %v12628_v6, -inf }
 0x8ce   : > { %5708 = vmatpush.msra.mxu1 %v1049_v50  ;;  %v4978_v25 = vsel %vm1473_vm12, %v12601_v33, -inf }
 0x8d0   : > { %5709 = vmatpush.msra.mxu1 %v1048_v55 }
 0x8d3   : > { %8517 = vmatmul.msk.f32.gmra.mxu1 %vm1473_vm12, %v4082_v52  ;;  %v15611_v52 = vld [vmem:[#allocation57_spill] sm:$0xff] }
 0x8d4   : > { %4976 = vmax.xlane.f32.xlu0 %v4975_v49  ;;  %v4869_v19 = vpop.f32.mrf.mxu3  ;;  %v3406_v49 = vadd.f32 %v15611_v52, %v12330_v28 }
 0x8d5   : > { %4952 = vmax.xlane.f32.xlu1 %v4951_v44  ;;  %v12614_v46 = vsel %vm1238_vm11, %v4869_v19, -1e+30 }
 0x8d6   : > { %v4981_v43 = vsel %vm1473_vm12, %v12614_v46, -inf }
 0x8dc   : > { %4979 = vmax.xlane.f32.xlu0 %v4978_v25  ;;  %v4872_v54 = vpop.f32.mrf.mxu3 }
 0x8dd   : > { %4955 = vmax.xlane.f32.xlu1 %v4954_v34  ;;  %v12634_v21 = vsel %vm1238_vm11, %v4872_v54, -1e+30 }
 0x8de   : > { %v4984_v11 = vsel %vm1473_vm12, %v12634_v21, -inf }
 0x8e4   : > { %4982 = vmax.xlane.f32.xlu0 %v4981_v43  ;;  %v12638_v56 = vpop.f32.mrf.mxu3  ;;  %v15612_v43 = vld [vmem:[#allocation19_spill] sm:$0xff] }
 0x8e5   : > { %4958 = vmax.xlane.f32.xlu1 %v4957_v1  ;;  %v3481_v1 = vadd.f32 %v15612_v43, %v3406_v49 }
 0x8ec   : > { %v12640_v50 = vpop.f32.mrf.mxu3 }
 0x8ed   : > { %4961 = vmax.xlane.f32.xlu1 %v4960_v24 }
 0x8f4   : > { %v12642_v55 = vpop.f32.mrf.mxu3 }
 0x8f5   : > { %4985 = vmax.xlane.f32.xlu1 %v4984_v11 }
 0x8fc   : > { %v12644_v42 = vpop.f32.mrf.mxu3 }
 0x904   : > { %v12653_v49 = vpop.f32.mrf.mxu3 }
 0x90e   : > { %v3965_v37 = vpop.xlane.xlu0 %3964 }
 0x90f   : > { %9021 = vrcp.f32 %v3965_v37  ;;  %v4094_v53 = vand.u32 2147483648, %v3965_v37  ;;  %v4092_v52 = vand.u32 2147483647, %v3965_v37  ;;  %vm4088_vm5 = vweird.f32 %v3965_v37 }
 0x911   : > { %v4095_v26 = vor.u32 1.1754944e-38, %v4094_v53  ;;  %vm4093_vm7 = vcmp.eq.f32.partialorder %v4092_v52, 8.507059e+37 }
 0x915   : > { %v9022_v44 = vpop.eup %9021 }
 0x916   : > { %v4084_v25 = vmul.f32 %v9022_v44, %v3965_v37  ;;  %v3863_v34 = vpop.xlane.xlu0 %3862  ;;  %vm4089_vm4 = vweird.f32 %v9022_v44 }
 0x917   : > { %v3968_v2 = vpop.xlane.xlu2 %3967  ;;  %v3895_v19 = vsub.f32 %v12349_v12, %v3863_v34  ;;  %vm12655_vm6 = vmor %vm4088_vm5, %vm4089_vm4 }
 0x918   : > { %9023 = vrcp.f32 %v3968_v2  ;;  %v4085_v54 = vsub.f32 1.0, %v4084_v25  ;;  %v3530_v24 = vpop.f32.mrf.mxu1  ;;  %vm4103_vm9 = vweird.f32 %v3968_v2 }
 0x919   : > { %v3948_v11 = vmul.f32 1.442695, %v3895_v19  ;;  %v3547_v13 = vadd.f32 %v3530_v24, %v3481_v1 }
 0x91a   : > { %v4086_v0 = vmul.f32 %v9022_v44, %v4085_v54 }
 0x91b   : > { %9025 = vpow2.f32 %v3948_v11  ;;  %8608 = vmatmul.msk.f32.gmra.mxu2 %vm588_vm0, %v3547_v13  ;;  %v15616_v13 = vld [vmem:[#allocation17_spill] sm:$0xff] }
 0x91c   : > { %v4087_v34 = vadd.f32 %v9022_v44, %v4086_v0  ;;  %v3482_v54 = vadd.f32 %v15616_v13, %v3409_v3  ;;  %v4109_v0 = vand.u32 2147483648, %v3968_v2 }
 0x91e   : > { %v9024_v28 = vpop.eup %9023  ;;  %v4091_v37 = vsel %vm12655_vm6, %v9022_v44, %v4087_v34  ;;  %v4110_v52 = vor.u32 1.1754944e-38, %v4109_v0 }
 0x91f   : > { %v4099_v57 = vmul.f32 %v9024_v28, %v3968_v2  ;;  %v3866_v12 = vpop.xlane.xlu2 %3865  ;;  %v12662_v1 = vpop.xlane.xlu0 %3973  ;;  %vm4104_vm8 = vweird.f32 %v9024_v28  ;;  %v4096_v45 = vsel %vm4093_vm7, %v4095_v26, %v4091_v37 }
 0x920   : > { %v3896_v16 = vsub.f32 %v12365_v63, %v3866_v12  ;;  %v12660_v43 = vpop.xlane.xlu1 %3970  ;;  %v3533_v53 = vpop.f32.mrf.mxu1  ;;  %v4097_v3 = vmul.f32 %v12328_v60, %v4096_v45  ;;  %vm4105_vm10 = vmor %vm4103_vm9, %vm4104_vm8  ;;  %vm4133_vm4 = vweird.f32 %v12662_v1 }
 0x921   : > { %v4100_v19 = vsub.f32 1.0, %v4099_v57  ;;  %9027 = vrcp.f32 %v12660_v43  ;;  %v4107_v57 = vand.u32 2147483647, %v3968_v2  ;;  %v12669_v63 = vpop.eup %9025  ;;  %v3548_v12 = vadd.f32 %v3533_v53, %v3482_v54 }
 0x922   : > { %v3950_v24 = vmul.f32 1.442695, %v3896_v16  ;;  %9029 = vrcp.f32 %v12662_v1  ;;  %15617 = vst [vmem:[#allocation32_spill] sm:$0xff] %v12669_v63  ;;  %v4029_v44 = vsel %vm1473_vm12, %v12669_v63, 0.0  ;;  %8518 = vmatmul.msk.f32.gmra.mxu1 %vm1473_vm12, %v4097_v3  ;;  %v15621_v63 = vld [vmem:[#allocation60_spill] sm:$0xff]  ;;  %vm4118_vm15 = vweird.f32 %v12660_v43 }
 0x923   : > { %v4101_v11 = vmul.f32 %v9024_v28, %v4100_v19  ;;  %8609 = vmatmul.msk.f32.gmra.mxu2 %vm588_vm0, %v3548_v12  ;;  %4030 = vadd.xlane.f32.xlu2 %v4029_v44  ;;  %vm4108_vm13 = vcmp.eq.f32.partialorder %v4107_v57, 8.507059e+37  ;;  %v15618_v19 = vld [vmem:[#allocation59_spill] sm:$0xff]  ;;  %v15620_v12 = vld [vmem:[#allocation18_spill] sm:$0xff] }
 0x924   : > { %9031 = vpow2.f32 %v3950_v24  ;;  %v3412_v26 = vadd.f32 %v15618_v19, %v12389_v27  ;;  %v12690_v24 = vpop.f32.mrf.mxu3 }
 0x925   : > { %v4102_v34 = vadd.f32 %v9024_v28, %v4101_v11  ;;  %15619 = vst [vmem:[#allocation33_spill] sm:$0xff] %v12690_v24  ;;  %v3415_v24 = vadd.f32 %v15621_v63, %v12432_v38 }
 0x926   : > { %v3483_v3 = vadd.f32 %v15620_v12, %v3412_v26 }
 0x927   : > { %v4106_v25 = vsel %vm4105_vm10, %v9024_v28, %v4102_v34  ;;  %v9028_v16 = vpop.eup %9027  ;;  %v12681_v60 = vpop.xlane.xlu2 %4018 }
 0x928   : > { %v4111_v2 = vsel %vm4108_vm13, %v4110_v52, %v4106_v25  ;;  %v12678_v13 = vpop.eup %9029  ;;  %v4114_v45 = vmul.f32 %v9028_v16, %v12660_v43  ;;  %v12683_v54 = vpop.xlane.xlu0 %4964  ;;  %9033 = vrcp.f32 %v12681_v60  ;;  %vm4119_vm14 = vweird.f32 %v9028_v16 }
 0x929   : > { %v4129_v0 = vmul.f32 %v12678_v13, %v12662_v1  ;;  %v3869_v28 = vpop.xlane.xlu1 %3868  ;;  %v4112_v53 = vmul.f32 %v12345_v18, %v4111_v2  ;;  %v3536_v44 = vpop.f32.mrf.mxu1  ;;  %v4124_v25 = vand.u32 2147483648, %v12660_v43  ;;  %vm4120_vm1 = vmor %vm4118_vm15, %vm4119_vm14  ;;  %vm4134_vm2 = vweird.f32 %v12678_v13 }
 0x92a   : > { %v12685_v37 = vpop.eup %9031  ;;  %v4115_v27 = vsub.f32 1.0, %v4114_v45  ;;  %v3897_v11 = vsub.f32 %v12425_v31, %v3869_v28  ;;  %v3549_v45 = vadd.f32 %v3536_v44, %v3483_v3  ;;  %v4122_v31 = vand.u32 2147483647, %v12660_v43  ;;  %vm12728_vm5 = vmor %vm4133_vm4, %vm4134_vm2 }
 0x92b   : > { %v4130_v57 = vsub.f32 1.0, %v4129_v0  ;;  %v4032_v34 = vsel %vm1473_vm12, %v12685_v37, 0.0  ;;  %8519 = vmatmul.msk.f32.gmra.mxu1 %vm1473_vm12, %v4112_v53  ;;  %v4125_v0 = vor.u32 1.1754944e-38, %v4124_v25  ;;  %vm4358_vm8 = vweird.f32 %v12681_v60 }
 0x92c   : > { %v4116_v52 = vmul.f32 %v9028_v16, %v4115_v27  ;;  %v3952_v19 = vmul.f32 1.442695, %v3897_v11  ;;  %4033 = vadd.xlane.f32.xlu2 %v4032_v34  ;;  %8610 = vmatmul.msk.f32.gmra.mxu2 %vm588_vm0, %v3549_v45  ;;  %v15622_v27 = vld [vmem:[#allocation29_spill] sm:$0xff]  ;;  %vm4123_vm3 = vcmp.eq.f32.partialorder %v4122_v31, 8.507059e+37  ;;  %v4139_v34 = vand.u32 2147483648, %v12662_v1 }
 0x92d   : > { %v4131_v18 = vmul.f32 %v12678_v13, %v4130_v57  ;;  %v3484_v11 = vadd.f32 %v15622_v27, %v3415_v24  ;;  %v4137_v31 = vand.u32 2147483647, %v12662_v1 }
 0x92e   : > { %9035 = vpow2.f32 %v3952_v19  ;;  %v4117_v26 = vadd.f32 %v9028_v16, %v4116_v52  ;;  %v12704_v2 = vpop.eup %9033  ;;  %v4893_v19 = vpop.f32.mrf.mxu3 }
 0x92f   : > { %v4354_v38 = vmul.f32 %v12704_v2, %v12681_v60  ;;  %v12709_v63 = vpop.xlane.xlu2 %4021  ;;  %v4132_v44 = vadd.f32 %v12678_v13, %v4131_v18  ;;  %vm4138_vm6 = vcmp.eq.f32.partialorder %v4137_v31, 8.507059e+37  ;;  %vm4359_vm7 = vweird.f32 %v12704_v2 }
 0x930   : > { %v4121_v28 = vsel %vm4120_vm1, %v9028_v16, %v4117_v26  ;;  %9037 = vrcp.f32 %v12709_v63  ;;  %v12715_v12 = vpop.xlane.xlu0 %4967  ;;  %vm12766_vm9 = vmor %vm4358_vm8, %vm4359_vm7  ;;  %vm4373_vm14 = vweird.f32 %v12709_v63 }
 0x931   : > { %v4944_v43 = vpop.xlane.xlu1 %4943  ;;  %v4355_v53 = vsub.f32 1.0, %v4354_v38  ;;  %v4126_v3 = vsel %vm4123_vm3, %v4125_v0, %v4121_v28  ;;  %v3539_v52 = vpop.f32.mrf.mxu1  ;;  %v4136_v1 = vsel %vm12728_vm5, %v12678_v13, %v4132_v44  ;;  %v4140_v38 = vor.u32 1.1754944e-38, %v4139_v34 }
 0x932   : > { %v5026_v57 = vsub.f32 %v12469_v47, %v4944_v43  ;;  %v4127_v16 = vmul.f32 %v12392_v7, %v4126_v3  ;;  %v3550_v45 = vadd.f32 %v3539_v52, %v3484_v11  ;;  %v15623_v47 = vld [vmem:[#allocation61_spill] sm:$0xff]  ;;  %v12747_v43 = vsel %vm1238_vm11, %v12638_v56, -1e+30  ;;  %v15626_v11 = vld [vmem:[#allocation34_spill] sm:$0xff] }
 0x933   : > { %v3418_v26 = vadd.f32 %v15623_v47, %v12473_v29  ;;  %v4356_v0 = vmul.f32 %v12704_v2, %v4355_v53  ;;  %v4364_v52 = vand.u32 2147483648, %v12681_v60 }
 0x934   : > { %v12720_v25 = vpop.eup %9035  ;;  %v5054_v24 = vmul.f32 1.442695, %v5026_v57  ;;  %8520 = vmatmul.msk.f32.gmra.mxu1 %vm1473_vm12, %v4127_v16  ;;  %8611 = vmatmul.msk.f32.gmra.mxu2 %vm588_vm0, %v3550_v45  ;;  %v4141_v57 = vsel %vm4138_vm6, %v4140_v38, %v4136_v1 }
 0x935   : > { %v4035_v7 = vsel %vm1473_vm12, %v12720_v25, 0.0  ;;  %v3485_v53 = vadd.f32 %v15626_v11, %v3418_v26  ;;  %v4357_v13 = vadd.f32 %v12704_v2, %v4356_v0  ;;  %v4142_v26 = vmul.f32 %v12386_v40, %v4141_v57 }
 0x936   : > { %9039 = vpow2.f32 %v5054_v24  ;;  %4036 = vadd.xlane.f32.xlu2 %v4035_v7  ;;  %v12739_v29 = vpop.eup %9037  ;;  %v4362_v24 = vand.u32 2147483647, %v12681_v60  ;;  %v4896_v0 = vpop.f32.mrf.mxu3  ;;  %v5033_v40 = vsub.f32 %v12421_v51, %v12683_v54  ;;  %v4365_v38 = vor.u32 1.1754944e-38, %v4364_v52 }
 0x937   : > { %v4369_v28 = vmul.f32 %v12739_v29, %v12709_v63  ;;  %v4361_v60 = vsel %vm12766_vm9, %v12704_v2, %v4357_v13  ;;  %vm4374_vm13 = vweird.f32 %v12739_v29  ;;  %v12792_v57 = vsel %vm1238_vm11, %v4893_v19, -1e+30 }
 0x938   : > { %v12753_v34 = vpop.xlane.xlu2 %4024  ;;  %v4971_v31 = vpop.xlane.xlu0 %4970  ;;  %vm4363_vm10 = vcmp.eq.f32.partialorder %v4362_v24, 8.507059e+37  ;;  %v5068_v11 = vmul.f32 1.442695, %v5033_v40  ;;  %v4379_v13 = vand.u32 2147483648, %v12709_v63  ;;  %vm12809_vm15 = vmor %vm4373_vm14, %vm4374_vm13 }
 0x939   : > { %v4947_v27 = vpop.xlane.xlu1 %4946  ;;  %v4370_v3 = vsub.f32 1.0, %v4369_v28  ;;  %9041 = vrcp.f32 %v12753_v34  ;;  %v3542_v56 = vpop.f32.mrf.mxu1  ;;  %v4366_v2 = vsel %vm4363_vm10, %v4365_v38, %v4361_v60  ;;  %v1235_v60 = vmul.f32 %v15532_v17, %v15603_v48 }
 0x93a   : > { %v5027_v44 = vsub.f32 %v12504_v4, %v4947_v27  ;;  %v3551_v47 = vadd.f32 %v3542_v56, %v3485_v53  ;;  %v4987_v4 = vsel %vm1473_vm12, %v12747_v43, -inf  ;;  %v12784_v27 = vsel %vm1238_vm11, %v4896_v0, -1e+30 }
 0x93b   : > { %v4371_v1 = vmul.f32 %v12739_v29, %v4370_v3  ;;  %v5034_v3 = vsub.f32 %v12462_v35, %v12715_v12  ;;  %v4367_v56 = vmul.f32 %v12435_v61, %v4366_v2  ;;  %v5008_v19 = vsel %vm1473_vm12, %v12784_v27, -inf }
 0x93c   : > { %v12758_v16 = vpop.eup %9039  ;;  %v5056_v45 = vmul.f32 1.442695, %v5027_v44  ;;  %8521 = vmatmul.msk.f32.gmra.mxu1 %vm1473_vm12, %v4142_v26  ;;  %8612 = vmatmul.msk.f32.gmra.mxu2 %vm588_vm0, %v3551_v47  ;;  %v5035_v35 = vsub.f32 %v12508_v30, %v4971_v31  ;;  %v1237_v12 = vmul.f32 %v15532_v17, %v15601_v39  ;;  %v5005_v39 = vsel %vm1473_vm12, %v12792_v57, -inf }
 0x93d   : > { %v5110_v7 = vsel %vm1473_vm12, %v12758_v16, 0.0  ;;  %v4372_v53 = vadd.f32 %v12739_v29, %v4371_v1  ;;  %v4380_v31 = vor.u32 1.1754944e-38, %v4379_v13  ;;  %v5070_v18 = vmul.f32 1.442695, %v5034_v3 }
 0x93e   : > { %9043 = vpow2.f32 %v5056_v45  ;;  %5111 = vadd.xlane.f32.xlu0 %v5110_v7  ;;  %4988 = vmax.xlane.f32.xlu2 %v4987_v4  ;;  %v4377_v45 = vand.u32 2147483647, %v12709_v63  ;;  %v1236_v7 = vmul.f32 %v15532_v17, %v15602_v23  ;;  %v5072_v0 = vmul.f32 1.442695, %v5035_v35 }
 0x93f   : > { %v12780_v28 = vpop.eup %9041  ;;  %v4376_v30 = vsel %vm12809_vm15, %v12739_v29, %v4372_v53  ;;  %v1234_v29 = vmul.f32 %v15532_v17, %v15605_v5  ;;  %v12839_v38 = vsel %vm1238_vm11, %v12640_v50, -1e+30  ;;  %v4394_v5 = vand.u32 2147483648, %v12753_v34 }
 0x940   : > { %v4384_v51 = vmul.f32 %v12780_v28, %v12753_v34  ;;  %v12798_v44 = vpop.xlane.xlu2 %4027  ;;  %v12820_v4 = vpop.xlane.xlu0 %4973  ;;  %vm4378_vm1 = vcmp.eq.f32.partialorder %v4377_v45, 8.507059e+37  ;;  %vm4389_vm2 = vweird.f32 %v12780_v28  ;;  %vm4388_vm3 = vweird.f32 %v12753_v34 }
 0x941   : > { %v4950_v54 = vpop.xlane.xlu1 %4949  ;;  %9045 = vrcp.f32 %v12798_v44  ;;  %v4381_v40 = vsel %vm4378_vm1, %v4380_v31, %v4376_v30  ;;  %v4392_v13 = vand.u32 2147483647, %v12753_v34  ;;  %v4990_v3 = vsel %vm1473_vm12, %v12839_v38, -inf  ;;  %vm12860_vm4 = vmor %vm4388_vm3, %vm4389_vm2 }
 0x942   : > { %v4385_v24 = vsub.f32 1.0, %v4384_v51  ;;  %9047 = vpow2.f32 %v5068_v11  ;;  %v5028_v26 = vsub.f32 %v12553_v62, %v4950_v54  ;;  %v4899_v62 = vpop.f32.mrf.mxu3  ;;  %v4382_v53 = vmul.f32 %v12475_v20, %v4381_v40 }
 0x943   : > { %v12845_v48 = vsel %vm1238_vm11, %v4899_v62, -1e+30  ;;  %9049 = vpow2.f32 %v5070_v18  ;;  %v1233_v45 = vmul.f32 %v15532_v17, %v15608_v22  ;;  %v4395_v34 = vor.u32 1.1754944e-38, %v4394_v5 }
 0x944   : > { %v12800_v52 = vpop.eup %9043  ;;  %v4386_v63 = vmul.f32 %v12780_v28, %v4385_v24  ;;  %8529 = vmatmul.msk.f32.vlgmr.msrb.gmra.mxu1 %vm1473_vm12, %v4367_v56  ;;  %v5058_v23 = vmul.f32 1.442695, %v5028_v26  ;;  %9051 = vpow2.f32 %v5072_v0  ;;  %v5011_v20 = vsel %vm1473_vm12, %v12845_v48, -inf }
 0x945   : > { %v5113_v61 = vsel %vm1473_vm12, %v12800_v52, 0.0  ;;  %5828 = vmatpush.msrb.mxu1 %v1237_v12  ;;  %v1232_v22 = vmul.f32 %v15532_v17, %v15609_v41  ;;  %vm4393_vm5 = vcmp.eq.f32.partialorder %v4392_v13, 8.507059e+37  ;;  %v4409_v41 = vand.u32 2147483648, %v12798_v44 }
 0x946   : > { %5009 = vmax.xlane.f32.xlu0 %v5008_v19  ;;  %5114 = vadd.xlane.f32.xlu1 %v5113_v61  ;;  %v4387_v11 = vadd.f32 %v12780_v28, %v4386_v63  ;;  %9053 = vpow2.f32 %v5058_v23  ;;  %vm4403_vm7 = vweird.f32 %v12798_v44  ;;  %v5036_v0 = vsub.f32 %v12546_v10, %v12820_v4 }
 0x947   : > { %5006 = vmax.xlane.f32.xlu2 %v5005_v39  ;;  %5829 = vmatpush.msrb.mxu1 %v1236_v7  ;;  %v12834_v1 = vpop.eup %9045 }
 0x948   : > { %v4399_v51 = vmul.f32 %v12834_v1, %v12798_v44  ;;  %v12850_v54 = vpop.eup %9047  ;;  %v4977_v12 = vpop.xlane.xlu0 %4976  ;;  %vm4404_vm6 = vweird.f32 %v12834_v1  ;;  %v5074_v10 = vmul.f32 1.442695, %v5036_v0 }
 0x949   : > { %v4953_v2 = vpop.xlane.xlu1 %4952  ;;  %5830 = vmatpush.msrb.mxu1 %v1235_v60  ;;  %v5131_v47 = vsel %vm1473_vm12, %v12850_v54, 0.0  ;;  %v12877_v61 = vpop.eup %9049  ;;  %vm4405_vm8 = vmor %vm4403_vm7, %vm4404_vm6 }
 0x94a   : > { %v5029_v50 = vsub.f32 %v12591_v58, %v4953_v2  ;;  %v4400_v24 = vsub.f32 1.0, %v4399_v51  ;;  %v4391_v58 = vsel %vm12860_vm4, %v12780_v28, %v4387_v11  ;;  %v1231_v28 = vmul.f32 %v15532_v17, %v15610_v59  ;;  %v12883_v39 = vpop.eup %9051  ;;  %v4902_v59 = vpop.f32.mrf.mxu3 }
 0x94b   : > { %5831 = vmatpush.msrb.mxu1 %v1234_v29  ;;  %v4396_v63 = vsel %vm4393_vm5, %v4395_v34, %v4391_v58  ;;  %v4407_v17 = vand.u32 2147483647, %v12798_v44  ;;  %v5134_v62 = vsel %vm1473_vm12, %v12877_v61, 0.0  ;;  %v5137_v60 = vsel %vm1473_vm12, %v12883_v39, 0.0 }
 0x94c   : > { %8530 = vmatmul.msk.f32.gmra.mxu1 %vm1473_vm12, %v4382_v53  ;;  %v4401_v19 = vmul.f32 %v12834_v1, %v4400_v24  ;;  %v5060_v35 = vmul.f32 1.442695, %v5029_v50  ;;  %v12886_v31 = vpop.eup %9053  ;;  %v4397_v18 = vmul.f32 %v12513_v14, %v4396_v63  ;;  %v4410_v29 = vor.u32 1.1754944e-38, %v4409_v41 }
 0x94d   : > { %5832 = vmatpush.msrb.mxu1 %v1233_v45  ;;  %v5116_v44 = vsel %vm1473_vm12, %v12886_v31, 0.0  ;;  %vm4408_vm9 = vcmp.eq.f32.partialorder %v4407_v17, 8.507059e+37  ;;  %v12907_v2 = vsel %vm1238_vm11, %v12642_v55, -1e+30  ;;  %v5037_v11 = vsub.f32 %v12586_v8, %v4977_v12 }
 0x94e   : > { %4991 = vmax.xlane.f32.xlu0 %v4990_v3  ;;  %5012 = vmax.xlane.f32.xlu1 %v5011_v20  ;;  %v4402_v30 = vadd.f32 %v12834_v1, %v4401_v19  ;;  %9055 = vpow2.f32 %v5060_v35  ;;  %v4993_v13 = vsel %vm1473_vm12, %v12907_v2, -inf }
 0x94f   : > { %5132 = vadd.xlane.f32.xlu2 %v5131_v47  ;;  %5833 = vmatpush.msrb.mxu1 %v1232_v22 }
 0x950   : > { %v4406_v14 = vsel %vm4405_vm8, %v12834_v1, %v4402_v30  ;;  %v4980_v4 = vpop.xlane.xlu0 %4979  ;;  %v12911_v1 = vsel %vm1238_vm11, %v4902_v59, -1e+30 }
 0x951   : > { %v4956_v26 = vpop.xlane.xlu1 %4955  ;;  %5834 = vmatpush.msrb.mxu1 %v1231_v28  ;;  %v4411_v40 = vsel %vm4408_vm9, %v4410_v29, %v4406_v14  ;;  %v5038_v51 = vsub.f32 %v12601_v33, %v4980_v4  ;;  %v5014_v55 = vsel %vm1473_vm12, %v12911_v1, -inf }
 0x952   : > { %v5030_v7 = vsub.f32 %v12606_v32, %v4956_v26  ;;  %v4412_v5 = vmul.f32 %v12558_v15, %v4411_v40  ;;  %v4905_v8 = vpop.f32.mrf.mxu3  ;;  %v5076_v15 = vmul.f32 1.442695, %v5037_v11 }
 0x953   : > { %v5078_v3 = vmul.f32 1.442695, %v5038_v51  ;;  %v12925_v33 = vsel %vm1238_vm11, %v4905_v8, -1e+30 }
 0x954   : > { %8531 = vmatmul.msk.f32.gmra.mxu1 %vm1473_vm12, %v4397_v18  ;;  %v5062_v32 = vmul.f32 1.442695, %v5030_v7  ;;  %v12902_v23 = vpop.eup %9055  ;;  %v5017_v45 = vsel %vm1473_vm12, %v12925_v33, -inf }
 0x955   : > { %v5119_v53 = vsel %vm1473_vm12, %v12902_v23, 0.0 }
 0x956   : > { %5135 = vadd.xlane.f32.xlu0 %v5134_v62  ;;  %5138 = vadd.xlane.f32.xlu1 %v5137_v60  ;;  %9057 = vpow2.f32 %v5062_v32 }
 0x957   : > { %5117 = vadd.xlane.f32.xlu2 %v5116_v44  ;;  %9059 = vpow2.f32 %v5074_v10  ;;  %v15633_v44 = vld [vmem:[#allocation33_spill] sm:$0xff] }
 0x958   : > { %9061 = vpow2.f32 %v5076_v15  ;;  %v4983_v12 = vpop.xlane.xlu0 %4982 }
 0x959   : > { %v4959_v50 = vpop.xlane.xlu1 %4958  ;;  %9063 = vpow2.f32 %v5078_v3  ;;  %v5039_v26 = vsub.f32 %v12614_v46, %v4983_v12 }
 0x95a   : > { %v5031_v20 = vsub.f32 %v12619_v9, %v4959_v50  ;;  %v12945_v9 = vsel %vm1238_vm11, %v12644_v42, -1e+30  ;;  %v4908_v18 = vpop.f32.mrf.mxu3 }
 0x95b   : > { %v4996_v41 = vsel %vm1473_vm12, %v12945_v9, -inf  ;;  %v5080_v59 = vmul.f32 1.442695, %v5039_v26  ;;  %v12962_v46 = vsel %vm1238_vm11, %v4908_v18, -1e+30 }
 0x95c   : > { %8532 = vmatmul.msk.f32.gmra.mxu1 %vm1473_vm12, %v4412_v5  ;;  %v12927_v56 = vpop.eup %9057  ;;  %v5064_v22 = vmul.f32 1.442695, %v5031_v20  ;;  %v5020_v60 = vsel %vm1473_vm12, %v12962_v46, -inf }
 0x95d   : > { %v12929_v24 = vpop.eup %9059  ;;  %v5122_v58 = vsel %vm1473_vm12, %v12927_v56, 0.0 }
 0x95e   : > { %5120 = vadd.xlane.f32.xlu0 %v5119_v53  ;;  %4994 = vmax.xlane.f32.xlu1 %v4993_v13  ;;  %v5140_v19 = vsel %vm1473_vm12, %v12929_v24, 0.0  ;;  %v12938_v47 = vpop.eup %9061  ;;  %9065 = vpow2.f32 %v5064_v22  ;;  %v12998_v13 = vpop.f32.mrf.mxu1 }
 0x95f   : > { %5015 = vmax.xlane.f32.xlu2 %v5014_v55  ;;  %v12940_v35 = vpop.eup %9063  ;;  %v5143_v63 = vsel %vm1473_vm12, %v12938_v47, 0.0 }
 0x960   : > { %v5146_v30 = vsel %vm1473_vm12, %v12940_v35, 0.0 }
 0x961   : > { %v4962_v34 = vpop.xlane.xlu1 %4961 }
 0x962   : > { %v5032_v28 = vsub.f32 %v12628_v6, %v4962_v34  ;;  %v12958_v6 = vsel %vm1238_vm11, %v12653_v49, -1e+30  ;;  %v4911_v11 = vpop.f32.mrf.mxu3 }
 0x963   : > { %v4999_v0 = vsel %vm1473_vm12, %v12958_v6, -inf  ;;  %v12992_v51 = vsel %vm1238_vm11, %v4911_v11, -1e+30 }
 0x964   : > { %v5066_v17 = vmul.f32 1.442695, %v5032_v28  ;;  %v12964_v7 = vpop.eup %9065  ;;  %v5023_v53 = vsel %vm1473_vm12, %v12992_v51, -inf }
 0x965   : > { %v5125_v49 = vsel %vm1473_vm12, %v12964_v7, 0.0 }
 0x966   : > { %5018 = vmax.xlane.f32.xlu0 %v5017_v45  ;;  %5123 = vadd.xlane.f32.xlu1 %v5122_v58  ;;  %9067 = vpow2.f32 %v5066_v17  ;;  %v13000_v55 = vpop.f32.mrf.mxu1 }
 0x967   : > { %5141 = vadd.xlane.f32.xlu2 %v5140_v19  ;;  %9069 = vpow2.f32 %v5080_v59 }
 0x969   : > { %v4986_v42 = vpop.xlane.xlu1 %4985 }
 0x96a   : > { %v5040_v62 = vsub.f32 %v12634_v21, %v4986_v42  ;;  %v12978_v21 = vsel %vm1238_vm11, %v15633_v44, -1e+30 }
 0x96b   : > { %v5002_v10 = vsel %vm1473_vm12, %v12978_v21, -inf }
 0x96c   : > { %v5082_v14 = vmul.f32 1.442695, %v5040_v62  ;;  %v12973_v29 = vpop.eup %9067  ;;  %v15634_v62 = vld [vmem:[#allocation32_spill] sm:$0xff] }
 0x96d   : > { %v12980_v32 = vpop.eup %9069  ;;  %v5128_v40 = vsel %vm1473_vm12, %v12973_v29, 0.0 }
 0x96e   : > { %5144 = vadd.xlane.f32.xlu0 %v5143_v63  ;;  %5147 = vadd.xlane.f32.xlu1 %v5146_v30  ;;  %9071 = vpow2.f32 %v5082_v14  ;;  %v5149_v4 = vsel %vm1473_vm12, %v12980_v32, 0.0  ;;  %v13002_v15 = vpop.f32.mrf.mxu1 }
 0x96f   : > { %4997 = vmax.xlane.f32.xlu2 %v4996_v41 }
 0x974   : > { %v12988_v5 = vpop.eup %9071 }
 0x975   : > { %v5152_v50 = vsel %vm1473_vm12, %v12988_v5, 0.0 }
 0x976   : > { %5000 = vmax.xlane.f32.xlu0 %v4999_v0  ;;  %5021 = vmax.xlane.f32.xlu1 %v5020_v60 }
 0x977   : > { %5126 = vadd.xlane.f32.xlu2 %v5125_v49 }
 0x97e   : > { %5129 = vadd.xlane.f32.xlu0 %v5128_v40  ;;  %5003 = vmax.xlane.f32.xlu1 %v5002_v10 }
 0x97f   : > { %5150 = vadd.xlane.f32.xlu2 %v5149_v4 }
 0x986   : > { %5153 = vadd.xlane.f32.xlu0 %v5152_v50 }
 0x987   : > { %5024 = vmax.xlane.f32.xlu2 %v5023_v53 }
 0x996   : > { %v4031_v8 = vpop.xlane.xlu2 %4030 }
 0x997   : > { %9073 = vrcp.f32 %v4031_v8  ;;  %v4424_v58 = vand.u32 2147483648, %v4031_v8  ;;  %v4422_v22 = vand.u32 2147483647, %v4031_v8  ;;  %vm4418_vm10 = vweird.f32 %v4031_v8 }
 0x999   : > { %v4425_v63 = vor.u32 1.1754944e-38, %v4424_v58  ;;  %vm4423_vm14 = vcmp.eq.f32.partialorder %v4422_v22, 8.507059e+37 }
 0x99d   : > { %v9074_v3 = vpop.eup %9073 }
 0x99e   : > { %v4414_v36 = vmul.f32 %v9074_v3, %v4031_v8  ;;  %vm4419_vm11 = vweird.f32 %v9074_v3 }
 0x99f   : > { %v4034_v45 = vpop.xlane.xlu2 %4033  ;;  %v13004_v34 = vpop.f32.mrf.mxu1  ;;  %vm4420_vm13 = vmor %vm4418_vm10, %vm4419_vm11 }
 0x9a0   : > { %9075 = vrcp.f32 %v4034_v45  ;;  %v4415_v20 = vsub.f32 1.0, %v4414_v36  ;;  %v4439_v42 = vand.u32 2147483648, %v4034_v45  ;;  %v4437_v49 = vand.u32 2147483647, %v4034_v45 }
 0x9a1   : > { %vm4433_vm1 = vweird.f32 %v4034_v45 }
 0x9a2   : > { %v4416_v19 = vmul.f32 %v9074_v3, %v4415_v20  ;;  %v4440_v44 = vor.u32 1.1754944e-38, %v4439_v42  ;;  %vm4438_vm3 = vcmp.eq.f32.partialorder %v4437_v49, 8.507059e+37 }
 0x9a4   : > { %v4417_v12 = vadd.f32 %v9074_v3, %v4416_v19 }
 0x9a6   : > { %v9076_v28 = vpop.eup %9075  ;;  %v4421_v30 = vsel %vm4420_vm13, %v9074_v3, %v4417_v12 }
 0x9a7   : > { %v4429_v26 = vmul.f32 %v9076_v28, %v4034_v45  ;;  %v4426_v18 = vsel %vm4423_vm14, %v4425_v63, %v4421_v30  ;;  %vm4434_vm15 = vweird.f32 %v9076_v28 }
 0x9a8   : > { %v13006_v59 = vpop.f32.mrf.mxu1  ;;  %v4427_v0 = vmul.f32 %v15634_v62, %v4426_v18  ;;  %vm4435_vm2 = vmor %vm4433_vm1, %vm4434_vm15 }
 0x9a9   : > { %v4037_v41 = vpop.xlane.xlu2 %4036  ;;  %v4430_v17 = vsub.f32 1.0, %v4429_v26 }
 0x9aa   : > { %9077 = vrcp.f32 %v4037_v41  ;;  %8533 = vmatmul.msk.f32.gmra.mxu1 %vm1473_vm12, %v4427_v0  ;;  %v4454_v58 = vand.u32 2147483648, %v4037_v41  ;;  %v4452_v22 = vand.u32 2147483647, %v4037_v41  ;;  %vm4448_vm5 = vweird.f32 %v4037_v41 }
 0x9ab   : > { %v4431_v60 = vmul.f32 %v9076_v28, %v4430_v17 }
 0x9ac   : > { %v4455_v63 = vor.u32 1.1754944e-38, %v4454_v58  ;;  %vm4453_vm7 = vcmp.eq.f32.partialorder %v4452_v22, 8.507059e+37 }
 0x9ad   : > { %v4432_v14 = vadd.f32 %v9076_v28, %v4431_v60 }
 0x9af   : > { %v4436_v10 = vsel %vm4435_vm2, %v9076_v28, %v4432_v14 }
 0x9b0   : > { %v9078_v40 = vpop.eup %9077  ;;  %v4441_v50 = vsel %vm4438_vm3, %v4440_v44, %v4436_v10 }
 0x9b1   : > { %v4444_v4 = vmul.f32 %v9078_v40, %v4037_v41  ;;  %v5112_v11 = vpop.xlane.xlu0 %5111  ;;  %v4989_v53 = vpop.xlane.xlu2 %4988  ;;  %v4442_v20 = vmul.f32 %v12685_v37, %v4441_v50  ;;  %vm4449_vm4 = vweird.f32 %v9078_v40 }
 0x9b2   : > { %9079 = vrcp.f32 %v5112_v11  ;;  %v5041_v3 = vsub.f32 %v12747_v43, %v4989_v53  ;;  %v13011_v36 = vpop.f32.mrf.mxu1  ;;  %vm4450_vm6 = vmor %vm4448_vm5, %vm4449_vm4  ;;  %v5205_v41 = vand.u32 2147483648, %v5112_v11  ;;  %vm5199_vm9 = vweird.f32 %v5112_v11  ;;  %v15635_v53 = vld [vmem:[#allocation2_spill] sm:$0xff] }
 0x9b3   : > { %v4445_v8 = vsub.f32 1.0, %v4444_v4  ;;  %8534 = vmatmul.msk.f32.gmra.mxu1 %vm1473_vm12, %v4442_v20 }
 0x9b4   : > { %v5084_v19 = vmul.f32 1.442695, %v5041_v3 }
 0x9b5   : > { %v4446_v45 = vmul.f32 %v9078_v40, %v4445_v8  ;;  %v5206_v8 = vor.u32 1.1754944e-38, %v5205_v41  ;;  %v15637_v41 = vld [vmem:[#allocation38_spill] sm:$0xff] }
 0x9b6   : > { %9081 = vpow2.f32 %v5084_v19 }
 0x9b7   : > { %v4447_v12 = vadd.f32 %v9078_v40, %v4446_v45 }
 0x9b8   : > { %v9080_v28 = vpop.eup %9079 }
 0x9b9   : > { %v5195_v26 = vmul.f32 %v9080_v28, %v5112_v11  ;;  %v5010_v30 = vpop.xlane.xlu0 %5009  ;;  %v4451_v43 = vsel %vm4450_vm6, %v9078_v40, %v4447_v12  ;;  %v13015_v18 = vpop.xlane.xlu1 %5114  ;;  %vm5200_vm8 = vweird.f32 %v9080_v28  ;;  %v5203_v40 = vand.u32 2147483647, %v5112_v11 }
 0x9ba   : > { %v5048_v37 = vsub.f32 %v12784_v27, %v5010_v30  ;;  %v4456_v17 = vsel %vm4453_vm7, %v4455_v63, %v4451_v43  ;;  %9083 = vrcp.f32 %v13015_v18  ;;  %v5007_v62 = vpop.xlane.xlu2 %5006  ;;  %v13019_v0 = vpop.f32.mrf.mxu1  ;;  %vm5201_vm11 = vmor %vm5199_vm9, %vm5200_vm8  ;;  %vm5214_vm14 = vweird.f32 %v13015_v18 }
 0x9bb   : > { %v5196_v42 = vsub.f32 1.0, %v5195_v26  ;;  %v5047_v60 = vsub.f32 %v12792_v57, %v5007_v62  ;;  %v4457_v10 = vmul.f32 %v12720_v25, %v4456_v17  ;;  %v4556_v57 = vadd.f32 %v12998_v13, %v15635_v53 }
 0x9bc   : > { %v5098_v49 = vmul.f32 1.442695, %v5048_v37  ;;  %v13022_v14 = vpop.eup %9081  ;;  %vm5204_vm10 = vcmp.eq.f32.partialorder %v5203_v40, 8.507059e+37 }
 0x9bd   : > { %v5197_v44 = vmul.f32 %v9080_v28, %v5196_v42  ;;  %v5096_v4 = vmul.f32 1.442695, %v5047_v60  ;;  %v5155_v27 = vsel %vm1473_vm12, %v13022_v14, 0.0  ;;  %8535 = vmatmul.msk.f32.gmra.mxu1 %vm1473_vm12, %v4457_v10  ;;  %v4559_v60 = vadd.f32 %v13000_v55, %v15637_v41 }
 0x9be   : > { %9085 = vpow2.f32 %v5098_v49  ;;  %5156 = vadd.xlane.f32.xlu2 %v5155_v27  ;;  %v15638_v49 = vld [vmem:[#allocation39_spill] sm:$0xff]  ;;  %v5218_v55 = vand.u32 2147483647, %v13015_v18 }
 0x9bf   : > { %v5198_v50 = vadd.f32 %v9080_v28, %v5197_v44  ;;  %9087 = vpow2.f32 %v5096_v4  ;;  %v4562_v44 = vadd.f32 %v13002_v15, %v15638_v49  ;;  %v15639_v4 = vld [vmem:[#allocation3_spill] sm:$0xff] }
 0x9c0   : > { %v13030_v3 = vpop.eup %9083  ;;  %v4565_v27 = vadd.f32 %v13004_v34, %v15639_v4  ;;  %v15640_v34 = vld [vmem:[#allocation7_spill] sm:$0xff]  ;;  %vm5219_vm2 = vcmp.eq.f32.partialorder %v5218_v55, 8.507059e+37 }
 0x9c1   : > { %v5202_v20 = vsel %vm5201_vm11, %v9080_v28, %v5198_v50  ;;  %v4992_v25 = vpop.xlane.xlu0 %4991  ;;  %v5210_v45 = vmul.f32 %v13030_v3, %v13015_v18  ;;  %v5013_v19 = vpop.xlane.xlu1 %5012  ;;  %v15636_v28 = vld [vmem:[#allocation6_spill] sm:$0xff]  ;;  %v5220_v50 = vand.u32 2147483648, %v13015_v18  ;;  %vm5215_vm13 = vweird.f32 %v13030_v3 }
 0x9c2   : > { %v5207_v58 = vsel %vm5204_vm10, %v5206_v8, %v5202_v20  ;;  %v5042_v11 = vsub.f32 %v12839_v38, %v4992_v25  ;;  %v5049_v12 = vsub.f32 %v12845_v48, %v5013_v19  ;;  %v13037_v13 = vpop.xlane.xlu2 %5132  ;;  %v4680_v63 = vpop.f32.mrf.mxu1  ;;  %v4635_v43 = vadd.f32 %v15636_v28, %v4556_v57  ;;  %vm5216_vm15 = vmor %vm5214_vm14, %vm5215_vm13 }
 0x9c3   : > { %v5208_v22 = vmul.f32 %v12758_v16, %v5207_v58  ;;  %v5211_v30 = vsub.f32 1.0, %v5210_v45  ;;  %9089 = vrcp.f32 %v13037_v13  ;;  %v4636_v25 = vadd.f32 %v15640_v34, %v4559_v60 }
 0x9c4   : > { %v13039_v26 = vpop.eup %9085  ;;  %v5100_v37 = vmul.f32 1.442695, %v5049_v12  ;;  %v5086_v17 = vmul.f32 1.442695, %v5042_v11  ;;  %v4701_v62 = vadd.f32 %v4680_v63, %v4635_v43  ;;  %v5308_v19 = vand.u32 2147483647, %v13037_v13 }
 0x9c5   : > { %v13043_v42 = vpop.eup %9087  ;;  %v5176_v16 = vsel %vm1473_vm12, %v13039_v26, 0.0  ;;  %v5212_v38 = vmul.f32 %v13030_v3, %v5211_v30  ;;  %8578 = vmatmul.msk.f32.vlgmr.msra.gmra.mxu1 %vm1473_vm12, %v5208_v22  ;;  %v15641_v11 = vld [vmem:[#allocation9_spill] sm:$0xff]  ;;  %v5221_v63 = vor.u32 1.1754944e-38, %v5220_v50  ;;  %v5310_v30 = vand.u32 2147483648, %v13037_v13  ;;  %v15642_v43 = vld [vmem:[#allocation8_spill] sm:$0xff] }
 0x9c6   : > { %9091 = vpow2.f32 %v5100_v37  ;;  %v5173_v48 = vsel %vm1473_vm12, %v13043_v42, 0.0  ;;  %5177 = vadd.xlane.f32.xlu0 %v5176_v16  ;;  %8613 = vmatmul.msk.f32.gmra.mxu2 %vm588_vm0, %v4701_v62  ;;  %v4637_v22 = vadd.f32 %v15641_v11, %v4562_v44  ;;  %v13082_v37 = vadd.f32 %v15642_v43, %v4565_v27 }
 0x9c7   : > { %9093 = vpow2.f32 %v5086_v17  ;;  %5174 = vadd.xlane.f32.xlu1 %v5173_v48  ;;  %v5213_v20 = vadd.f32 %v13030_v3, %v5212_v38  ;;  %v13084_v17 = vpop.f32.mrf.mxu2  ;;  %vm5304_vm3 = vweird.f32 %v13037_v13  ;;  %vm13097_vm4 = vcmp.eq.f32.partialorder %v5308_v19, 8.507059e+37 }
 0x9c8   : > { %v5311_v50 = vor.u32 1.1754944e-38, %v5310_v30 }
 0x9c9   : > { %v13056_v40 = vpop.xlane.xlu0 %5135  ;;  %v9090_v10 = vpop.eup %9089  ;;  %v5217_v18 = vsel %vm5216_vm15, %v13030_v3, %v5213_v20 }
 0x9ca   : > { %v13061_v53 = vpop.xlane.xlu1 %5138  ;;  %9095 = vrcp.f32 %v13056_v40  ;;  %v5300_v57 = vmul.f32 %v9090_v10, %v13037_v13  ;;  %v13067_v8 = vpop.xlane.xlu2 %5117  ;;  %vm5305_vm1 = vweird.f32 %v9090_v10  ;;  %v5222_v38 = vsel %vm5219_vm2, %v5221_v63, %v5217_v18 }
 0x9cb   : > { %9097 = vrcp.f32 %v13061_v53  ;;  %v4683_v15 = vpop.f32.mrf.mxu1  ;;  %v5223_v13 = vmul.f32 %v12800_v52, %v5222_v38  ;;  %vm5306_vm5 = vmor %vm5304_vm3, %vm5305_vm1  ;;  %vm5319_vm6 = vweird.f32 %v13056_v40  ;;  %v5323_v34 = vand.u32 2147483647, %v13056_v40 }
 0x9cc   : > { %9099 = vrcp.f32 %v13067_v8  ;;  %v13073_v58 = vpop.eup %9091  ;;  %v5301_v45 = vsub.f32 1.0, %v5300_v57  ;;  %v4702_v28 = vadd.f32 %v4683_v15, %v4636_v25  ;;  %v5233_v11 = vand.u32 2147483647, %v13067_v8 }
 0x9cd   : > { %v13078_v12 = vpop.eup %9093  ;;  %v5179_v48 = vsel %vm1473_vm12, %v13073_v58, 0.0  ;;  %8579 = vmatmul.msk.f32.gmra.mxu1 %vm1473_vm12, %v5223_v13  ;;  %v5235_v18 = vand.u32 2147483648, %v13067_v8  ;;  %v5325_v38 = vand.u32 2147483648, %v13056_v40  ;;  %vm5334_vm7 = vweird.f32 %v13061_v53 }
 0x9ce   : > { %v5302_v62 = vmul.f32 %v9090_v10, %v5301_v45  ;;  %8614 = vmatmul.msk.f32.gmra.mxu2 %vm588_vm0, %v4702_v28  ;;  %v5158_v41 = vsel %vm1473_vm12, %v13078_v12, 0.0  ;;  %5180 = vadd.xlane.f32.xlu2 %v5179_v48  ;;  %vm5229_vm9 = vweird.f32 %v13067_v8  ;;  %v5338_v44 = vand.u32 2147483647, %v13061_v53 }
 0x9cf   : > { %5159 = vadd.xlane.f32.xlu1 %v5158_v41  ;;  %vm13142_vm11 = vcmp.eq.f32.partialorder %v5233_v11, 8.507059e+37  ;;  %vm13154_vm13 = vcmp.eq.f32.partialorder %v5323_v34, 8.507059e+37 }
 0x9d0   : > { %v13087_v16 = vpop.eup %9095  ;;  %v5303_v49 = vadd.f32 %v9090_v10, %v5302_v62  ;;  %vm13176_vm1 = vcmp.eq.f32.partialorder %v5338_v44, 8.507059e+37 }
 0x9d1   : > { %v13095_v60 = vpop.eup %9097  ;;  %v5315_v3 = vmul.f32 %v13087_v16, %v13056_v40  ;;  %v13104_v4 = vpop.xlane.xlu0 %5120  ;;  %vm5320_vm8 = vweird.f32 %v13087_v16 }
 0x9d2   : > { %v13106_v27 = vpop.eup %9099  ;;  %v5330_v55 = vmul.f32 %v13095_v60, %v13061_v53  ;;  %v4995_v57 = vpop.xlane.xlu1 %4994  ;;  %9101 = vrcp.f32 %v13104_v4  ;;  %v5307_v15 = vsel %vm5306_vm5, %v9090_v10, %v5303_v49  ;;  %vm13150_vm10 = vmor %vm5319_vm6, %vm5320_vm8  ;;  %vm5335_vm15 = vweird.f32 %v13095_v60 }
 0x9d3   : > { %v5225_v52 = vmul.f32 %v13106_v27, %v13067_v8  ;;  %v5316_v20 = vsub.f32 1.0, %v5315_v3  ;;  %v5016_v25 = vpop.xlane.xlu2 %5015  ;;  %v4686_v45 = vpop.f32.mrf.mxu1  ;;  %v5312_v19 = vsel %vm13097_vm4, %v5311_v50, %v5307_v15  ;;  %v5043_v30 = vsub.f32 %v12907_v2, %v4995_v57  ;;  %vm13194_vm4 = vmor %vm5334_vm7, %vm5335_vm15 }
 0x9d4   : > { %v5050_v63 = vsub.f32 %v12911_v1, %v5016_v25  ;;  %v5313_v10 = vmul.f32 %v12850_v54, %v5312_v19  ;;  %v5331_v43 = vsub.f32 1.0, %v5330_v55  ;;  %v4703_v1 = vadd.f32 %v4686_v45, %v4637_v22  ;;  %v13135_v3 = vpop.f32.mrf.mxu2 }
 0x9d5   : > { %v5226_v28 = vsub.f32 1.0, %v5225_v52  ;;  %v5317_v62 = vmul.f32 %v13087_v16, %v5316_v20  ;;  %v5088_v41 = vmul.f32 1.442695, %v5043_v30  ;;  %v5340_v50 = vand.u32 2147483648, %v13061_v53 }
 0x9d6   : > { %v5102_v48 = vmul.f32 1.442695, %v5050_v63  ;;  %8571 = vmatmul.msk.f32.vlgmr.msrb.gmra.mxu0 %vm1473_vm12, %v5313_v10  ;;  %v5332_v13 = vmul.f32 %v13095_v60, %v5331_v43  ;;  %8615 = vmatmul.msk.f32.gmra.mxu2 %vm588_vm0, %v4703_v1  ;;  %v5236_v15 = vor.u32 1.1754944e-38, %v5235_v18  ;;  %v5326_v19 = vor.u32 1.1754944e-38, %v5325_v38 }
 0x9d7   : > { %v5318_v49 = vadd.f32 %v13087_v16, %v5317_v62  ;;  %v5227_v2 = vmul.f32 %v13106_v27, %v5226_v28  ;;  %vm5230_vm14 = vweird.f32 %v13106_v27  ;;  %v5248_v28 = vand.u32 2147483647, %v13104_v4 }
 0x9d8   : > { %v13130_v54 = vpop.eup %9101  ;;  %9103 = vpow2.f32 %v5102_v48  ;;  %vm5231_vm2 = vmor %vm5229_vm9, %vm5230_vm14  ;;  %vm5244_vm5 = vweird.f32 %v13104_v4 }
 0x9d9   : > { %9105 = vpow2.f32 %v5088_v41  ;;  %v5240_v22 = vmul.f32 %v13130_v54, %v13104_v4  ;;  %v5019_v55 = vpop.xlane.xlu0 %5018  ;;  %v5322_v40 = vsel %vm13150_vm10, %v13087_v16, %v5318_v49  ;;  %v5228_v34 = vadd.f32 %v13106_v27, %v5227_v2 }
 0x9da   : > { %v13158_v25 = vpop.xlane.xlu1 %5123  ;;  %v5051_v45 = vsub.f32 %v12925_v33, %v5019_v55  ;;  %v5333_v33 = vadd.f32 %v13095_v60, %v5332_v13  ;;  %v5250_v16 = vand.u32 2147483648, %v13104_v4  ;;  %v5327_v48 = vsel %vm13154_vm13, %v5326_v19, %v5322_v40 }
 0x9db   : > { %v5241_v11 = vsub.f32 1.0, %v5240_v22  ;;  %9107 = vrcp.f32 %v13158_v25  ;;  %v13162_v63 = vpop.xlane.xlu2 %5141  ;;  %v4689_v30 = vpop.f32.mrf.mxu1  ;;  %v5341_v49 = vor.u32 1.1754944e-38, %v5340_v50  ;;  %vm5245_vm3 = vweird.f32 %v13130_v54 }
 0x9dc   : > { %9109 = vrcp.f32 %v13162_v63  ;;  %v5104_v43 = vmul.f32 1.442695, %v5051_v45  ;;  %v4704_v38 = vadd.f32 %v4689_v30, %v13082_v37  ;;  %v5328_v1 = vmul.f32 %v12877_v61, %v5327_v48  ;;  %vm13234_vm7 = vmor %vm5244_vm5, %vm5245_vm3 }
 0x9dd   : > { %v5242_v10 = vmul.f32 %v13130_v54, %v5241_v11  ;;  %v5232_v44 = vsel %vm5231_vm2, %v13106_v27, %v5228_v34  ;;  %vm13207_vm6 = vcmp.eq.f32.partialorder %v5248_v28, 8.507059e+37  ;;  %v5337_v22 = vsel %vm13194_vm4, %v13095_v60, %v5333_v33 }
 0x9de   : > { %v13174_v62 = vpop.eup %9103  ;;  %9111 = vpow2.f32 %v5104_v43  ;;  %8572 = vmatmul.msk.f32.gmra.mxu0 %vm1473_vm12, %v5328_v1  ;;  %v5237_v53 = vsel %vm13142_vm11, %v5236_v15, %v5232_v44  ;;  %8616 = vmatmul.msk.f32.gmra.mxu2 %vm588_vm0, %v4704_v38  ;;  %v5251_v52 = vor.u32 1.1754944e-38, %v5250_v16  ;;  %v13228_v15 = vpop.f32.mrf.mxu2  ;;  %vm5259_vm8 = vweird.f32 %v13158_v25 }
 0x9df   : > { %v13184_v41 = vpop.eup %9105  ;;  %v5243_v2 = vadd.f32 %v13130_v54, %v5242_v10  ;;  %v5182_v13 = vsel %vm1473_vm12, %v13174_v62, 0.0  ;;  %v5238_v45 = vmul.f32 %v12886_v31, %v5237_v53  ;;  %v5263_v31 = vand.u32 2147483647, %v13158_v25 }
 0x9e0   : > { %v5161_v8 = vsel %vm1473_vm12, %v13184_v41, 0.0  ;;  %5183 = vadd.xlane.f32.xlu1 %v5182_v13  ;;  %v5342_v4 = vsel %vm13176_vm1, %v5341_v49, %v5337_v22  ;;  %v5265_v10 = vand.u32 2147483648, %v13158_v25  ;;  %vm5349_vm9 = vweird.f32 %v13162_v63 }
 0x9e1   : > { %v13204_v50 = vpop.eup %9107  ;;  %v13215_v27 = vpop.xlane.xlu0 %5144  ;;  %5162 = vadd.xlane.f32.xlu0 %v5161_v8  ;;  %8580 = vmatmul.msk.f32.gmra.mxu1 %vm1473_vm12, %v5238_v45  ;;  %v5247_v34 = vsel %vm13234_vm7, %v13130_v54, %v5243_v2  ;;  %v5353_v43 = vand.u32 2147483647, %v13162_v63  ;;  %v5343_v54 = vmul.f32 %v12883_v39, %v5342_v4  ;;  %vm13277_vm14 = vcmp.eq.f32.partialorder %v5263_v31, 8.507059e+37 }
 0x9e2   : > { %v13220_v55 = vpop.eup %9109  ;;  %v5255_v20 = vmul.f32 %v13204_v50, %v13158_v25  ;;  %v13225_v57 = vpop.xlane.xlu1 %5147  ;;  %9113 = vrcp.f32 %v13215_v27  ;;  %vm5260_vm11 = vweird.f32 %v13204_v50  ;;  %v5252_v48 = vsel %vm13207_vm6, %v5251_v52, %v5247_v34  ;;  %v13288_v25 = vld [vmem:[%s15372_s8] ss:$0 sm:$0xff] }
 0x9e3   : > { %v5345_v19 = vmul.f32 %v13220_v55, %v13162_v63  ;;  %v4998_v11 = vpop.xlane.xlu2 %4997  ;;  %9115 = vrcp.f32 %v13225_v57  ;;  %vm5350_vm10 = vweird.f32 %v13220_v55  ;;  %v5253_v37 = vmul.f32 %v12902_v23, %v5252_v48  ;;  %vm13273_vm13 = vmor %vm5259_vm8, %vm5260_vm11 }
 0x9e4   : > { %v5256_v30 = vsub.f32 1.0, %v5255_v20  ;;  %v5044_v40 = vsub.f32 %v12945_v9, %v4998_v11  ;;  %v13250_v33 = vpop.eup %9111  ;;  %v5355_v9 = vand.u32 2147483648, %v13162_v63  ;;  %v5266_v13 = vor.u32 1.1754944e-38, %v5265_v10  ;;  %vm13294_vm15 = vmor %vm5349_vm9, %vm5350_vm10 }
 0x9e5   : > { %v5346_v28 = vsub.f32 1.0, %v5345_v19  ;;  %v5185_v2 = vsel %vm1473_vm12, %v13250_v33, 0.0  ;;  %vm13298_vm1 = vcmp.eq.f32.partialorder %v5353_v43, 8.507059e+37  ;;  %v5370_v4 = vand.u32 2147483648, %v13215_v27 }
 0x9e6   : > { %v5257_v16 = vmul.f32 %v13204_v50, %v5256_v30  ;;  %v5090_v18 = vmul.f32 1.442695, %v5044_v40  ;;  %8573 = vmatmul.msk.f32.gmra.mxu0 %vm1473_vm12, %v5343_v54  ;;  %v5356_v63 = vor.u32 1.1754944e-38, %v5355_v9  ;;  %vm5364_vm3 = vweird.f32 %v13215_v27 }
 0x9e7   : > { %v5347_v38 = vmul.f32 %v13220_v55, %v5346_v28  ;;  %vm5379_vm6 = vweird.f32 %v13225_v57  ;;  %v5383_v22 = vand.u32 2147483647, %v13225_v57 }
 0x9e8   : > { %v13263_v49 = vpop.eup %9113  ;;  %v5258_v1 = vadd.f32 %v13204_v50, %v5257_v16  ;;  %9117 = vpow2.f32 %v5090_v18  ;;  %v5368_v16 = vand.u32 2147483647, %v13215_v27 }
 0x9e9   : > { %v13269_v44 = vpop.eup %9115  ;;  %v5348_v61 = vadd.f32 %v13220_v55, %v5347_v38  ;;  %v5360_v23 = vmul.f32 %v13263_v49, %v13215_v27  ;;  %v5001_v53 = vpop.xlane.xlu0 %5000  ;;  %5186 = vadd.xlane.f32.xlu0 %v5185_v2  ;;  %vm5365_vm2 = vweird.f32 %v13263_v49  ;;  %8581 = vmatmul.msk.f32.gmra.mxu1 %vm1473_vm12, %v5253_v37  ;;  %v5371_v37 = vor.u32 1.1754944e-38, %v5370_v4 }
 0x9ea   : > { %v5375_v20 = vmul.f32 %v13269_v44, %v13225_v57  ;;  %v5022_v45 = vpop.xlane.xlu1 %5021  ;;  %v5045_v60 = vsub.f32 %v12958_v6, %v5001_v53  ;;  %v5262_v31 = vsel %vm13273_vm13, %v13204_v50, %v5258_v1  ;;  %v13320_v50 = vpop.f32.mrf.mxu2  ;;  %vm13335_vm4 = vmor %vm5364_vm3, %vm5365_vm2  ;;  %vm5369_vm5 = vcmp.eq.f32.partialorder %v5368_v16, 8.507059e+37 }
 0x9eb   : > { %v5361_v19 = vsub.f32 1.0, %v5360_v23  ;;  %v13308_v11 = vpop.xlane.xlu2 %5126  ;;  %v5052_v30 = vsub.f32 %v12962_v46, %v5022_v45  ;;  %v5352_v40 = vsel %vm13294_vm15, %v13220_v55, %v5348_v61  ;;  %v5267_v6 = vsel %vm13277_vm14, %v5266_v13, %v5262_v31  ;;  %v9450_v23 = vld [vmem:[%s9613_s25] sm:$0xff] }
 0x9ec   : > { %9119 = vrcp.f32 %v13308_v11  ;;  %v5376_v34 = vsub.f32 1.0, %v5375_v20  ;;  %v5092_v28 = vmul.f32 1.442695, %v5045_v60  ;;  %v5974_v55 = vadd.f32 %v13288_v25, %v13084_v17 }
 0x9ed   : > { %v5362_v46 = vmul.f32 %v13263_v49, %v5361_v19  ;;  %v5106_v10 = vmul.f32 1.442695, %v5052_v30  ;;  %v5357_v9 = vsel %vm13298_vm1, %v5356_v63, %v5352_v40  ;;  %v5268_v17 = vmul.f32 %v12927_v56, %v5267_v6 }
 0x9ee   : > { %v13323_v43 = vpop.eup %9117  ;;  %v5358_v38 = vmul.f32 %v12929_v24, %v5357_v9  ;;  %v5377_v1 = vmul.f32 %v13269_v44, %v5376_v34  ;;  %v13355_v53 = vadd.f32 %v9450_v23, %v5974_v55  ;;  %vm5380_vm7 = vweird.f32 %v13269_v44 }
 0x9ef   : > { %v5363_v18 = vadd.f32 %v13263_v49, %v5362_v46  ;;  %9121 = vpow2.f32 %v5106_v10  ;;  %v5164_v48 = vsel %vm1473_vm12, %v13323_v43, 0.0  ;;  %v5278_v31 = vand.u32 2147483647, %v13308_v11  ;;  %vm13383_vm9 = vmor %vm5379_vm6, %vm5380_vm7 }
 0x9f0   : > { %9123 = vpow2.f32 %v5092_v28  ;;  %8574 = vmatmul.msk.f32.gmra.mxu0 %vm1473_vm12, %v5358_v38  ;;  %5165 = vadd.xlane.f32.xlu2 %v5164_v48  ;;  %v5280_v63 = vand.u32 2147483648, %v13308_v11  ;;  %v5977_v46 = vadd.f32 %v13288_v25, %v13135_v3  ;;  %vm13387_vm11 = vcmp.eq.f32.partialorder %v5383_v22, 8.507059e+37 }
 0x9f1   : > { %v13344_v24 = vpop.xlane.xlu0 %5129  ;;  %v5367_v27 = vsel %vm13335_vm4, %v13263_v49, %v5363_v18  ;;  %v5385_v49 = vand.u32 2147483648, %v13225_v57  ;;  %8582 = vmatmul.msk.f32.gmra.mxu1 %vm1473_vm12, %v5268_v17  ;;  %v6087_v55 = vsel %vm588_vm0, %v13355_v53, 0.0  ;;  %vm5274_vm10 = vweird.f32 %v13308_v11 }
 0x9f2   : > { %v9120_v2 = vpop.eup %9119  ;;  %v5004_v8 = vpop.xlane.xlu1 %5003  ;;  %9125 = vrcp.f32 %v13344_v24  ;;  %v5372_v61 = vsel %vm5369_vm5, %v5371_v37, %v5367_v27  ;;  %vm5279_vm14 = vcmp.eq.f32.partialorder %v5278_v31, 8.507059e+37  ;;  %v5281_v38 = vor.u32 1.1754944e-38, %v5280_v63 }
 0x9f3   : > { %v5270_v56 = vmul.f32 %v9120_v2, %v13308_v11  ;;  %v5046_v39 = vsub.f32 %v12978_v21, %v5004_v8  ;;  %v13352_v13 = vpop.xlane.xlu2 %5150  ;;  %v5378_v21 = vadd.f32 %v13269_v44, %v5377_v1  ;;  %v5373_v19 = vmul.f32 %v12938_v47, %v5372_v61  ;;  %v13373_v40 = vpop.f32.mrf.mxu2 }
 0x9f4   : > { %9127 = vrcp.f32 %v13352_v13  ;;  %vm5275_vm8 = vweird.f32 %v9120_v2  ;;  %v5386_v28 = vor.u32 1.1754944e-38, %v5385_v49  ;;  %vm5289_vm15 = vweird.f32 %v13344_v24 }
 0x9f5   : > { %v13362_v52 = vpop.eup %9121  ;;  %v5271_v20 = vsub.f32 1.0, %v5270_v56  ;;  %v5094_v45 = vmul.f32 1.442695, %v5046_v39  ;;  %v5382_v9 = vsel %vm13383_vm9, %v13269_v44, %v5378_v21  ;;  %vm5276_vm13 = vmor %vm5274_vm10, %vm5275_vm8  ;;  %v5293_v17 = vand.u32 2147483647, %v13344_v24 }
 0x9f6   : > { %v13366_v60 = vpop.eup %9123  ;;  %v5188_v30 = vsel %vm1473_vm12, %v13362_v52, 0.0  ;;  %v5295_v37 = vand.u32 2147483648, %v13344_v24  ;;  %v5387_v27 = vsel %vm13387_vm11, %v5386_v28, %v5382_v9  ;;  %v5398_v22 = vand.u32 2147483647, %v13352_v13  ;;  %v9452_v9 = vld [vmem:[%s9613_s25 + $0x18] sm:$0xff] }
 0x9f7   : > { %v5272_v4 = vmul.f32 %v9120_v2, %v5271_v20  ;;  %9129 = vpow2.f32 %v5094_v45  ;;  %v5167_v6 = vsel %vm1473_vm12, %v13366_v60, 0.0  ;;  %v5400_v49 = vand.u32 2147483648, %v13352_v13 }
 0x9f8   : > { %v9126_v34 = vpop.eup %9125  ;;  %5168 = vadd.xlane.f32.xlu1 %v5167_v6  ;;  %8575 = vmatmul.msk.f32.gmra.mxu0 %vm1473_vm12, %v5373_v19  ;;  %v5388_v45 = vmul.f32 %v12940_v35, %v5387_v27  ;;  %vm5394_vm3 = vweird.f32 %v13352_v13  ;;  %v5296_v63 = vor.u32 1.1754944e-38, %v5295_v37  ;;  %vm5294_vm5 = vcmp.eq.f32.partialorder %v5293_v17, 8.507059e+37  ;;  %v9451_v6 = vld [vmem:[%s9613_s25 + $0x8] sm:$0xff]  ;;  %v9454_v27 = vld [vmem:[%s9613_s25 + $0x10] sm:$0xff] }
 0x9f9   : > { %v5273_v16 = vadd.f32 %v9120_v2, %v5272_v4  ;;  %v5285_v3 = vmul.f32 %v9126_v34, %v13344_v24  ;;  %5189 = vadd.xlane.f32.xlu2 %v5188_v30  ;;  %v13396_v57 = vpop.xlane.xlu0 %5153  ;;  %vm5290_vm1 = vweird.f32 %v9126_v34  ;;  %v13429_v47 = vadd.f32 %v9451_v6, %v5977_v46  ;;  %v15676_v6 = vld [vmem:[#allocation21_spill] sm:$0xff] }
 0x9fa   : > { %v9128_v18 = vpop.eup %9127  ;;  %9131 = vrcp.f32 %v13396_v57  ;;  %vm5291_vm4 = vmor %vm5289_vm15, %vm5290_vm1  ;;  %vm5399_vm7 = vcmp.eq.f32.partialorder %v5398_v22, 8.507059e+37  ;;  %v5986_v46 = vadd.f32 %v13288_v25, %v13373_v40  ;;  %vm5409_vm9 = vweird.f32 %v13396_v57 }
 0x9fb   : > { %v5390_v11 = vmul.f32 %v9128_v18, %v13352_v13  ;;  %v5286_v54 = vsub.f32 1.0, %v5285_v3  ;;  %v5025_v48 = vpop.xlane.xlu2 %5024  ;;  %v5277_v1 = vsel %vm5276_vm13, %v9120_v2, %v5273_v16  ;;  %vm5395_vm2 = vweird.f32 %v9128_v18  ;;  %v5988_v19 = vpop.f32.mrf.mxu2 }
 0x9fc   : > { %v5053_v44 = vsub.f32 %v12992_v51, %v5025_v48  ;;  %v5282_v8 = vsel %vm5279_vm14, %v5281_v38, %v5277_v1  ;;  %vm5396_vm6 = vmor %vm5394_vm3, %vm5395_vm2  ;;  %v5415_v16 = vand.u32 2147483648, %v13396_v57  ;;  %v5989_v22 = vadd.f32 %v13288_v25, %v5988_v19 }
 0x9fd   : > { %v13410_v56 = vpop.eup %9129  ;;  %v5391_v39 = vsub.f32 1.0, %v5390_v11  ;;  %v5287_v61 = vmul.f32 %v9126_v34, %v5286_v54  ;;  %v5283_v23 = vmul.f32 %v12964_v7, %v5282_v8  ;;  %v5983_v7 = vadd.f32 %v13288_v25, %v13320_v50 }
 0x9fe   : > { %v5108_v2 = vmul.f32 1.442695, %v5053_v44  ;;  %v5170_v21 = vsel %vm1473_vm12, %v13410_v56, 0.0  ;;  %v5401_v50 = vor.u32 1.1754944e-38, %v5400_v49  ;;  %v5416_v48 = vor.u32 1.1754944e-38, %v5415_v16  ;;  %v15677_v16 = vld [vmem:[#allocation5_spill] sm:$0xff] }
 0x9ff   : > { %v5392_v51 = vmul.f32 %v9128_v18, %v5391_v39  ;;  %v5288_v20 = vadd.f32 %v9126_v34, %v5287_v61  ;;  %8583 = vmatmul.msk.f32.gmra.mxu1 %vm1473_vm12, %v5283_v23  ;;  %5171 = vadd.xlane.f32.xlu0 %v5170_v21  ;;  %v13434_v38 = vadd.f32 %v9452_v9, %v5983_v7 }
 0xa00   : > { %v9132_v31 = vpop.eup %9131  ;;  %9133 = vpow2.f32 %v5108_v2  ;;  %8576 = vmatmul.msk.f32.gmra.mxu0 %vm1473_vm12, %v5388_v45  ;;  %v9455_v2 = vld [vmem:[%s9613_s25 + $0x30] sm:$0xff] }
 0xa01   : > { %v5393_v30 = vadd.f32 %v9128_v18, %v5392_v51  ;;  %v5405_v35 = vmul.f32 %v9132_v31, %v13396_v57  ;;  %6088 = vadd.xlane.f32.xlu2 %v6087_v55  ;;  %v5292_v4 = vsel %vm5291_vm4, %v9126_v34, %v5288_v20  ;;  %vm5410_vm8 = vweird.f32 %v9132_v31  ;;  %v9456_v51 = vld [vmem:[%s9613_s25 + $0x28] sm:$0xff] }
 0xa02   : > { %v5297_v13 = vsel %vm5294_vm5, %v5296_v63, %v5292_v4  ;;  %v5413_v34 = vand.u32 2147483647, %v13396_v57  ;;  %vm5411_vm11 = vmor %vm5409_vm9, %vm5410_vm8  ;;  %v6096_v40 = vsel %vm588_vm0, %v13434_v38, 0.0  ;;  %v13471_v20 = vadd.f32 %v9456_v51, %v5989_v22  ;;  %v15674_v63 = vld [vmem:[#allocation30_spill] sm:$0xff]  ;;  %v15675_v4 = vld [vmem:[#allocation40_spill] sm:$0xff] }
 0xa03   : > { %v5406_v24 = vsub.f32 1.0, %v5405_v35  ;;  %v5397_v10 = vsel %vm5396_vm6, %v9128_v18, %v5393_v30  ;;  %v5298_v28 = vmul.f32 %v12973_v29, %v5297_v13  ;;  %v6090_v29 = vsel %vm588_vm0, %v13429_v47, 0.0  ;;  %v5991_v44 = vpop.f32.mrf.mxu2 }
 0xa04   : > { %v5402_v3 = vsel %vm5399_vm7, %v5401_v50, %v5397_v10  ;;  %v5980_v18 = vadd.f32 %v13288_v25, %v13228_v15  ;;  %vm5414_vm10 = vcmp.eq.f32.partialorder %v5413_v34, 8.507059e+37  ;;  %v9453_v15 = vld [vmem:[%s9613_s25 + $0x20] sm:$0xff]  ;;  %v5992_v61 = vadd.f32 %v13288_v25, %v5991_v44 }
 0xa05   : > { %v5407_v55 = vmul.f32 %v9132_v31, %v5406_v24  ;;  %v5403_v11 = vmul.f32 %v12980_v32, %v5402_v3  ;;  %v13454_v57 = vadd.f32 %v9453_v15, %v5986_v46  ;;  %v6102_v45 = vsel %vm588_vm0, %v13471_v20, 0.0 }
 0xa06   : > { %v13438_v54 = vpop.eup %9133  ;;  %v13457_v8 = vadd.f32 %v9454_v27, %v5980_v18  ;;  %v13468_v21 = vadd.f32 %v9455_v2, %v5992_v61  ;;  %v4571_v50 = vadd.f32 %v13011_v36, %v15675_v4 }
 0xa07   : > { %v5408_v17 = vadd.f32 %v9132_v31, %v5407_v55  ;;  %8584 = vmatmul.msk.f32.gmra.mxu1 %vm1473_vm12, %v5298_v28  ;;  %6091 = vadd.xlane.f32.xlu0 %v6090_v29  ;;  %v5191_v32 = vsel %vm1473_vm12, %v13438_v54, 0.0  ;;  %v6099_v23 = vsel %vm588_vm0, %v13454_v57, 0.0 }
 0xa08   : > { %5192 = vadd.xlane.f32.xlu1 %v5191_v32  ;;  %8577 = vmatmul.msk.f32.gmra.mxu0 %vm1473_vm12, %v5403_v11  ;;  %v6093_v49 = vsel %vm588_vm0, %v13457_v8, 0.0  ;;  %v4640_v24 = vadd.f32 %v15676_v6, %v4571_v50  ;;  %v15678_v11 = vld [vmem:[#allocation31_spill] sm:$0xff] }
 0xa09   : > { %v5412_v1 = vsel %vm5411_vm11, %v9132_v31, %v5408_v17  ;;  %6097 = vadd.xlane.f32.xlu2 %v6096_v40  ;;  %v15673_v31 = vld [vmem:[#allocation4_spill] sm:$0xff] }
 0xa0a   : > { %v5417_v37 = vsel %vm5414_vm10, %v5416_v48, %v5412_v1  ;;  %v4568_v7 = vadd.f32 %v13006_v59, %v15673_v31  ;;  %v4574_v59 = vadd.f32 %v13019_v0, %v15677_v16 }
 0xa0b   : > { %v5418_v39 = vmul.f32 %v12988_v5, %v5417_v37  ;;  %v6105_v5 = vsel %vm588_vm0, %v13468_v21, 0.0 }
 0xa0c   : > { %v4639_v19 = vadd.f32 %v15674_v63, %v4568_v7  ;;  %v4641_v46 = vadd.f32 %v15678_v11, %v4574_v59 }
 0xa0f   : > { %6100 = vadd.xlane.f32.xlu0 %v6099_v23 }
 0xa10   : > { %6094 = vadd.xlane.f32.xlu1 %v6093_v49  ;;  %8585 = vmatmul.msk.f32.vlgmr.msra.gmra.mxu0 %vm1473_vm12, %v5418_v39 }
 0xa17   : > { %6106 = vadd.xlane.f32.xlu0 %v6105_v5 }
 0xa18   : > { %6103 = vadd.xlane.f32.xlu1 %v6102_v45 }
 0xa27   : > { %v4692_v30 = vpop.f32.mrf.mxu1 }
 0xa28   : > { %v4705_v35 = vadd.f32 %v4692_v30, %v4639_v19 }
 0xa2a   : > { %8617 = vmatmul.msk.f32.gmra.mxu2 %vm588_vm0, %v4705_v35 }
 0xa30   : > { %v4695_v10 = vpop.f32.mrf.mxu1 }
 0xa31   : > { %v5157_v13 = vpop.xlane.xlu2 %5156  ;;  %v4706_v28 = vadd.f32 %v4695_v10, %v4640_v24 }
 0xa32   : > { %9135 = vrcp.f32 %v5157_v13  ;;  %v5430_v18 = vand.u32 2147483648, %v5157_v13  ;;  %v5428_v48 = vand.u32 2147483647, %v5157_v13  ;;  %vm5424_vm14 = vweird.f32 %v5157_v13 }
 0xa33   : > { %8618 = vmatmul.msk.f32.gmra.mxu2 %vm588_vm0, %v4706_v28 }
 0xa34   : > { %v5431_v1 = vor.u32 1.1754944e-38, %v5430_v18  ;;  %vm5429_vm1 = vcmp.eq.f32.partialorder %v5428_v48, 8.507059e+37 }
 0xa38   : > { %v9136_v3 = vpop.eup %9135 }
 0xa39   : > { %v5420_v9 = vmul.f32 %v9136_v3, %v5157_v13  ;;  %v5178_v55 = vpop.xlane.xlu0 %5177  ;;  %vm5425_vm13 = vweird.f32 %v9136_v3 }
 0xa3a   : > { %v5175_v34 = vpop.xlane.xlu1 %5174  ;;  %9137 = vrcp.f32 %v5178_v55  ;;  %v4698_v36 = vpop.f32.mrf.mxu1  ;;  %vm5426_vm15 = vmor %vm5424_vm14, %vm5425_vm13  ;;  %v5535_v50 = vand.u32 2147483648, %v5178_v55  ;;  %vm5529_vm7 = vweird.f32 %v5178_v55  ;;  %v5533_v24 = vand.u32 2147483647, %v5178_v55 }
 0xa3b   : > { %v5421_v29 = vsub.f32 1.0, %v5420_v9  ;;  %9139 = vrcp.f32 %v5175_v34  ;;  %v4707_v17 = vadd.f32 %v4698_v36, %v4641_v46  ;;  %v5520_v51 = vand.u32 2147483648, %v5175_v34 }
 0xa3c   : > { %v5518_v45 = vand.u32 2147483647, %v5175_v34  ;;  %vm5514_vm3 = vweird.f32 %v5175_v34  ;;  %vm5534_vm9 = vcmp.eq.f32.partialorder %v5533_v24, 8.507059e+37 }
 0xa3d   : > { %v5422_v32 = vmul.f32 %v9136_v3, %v5421_v29  ;;  %8619 = vmatmul.msk.f32.gmra.mxu2 %vm588_vm0, %v4707_v17  ;;  %v5521_v63 = vor.u32 1.1754944e-38, %v5520_v51  ;;  %v13511_v51 = vpop.f32.mrf.mxu2 }
 0xa3e   : > { %vm5519_vm5 = vcmp.eq.f32.partialorder %v5518_v45, 8.507059e+37 }
 0xa3f   : > { %v5423_v40 = vadd.f32 %v9136_v3, %v5422_v32 }
 0xa40   : > { %v9138_v0 = vpop.eup %9137 }
 0xa41   : > { %v9140_v15 = vpop.eup %9139  ;;  %v5525_v37 = vmul.f32 %v9138_v0, %v5178_v55  ;;  %v5427_v44 = vsel %vm5426_vm15, %v9136_v3, %v5423_v40  ;;  %v13489_v23 = vpop.xlane.xlu2 %5180  ;;  %vm5530_vm6 = vweird.f32 %v9138_v0  ;;  %v5536_v3 = vor.u32 1.1754944e-38, %v5535_v50 }
 0xa42   : > { %v5510_v27 = vmul.f32 %v9140_v15, %v5175_v34  ;;  %v5432_v39 = vsel %vm5429_vm1, %v5431_v1, %v5427_v44  ;;  %v5160_v22 = vpop.xlane.xlu1 %5159  ;;  %9141 = vrcp.f32 %v13489_v23  ;;  %vm5515_vm2 = vweird.f32 %v9140_v15  ;;  %vm5531_vm8 = vmor %vm5529_vm7, %vm5530_vm6 }
 0xa43   : > { %v5526_v61 = vsub.f32 1.0, %v5525_v37  ;;  %v5433_v49 = vmul.f32 %v13022_v14, %v5432_v39  ;;  %9143 = vrcp.f32 %v5160_v22  ;;  %vm5516_vm4 = vmor %vm5514_vm3, %vm5515_vm2  ;;  %vm5439_vm10 = vweird.f32 %v5160_v22 }
 0xa44   : > { %v5511_v2 = vsub.f32 1.0, %v5510_v27  ;;  %v5445_v11 = vand.u32 2147483648, %v5160_v22  ;;  %v5443_v36 = vand.u32 2147483647, %v5160_v22  ;;  %v5550_v55 = vand.u32 2147483648, %v13489_v23 }
 0xa45   : > { %8586 = vmatmul.msk.f32.gmra.mxu0 %vm1473_vm12, %v5433_v49  ;;  %v5527_v31 = vmul.f32 %v9138_v0, %v5526_v61  ;;  %vm5544_vm15 = vweird.f32 %v13489_v23  ;;  %v5548_v17 = vand.u32 2147483647, %v13489_v23  ;;  %v9494_v39 = vmov 32.0  }
 0xa46   : > { %v5512_v5 = vmul.f32 %v9140_v15, %v5511_v2  ;;  %v5446_v1 = vor.u32 1.1754944e-38, %v5445_v11  ;;  %vm5444_vm2 = vcmp.eq.f32.partialorder %v5443_v36, 8.507059e+37  ;;  %v5551_v37 = vor.u32 1.1754944e-38, %v5550_v55 }
 0xa47   : > { %v5528_v35 = vadd.f32 %v9138_v0, %v5527_v31  ;;  %vm5549_vm3 = vcmp.eq.f32.partialorder %v5548_v17, 8.507059e+37 }
 0xa48   : > { %v5513_v7 = vadd.f32 %v9140_v15, %v5512_v5  ;;  %v9142_v19 = vpop.eup %9141 }
 0xa49   : > { %v9144_v14 = vpop.eup %9143  ;;  %v5540_v13 = vmul.f32 %v9142_v19, %v13489_v23  ;;  %v5532_v59 = vsel %vm5531_vm8, %v9138_v0, %v5528_v35  ;;  %vm5545_vm13 = vweird.f32 %v9142_v19 }
 0xa4a   : > { %v5517_v30 = vsel %vm5516_vm4, %v9140_v15, %v5513_v7  ;;  %v5435_v10 = vmul.f32 %v9144_v14, %v5160_v22  ;;  %vm5440_vm11 = vweird.f32 %v9144_v14  ;;  %v5537_v46 = vsel %vm5534_vm9, %v5536_v3, %v5532_v59  ;;  %vm5546_vm1 = vmor %vm5544_vm15, %vm5545_vm13 }
 0xa4b   : > { %v5522_v4 = vsel %vm5519_vm5, %v5521_v63, %v5517_v30  ;;  %v5541_v28 = vsub.f32 1.0, %v5540_v13  ;;  %vm13498_vm14 = vmor %vm5439_vm10, %vm5440_vm11  ;;  %v5538_v0 = vmul.f32 %v13039_v26, %v5537_v46 }
 0xa4c   : > { %v5523_v6 = vmul.f32 %v13043_v42, %v5522_v4  ;;  %v5436_v16 = vsub.f32 1.0, %v5435_v10 }
 0xa4d   : > { %v5542_v9 = vmul.f32 %v9142_v19, %v5541_v28 }
 0xa4e   : > { %8592 = vmatmul.msk.f32.vlgmr.msrb.gmra.mxu1 %vm1473_vm12, %v5523_v6  ;;  %v5437_v34 = vmul.f32 %v9144_v14, %v5436_v16 }
 0xa4f   : > { %v5543_v29 = vadd.f32 %v9142_v19, %v5542_v9 }
 0xa50   : > { %v5438_v42 = vadd.f32 %v9144_v14, %v5437_v34  ;;  %v13517_v34 = vpop.f32.mrf.mxu2 }
 0xa51   : > { %v5547_v15 = vsel %vm5546_vm1, %v9142_v19, %v5543_v29 }
 0xa52   : > { %v5442_v40 = vsel %vm13498_vm14, %v9144_v14, %v5438_v42  ;;  %v5552_v61 = vsel %vm5549_vm3, %v5551_v37, %v5547_v15 }
 0xa53   : > { %v5184_v32 = vpop.xlane.xlu1 %5183  ;;  %v5447_v44 = vsel %vm5444_vm2, %v5446_v1, %v5442_v40  ;;  %v5553_v2 = vmul.f32 %v13073_v58, %v5552_v61 }
 0xa54   : > { %v5163_v48 = vpop.xlane.xlu0 %5162  ;;  %9145 = vrcp.f32 %v5184_v32  ;;  %v5448_v27 = vmul.f32 %v13078_v12, %v5447_v44  ;;  %v5563_v14 = vand.u32 2147483647, %v5184_v32  ;;  %v5565_v4 = vand.u32 2147483648, %v5184_v32 }
 0xa55   : > { %9147 = vrcp.f32 %v5163_v48  ;;  %v5460_v63 = vand.u32 2147483648, %v5163_v48  ;;  %v5458_v30 = vand.u32 2147483647, %v5163_v48  ;;  %vm5454_vm6 = vweird.f32 %v5163_v48 }
 0xa56   : > { %8593 = vmatmul.msk.f32.gmra.mxu1 %vm1473_vm12, %v5538_v0  ;;  %9149 = vrcp.f32 %v9494_v39  ;;  %8587 = vmatmul.msk.f32.gmra.mxu0 %vm1473_vm12, %v5448_v27  ;;  %vm5559_vm8 = vweird.f32 %v5184_v32  ;;  %v5566_v59 = vor.u32 1.1754944e-38, %v5565_v4  ;;  %vm5564_vm10 = vcmp.eq.f32.partialorder %v5563_v14, 8.507059e+37 }
 0xa57   : > { %v5461_v24 = vor.u32 1.1754944e-38, %v5460_v63  ;;  %vm5459_vm9 = vcmp.eq.f32.partialorder %v5458_v30, 8.507059e+37 }
 0xa58   : > { %v13532_v27 = vpop.f32.mrf.mxu2 }
 0xa5a   : > { %v9146_v23 = vpop.eup %9145 }
 0xa5b   : > { %v9148_v26 = vpop.eup %9147  ;;  %v5555_v22 = vmul.f32 %v9146_v23, %v5184_v32  ;;  %vm5560_vm5 = vweird.f32 %v9146_v23 }
 0xa5c   : > { %v5187_v49 = vpop.xlane.xlu0 %5186  ;;  %v5450_v5 = vmul.f32 %v9148_v26, %v5163_v48  ;;  %v13513_v45 = vpop.eup %9149  ;;  %vm5455_vm4 = vweird.f32 %v9148_v26  ;;  %vm5561_vm11 = vmor %vm5559_vm8, %vm5560_vm5 }
 0xa5d   : > { %9151 = vrcp.f32 %v5187_v49  ;;  %v5556_v31 = vsub.f32 1.0, %v5555_v22  ;;  %v6172_v35 = vmul.f32 32.0, %v13513_v45  ;;  %vm5456_vm7 = vmor %vm5454_vm6, %vm5455_vm4  ;;  %v5580_v42 = vand.u32 2147483648, %v5187_v49 }
 0xa5e   : > { %8594 = vmatmul.msk.f32.gmra.mxu1 %vm1473_vm12, %v5553_v2  ;;  %v5451_v12 = vsub.f32 1.0, %v5450_v5  ;;  %v5578_v55 = vand.u32 2147483647, %v5187_v49  ;;  %vm5574_vm14 = vweird.f32 %v5187_v49  ;;  %vm6176_vm2 = vweird.f32 %v13513_v45 }
 0xa5f   : > { %v5557_v7 = vmul.f32 %v9146_v23, %v5556_v31  ;;  %v6173_v16 = vsub.f32 1.0, %v6172_v35  ;;  %v5581_v1 = vor.u32 1.1754944e-38, %v5580_v42 }
 0xa60   : > { %v5452_v19 = vmul.f32 %v9148_v26, %v5451_v12  ;;  %vm5579_vm1 = vcmp.eq.f32.partialorder %v5578_v55, 8.507059e+37 }
 0xa61   : > { %v5558_v50 = vadd.f32 %v9146_v23, %v5557_v7  ;;  %v6174_v17 = vmul.f32 %v13513_v45, %v6173_v16 }
 0xa62   : > { %v5453_v13 = vadd.f32 %v9148_v26, %v5452_v19 }
 0xa63   : > { %v9152_v58 = vpop.eup %9151  ;;  %v5166_v6 = vpop.xlane.xlu2 %5165  ;;  %v5562_v46 = vsel %vm5561_vm11, %v9146_v23, %v5558_v50  ;;  %v6175_v37 = vadd.f32 %v13513_v45, %v6174_v17 }
 0xa64   : > { %v5570_v10 = vmul.f32 %v9152_v58, %v5187_v49  ;;  %9153 = vrcp.f32 %v5166_v6  ;;  %v5457_v28 = vsel %vm5456_vm7, %v9148_v26, %v5453_v13  ;;  %v5567_v36 = vsel %vm5564_vm10, %v5566_v59, %v5562_v46 }
 0xa65   : > { %v5462_v9 = vsel %vm5459_vm9, %v5461_v24, %v5457_v28  ;;  %vm5575_vm13 = vweird.f32 %v9152_v58  ;;  %v5568_v18 = vmul.f32 %v13174_v62, %v5567_v36  ;;  %v5475_v61 = vand.u32 2147483648, %v5166_v6 }
 0xa66   : > { %v5571_v3 = vsub.f32 1.0, %v5570_v10  ;;  %v5463_v11 = vmul.f32 %v13184_v41, %v5462_v9  ;;  %vm5576_vm15 = vmor %vm5574_vm14, %vm5575_vm13  ;;  %v5473_v26 = vand.u32 2147483647, %v5166_v6  ;;  %v13536_v2 = vsel %vm6176_vm2, %v13513_v45, %v6175_v37 }
 0xa67   : > { %8595 = vmatmul.msk.f32.gmra.mxu1 %vm1473_vm12, %v5568_v18  ;;  %vm5469_vm4 = vweird.f32 %v5166_v6  ;;  %v5476_v7 = vor.u32 1.1754944e-38, %v5475_v61  ;;  %v5995_v24 = vadd.f32 %v13288_v25, %v13511_v51  ;;  %v9457_v61 = vld [vmem:[%s9613_s25 + $0x38] sm:$0xff] }
 0xa68   : > { %v5572_v29 = vmul.f32 %v9152_v58, %v5571_v3  ;;  %8588 = vmatmul.msk.f32.gmra.mxu0 %vm1473_vm12, %v5463_v11  ;;  %vm5474_vm6 = vcmp.eq.f32.partialorder %v5473_v26, 8.507059e+37 }
 0xa6a   : > { %v9154_v32 = vpop.eup %9153  ;;  %v5573_v48 = vadd.f32 %v9152_v58, %v5572_v29 }
 0xa6b   : > { %v13523_v40 = vpop.xlane.xlu1 %5168  ;;  %v5465_v0 = vmul.f32 %v9154_v32, %v5166_v6  ;;  %vm5470_vm3 = vweird.f32 %v9154_v32 }
 0xa6c   : > { %v13526_v41 = vpop.xlane.xlu2 %5189  ;;  %9155 = vrcp.f32 %v13523_v40  ;;  %v5577_v15 = vsel %vm5576_vm15, %v9152_v58, %v5573_v48  ;;  %vm5471_vm5 = vmor %vm5469_vm4, %vm5470_vm3  ;;  %v5490_v4 = vand.u32 2147483648, %v13523_v40  ;;  %v5488_v16 = vand.u32 2147483647, %v13523_v40 }
 0xa6d   : > { %9157 = vrcp.f32 %v13526_v41  ;;  %v5466_v62 = vsub.f32 1.0, %v5465_v0  ;;  %v5582_v44 = vsel %vm5579_vm1, %v5581_v1, %v5577_v15  ;;  %v5593_v14 = vand.u32 2147483647, %v13526_v41 }
 0xa6e   : > { %v5583_v23 = vmul.f32 %v13250_v33, %v5582_v44  ;;  %v5595_v28 = vand.u32 2147483648, %v13526_v41  ;;  %vm5589_vm8 = vweird.f32 %v13526_v41  ;;  %vm5484_vm9 = vweird.f32 %v13523_v40 }
 0xa6f   : > { %v5467_v39 = vmul.f32 %v9154_v32, %v5466_v62  ;;  %vm13568_vm10 = vcmp.eq.f32.partialorder %v5593_v14, 8.507059e+37  ;;  %v5491_v42 = vor.u32 1.1754944e-38, %v5490_v4  ;;  %vm5489_vm14 = vcmp.eq.f32.partialorder %v5488_v16, 8.507059e+37 }
 0xa70   : > { %8596 = vmatmul.msk.f32.gmra.mxu1 %vm1473_vm12, %v5583_v23  ;;  %v13597_v23 = vadd.f32 %v9457_v61, %v5995_v24 }
 0xa71   : > { %v5468_v49 = vadd.f32 %v9154_v32, %v5467_v39 }
 0xa72   : > { %v9156_v22 = vpop.eup %9155  ;;  %v13538_v5 = vpop.xlane.xlu0 %5171 }
 0xa73   : > { %v13540_v31 = vpop.eup %9157  ;;  %v5480_v12 = vmul.f32 %v9156_v22, %v13523_v40  ;;  %9159 = vrcp.f32 %v13538_v5  ;;  %v5472_v30 = vsel %vm5471_vm5, %v9154_v32, %v5468_v49  ;;  %vm5485_vm7 = vweird.f32 %v9156_v22 }
 0xa74   : > { %v5585_v33 = vmul.f32 %v13540_v31, %v13526_v41  ;;  %v6089_v63 = vpop.xlane.xlu2 %6088  ;;  %v5477_v58 = vsel %vm5474_vm6, %v5476_v7, %v5472_v30  ;;  %vm5590_vm11 = vweird.f32 %v13540_v31  ;;  %vm13573_vm13 = vmor %vm5484_vm9, %vm5485_vm7  ;;  %v5596_v32 = vor.u32 1.1754944e-38, %v5595_v28 }
 0xa75   : > { %v5481_v45 = vsub.f32 1.0, %v5480_v12  ;;  %v6178_v19 = vmul.f32 %v13536_v2, %v6089_v63  ;;  %v5478_v6 = vmul.f32 %v13323_v43, %v5477_v58  ;;  %vm5591_vm15 = vmor %vm5589_vm8, %vm5590_vm11  ;;  %v5503_v0 = vand.u32 2147483647, %v13538_v5  ;;  %v9458_v58 = vld [vmem:[%s9613_s25 + $0x40] sm:$0xff] }
 0xa76   : > { %v5586_v35 = vsub.f32 1.0, %v5585_v33  ;;  %v5505_v1 = vand.u32 2147483648, %v13538_v5  ;;  %vm5499_vm2 = vweird.f32 %v13538_v5  ;;  %v13613_v33 = vpop.f32.mrf.mxu0 }
 0xa77   : > { %v5482_v50 = vmul.f32 %v9156_v22, %v5481_v45  ;;  %v13551_v13 = vsub.f32 %v13355_v53, %v6178_v19  ;;  %8589 = vmatmul.msk.f32.gmra.mxu0 %vm1473_vm12, %v5478_v6  ;;  %v13564_v53 = vpop.f32.mrf.mxu2  ;;  %vm5504_vm4 = vcmp.eq.f32.partialorder %v5503_v0, 8.507059e+37  ;;  %v6108_v19 = vsel %vm588_vm0, %v13597_v23, 0.0 }
 0xa78   : > { %v5587_v10 = vmul.f32 %v13540_v31, %v5586_v35  ;;  %v5506_v12 = vor.u32 1.1754944e-38, %v5505_v1 }
 0xa79   : > { %v9160_v59 = vpop.eup %9159  ;;  %v5483_v3 = vadd.f32 %v9156_v22, %v5482_v50  ;;  %v6234_v43 = vmul.f32 %v13551_v13, %v13551_v13 }
 0xa7a   : > { %v5588_v51 = vadd.f32 %v13540_v31, %v5587_v10  ;;  %v5495_v46 = vmul.f32 %v9160_v59, %v13538_v5  ;;  %v6092_v29 = vpop.xlane.xlu0 %6091  ;;  %vm5500_vm1 = vweird.f32 %v9160_v59 }
 0xa7b   : > { %v6262_v36 = vsel %vm588_vm0, %v6234_v43, 0.0  ;;  %v13579_v55 = vpop.xlane.xlu1 %5192  ;;  %v6179_v18 = vmul.f32 %v13536_v2, %v6092_v29  ;;  %v5487_v17 = vsel %vm13573_vm13, %v9156_v22, %v5483_v3  ;;  %vm13608_vm3 = vmor %vm5499_vm2, %vm5500_vm1 }
 0xa7c   : > { %v5496_v48 = vsub.f32 1.0, %v5495_v46  ;;  %6263 = vadd.xlane.f32.xlu2 %v6262_v36  ;;  %v6098_v40 = vpop.xlane.xlu2 %6097  ;;  %9161 = vrcp.f32 %v13579_v55  ;;  %v5492_v15 = vsel %vm5489_vm14, %v5491_v42, %v5487_v17  ;;  %v5592_v39 = vsel %vm5591_vm15, %v13540_v31, %v5588_v51  ;;  %v13656_v36 = vpop.f32.mrf.mxu1 }
 0xa7d   : > { %v13592_v62 = vsub.f32 %v13429_v47, %v6179_v18  ;;  %v5493_v44 = vmul.f32 %v13366_v60, %v5492_v15  ;;  %v6181_v41 = vmul.f32 %v13536_v2, %v6098_v40  ;;  %v5597_v26 = vsel %vm13568_vm10, %v5596_v32, %v5592_v39  ;;  %v9459_v40 = vld [vmem:[%s9613_s25 + $0x48] sm:$0xff] }
 0xa7e   : > { %v5497_v37 = vmul.f32 %v9160_v59, %v5496_v48  ;;  %v5598_v47 = vmul.f32 %v13362_v52, %v5597_v26  ;;  %v5998_v60 = vadd.f32 %v13288_v25, %v13517_v34  ;;  %vm5604_vm6 = vweird.f32 %v13579_v55  ;;  %v5655_v17 = vpop.f32.mrf.mxu0 }
 0xa7f   : > { %v6235_v49 = vmul.f32 %v13592_v62, %v13592_v62  ;;  %8590 = vmatmul.msk.f32.gmra.mxu0 %vm1473_vm12, %v5493_v44  ;;  %v13620_v63 = vsub.f32 %v13434_v38, %v6181_v41  ;;  %v6006_v14 = vpop.f32.mrf.mxu2  ;;  %v5610_v38 = vand.u32 2147483648, %v13579_v55  ;;  %v6004_v42 = vadd.f32 %v13288_v25, %v13564_v53 }
 0xa80   : > { %v5498_v22 = vadd.f32 %v9160_v59, %v5497_v37  ;;  %8597 = vmatmul.msk.f32.gmra.mxu1 %vm1473_vm12, %v5598_v47  ;;  %v13627_v50 = vadd.f32 %v9458_v58, %v5998_v60  ;;  %v9460_v37 = vld [vmem:[%s9613_s25 + $0x50] sm:$0xff]  ;;  %v6007_v61 = vadd.f32 %v13288_v25, %v6006_v14 }
 0xa81   : > { %v6265_v52 = vsel %vm588_vm0, %v6235_v49, 0.0  ;;  %v6237_v3 = vmul.f32 %v13620_v63, %v13620_v63  ;;  %v5611_v11 = vor.u32 1.1754944e-38, %v5610_v38  ;;  %v13669_v44 = vadd.f32 %v9460_v37, %v6004_v42  ;;  %v9461_v49 = vld [vmem:[%s9613_s25 + $0x58] sm:$0xff] }
 0xa82   : > { %v9162_v7 = vpop.eup %9161  ;;  %v6101_v5 = vpop.xlane.xlu0 %6100  ;;  %v5502_v34 = vsel %vm13608_vm3, %v9160_v59, %v5498_v22  ;;  %6266 = vadd.xlane.f32.xlu1 %v6265_v52  ;;  %v5608_v59 = vand.u32 2147483647, %v13579_v55  ;;  %v13686_v60 = vadd.f32 %v9461_v49, %v6007_v61  ;;  %v6772_v49 = vld [vmem:[%s15375_s11] sm:$0xff] }
 0xa83   : > { %v5600_v45 = vmul.f32 %v9162_v7, %v13579_v55  ;;  %v6095_v30 = vpop.xlane.xlu1 %6094  ;;  %v5507_v35 = vsel %vm5504_vm4, %v5506_v12, %v5502_v34  ;;  %v6182_v28 = vmul.f32 %v13536_v2, %v6101_v5  ;;  %vm5605_vm5 = vweird.f32 %v9162_v7 }
 0xa84   : > { %6109 = vadd.xlane.f32.xlu2 %v6108_v19  ;;  %v6180_v4 = vmul.f32 %v13536_v2, %v6095_v30  ;;  %v5508_v24 = vmul.f32 %v13410_v56, %v5507_v35  ;;  %v6111_v56 = vsel %vm588_vm0, %v13627_v50, 0.0  ;;  %vm13646_vm7 = vmor %vm5604_vm6, %vm5605_vm5  ;;  %vm5609_vm8 = vcmp.eq.f32.partialorder %v5608_v59, 8.507059e+37  ;;  %v9462_v30 = vld [vmem:[%s9613_s25 + $0x60] sm:$0xff] }
 0xa85   : > { %v5601_v6 = vsub.f32 1.0, %v5600_v45  ;;  %v13651_v46 = vsub.f32 %v13454_v57, %v6182_v28  ;;  %v6117_v47 = vsel %vm588_vm0, %v13669_v44, 0.0  ;;  %v6120_v34 = vsel %vm588_vm0, %v13686_v60, 0.0 }
 0xa86   : > { %v13632_v10 = vsub.f32 %v13457_v8, %v6180_v4  ;;  %v6001_v8 = vadd.f32 %v13288_v25, %v13532_v27  ;;  %v6271_v27 = vsel %vm588_vm0, %v6237_v3, 0.0  ;;  %v5658_v31 = vpop.f32.mrf.mxu0  ;;  %v9463_v4 = vld [vmem:[%s9613_s25 + $0x68] sm:$0xff] }
 0xa87   : > { %v5602_v16 = vmul.f32 %v9162_v7, %v5601_v6  ;;  %8591 = vmatmul.msk.f32.gmra.mxu0 %vm1473_vm12, %v5508_v24  ;;  %v6009_v0 = vpop.f32.mrf.mxu2  ;;  %v6238_v15 = vmul.f32 %v13651_v46, %v13651_v46 }
 0xa88   : > { %v6236_v43 = vmul.f32 %v13632_v10, %v13632_v10  ;;  %v13663_v53 = vadd.f32 %v9459_v40, %v6001_v8  ;;  %v6010_v52 = vadd.f32 %v13288_v25, %v6009_v0  ;;  %v5712_v8 = vadd.f32 %v13656_v36, %v13613_v33 }
 0xa89   : > { %v5603_v51 = vadd.f32 %v9162_v7, %v5602_v16  ;;  %v6274_v26 = vsel %vm588_vm0, %v6238_v15, 0.0 }
 0xa8a   : > { %v6268_v29 = vsel %vm588_vm0, %v6236_v43, 0.0  ;;  %6112 = vadd.xlane.f32.xlu1 %v6111_v56  ;;  %v6107_v57 = vpop.xlane.xlu0 %6106  ;;  %v6114_v41 = vsel %vm588_vm0, %v13663_v53, 0.0  ;;  %v13699_v35 = vadd.f32 %v9462_v30, %v6010_v52 }
 0xa8b   : > { %6269 = vadd.xlane.f32.xlu0 %v6268_v29  ;;  %v6104_v55 = vpop.xlane.xlu1 %6103  ;;  %v5607_v18 = vsel %vm13646_vm7, %v9162_v7, %v5603_v51  ;;  %v6184_v39 = vmul.f32 %v13536_v2, %v6107_v57 }
 0xa8c   : > { %6272 = vadd.xlane.f32.xlu2 %v6271_v27  ;;  %v5612_v32 = vsel %vm5609_vm8, %v5611_v11, %v5607_v18  ;;  %v6183_v1 = vmul.f32 %v13536_v2, %v6104_v55  ;;  %v6123_v24 = vsel %vm588_vm0, %v13699_v35, 0.0 }
 0xa8d   : > { %v5613_v48 = vmul.f32 %v13438_v54, %v5612_v32  ;;  %v13681_v22 = vsub.f32 %v13468_v21, %v6184_v39 }
 0xa8e   : > { %v13675_v54 = vsub.f32 %v13471_v20, %v6183_v1  ;;  %v5714_v20 = vpop.f32.mrf.mxu1  ;;  %v5661_v6 = vpop.f32.mrf.mxu0 }
 0xa8f   : > { %8598 = vmatmul.msk.f32.gmra.mxu1 %vm1473_vm12, %v5613_v48  ;;  %v6240_v21 = vmul.f32 %v13681_v22, %v13681_v22  ;;  %v6012_v7 = vpop.f32.mrf.mxu2  ;;  %v5715_v27 = vadd.f32 %v5714_v20, %v5655_v17  ;;  %v6775_v17 = vld [vmem:[%s15375_s11 + $0x18] sm:$0xff] }
 0xa90   : > { %v6239_v12 = vmul.f32 %v13675_v54, %v13675_v54  ;;  %v6013_v45 = vadd.f32 %v13288_v25, %v6012_v7  ;;  %6876 = vmatpush.msrb.mxu0 %v6775_v17 }
 0xa91   : > { %v6280_v19 = vsel %vm588_vm0, %v6240_v21, 0.0 }
 0xa92   : > { %6275 = vadd.xlane.f32.xlu1 %v6274_v26  ;;  %v6277_v5 = vsel %vm588_vm0, %v6239_v12, 0.0  ;;  %v13702_v58 = vadd.f32 %v9463_v4, %v6013_v45 }
 0xa93   : > { %6115 = vadd.xlane.f32.xlu0 %v6114_v41  ;;  %v6774_v41 = vld [vmem:[%s15375_s11 + $0x10] sm:$0xff] }
 0xa94   : > { %6118 = vadd.xlane.f32.xlu2 %v6117_v47  ;;  %v6126_v25 = vsel %vm588_vm0, %v13702_v58, 0.0  ;;  %6877 = vmatpush.msrb.mxu0 %v6774_v41  ;;  %v6773_v47 = vld [vmem:[%s15375_s11 + $0x8] sm:$0xff] }
 0xa96   : > { %v5717_v14 = vpop.f32.mrf.mxu1  ;;  %v5664_v28 = vpop.f32.mrf.mxu0  ;;  %6878 = vmatpush.msrb.mxu0 %v6773_v47  ;;  %v13774_v47 = vld [vmem:[%s15373_s9] ss:$0 sm:$0xff] }
 0xa97   : > { %v5718_v48 = vadd.f32 %v5717_v14, %v5658_v31  ;;  %v6015_v33 = vpop.f32.mrf.mxu2 }
 0xa98   : > { %6879 = vmatpush.msrb.mxu0 %v6772_v49 }
 0xa9a   : > { %6121 = vadd.xlane.f32.xlu1 %v6120_v34 }
 0xa9b   : > { %6278 = vadd.xlane.f32.xlu0 %v6277_v5 }
 0xa9c   : > { %6281 = vadd.xlane.f32.xlu2 %v6280_v19 }
 0xa9e   : > { %v5720_v38 = vpop.f32.mrf.mxu1  ;;  %v5667_v59 = vpop.f32.mrf.mxu0 }
 0xa9f   : > { %v5721_v36 = vadd.f32 %v5720_v38, %v5661_v6  ;;  %v6018_v26 = vpop.f32.mrf.mxu2 }
 0xaa3   : > { %6124 = vadd.xlane.f32.xlu0 %v6123_v24 }
 0xaa4   : > { %6127 = vadd.xlane.f32.xlu2 %v6126_v25 }
 0xaa6   : > { %v5723_v16 = vpop.f32.mrf.mxu1  ;;  %v13708_v43 = vpop.f32.mrf.mxu0 }
 0xaa7   : > { %v13731_v21 = vpop.f32.mrf.mxu2  ;;  %v5724_v7 = vadd.f32 %v5723_v16, %v5664_v28 }
 0xaae   : > { %v5726_v3 = vpop.f32.mrf.mxu1  ;;  %v5770_v56 = vpop.f32.mrf.mxu0 }
 0xaaf   : > { %v5791_v9 = vadd.f32 %v5770_v56, %v5712_v8  ;;  %v5727_v16 = vadd.f32 %v5726_v3, %v5667_v59  ;;  %v13747_v8 = vld [vmem:[%s15372_s8] ss:$0 sm:$0xff] }
 0xab6   : > { %v13710_v51 = vpop.f32.mrf.mxu1 }
 0xac2   : > { %v5773_v42 = vpop.f32.mrf.mxu0 }
 0xac3   : > { %v5792_v55 = vadd.f32 %v5773_v42, %v5715_v27  ;;  %v13751_v42 = vpop.f32.mrf.mxu2 }
 0xacb   : > { %v5836_v11 = vpop.f32.mrf.mxu1 }
 0xacc   : > { %v5857_v29 = vadd.f32 %v5836_v11, %v5791_v9  ;;  %v6016_v9 = vadd.f32 %v13747_v8, %v6015_v33 }
 0xace   : > { %8620 = vmatmul.msk.f32.gmra.mxu2 %vm588_vm0, %v5857_v29 }
 0xad3   : > { %v5839_v18 = vpop.f32.mrf.mxu1  ;;  %v5776_v32 = vpop.f32.mrf.mxu0 }
 0xad4   : > { %v5858_v57 = vadd.f32 %v5839_v18, %v5792_v55  ;;  %v5793_v40 = vadd.f32 %v5776_v32, %v5718_v48 }
 0xad6   : > { %8621 = vmatmul.msk.f32.gmra.mxu2 %vm588_vm0, %v5858_v57 }
 0xadb   : > { %v5842_v0 = vpop.f32.mrf.mxu1 }
 0xadc   : > { %v5859_v1 = vadd.f32 %v5842_v0, %v5793_v40 }
 0xade   : > { %8622 = vmatmul.msk.f32.gmra.mxu2 %vm588_vm0, %v5859_v1 }
 0xae4   : > { %v5845_v39 = vpop.f32.mrf.mxu1 }
 0xae5   : > { %v5779_v15 = vpop.f32.mrf.mxu0 }
 0xae6   : > { %v5794_v37 = vadd.f32 %v5779_v15, %v5721_v36  ;;  %v9465_v36 = vld [vmem:[%s9613_s25 + $0x70] sm:$0xff] }
 0xae7   : > { %v13760_v15 = vadd.f32 %v9465_v36, %v6016_v9 }
 0xae8   : > { %v5860_v61 = vadd.f32 %v5845_v39, %v5794_v37  ;;  %v6019_v37 = vadd.f32 %v13747_v8, %v6018_v26 }
 0xaea   : > { %8623 = vmatmul.msk.f32.gmra.mxu2 %vm588_vm0, %v5860_v61 }
 0xaed   : > { %v5848_v30 = vpop.f32.mrf.mxu1 }
 0xaef   : > { %v6264_v20 = vpop.xlane.xlu2 %6263 }
 0xaf0   : > { %v6346_v31 = vmul.f32 %v6264_v20, %v13536_v2 }
 0xaf2   : > { %v6374_v12 = vadd.f32 1e-05, %v6346_v31  ;;  %v13783_v31 = vld [vmem:[%s15374_s10] ss:$0 sm:$0xff] }
 0xaf4   : > { %9163 = vrsqrt.f32 %v6374_v12  ;;  %v5782_v52 = vpop.f32.mrf.mxu0  ;;  %vm6408_vm9 = vweird.f32 %v6374_v12 }
 0xaf5   : > { %v6267_v5 = vpop.xlane.xlu1 %6266  ;;  %v5795_v34 = vadd.f32 %v5782_v52, %v5724_v7  ;;  %v6129_v52 = vsel %vm588_vm0, %v13760_v15, 0.0 }
 0xaf6   : > { %v6347_v19 = vmul.f32 %v6267_v5, %v13536_v2 }
 0xaf7   : > { %v6110_v45 = vpop.xlane.xlu2 %6109  ;;  %v5861_v4 = vadd.f32 %v5848_v30, %v5795_v34  ;;  %v9466_v34 = vld [vmem:[%s9613_s25 + $0x78] sm:$0xff] }
 0xaf8   : > { %v6185_v14 = vmul.f32 %v13536_v2, %v6110_v45  ;;  %v13735_v6 = vadd.f32 1e-05, %v6347_v19  ;;  %v13789_v45 = vadd.f32 %v9466_v34, %v6019_v37  ;;  %v13791_v19 = vpop.f32.mrf.mxu2 }
 0xaf9   : > { %8624 = vmatmul.msk.f32.gmra.mxu2 %vm588_vm0, %v5861_v4 }
 0xafa   : > { %v9164_v24 = vpop.eup %9163  ;;  %v13738_v25 = vsub.f32 %v13597_v23, %v6185_v14  ;;  %9165 = vrsqrt.f32 %v13735_v6  ;;  %vm6418_vm13 = vweird.f32 %v13735_v6 }
 0xafb   : > { %v6403_v38 = vmul.f32 %v9164_v24, %v6374_v12  ;;  %vm6409_vm12 = vweird.f32 %v9164_v24 }
 0xafc   : > { %v6241_v28 = vmul.f32 %v13738_v25, %v13738_v25  ;;  %v5785_v11 = vpop.f32.mrf.mxu0  ;;  %vm6410_vm11 = vmor %vm6408_vm9, %vm6409_vm12 }
 0xafd   : > { %v6404_v56 = vmul.f32 %v9164_v24, %v6403_v38  ;;  %v6113_v23 = vpop.xlane.xlu1 %6112  ;;  %v5796_v55 = vadd.f32 %v5785_v11, %v5727_v16  ;;  %v5851_v3 = vpop.f32.mrf.mxu1  ;;  %v6022_v16 = vadd.f32 %v13747_v8, %v13731_v21  ;;  %v6132_v21 = vsel %vm588_vm0, %v13789_v45, 0.0 }
 0xafe   : > { %v6283_v29 = vsel %vm588_vm0, %v6241_v28, 0.0  ;;  %v6186_v59 = vmul.f32 %v13536_v2, %v6113_v23  ;;  %v6270_v32 = vpop.xlane.xlu0 %6269 }
 0xaff   : > { %v6405_v27 = vmul.f32 0.5, %v6404_v56  ;;  %v6273_v18 = vpop.xlane.xlu2 %6272  ;;  %6284 = vadd.xlane.f32.xlu1 %v6283_v29  ;;  %v5862_v0 = vadd.f32 %v5851_v3, %v5796_v55  ;;  %v6348_v33 = vmul.f32 %v6270_v32, %v13536_v2  ;;  %v5730_v56 = vadd.f32 %v13710_v51, %v13708_v43 }
 0xb00   : > { %v6349_v57 = vmul.f32 %v6273_v18, %v13536_v2  ;;  %v9166_v48 = vpop.eup %9165  ;;  %v13756_v1 = vsub.f32 %v13627_v50, %v6186_v59  ;;  %v6025_v59 = vadd.f32 %v13747_v8, %v13751_v42 }
 0xb01   : > { %v6406_v40 = vsub.f32 1.5, %v6405_v27  ;;  %v6413_v17 = vmul.f32 %v9166_v48, %v13735_v6  ;;  %v13766_v41 = vadd.f32 1e-05, %v6348_v33  ;;  %8625 = vmatmul.msk.f32.gmra.mxu2 %vm588_vm0, %v5862_v0  ;;  %vm6419_vm10 = vweird.f32 %v9166_v48 }
 0xb02   : > { %v13764_v39 = vadd.f32 1e-05, %v6349_v57  ;;  %v6242_v50 = vmul.f32 %v13756_v1, %v13756_v1  ;;  %vm6420_vm14 = vmor %vm6418_vm13, %vm6419_vm10 }
 0xb03   : > { %v6407_v61 = vmul.f32 %v9164_v24, %v6406_v40  ;;  %v6414_v26 = vmul.f32 %v9166_v48, %v6413_v17  ;;  %vm6428_vm2 = vweird.f32 %v13766_v41 }
 0xb04   : > { %9167 = vrsqrt.f32 %v13764_v39  ;;  %v6286_v20 = vsel %vm588_vm0, %v6242_v50, 0.0  ;;  %vm6438_vm4 = vweird.f32 %v13764_v39 }
 0xb05   : > { %v6411_v49 = vsel %vm6410_vm11, %v9164_v24, %v6407_v61  ;;  %9169 = vrsqrt.f32 %v13766_v41  ;;  %v6415_v7 = vmul.f32 0.5, %v6414_v26  ;;  %6287 = vadd.xlane.f32.xlu0 %v6286_v20  ;;  %v6276_v5 = vpop.xlane.xlu1 %6275 }
 0xb06   : > { %v6682_v12 = vmul.f32 %v6411_v49, %v13551_v13  ;;  %v6350_v14 = vmul.f32 %v6276_v5, %v13536_v2  ;;  %v5788_v13 = vpop.f32.mrf.mxu0  ;;  %v6116_v28 = vpop.xlane.xlu0 %6115  ;;  %v9468_v49 = vld [vmem:[%s9613_s25 + $0x88] sm:$0xff] }
 0xb07   : > { %v6119_v30 = vpop.xlane.xlu2 %6118  ;;  %6130 = vadd.xlane.f32.xlu1 %v6129_v52  ;;  %v6416_v24 = vsub.f32 1.5, %v6415_v7  ;;  %v6187_v11 = vmul.f32 %v13536_v2, %v6116_v28  ;;  %v5797_v51 = vadd.f32 %v5788_v13, %v5730_v56  ;;  %v13843_v20 = vadd.f32 %v9468_v49, %v6025_v59  ;;  %v6030_v13 = vpop.f32.mrf.mxu2 }
 0xb08   : > { %v6713_v4 = vmul.f32 %v13774_v47, %v6682_v12  ;;  %v6188_v38 = vmul.f32 %v13536_v2, %v6119_v30  ;;  %v13800_v9 = vadd.f32 1e-05, %v6350_v14 }
 0xb09   : > { %v6417_v27 = vmul.f32 %v9166_v48, %v6416_v24  ;;  %v13824_v3 = vsub.f32 %v13663_v53, %v6187_v11 }
 0xb0a   : > { %v13803_v23 = vpop.eup %9167  ;;  %v13806_v29 = vadd.f32 %v13783_v31, %v6713_v4  ;;  %v13810_v55 = vsub.f32 %v13669_v44, %v6188_v38  ;;  %9171 = vrsqrt.f32 %v13800_v9  ;;  %vm6448_vm7 = vweird.f32 %v13800_v9 }
 0xb0b   : > { %v13812_v18 = vpop.eup %9169  ;;  %v6433_v43 = vmul.f32 %v13803_v23, %v13764_v39  ;;  %v6421_v6 = vsel %vm6420_vm14, %v9166_v48, %v6417_v27  ;;  %v9467_v48 = vld [vmem:[%s9613_s25 + $0x80] sm:$0xff]  ;;  %v6243_v37 = vmul.f32 %v13824_v3, %v13824_v3  ;;  %vm6439_vm1 = vweird.f32 %v13803_v23 }
 0xb0c   : > { %v6423_v44 = vmul.f32 %v13812_v18, %v13766_v41  ;;  %8627 = vmatmul.msk.f32.vlgmr.msrb.gmra.mxu0 %vm588_vm0, %v13806_v29  ;;  %v5854_v57 = vpop.f32.mrf.mxu1  ;;  %v6683_v32 = vmul.f32 %v6421_v6, %v13592_v62  ;;  %v6244_v42 = vmul.f32 %v13810_v55, %v13810_v55  ;;  %v13833_v33 = vadd.f32 %v9467_v48, %v6022_v16  ;;  %vm13881_vm5 = vmor %vm6438_vm4, %vm6439_vm1 }
 0xb0d   : > { %v6434_v40 = vmul.f32 %v13803_v23, %v6433_v43  ;;  %v5863_v0 = vadd.f32 %v5854_v57, %v5797_v51  ;;  %6133 = vadd.xlane.f32.xlu0 %v6132_v21  ;;  %v6122_v53 = vpop.xlane.xlu1 %6121  ;;  %v6289_v52 = vsel %vm588_vm0, %v6243_v37, 0.0  ;;  %vm6429_vm15 = vweird.f32 %v13812_v18 }
 0xb0e   : > { %v6424_v36 = vmul.f32 %v13812_v18, %v6423_v44  ;;  %v6292_v62 = vsel %vm588_vm0, %v6244_v42, 0.0  ;;  %v6189_v61 = vmul.f32 %v13536_v2, %v6122_v53  ;;  %v6714_v26 = vmul.f32 %v13774_v47, %v6683_v32  ;;  %v6279_v5 = vpop.xlane.xlu0 %6278  ;;  %6290 = vadd.xlane.f32.xlu2 %v6289_v52  ;;  %vm6430_vm3 = vmor %vm6428_vm2, %vm6429_vm15  ;;  %v9469_v42 = vld [vmem:[%s9613_s25 + $0x90] sm:$0xff] }
 0xb0f   : > { %v6435_v17 = vmul.f32 0.5, %v6434_v40  ;;  %v6282_v50 = vpop.xlane.xlu2 %6281  ;;  %8626 = vmatmul.msk.f32.gmra.mxu2 %vm588_vm0, %v5863_v0  ;;  %6293 = vadd.xlane.f32.xlu1 %v6292_v62  ;;  %v6351_v4 = vmul.f32 %v6279_v5, %v13536_v2  ;;  %v6028_v51 = vadd.f32 %v13747_v8, %v13791_v19  ;;  %v6138_v44 = vsel %vm588_vm0, %v13843_v20, 0.0 }
 0xb10   : > { %v6425_v12 = vmul.f32 0.5, %v6424_v36  ;;  %v6352_v7 = vmul.f32 %v6282_v50, %v13536_v2  ;;  %v13847_v34 = vpop.eup %9171  ;;  %v13850_v14 = vsub.f32 %v13686_v60, %v6189_v61  ;;  %v13854_v24 = vadd.f32 %v13783_v31, %v6714_v26  ;;  %v6033_v50 = vpop.f32.mrf.mxu2 }
 0xb11   : > { %v6436_v30 = vsub.f32 1.5, %v6435_v17  ;;  %v6443_v28 = vmul.f32 %v13847_v34, %v13800_v9  ;;  %v13863_v60 = vadd.f32 1e-05, %v6351_v4  ;;  %v6135_v40 = vsel %vm588_vm0, %v13833_v33, 0.0 }
 0xb12   : > { %v6426_v38 = vsub.f32 1.5, %v6425_v12  ;;  %v13859_v16 = vadd.f32 1e-05, %v6352_v7  ;;  %v6245_v56 = vmul.f32 %v13850_v14, %v13850_v14  ;;  %v13895_v48 = vadd.f32 %v9469_v42, %v6028_v51 }
 0xb13   : > { %v6437_v11 = vmul.f32 %v13803_v23, %v6436_v30  ;;  %v6444_v43 = vmul.f32 %v13847_v34, %v6443_v28  ;;  %vm6449_vm6 = vweird.f32 %v13847_v34  ;;  %v6034_v5 = vadd.f32 %v13747_v8, %v6033_v50 }
 0xb14   : > { %v6427_v27 = vmul.f32 %v13812_v18, %v6426_v38  ;;  %9173 = vrsqrt.f32 %v13859_v16  ;;  %8628 = vmatmul.msk.f32.gmra.mxu0 %vm588_vm0, %v13854_v24  ;;  %v6295_v41 = vsel %vm588_vm0, %v6245_v56, 0.0  ;;  %vm6450_vm8 = vmor %vm6448_vm7, %vm6449_vm6  ;;  %v6031_v38 = vadd.f32 %v13747_v8, %v6030_v13 }
 0xb15   : > { %9175 = vrsqrt.f32 %v13863_v60  ;;  %v6445_v59 = vmul.f32 0.5, %v6444_v43  ;;  %6296 = vadd.xlane.f32.xlu0 %v6295_v41  ;;  %v6441_v39 = vsel %vm13881_vm5, %v13803_v23, %v6437_v11  ;;  %vm6458_vm9 = vweird.f32 %v13863_v60 }
 0xb16   : > { %v6431_v21 = vsel %vm6430_vm3, %v13812_v18, %v6427_v27  ;;  %v6125_v0 = vpop.xlane.xlu0 %6124  ;;  %6136 = vadd.xlane.f32.xlu2 %v6135_v40  ;;  %v6685_v17 = vmul.f32 %v6441_v39, %v13620_v63  ;;  %v6141_v63 = vsel %vm588_vm0, %v13895_v48, 0.0  ;;  %v9470_v27 = vld [vmem:[%s9613_s25 + $0xa0] sm:$0xff]  ;;  %vm6468_vm13 = vweird.f32 %v13859_v16 }
 0xb17   : > { %v6684_v19 = vmul.f32 %v6431_v21, %v13632_v10  ;;  %v6128_v57 = vpop.xlane.xlu2 %6127  ;;  %v6446_v32 = vsub.f32 1.5, %v6445_v59  ;;  %6139 = vadd.xlane.f32.xlu1 %v6138_v44  ;;  %v6190_v10 = vmul.f32 %v13536_v2, %v6125_v0  ;;  %v13931_v43 = vadd.f32 %v9470_v27, %v6034_v5  ;;  %v9471_v21 = vld [vmem:[%s9613_s25 + $0x98] sm:$0xff] }
 0xb18   : > { %v6191_v18 = vmul.f32 %v13536_v2, %v6128_v57  ;;  %v6716_v4 = vmul.f32 %v13774_v47, %v6685_v17  ;;  %v13938_v59 = vadd.f32 %v9471_v21, %v6031_v38 }
 0xb19   : > { %v6715_v36 = vmul.f32 %v13774_v47, %v6684_v19  ;;  %v13905_v62 = vsub.f32 %v13699_v35, %v6190_v10  ;;  %v6447_v26 = vmul.f32 %v13847_v34, %v6446_v32 }
 0xb1a   : > { %v9174_v53 = vpop.eup %9173  ;;  %v13900_v37 = vsub.f32 %v13702_v58, %v6191_v18  ;;  %v13935_v41 = vadd.f32 %v13783_v31, %v6716_v4  ;;  %v6144_v57 = vsel %vm588_vm0, %v13938_v59, 0.0 }
 0xb1b   : > { %v9176_v23 = vpop.eup %9175  ;;  %v13908_v61 = vadd.f32 %v13783_v31, %v6715_v36  ;;  %v6463_v49 = vmul.f32 %v9174_v53, %v13859_v16  ;;  %v6246_v35 = vmul.f32 %v13905_v62, %v13905_v62  ;;  %v6451_v28 = vsel %vm6450_vm8, %v13847_v34, %v6447_v26 }
 0xb1c   : > { %v6453_v12 = vmul.f32 %v9176_v23, %v13863_v60  ;;  %v6247_v58 = vmul.f32 %v13900_v37, %v13900_v37  ;;  %v6686_v51 = vmul.f32 %v6451_v28, %v13651_v46  ;;  %vm6459_vm12 = vweird.f32 %v9176_v23 }
 0xb1d   : > { %8629 = vmatmul.msk.f32.gmra.mxu0 %vm588_vm0, %v13908_v61  ;;  %6142 = vadd.xlane.f32.xlu0 %v6141_v63  ;;  %v6298_v30 = vsel %vm588_vm0, %v6246_v35, 0.0  ;;  %v6464_v56 = vmul.f32 %v9174_v53, %v6463_v49  ;;  %vm6460_vm11 = vmor %vm6458_vm9, %vm6459_vm12  ;;  %v6147_v34 = vsel %vm588_vm0, %v13931_v43, 0.0  ;;  %vm6469_vm10 = vweird.f32 %v9174_v53 }
 0xb1e   : > { %v6454_v7 = vmul.f32 %v9176_v23, %v6453_v12  ;;  %v6301_v52 = vsel %vm588_vm0, %v6247_v58, 0.0  ;;  %6299 = vadd.xlane.f32.xlu2 %v6298_v30  ;;  %v6717_v46 = vmul.f32 %v13774_v47, %v6686_v51  ;;  %vm6470_vm14 = vmor %vm6468_vm13, %vm6469_vm10 }
 0xb1f   : > { %6302 = vadd.xlane.f32.xlu1 %v6301_v52  ;;  %v6465_v6 = vmul.f32 0.5, %v6464_v56 }
 0xb20   : > { %v6455_v9 = vmul.f32 0.5, %v6454_v7  ;;  %v13950_v32 = vadd.f32 %v13783_v31, %v6717_v46 }
 0xb21   : > { %v6466_v19 = vsub.f32 1.5, %v6465_v6 }
 0xb22   : > { %v6456_v11 = vsub.f32 1.5, %v6455_v9 }
 0xb23   : > { %v6467_v18 = vmul.f32 %v9174_v53, %v6466_v19 }
 0xb24   : > { %v6457_v13 = vmul.f32 %v9176_v23, %v6456_v11 }
 0xb25   : > { %8630 = vmatmul.msk.f32.gmra.mxu0 %vm588_vm0, %v13935_v41  ;;  %v6471_v40 = vsel %vm6470_vm14, %v9174_v53, %v6467_v18 }
 0xb26   : > { %v6461_v44 = vsel %vm6460_vm11, %v9176_v23, %v6457_v13  ;;  %6145 = vadd.xlane.f32.xlu2 %v6144_v57  ;;  %v6688_v0 = vmul.f32 %v6471_v40, %v13681_v22  ;;  %v9472_v13 = vld [vmem:[%s9613_s25 + $0xa8] sm:$0xff] }
 0xb27   : > { %6148 = vadd.xlane.f32.xlu1 %v6147_v34  ;;  %v6687_v39 = vmul.f32 %v6461_v44, %v13675_v54 }
 0xb28   : > { %v6719_v54 = vmul.f32 %v13774_v47, %v6688_v0 }
 0xb29   : > { %v6718_v60 = vmul.f32 %v13774_v47, %v6687_v39  ;;  %v14001_v39 = vld [vmem:[%s15376_s12] ss:$0 sm:$0xff] }
 0xb2a   : > { %v13964_v10 = vadd.f32 %v13783_v31, %v6719_v54 }
 0xb2b   : > { %v13958_v42 = vadd.f32 %v13783_v31, %v6718_v60 }
 0xb2d   : > { %8631 = vmatmul.msk.f32.gmra.mxu0 %vm588_vm0, %v13950_v32 }
 0xb35   : > { %8632 = vmatmul.msk.f32.gmra.mxu0 %vm588_vm0, %v13958_v42 }
 0xb3d   : > { %8633 = vmatmul.msk.f32.gmra.mxu0 %vm588_vm0, %v13964_v10 }
 0xb51   : > { %v6036_v16 = vpop.f32.mrf.mxu2 }
 0xb52   : > { %v6037_v30 = vadd.f32 %v13747_v8, %v6036_v16 }
 0xb54   : > { %v13991_v34 = vadd.f32 %v9472_v13, %v6037_v30 }
 0xb59   : > { %v6039_v36 = vpop.f32.mrf.mxu2 }
 0xb5a   : > { %v6040_v18 = vadd.f32 %v13747_v8, %v6039_v36  ;;  %v6150_v36 = vsel %vm588_vm0, %v13991_v34, 0.0 }
 0xb61   : > { %v13970_v49 = vpop.f32.mrf.mxu2 }
 0xb62   : > { %v6043_v13 = vadd.f32 %v13747_v8, %v13970_v49 }
 0xb6d   : > { %v6045_v9 = vpop.f32.mrf.mxu2 }
 0xb72   : > { %v6285_v23 = vpop.xlane.xlu1 %6284 }
 0xb73   : > { %v6353_v53 = vmul.f32 %v6285_v23, %v13536_v2 }
 0xb75   : > { %v6381_v22 = vadd.f32 1e-05, %v6353_v53 }
 0xb77   : > { %9177 = vrsqrt.f32 %v6381_v22  ;;  %vm6478_vm1 = vweird.f32 %v6381_v22 }
 0xb78   : > { %v6288_v17 = vpop.xlane.xlu0 %6287 }
 0xb79   : > { %v6354_v26 = vmul.f32 %v6288_v17, %v13536_v2 }
 0xb7a   : > { %v6131_v50 = vpop.xlane.xlu1 %6130 }
 0xb7b   : > { %v6192_v12 = vmul.f32 %v13536_v2, %v6131_v50  ;;  %v13973_v58 = vadd.f32 1e-05, %v6354_v26  ;;  %v9473_v26 = vld [vmem:[%s9613_s25 + $0xb0] sm:$0xff] }
 0xb7d   : > { %v9178_v63 = vpop.eup %9177  ;;  %v13976_v35 = vsub.f32 %v13760_v15, %v6192_v12  ;;  %9179 = vrsqrt.f32 %v13973_v58  ;;  %v14020_v12 = vadd.f32 %v9473_v26, %v6040_v18  ;;  %v6046_v18 = vadd.f32 %v13747_v8, %v6045_v9  ;;  %v9474_v9 = vld [vmem:[%s9613_s25 + $0xb8] sm:$0xff] }
 0xb7e   : > { %v6473_v7 = vmul.f32 %v9178_v63, %v6381_v22  ;;  %vm6479_vm15 = vweird.f32 %v9178_v63  ;;  %vm6488_vm4 = vweird.f32 %v13973_v58 }
 0xb7f   : > { %v6248_v52 = vmul.f32 %v13976_v35, %v13976_v35  ;;  %vm6480_vm2 = vmor %vm6478_vm1, %vm6479_vm15  ;;  %vm7278_vm15 = vcmask 64512  }
 0xb80   : > { %v6474_v5 = vmul.f32 %v9178_v63, %v6473_v7  ;;  %v6134_v38 = vpop.xlane.xlu0 %6133 }
 0xb81   : > { %v6304_v4 = vsel %vm588_vm0, %v6248_v52, 0.0  ;;  %v6193_v56 = vmul.f32 %v13536_v2, %v6134_v38  ;;  %v6291_v21 = vpop.xlane.xlu2 %6290 }
 0xb82   : > { %v6475_v28 = vmul.f32 0.5, %v6474_v5  ;;  %6305 = vadd.xlane.f32.xlu0 %v6304_v4  ;;  %v6294_v15 = vpop.xlane.xlu1 %6293  ;;  %v6355_v19 = vmul.f32 %v6291_v21, %v13536_v2 }
 0xb83   : > { %v13984_v11 = vpop.eup %9179  ;;  %v6356_v51 = vmul.f32 %v6294_v15, %v13536_v2  ;;  %v13988_v6 = vsub.f32 %v13789_v45, %v6193_v56 }
 0xb84   : > { %v6476_v27 = vsub.f32 1.5, %v6475_v28  ;;  %v6483_v46 = vmul.f32 %v13984_v11, %v13973_v58  ;;  %v14007_v40 = vadd.f32 1e-05, %v6355_v19  ;;  %vm6489_vm3 = vweird.f32 %v13984_v11 }
 0xb85   : > { %v13996_v57 = vadd.f32 1e-05, %v6356_v51  ;;  %v6249_v45 = vmul.f32 %v13988_v6, %v13988_v6  ;;  %vm14072_vm5 = vmor %vm6488_vm4, %vm6489_vm3 }
 0xb86   : > { %v6477_v44 = vmul.f32 %v9178_v63, %v6476_v27  ;;  %v6484_v60 = vmul.f32 %v13984_v11, %v6483_v46  ;;  %vm6498_vm7 = vweird.f32 %v14007_v40 }
 0xb87   : > { %9181 = vrsqrt.f32 %v13996_v57  ;;  %v6307_v54 = vsel %vm588_vm0, %v6249_v45, 0.0  ;;  %vm6508_vm9 = vweird.f32 %v13996_v57 }
 0xb88   : > { %v6481_v0 = vsel %vm6480_vm2, %v9178_v63, %v6477_v44  ;;  %v6485_v23 = vmul.f32 0.5, %v6484_v60  ;;  %9183 = vrsqrt.f32 %v14007_v40  ;;  %6308 = vadd.xlane.f32.xlu2 %v6307_v54  ;;  %v6297_v22 = vpop.xlane.xlu0 %6296  ;;  %v14022_v63 = vpop.f32.mrf.mxu2 }
 0xb89   : > { %v6689_v16 = vmul.f32 %v6481_v0, %v13738_v25  ;;  %v6881_v53 = vpop.f32.mrf.mxu0  ;;  %v6357_v50 = vmul.f32 %v6297_v22, %v13536_v2  ;;  %v6137_v4 = vpop.xlane.xlu2 %6136 }
 0xb8a   : > { %v14016_v17 = vadd.f32 %v14001_v39, %v6881_v53  ;;  %6151 = vadd.xlane.f32.xlu0 %v6150_v36  ;;  %v6140_v25 = vpop.xlane.xlu1 %6139  ;;  %v6486_v52 = vsub.f32 1.5, %v6485_v23  ;;  %v6194_v28 = vmul.f32 %v13536_v2, %v6137_v4  ;;  %v14068_v36 = vadd.f32 %v9474_v9, %v6043_v13 }
 0xb8b   : > { %v6720_v7 = vmul.f32 %v13774_v47, %v6689_v16  ;;  %v6195_v30 = vmul.f32 %v13536_v2, %v6140_v25  ;;  %v14027_v38 = vadd.f32 1e-05, %v6357_v50 }
 0xb8c   : > { %v6993_v5 = vand.u32 2147483647, %v14016_v17  ;;  %v14046_v19 = vsub.f32 %v13833_v33, %v6194_v28  ;;  %v6487_v44 = vmul.f32 %v13984_v11, %v6486_v52 }
 0xb8d   : > { %v14031_v56 = vadd.f32 %v13783_v31, %v6720_v7  ;;  %v14033_v15 = vpop.eup %9181  ;;  %v14036_v51 = vsub.f32 %v13843_v20, %v6195_v30  ;;  %9185 = vrsqrt.f32 %v14027_v38  ;;  %v6153_v20 = vsel %vm588_vm0, %v14020_v12, 0.0 }
 0xb8e   : > { %v7021_v27 = vsub.f32 0.0, %v6993_v5  ;;  %v14039_v21 = vpop.eup %9183  ;;  %v6503_v46 = vmul.f32 %v14033_v15, %v13996_v57  ;;  %v6250_v54 = vmul.f32 %v14046_v19, %v14046_v19  ;;  %v6491_v52 = vsel %vm14072_vm5, %v13984_v11, %v6487_v44 }
 0xb8f   : > { %8634 = vmatmul.msk.f32.gmra.mxu0 %vm588_vm0, %v14031_v56  ;;  %v6493_v49 = vmul.f32 %v14039_v21, %v14007_v40  ;;  %v6251_v0 = vmul.f32 %v14036_v51, %v14036_v51  ;;  %vm6499_vm6 = vweird.f32 %v14039_v21  ;;  %vm6509_vm12 = vweird.f32 %v14033_v15 }
 0xb90   : > { %v7049_v45 = vmul.f32 1.442695, %v7021_v27  ;;  %v6504_v33 = vmul.f32 %v14033_v15, %v6503_v46  ;;  %6154 = vadd.xlane.f32.xlu2 %v6153_v20  ;;  %v6143_v16 = vpop.xlane.xlu0 %6142  ;;  %v6310_v25 = vsel %vm588_vm0, %v6250_v54, 0.0  ;;  %v14085_v27 = vpop.f32.mrf.mxu2  ;;  %v6156_v54 = vsel %vm588_vm0, %v14068_v36, 0.0  ;;  %vm6500_vm8 = vmor %vm6498_vm7, %vm6499_vm6 }
 0xb91   : > { %v6884_v60 = vpop.f32.mrf.mxu0  ;;  %v6494_v23 = vmul.f32 %v14039_v21, %v6493_v49  ;;  %v6313_v26 = vsel %vm588_vm0, %v6251_v0, 0.0  ;;  %6311 = vadd.xlane.f32.xlu1 %v6310_v25  ;;  %v6300_v4 = vpop.xlane.xlu2 %6299  ;;  %v6196_v28 = vmul.f32 %v13536_v2, %v6143_v16  ;;  %v9475_v49 = vld [vmem:[%s9613_s25 + $0xc0] sm:$0xff]  ;;  %vm14151_vm11 = vmor %vm6508_vm9, %vm6509_vm12  ;;  %vm6518_vm13 = vweird.f32 %v14027_v38 }
 0xb92   : > { %9187 = vpow2.f32 %v7049_v45  ;;  %v14065_v53 = vadd.f32 %v14001_v39, %v6884_v60  ;;  %v6505_v50 = vmul.f32 0.5, %v6504_v33  ;;  %v6303_v58 = vpop.xlane.xlu1 %6302  ;;  %6314 = vadd.xlane.f32.xlu0 %v6313_v26  ;;  %v6358_v20 = vmul.f32 %v6300_v4, %v13536_v2  ;;  %v7273_v16 = vld [vmem:[%s15377_s13] sm:$0xff] }
 0xb93   : > { %v14078_v7 = vpop.eup %9185  ;;  %v6495_v5 = vmul.f32 0.5, %v6494_v23  ;;  %v6359_v46 = vmul.f32 %v6303_v58, %v13536_v2  ;;  %v14092_v45 = vadd.f32 %v9475_v49, %v6046_v18  ;;  %v6690_v33 = vmul.f32 %v6491_v52, %v13756_v1  ;;  %7378 = vmatpush.msra.mxu1 %v7273_v16 }
 0xb94   : > { %v6994_v30 = vand.u32 2147483647, %v14065_v53  ;;  %v6513_v13 = vmul.f32 %v14078_v7, %v14027_v38  ;;  %v6506_v60 = vsub.f32 1.5, %v6505_v50  ;;  %v14096_v0 = vadd.f32 1e-05, %v6358_v20 }
 0xb95   : > { %v6496_v11 = vsub.f32 1.5, %v6495_v5  ;;  %v14106_v22 = vsub.f32 %v13895_v48, %v6196_v28  ;;  %v14109_v26 = vadd.f32 1e-05, %v6359_v46  ;;  %v6049_v58 = vadd.f32 %v13747_v8, %v14022_v63 }
 0xb96   : > { %v7022_v44 = vsub.f32 0.0, %v6994_v30  ;;  %v6514_v50 = vmul.f32 %v14078_v7, %v6513_v13  ;;  %9189 = vrsqrt.f32 %v14096_v0  ;;  %v6159_v48 = vsel %vm588_vm0, %v14092_v45, 0.0 }
 0xb97   : > { %v6497_v18 = vmul.f32 %v14039_v21, %v6496_v11  ;;  %v6507_v52 = vmul.f32 %v14033_v15, %v6506_v60  ;;  %v6721_v30 = vmul.f32 %v13774_v47, %v6690_v33  ;;  %v6252_v13 = vmul.f32 %v14106_v22, %v14106_v22 }
 0xb98   : > { %v9188_v23 = vpop.eup %9187  ;;  %v7051_v9 = vmul.f32 1.442695, %v7022_v44  ;;  %v6515_v46 = vmul.f32 0.5, %v6514_v50  ;;  %vm6519_vm10 = vweird.f32 %v14078_v7  ;;  %vm6528_vm2 = vweird.f32 %v14096_v0 }
 0xb99   : > { %v7105_v1 = vadd.f32 1.0, %v9188_v23  ;;  %v6501_v25 = vsel %vm6500_vm8, %v14039_v21, %v6497_v18  ;;  %6157 = vadd.xlane.f32.xlu1 %v6156_v54  ;;  %v6146_v28 = vpop.xlane.xlu2 %6145  ;;  %v14129_v20 = vadd.f32 %v13783_v31, %v6721_v30  ;;  %v6316_v33 = vsel %vm588_vm0, %v6252_v13, 0.0  ;;  %v9476_v54 = vld [vmem:[%s9613_s25 + $0xc8] sm:$0xff]  ;;  %vm14198_vm14 = vmor %vm6518_vm13, %vm6519_vm10 }
 0xb9a   : > { %9191 = vpow2.f32 %v7051_v9  ;;  %v6887_v40 = vpop.f32.mrf.mxu0  ;;  %v6691_v5 = vmul.f32 %v6501_v25, %v13824_v3  ;;  %v6149_v4 = vpop.xlane.xlu1 %6148  ;;  %6160 = vadd.xlane.f32.xlu0 %v6159_v48  ;;  %v6197_v49 = vmul.f32 %v13536_v2, %v6146_v28  ;;  %v14140_v16 = vadd.f32 %v9476_v54, %v6049_v58  ;;  %6317 = vadd.xlane.f32.xlu2 %v6316_v33 }
 0xb9b   : > { %9193 = vlog2.f32 %v7105_v1  ;;  %v14122_v63 = vadd.f32 %v14001_v39, %v6887_v40  ;;  %v6198_v21 = vmul.f32 %v13536_v2, %v6149_v4  ;;  %v6054_v3 = vpop.f32.mrf.mxu2  ;;  %8635 = vmatmul.msk.f32.gmra.mxu0 %vm588_vm0, %v14129_v20  ;;  %v6965_v1 = vmax.f32 %v14016_v17, 0.0 }
 0xb9c   : > { %9195 = vrsqrt.f32 %v14109_v26  ;;  %v14137_v60 = vpop.eup %9189  ;;  %v14146_v23 = vsub.f32 %v13938_v59, %v6197_v49  ;;  %v6722_v18 = vmul.f32 %v13774_v47, %v6691_v5  ;;  %v6055_v50 = vadd.f32 %v13747_v8, %v6054_v3 }
 0xb9d   : > { %v6995_v11 = vand.u32 2147483647, %v14122_v63  ;;  %v14134_v44 = vsub.f32 %v13931_v43, %v6198_v21  ;;  %v6523_v57 = vmul.f32 %v14137_v60, %v14096_v0  ;;  %v6511_v25 = vsel %vm14151_vm11, %v14033_v15, %v6507_v52 }
 0xb9e   : > { %v6516_v40 = vsub.f32 1.5, %v6515_v46  ;;  %v6253_v13 = vmul.f32 %v14146_v23, %v14146_v23  ;;  %v14170_v49 = vadd.f32 %v13783_v31, %v6722_v18  ;;  %v6052_v46 = vadd.f32 %v13747_v8, %v14085_v27 }
 0xb9f   : > { %v7023_v58 = vsub.f32 0.0, %v6995_v11  ;;  %v6254_v5 = vmul.f32 %v14134_v44, %v14134_v44  ;;  %v6524_v4 = vmul.f32 %v14137_v60, %v6523_v57  ;;  %v6692_v54 = vmul.f32 %v6511_v25, %v13810_v55 }
 0xba0   : > { %v9192_v43 = vpop.eup %9191  ;;  %v6319_v33 = vsel %vm588_vm0, %v6253_v13, 0.0  ;;  %v6517_v18 = vmul.f32 %v14078_v7, %v6516_v40  ;;  %v6162_v27 = vsel %vm588_vm0, %v14140_v16, 0.0  ;;  %vm6529_vm1 = vweird.f32 %v14137_v60 }
 0xba1   : > { %v9194_v59 = vpop.eup %9193  ;;  %v7106_v48 = vadd.f32 1.0, %v9192_v43  ;;  %v7053_v21 = vmul.f32 1.442695, %v7023_v58  ;;  %v6322_v52 = vsel %vm588_vm0, %v6254_v5, 0.0  ;;  %6320 = vadd.xlane.f32.xlu1 %v6319_v33  ;;  %v6525_v8 = vmul.f32 0.5, %v6524_v4  ;;  %v9478_v58 = vld [vmem:[%s9613_s25 + $0xd0] sm:$0xff]  ;;  %vm6530_vm3 = vmor %vm6528_vm2, %vm6529_vm1 }
 0xba2   : > { %v7134_v30 = vmul.f32 0.6931472, %v9194_v59  ;;  %v6890_v28 = vpop.f32.mrf.mxu0  ;;  %v14167_v3 = vpop.eup %9195  ;;  %6323 = vadd.xlane.f32.xlu0 %v6322_v52  ;;  %6163 = vadd.xlane.f32.xlu2 %v6162_v27  ;;  %v14194_v59 = vadd.f32 %v9478_v58, %v6052_v46  ;;  %v6521_v38 = vsel %vm14198_vm14, %v14078_v7, %v6517_v18  ;;  %vm6538_vm5 = vweird.f32 %v14109_v26 }
 0xba3   : > { %9197 = vlog2.f32 %v7106_v48  ;;  %v14173_v15 = vadd.f32 %v14001_v39, %v6890_v28  ;;  %v6533_v9 = vmul.f32 %v14167_v3, %v14109_v26  ;;  %8636 = vmatmul.msk.f32.gmra.mxu0 %vm588_vm0, %v14170_v49  ;;  %v6723_v48 = vmul.f32 %v13774_v47, %v6692_v54 }
 0xba4   : > { %v7189_v11 = vadd.f32 %v7134_v30, %v6965_v1  ;;  %9199 = vpow2.f32 %v7053_v21  ;;  %v9477_v1 = vld [vmem:[%s9613_s25 + $0xd8] sm:$0xff]  ;;  %v6966_v30 = vmax.f32 %v14065_v53, 0.0  ;;  %v6526_v28 = vsub.f32 1.5, %v6525_v8 }
 0xba5   : > { %v6996_v43 = vand.u32 2147483647, %v14173_v15  ;;  %v14189_v57 = vadd.f32 %v9477_v1, %v6055_v50  ;;  %v6534_v21 = vmul.f32 %v14167_v3, %v6533_v9  ;;  %v6693_v33 = vmul.f32 %v6521_v38, %v13850_v14 }
 0xba6   : > { %9201 = vtanh.f32 %v7189_v11  ;;  %v6165_v18 = vsel %vm588_vm0, %v14194_v59, 0.0  ;;  %v14218_v9 = vadd.f32 %v13783_v31, %v6723_v48  ;;  %v6527_v1 = vmul.f32 %v14137_v60, %v6526_v28 }
 0xba7   : > { %v7024_v55 = vsub.f32 0.0, %v6996_v43  ;;  %v6168_v11 = vsel %vm588_vm0, %v14189_v57, 0.0  ;;  %v6535_v27 = vmul.f32 0.5, %v6534_v21  ;;  %v6724_v58 = vmul.f32 %v13774_v47, %v6693_v33 }
 0xba8   : > { %vm6539_vm4 = vweird.f32 %v14167_v3 }
 0xba9   : > { %v9198_v40 = vpop.eup %9197  ;;  %v7055_v50 = vmul.f32 1.442695, %v7024_v55  ;;  %6166 = vadd.xlane.f32.xlu1 %v6165_v18  ;;  %v6536_v25 = vsub.f32 1.5, %v6535_v27  ;;  %vm6540_vm6 = vmor %vm6538_vm5, %vm6539_vm4  ;;  %v6968_v27 = vmax.f32 %v14173_v15, 0.0 }
 0xbaa   : > { %v9200_v5 = vpop.eup %9199  ;;  %v7136_v4 = vmul.f32 0.6931472, %v9198_v40  ;;  %v6893_v13 = vpop.f32.mrf.mxu0  ;;  %6169 = vadd.xlane.f32.xlu0 %v6168_v11  ;;  %v6531_v40 = vsel %vm6530_vm3, %v14137_v60, %v6527_v1 }
 0xbab   : > { %v7107_v52 = vadd.f32 1.0, %v9200_v5  ;;  %9203 = vpow2.f32 %v7055_v50  ;;  %v14209_v46 = vadd.f32 %v14001_v39, %v6893_v13  ;;  %8637 = vmatmul.msk.f32.gmra.mxu0 %vm588_vm0, %v14218_v9  ;;  %v6694_v28 = vmul.f32 %v6531_v40, %v13905_v62 }
 0xbac   : > { %v9202_v7 = vpop.eup %9201  ;;  %v7190_v54 = vadd.f32 %v7136_v4, %v6966_v30  ;;  %v6967_v4 = vmax.f32 %v14122_v63, 0.0  ;;  %v14236_v13 = vadd.f32 %v13783_v31, %v6724_v58 }
 0xbad   : > { %v7245_v43 = vmul.f32 %v9202_v7, %v14016_v17  ;;  %9205 = vlog2.f32 %v7107_v52  ;;  %v6997_v8 = vand.u32 2147483647, %v14209_v46  ;;  %v6537_v52 = vmul.f32 %v14167_v3, %v6536_v25 }
 0xbae   : > { %9207 = vtanh.f32 %v7190_v54  ;;  %v6725_v33 = vmul.f32 %v13774_v47, %v6694_v28 }
 0xbaf   : > { %v7025_v14 = vsub.f32 0.0, %v6997_v8  ;;  %8655 = vmatmul.msk.f32.vlgmr.msra.gmra.mxu1 %vm7278_vm15, %v7245_v43  ;;  %v6541_v18 = vsel %vm6540_vm6, %v14167_v3, %v6537_v52 }
 0xbb0   : > { %v6695_v26 = vmul.f32 %v6541_v18, %v13900_v37 }
 0xbb1   : > { %v9204_v17 = vpop.eup %9203  ;;  %v7057_v55 = vmul.f32 1.442695, %v7025_v14 }
 0xbb2   : > { %v7108_v38 = vadd.f32 1.0, %v9204_v17  ;;  %v6896_v50 = vpop.f32.mrf.mxu0 }
 0xbb3   : > { %v9206_v48 = vpop.eup %9205  ;;  %9209 = vpow2.f32 %v7057_v55  ;;  %v14230_v5 = vadd.f32 %v14001_v39, %v6896_v50  ;;  %8638 = vmatmul.msk.f32.gmra.mxu0 %vm588_vm0, %v14236_v13  ;;  %v14251_v55 = vadd.f32 %v13783_v31, %v6725_v33 }
 0xbb4   : > { %v9208_v30 = vpop.eup %9207  ;;  %v7138_v21 = vmul.f32 0.6931472, %v9206_v48  ;;  %9211 = vlog2.f32 %v7108_v38  ;;  %v6726_v48 = vmul.f32 %v13774_v47, %v6695_v26 }
 0xbb5   : > { %v7246_v0 = vmul.f32 %v9208_v30, %v14065_v53  ;;  %v6998_v60 = vand.u32 2147483647, %v14230_v5 }
 0xbb6   : > { %v7191_v11 = vadd.f32 %v7138_v21, %v6967_v4  ;;  %v6969_v4 = vmax.f32 %v14209_v46, 0.0  ;;  %v14260_v28 = vadd.f32 %v13783_v31, %v6726_v48 }
 0xbb7   : > { %v7026_v7 = vsub.f32 0.0, %v6998_v60  ;;  %8656 = vmatmul.msk.f32.gmra.mxu1 %vm7278_vm15, %v7246_v0 }
 0xbb8   : > { %9213 = vtanh.f32 %v7191_v11 }
 0xbb9   : > { %v9210_v62 = vpop.eup %9209  ;;  %v7059_v53 = vmul.f32 1.442695, %v7026_v7  ;;  %v6970_v7 = vmax.f32 %v14230_v5, 0.0 }
 0xbba   : > { %v9212_v54 = vpop.eup %9211  ;;  %v7109_v43 = vadd.f32 1.0, %v9210_v62  ;;  %v6899_v8 = vpop.f32.mrf.mxu0 }
 0xbbb   : > { %v7140_v1 = vmul.f32 0.6931472, %v9212_v54  ;;  %9215 = vpow2.f32 %v7059_v53  ;;  %v6900_v14 = vadd.f32 %v14001_v39, %v6899_v8  ;;  %8639 = vmatmul.msk.f32.gmra.mxu0 %vm588_vm0, %v14251_v55 }
 0xbbc   : > { %9217 = vlog2.f32 %v7109_v43 }
 0xbbd   : > { %v7192_v17 = vadd.f32 %v7140_v1, %v6968_v27  ;;  %v6999_v58 = vand.u32 2147483647, %v6900_v14  ;;  %v6971_v54 = vmax.f32 %v6900_v14, 0.0 }
 0xbbe   : > { %v9214_v25 = vpop.eup %9213 }
 0xbbf   : > { %v7247_v40 = vmul.f32 %v9214_v25, %v14122_v63  ;;  %9219 = vtanh.f32 %v7192_v17  ;;  %v7027_v3 = vsub.f32 0.0, %v6999_v58 }
 0xbc1   : > { %v9216_v38 = vpop.eup %9215  ;;  %v7061_v50 = vmul.f32 1.442695, %v7027_v3  ;;  %8657 = vmatmul.msk.f32.gmra.mxu1 %vm7278_vm15, %v7247_v40 }
 0xbc2   : > { %v9218_v37 = vpop.eup %9217  ;;  %v7110_v30 = vadd.f32 1.0, %v9216_v38 }
 0xbc3   : > { %v7142_v21 = vmul.f32 0.6931472, %v9218_v37  ;;  %9221 = vpow2.f32 %v7061_v50  ;;  %8640 = vmatmul.msk.f32.gmra.mxu0 %vm588_vm0, %v14260_v28 }
 0xbc4   : > { %9223 = vlog2.f32 %v7110_v30 }
 0xbc5   : > { %v9220_v0 = vpop.eup %9219  ;;  %v7193_v63 = vadd.f32 %v7142_v21, %v6969_v4 }
 0xbc6   : > { %v7248_v60 = vmul.f32 %v9220_v0, %v14173_v15 }
 0xbc7   : > { %9225 = vtanh.f32 %v7193_v63 }
 0xbc9   : > { %v9222_v47 = vpop.eup %9221  ;;  %8658 = vmatmul.msk.f32.gmra.mxu1 %vm7278_vm15, %v7248_v60 }
 0xbca   : > { %v9224_v52 = vpop.eup %9223  ;;  %v7111_v11 = vadd.f32 1.0, %v9222_v47 }
 0xbcb   : > { %v7144_v62 = vmul.f32 0.6931472, %v9224_v52 }
 0xbcc   : > { %9227 = vlog2.f32 %v7111_v11 }
 0xbcd   : > { %v9226_v53 = vpop.eup %9225  ;;  %v7194_v33 = vadd.f32 %v7144_v62, %v6970_v7 }
 0xbce   : > { %v7249_v31 = vmul.f32 %v9226_v53, %v14209_v46 }
 0xbcf   : > { %9229 = vtanh.f32 %v7194_v33 }
 0xbd1   : > { %8659 = vmatmul.msk.f32.gmra.mxu1 %vm7278_vm15, %v7249_v31 }
 0xbd2   : > { %v9228_v15 = vpop.eup %9227 }
 0xbd3   : > { %v7146_v18 = vmul.f32 0.6931472, %v9228_v15 }
 0xbd5   : > { %v9230_v43 = vpop.eup %9229  ;;  %v7195_v8 = vadd.f32 %v7146_v18, %v6971_v54 }
 0xbd6   : > { %v7250_v27 = vmul.f32 %v9230_v43, %v14230_v5 }
 0xbd7   : > { %9231 = vtanh.f32 %v7195_v8 }
 0xbd9   : > { %8660 = vmatmul.msk.f32.gmra.mxu1 %vm7278_vm15, %v7250_v27 }
 0xbdd   : > { %v9232_v1 = vpop.eup %9231 }
 0xbde   : > { %v7251_v26 = vmul.f32 %v9232_v1, %v6900_v14 }
 0xbe1   : > { %8661 = vmatmul.msk.f32.gmra.mxu1 %vm7278_vm15, %v7251_v26 }
 0xbf5   : > { %v6306_v17 = vpop.xlane.xlu0 %6305 }
 0xbf6   : > { %v6360_v46 = vmul.f32 %v6306_v17, %v13536_v2 }
 0xbf8   : > { %v6388_v58 = vadd.f32 1e-05, %v6360_v46  ;;  %v14303_v46 = vld [vmem:[%s15373_s9] ss:$0 sm:$0xff] }
 0xbfa   : > { %9233 = vrsqrt.f32 %v6388_v58  ;;  %vm6548_vm8 = vweird.f32 %v6388_v58 }
 0xbfb   : > { %v6309_v25 = vpop.xlane.xlu2 %6308 }
 0xbfc   : > { %v6361_v40 = vmul.f32 %v6309_v25, %v13536_v2 }
 0xbfd   : > { %v6152_v3 = vpop.xlane.xlu0 %6151 }
 0xbfe   : > { %v6199_v38 = vmul.f32 %v13536_v2, %v6152_v3  ;;  %v6389_v50 = vadd.f32 1e-05, %v6361_v40 }
 0xc00   : > { %v9234_v5 = vpop.eup %9233  ;;  %v14276_v48 = vsub.f32 %v13991_v34, %v6199_v38  ;;  %9235 = vrsqrt.f32 %v6389_v50  ;;  %vm6558_vm11 = vweird.f32 %v6389_v50 }
 0xc01   : > { %v6543_v37 = vmul.f32 %v9234_v5, %v6388_v58  ;;  %vm6549_vm7 = vweird.f32 %v9234_v5 }
 0xc02   : > { %v6255_v14 = vmul.f32 %v14276_v48, %v14276_v48  ;;  %vm6550_vm12 = vmor %vm6548_vm8, %vm6549_vm7 }
 0xc03   : > { %v6544_v30 = vmul.f32 %v9234_v5, %v6543_v37  ;;  %v6155_v4 = vpop.xlane.xlu2 %6154  ;;  %v14312_v37 = vld [vmem:[%s15374_s10] ss:$0 sm:$0xff] }
 0xc04   : > { %v6325_v21 = vsel %vm588_vm0, %v6255_v14, 0.0  ;;  %v6200_v63 = vmul.f32 %v13536_v2, %v6155_v4  ;;  %v6312_v52 = vpop.xlane.xlu1 %6311 }
 0xc05   : > { %v6545_v0 = vmul.f32 0.5, %v6544_v30  ;;  %6326 = vadd.xlane.f32.xlu2 %v6325_v21  ;;  %v6315_v11 = vpop.xlane.xlu0 %6314  ;;  %v6362_v62 = vmul.f32 %v6312_v52, %v13536_v2 }
 0xc06   : > { %v9236_v60 = vpop.eup %9235  ;;  %v14283_v34 = vsub.f32 %v14020_v12, %v6200_v63  ;;  %v6363_v53 = vmul.f32 %v6315_v11, %v13536_v2 }
 0xc07   : > { %v6546_v47 = vsub.f32 1.5, %v6545_v0  ;;  %v6553_v7 = vmul.f32 %v9236_v60, %v6389_v50  ;;  %v14289_v54 = vadd.f32 1e-05, %v6362_v62  ;;  %vm6559_vm9 = vweird.f32 %v9236_v60 }
 0xc08   : > { %v6256_v31 = vmul.f32 %v14283_v34, %v14283_v34  ;;  %v14291_v18 = vadd.f32 1e-05, %v6363_v53  ;;  %vm6560_vm10 = vmor %vm6558_vm11, %vm6559_vm9 }
 0xc09   : > { %v6547_v33 = vmul.f32 %v9234_v5, %v6546_v47  ;;  %v6554_v15 = vmul.f32 %v9236_v60, %v6553_v7  ;;  %9237 = vrsqrt.f32 %v14289_v54  ;;  %vm6568_vm1 = vweird.f32 %v14289_v54 }
 0xc0a   : > { %v6328_v12 = vsel %vm588_vm0, %v6256_v31, 0.0  ;;  %9239 = vrsqrt.f32 %v14291_v18  ;;  %vm6578_vm3 = vweird.f32 %v14291_v18 }
 0xc0b   : > { %v6551_v43 = vsel %vm6550_vm12, %v9234_v5, %v6547_v33  ;;  %v6555_v27 = vmul.f32 0.5, %v6554_v15  ;;  %6329 = vadd.xlane.f32.xlu1 %v6328_v12 }
 0xc0c   : > { %v6696_v8 = vmul.f32 %v6551_v43, %v13976_v35  ;;  %v6902_v1 = vpop.f32.mrf.mxu0  ;;  %v6158_v25 = vpop.xlane.xlu1 %6157 }
 0xc0d   : > { %v14298_v26 = vadd.f32 %v14001_v39, %v6902_v1  ;;  %v6556_v17 = vsub.f32 1.5, %v6555_v27  ;;  %v6161_v40 = vpop.xlane.xlu0 %6160  ;;  %v6201_v38 = vmul.f32 %v13536_v2, %v6158_v25  ;;  %v6318_v0 = vpop.xlane.xlu2 %6317 }
 0xc0e   : > { %v6727_v58 = vmul.f32 %v14303_v46, %v6696_v8  ;;  %v6202_v5 = vmul.f32 %v13536_v2, %v6161_v40 }
 0xc0f   : > { %v7000_v35 = vand.u32 2147483647, %v14298_v26  ;;  %v6557_v3 = vmul.f32 %v9236_v60, %v6556_v17  ;;  %v9238_v50 = vpop.eup %9237  ;;  %v14318_v21 = vsub.f32 %v14068_v36, %v6201_v38 }
 0xc10   : > { %v14315_v14 = vadd.f32 %v14312_v37, %v6727_v58  ;;  %v14321_v63 = vsub.f32 %v14092_v45, %v6202_v5  ;;  %v9240_v47 = vpop.eup %9239  ;;  %v6563_v11 = vmul.f32 %v9238_v50, %v14289_v54  ;;  %vm6569_vm13 = vweird.f32 %v9238_v50 }
 0xc11   : > { %v7028_v30 = vsub.f32 0.0, %v7000_v35  ;;  %v6561_v4 = vsel %vm6560_vm10, %v9236_v60, %v6557_v3  ;;  %v6573_v62 = vmul.f32 %v9240_v47, %v14291_v18  ;;  %v6364_v60 = vmul.f32 %v6318_v0, %v13536_v2  ;;  %vm6570_vm2 = vmor %vm6568_vm1, %vm6569_vm13 }
 0xc12   : > { %8641 = vmatmul.msk.f32.gmra.mxu0 %vm588_vm0, %v14315_v14  ;;  %v6697_v52 = vmul.f32 %v6561_v4, %v13988_v6  ;;  %v6257_v36 = vmul.f32 %v14318_v21, %v14318_v21  ;;  %v6564_v53 = vmul.f32 %v9238_v50, %v6563_v11  ;;  %v6258_v45 = vmul.f32 %v14321_v63, %v14321_v63 }
 0xc13   : > { %v7063_v7 = vmul.f32 1.442695, %v7028_v30  ;;  %v6574_v31 = vmul.f32 %v9240_v47, %v6573_v62  ;;  %v14334_v15 = vadd.f32 1e-05, %v6364_v60  ;;  %vm6579_vm14 = vweird.f32 %v9240_v47 }
 0xc14   : > { %v6728_v33 = vmul.f32 %v14303_v46, %v6697_v52  ;;  %v6331_v6 = vsel %vm588_vm0, %v6257_v36, 0.0  ;;  %v6565_v43 = vmul.f32 0.5, %v6564_v53  ;;  %v6334_v12 = vsel %vm588_vm0, %v6258_v45, 0.0  ;;  %v6321_v17 = vpop.xlane.xlu1 %6320  ;;  %vm6580_vm4 = vmor %vm6578_vm3, %vm6579_vm14 }
 0xc15   : > { %9241 = vpow2.f32 %v7063_v7  ;;  %6332 = vadd.xlane.f32.xlu2 %v6331_v6  ;;  %v6324_v8 = vpop.xlane.xlu0 %6323  ;;  %v6575_v1 = vmul.f32 0.5, %v6574_v31  ;;  %6335 = vadd.xlane.f32.xlu0 %v6334_v12  ;;  %v6365_v25 = vmul.f32 %v6321_v17, %v13536_v2  ;;  %v6164_v3 = vpop.xlane.xlu2 %6163  ;;  %vm6588_vm6 = vweird.f32 %v14334_v15 }
 0xc16   : > { %v14339_v27 = vadd.f32 %v14312_v37, %v6728_v33  ;;  %9243 = vrsqrt.f32 %v14334_v15  ;;  %v6366_v58 = vmul.f32 %v6324_v8, %v13536_v2  ;;  %v6566_v35 = vsub.f32 1.5, %v6565_v43 }
 0xc17   : > { %v6576_v40 = vsub.f32 1.5, %v6575_v1  ;;  %v14349_v4 = vadd.f32 1e-05, %v6365_v25  ;;  %v6203_v0 = vmul.f32 %v13536_v2, %v6164_v3 }
 0xc18   : > { %v14344_v38 = vadd.f32 1e-05, %v6366_v58  ;;  %v6567_v30 = vmul.f32 %v9238_v50, %v6566_v35  ;;  %v6905_v7 = vpop.f32.mrf.mxu0 }
 0xc19   : > { %v6577_v52 = vmul.f32 %v9240_v47, %v6576_v40  ;;  %v14356_v60 = vadd.f32 %v14001_v39, %v6905_v7  ;;  %v14361_v45 = vsub.f32 %v14140_v16, %v6203_v0  ;;  %v6972_v40 = vmax.f32 %v14298_v26, 0.0 }
 0xc1a   : > { %8642 = vmatmul.msk.f32.gmra.mxu0 %vm588_vm0, %v14339_v27  ;;  %9245 = vrsqrt.f32 %v14344_v38  ;;  %v6571_v62 = vsel %vm6570_vm2, %v9238_v50, %v6567_v30  ;;  %vm6598_vm12 = vweird.f32 %v14349_v4  ;;  %vm6608_vm10 = vweird.f32 %v14344_v38 }
 0xc1b   : > { %v9242_v5 = vpop.eup %9241  ;;  %9247 = vrsqrt.f32 %v14349_v4  ;;  %v6698_v36 = vmul.f32 %v6571_v62, %v14046_v19  ;;  %v6581_v53 = vsel %vm6580_vm4, %v9240_v47, %v6577_v52  ;;  %v7001_v50 = vand.u32 2147483647, %v14356_v60 }
 0xc1c   : > { %v7112_v11 = vadd.f32 1.0, %v9242_v5  ;;  %v9244_v54 = vpop.eup %9243  ;;  %v6167_v31 = vpop.xlane.xlu1 %6166  ;;  %v6259_v6 = vmul.f32 %v14361_v45, %v14361_v45  ;;  %v6699_v19 = vmul.f32 %v6581_v53, %v14036_v51 }
 0xc1d   : > { %v6583_v18 = vmul.f32 %v9244_v54, %v14334_v15  ;;  %v6170_v33 = vpop.xlane.xlu0 %6169  ;;  %v6729_v12 = vmul.f32 %v14303_v46, %v6698_v36  ;;  %v6204_v8 = vmul.f32 %v13536_v2, %v6167_v31  ;;  %v7029_v1 = vsub.f32 0.0, %v7001_v50 }
 0xc1e   : > { %9249 = vlog2.f32 %v7112_v11  ;;  %v6205_v43 = vmul.f32 %v13536_v2, %v6170_v33  ;;  %v6337_v17 = vsel %vm588_vm0, %v6259_v6, 0.0  ;;  %vm6589_vm5 = vweird.f32 %v9244_v54 }
 0xc1f   : > { %v6584_v47 = vmul.f32 %v9244_v54, %v6583_v18  ;;  %v14378_v35 = vadd.f32 %v14312_v37, %v6729_v12  ;;  %v14384_v5 = vsub.f32 %v14194_v59, %v6204_v8  ;;  %6338 = vadd.xlane.f32.xlu1 %v6337_v17  ;;  %v7065_v0 = vmul.f32 1.442695, %v7029_v1  ;;  %vm6590_vm7 = vmor %vm6588_vm6, %vm6589_vm5  ;;  %v14406_v8 = vld [vmem:[%s15378_s14] ss:$0 sm:$0xff] }
 0xc20   : > { %v14371_v16 = vpop.eup %9245  ;;  %v14375_v58 = vsub.f32 %v14189_v57, %v6205_v43  ;;  %v6908_v52 = vpop.f32.mrf.mxu0  ;;  %v6730_v59 = vmul.f32 %v14303_v46, %v6699_v19 }
 0xc21   : > { %v9248_v25 = vpop.eup %9247  ;;  %v6585_v3 = vmul.f32 0.5, %v6584_v47  ;;  %v6603_v51 = vmul.f32 %v14371_v16, %v14344_v38  ;;  %v14392_v36 = vadd.f32 %v14001_v39, %v6908_v52  ;;  %9251 = vpow2.f32 %v7065_v0 }
 0xc22   : > { %v6593_v57 = vmul.f32 %v9248_v25, %v14349_v4  ;;  %8643 = vmatmul.msk.f32.gmra.mxu0 %vm588_vm0, %v14378_v35  ;;  %v6261_v11 = vmul.f32 %v14375_v58, %v14375_v58  ;;  %v6260_v18 = vmul.f32 %v14384_v5, %v14384_v5  ;;  %vm6599_vm8 = vweird.f32 %v9248_v25 }
 0xc23   : > { %v6586_v62 = vsub.f32 1.5, %v6585_v3  ;;  %v6604_v6 = vmul.f32 %v14371_v16, %v6603_v51  ;;  %v7002_v12 = vand.u32 2147483647, %v14392_v36  ;;  %vm6600_vm9 = vmor %vm6598_vm12, %vm6599_vm8  ;;  %vm6609_vm11 = vweird.f32 %v14371_v16 }
 0xc24   : > { %v9250_v30 = vpop.eup %9249  ;;  %v6594_v53 = vmul.f32 %v9248_v25, %v6593_v57  ;;  %v6343_v33 = vsel %vm588_vm0, %v6261_v11, 0.0  ;;  %v6340_v19 = vsel %vm588_vm0, %v6260_v18, 0.0  ;;  %vm6610_vm13 = vmor %vm6608_vm10, %vm6609_vm11 }
 0xc25   : > { %v7148_v7 = vmul.f32 0.6931472, %v9250_v30  ;;  %v6587_v31 = vmul.f32 %v9244_v54, %v6586_v62  ;;  %6344 = vadd.xlane.f32.xlu0 %v6343_v33  ;;  %6341 = vadd.xlane.f32.xlu2 %v6340_v19  ;;  %v7030_v17 = vsub.f32 0.0, %v7002_v12  ;;  %v6605_v3 = vmul.f32 0.5, %v6604_v6 }
 0xc26   : > { %v6595_v43 = vmul.f32 0.5, %v6594_v53 }
 0xc27   : > { %v7196_v50 = vadd.f32 %v7148_v7, %v6972_v40  ;;  %v6591_v47 = vsel %vm6590_vm7, %v9244_v54, %v6587_v31  ;;  %v14410_v40 = vadd.f32 %v14312_v37, %v6730_v59  ;;  %v9252_v51 = vpop.eup %9251  ;;  %v7067_v0 = vmul.f32 1.442695, %v7030_v17 }
 0xc28   : > { %v6700_v15 = vmul.f32 %v6591_v47, %v14106_v22  ;;  %v6596_v1 = vsub.f32 1.5, %v6595_v43  ;;  %v6911_v57 = vpop.f32.mrf.mxu0  ;;  %v7113_v52 = vadd.f32 1.0, %v9252_v51  ;;  %v6606_v53 = vsub.f32 1.5, %v6605_v3 }
 0xc29   : > { %9253 = vtanh.f32 %v7196_v50  ;;  %v14416_v22 = vadd.f32 %v14001_v39, %v6911_v57  ;;  %v6973_v17 = vmax.f32 %v14356_v60, 0.0 }
 0xc2a   : > { %v6597_v30 = vmul.f32 %v9248_v25, %v6596_v1  ;;  %8644 = vmatmul.msk.f32.gmra.mxu0 %vm588_vm0, %v14410_v40  ;;  %9255 = vpow2.f32 %v7067_v0  ;;  %v6731_v7 = vmul.f32 %v14303_v46, %v6700_v15 }
 0xc2b   : > { %9257 = vlog2.f32 %v7113_v52  ;;  %v7003_v18 = vand.u32 2147483647, %v14416_v22 }
 0xc2c   : > { %v7380_v54 = vpop.f32.mrf.mxu1  ;;  %v6601_v59 = vsel %vm6600_vm9, %v9248_v25, %v6597_v30  ;;  %v14430_v43 = vadd.f32 %v14312_v37, %v6731_v7  ;;  %v6607_v25 = vmul.f32 %v14371_v16, %v6606_v53  ;;  %v14461_v53 = vld [vmem:[%s15376_s12] ss:$0 sm:$0xff] }
 0xc2d   : > { %v7381_v11 = vadd.f32 %v14406_v8, %v7380_v54  ;;  %v7031_v4 = vsub.f32 0.0, %v7003_v18  ;;  %v6701_v31 = vmul.f32 %v6601_v59, %v14146_v23  ;;  %v6974_v18 = vmax.f32 %v14392_v36, 0.0 }
 0xc2e   : > { %v6611_v51 = vsel %vm6610_vm13, %v14371_v16, %v6607_v25 }
 0xc2f   : > { %v9254_v62 = vpop.eup %9253  ;;  %v14423_v50 = vadd.f32 %v7381_v11, %v13806_v29  ;;  %v7069_v12 = vmul.f32 1.442695, %v7031_v4  ;;  %v6732_v38 = vmul.f32 %v14303_v46, %v6701_v31  ;;  %v6702_v52 = vmul.f32 %v6611_v51, %v14134_v44 }
 0xc30   : > { %v7252_v33 = vmul.f32 %v9254_v62, %v14298_v26  ;;  %v9256_v26 = vpop.eup %9255  ;;  %v6914_v29 = vpop.f32.mrf.mxu0 }
 0xc31   : > { %v7494_v6 = vsel %vm588_vm0, %v14423_v50, 0.0  ;;  %v9258_v19 = vpop.eup %9257  ;;  %v7114_v47 = vadd.f32 1.0, %v9256_v26  ;;  %9259 = vpow2.f32 %v7069_v12  ;;  %v14438_v15 = vadd.f32 %v14001_v39, %v6914_v29 }
 0xc32   : > { %8662 = vmatmul.msk.f32.gmra.mxu1 %vm7278_vm15, %v7252_v33  ;;  %7495 = vadd.xlane.f32.xlu1 %v7494_v6  ;;  %v7150_v3 = vmul.f32 0.6931472, %v9258_v19  ;;  %v14454_v11 = vadd.f32 %v14312_v37, %v6732_v38  ;;  %v6733_v31 = vmul.f32 %v14303_v46, %v6702_v52 }
 0xc33   : > { %8645 = vmatmul.msk.f32.gmra.mxu0 %vm588_vm0, %v14430_v43  ;;  %9261 = vlog2.f32 %v7114_v47  ;;  %v7004_v30 = vand.u32 2147483647, %v14438_v15 }
 0xc34   : > { %v7383_v23 = vpop.f32.mrf.mxu1  ;;  %v7197_v39 = vadd.f32 %v7150_v3, %v6973_v17  ;;  %v14475_v47 = vadd.f32 %v14312_v37, %v6733_v31 }
 0xc35   : > { %v7384_v1 = vadd.f32 %v14406_v8, %v7383_v23  ;;  %v7032_v57 = vsub.f32 0.0, %v7004_v30 }
 0xc36   : > { %9263 = vtanh.f32 %v7197_v39 }
 0xc37   : > { %v14448_v0 = vadd.f32 %v7384_v1, %v13854_v24  ;;  %v9260_v7 = vpop.eup %9259  ;;  %v7071_v16 = vmul.f32 1.442695, %v7032_v57 }
 0xc38   : > { %v7115_v62 = vadd.f32 1.0, %v9260_v7  ;;  %v6917_v59 = vpop.f32.mrf.mxu0 }
 0xc39   : > { %v7497_v54 = vsel %vm588_vm0, %v14448_v0, 0.0  ;;  %v9262_v24 = vpop.eup %9261  ;;  %9265 = vpow2.f32 %v7071_v16  ;;  %v14464_v44 = vadd.f32 %v14461_v53, %v6917_v59 }
 0xc3a   : > { %7498 = vadd.xlane.f32.xlu2 %v7497_v54  ;;  %v7152_v33 = vmul.f32 0.6931472, %v9262_v24  ;;  %9267 = vlog2.f32 %v7115_v62 }
 0xc3b   : > { %8646 = vmatmul.msk.f32.gmra.mxu0 %vm588_vm0, %v14454_v11  ;;  %v7005_v6 = vand.u32 2147483647, %v14464_v44 }
 0xc3c   : > { %v9264_v12 = vpop.eup %9263  ;;  %v7198_v26 = vadd.f32 %v7152_v33, %v6974_v18 }
 0xc3d   : > { %v7253_v29 = vmul.f32 %v9264_v12, %v14356_v60  ;;  %v7033_v23 = vsub.f32 0.0, %v7005_v6 }
 0xc3e   : > { %v7386_v4 = vpop.f32.mrf.mxu1  ;;  %9269 = vtanh.f32 %v7198_v26 }
 0xc3f   : > { %v7387_v25 = vadd.f32 %v14406_v8, %v7386_v4  ;;  %v9266_v1 = vpop.eup %9265  ;;  %v7073_v17 = vmul.f32 1.442695, %v7033_v23  ;;  %8663 = vmatmul.msk.f32.gmra.mxu1 %vm7278_vm15, %v7253_v29 }
 0xc40   : > { %v9268_v38 = vpop.eup %9267  ;;  %v7116_v51 = vadd.f32 1.0, %v9266_v1  ;;  %v6920_v30 = vpop.f32.mrf.mxu0 }
 0xc41   : > { %v14472_v19 = vadd.f32 %v7387_v25, %v13908_v61  ;;  %v6975_v61 = vmax.f32 %v14416_v22, 0.0  ;;  %v7154_v60 = vmul.f32 0.6931472, %v9268_v38  ;;  %9271 = vpow2.f32 %v7073_v17 }
 0xc42   : > { %v6921_v39 = vadd.f32 %v14461_v53, %v6920_v30  ;;  %9273 = vlog2.f32 %v7116_v51  ;;  %v6976_v25 = vmax.f32 %v14438_v15, 0.0  ;;  %v6977_v30 = vmax.f32 %v14464_v44, 0.0 }
 0xc43   : > { %v7500_v3 = vsel %vm588_vm0, %v14472_v19, 0.0  ;;  %8647 = vmatmul.msk.f32.gmra.mxu0 %vm588_vm0, %v14475_v47  ;;  %v7199_v54 = vadd.f32 %v7154_v60, %v6975_v61 }
 0xc44   : > { %7501 = vadd.xlane.f32.xlu0 %v7500_v3  ;;  %v7006_v52 = vand.u32 2147483647, %v6921_v39  ;;  %v9270_v16 = vpop.eup %9269 }
 0xc45   : > { %v7254_v62 = vmul.f32 %v9270_v16, %v14392_v36  ;;  %9275 = vtanh.f32 %v7199_v54 }
 0xc46   : > { %v7389_v57 = vpop.f32.mrf.mxu1  ;;  %v7034_v59 = vsub.f32 0.0, %v7006_v52 }
 0xc47   : > { %v7390_v7 = vadd.f32 %v14406_v8, %v7389_v57  ;;  %v9272_v18 = vpop.eup %9271  ;;  %8664 = vmatmul.msk.f32.gmra.mxu1 %vm7278_vm15, %v7254_v62  ;;  %v6978_v62 = vmax.f32 %v6921_v39, 0.0 }
 0xc48   : > { %v7075_v33 = vmul.f32 1.442695, %v7034_v59  ;;  %v9274_v31 = vpop.eup %9273  ;;  %v7117_v6 = vadd.f32 1.0, %v9272_v18 }
 0xc49   : > { %v14487_v24 = vadd.f32 %v7390_v7, %v13935_v41  ;;  %v7156_v12 = vmul.f32 0.6931472, %v9274_v31 }
 0xc4a   : > { %9277 = vpow2.f32 %v7075_v33 }
 0xc4b   : > { %v7503_v4 = vsel %vm588_vm0, %v14487_v24, 0.0  ;;  %9279 = vlog2.f32 %v7117_v6  ;;  %v9276_v26 = vpop.eup %9275  ;;  %v7200_v29 = vadd.f32 %v7156_v12, %v6976_v25 }
 0xc4c   : > { %7504 = vadd.xlane.f32.xlu1 %v7503_v4  ;;  %v7255_v23 = vmul.f32 %v9276_v26, %v14416_v22 }
 0xc4d   : > { %9281 = vtanh.f32 %v7200_v29 }
 0xc4e   : > { %v7392_v36 = vpop.f32.mrf.mxu1 }
 0xc4f   : > { %v7393_v41 = vadd.f32 %v14406_v8, %v7392_v36  ;;  %8665 = vmatmul.msk.f32.gmra.mxu1 %vm7278_vm15, %v7255_v23 }
 0xc50   : > { %v9278_v17 = vpop.eup %9277 }
 0xc51   : > { %v14496_v1 = vadd.f32 %v7393_v41, %v13950_v32  ;;  %v9280_v38 = vpop.eup %9279  ;;  %v7118_v51 = vadd.f32 1.0, %v9278_v17 }
 0xc52   : > { %v7158_v61 = vmul.f32 0.6931472, %v9280_v38 }
 0xc53   : > { %v7506_v3 = vsel %vm588_vm0, %v14496_v1, 0.0  ;;  %9283 = vlog2.f32 %v7118_v51  ;;  %v9282_v57 = vpop.eup %9281 }
 0xc54   : > { %7507 = vadd.xlane.f32.xlu2 %v7506_v3  ;;  %v7201_v22 = vadd.f32 %v7158_v61, %v6977_v30  ;;  %v7256_v32 = vmul.f32 %v9282_v57, %v14438_v15 }
 0xc56   : > { %v7395_v60 = vpop.f32.mrf.mxu1  ;;  %9285 = vtanh.f32 %v7201_v22 }
 0xc57   : > { %v7396_v54 = vadd.f32 %v14406_v8, %v7395_v60  ;;  %8666 = vmatmul.msk.f32.gmra.mxu1 %vm7278_vm15, %v7256_v32 }
 0xc59   : > { %v14505_v52 = vadd.f32 %v7396_v54, %v13958_v42  ;;  %v9284_v16 = vpop.eup %9283 }
 0xc5a   : > { %v7160_v59 = vmul.f32 0.6931472, %v9284_v16 }
 0xc5b   : > { %v7509_v7 = vsel %vm588_vm0, %v14505_v52, 0.0 }
 0xc5c   : > { %7510 = vadd.xlane.f32.xlu0 %v7509_v7  ;;  %v9286_v33 = vpop.eup %9285  ;;  %v7202_v4 = vadd.f32 %v7160_v59, %v6978_v62 }
 0xc5d   : > { %v7257_v15 = vmul.f32 %v9286_v33, %v14464_v44 }
 0xc5e   : > { %v7398_v18 = vpop.f32.mrf.mxu1  ;;  %9287 = vtanh.f32 %v7202_v4 }
 0xc5f   : > { %v7399_v31 = vadd.f32 %v14406_v8, %v7398_v18  ;;  %8667 = vmatmul.msk.f32.gmra.mxu1 %vm7278_vm15, %v7257_v15 }
 0xc61   : > { %v14513_v42 = vadd.f32 %v7399_v31, %v13964_v10 }
 0xc63   : > { %v7512_v6 = vsel %vm588_vm0, %v14513_v42, 0.0 }
 0xc64   : > { %7513 = vadd.xlane.f32.xlu1 %v7512_v6  ;;  %v9288_v25 = vpop.eup %9287 }
 0xc65   : > { %v7258_v12 = vmul.f32 %v9288_v25, %v6921_v39 }
 0xc67   : > { %8668 = vmatmul.msk.f32.gmra.mxu1 %vm7278_vm15, %v7258_v12 }
 0xc78   : > { %v6327_v36 = vpop.xlane.xlu2 %6326 }
 0xc79   : > { %v6367_v26 = vmul.f32 %v6327_v36, %v13536_v2 }
 0xc7b   : > { %v6395_v29 = vadd.f32 1e-05, %v6367_v26 }
 0xc7d   : > { %9289 = vrsqrt.f32 %v6395_v29  ;;  %vm6618_vm1 = vweird.f32 %v6395_v29 }
 0xc7e   : > { %v6330_v44 = vpop.xlane.xlu1 %6329 }
 0xc7f   : > { %v6368_v41 = vmul.f32 %v6330_v44, %v13536_v2 }
 0xc81   : > { %v6396_v10 = vadd.f32 1e-05, %v6368_v41 }
 0xc83   : > { %v9290_v23 = vpop.eup %9289  ;;  %9291 = vrsqrt.f32 %v6396_v10  ;;  %vm6628_vm4 = vweird.f32 %v6396_v10 }
 0xc84   : > { %v6613_v17 = vmul.f32 %v9290_v23, %v6395_v29  ;;  %vm6619_vm14 = vweird.f32 %v9290_v23 }
 0xc85   : > { %vm6620_vm2 = vmor %vm6618_vm1, %vm6619_vm14 }
 0xc86   : > { %v6614_v3 = vmul.f32 %v9290_v23, %v6613_v17 }
 0xc88   : > { %v6615_v38 = vmul.f32 0.5, %v6614_v3  ;;  %v6333_v39 = vpop.xlane.xlu2 %6332  ;;  %v6336_v57 = vpop.xlane.xlu0 %6335 }
 0xc89   : > { %v9292_v51 = vpop.eup %9291  ;;  %v6369_v60 = vmul.f32 %v6333_v39, %v13536_v2  ;;  %v6370_v54 = vmul.f32 %v6336_v57, %v13536_v2 }
 0xc8a   : > { %v6616_v30 = vsub.f32 1.5, %v6615_v38  ;;  %v6623_v61 = vmul.f32 %v9292_v51, %v6396_v10  ;;  %vm6629_vm3 = vweird.f32 %v9292_v51 }
 0xc8b   : > { %v6397_v7 = vadd.f32 1e-05, %v6369_v60  ;;  %v6398_v62 = vadd.f32 1e-05, %v6370_v54  ;;  %vm6630_vm5 = vmor %vm6628_vm4, %vm6629_vm3 }
 0xc8c   : > { %v6617_v22 = vmul.f32 %v9290_v23, %v6616_v30  ;;  %v6624_v32 = vmul.f32 %v9292_v51, %v6623_v61 }
 0xc8d   : > { %9293 = vrsqrt.f32 %v6397_v7  ;;  %vm6638_vm8 = vweird.f32 %v6397_v7  ;;  %vm6648_vm12 = vweird.f32 %v6398_v62 }
 0xc8e   : > { %v6621_v16 = vsel %vm6620_vm2, %v9290_v23, %v6617_v22  ;;  %v6625_v18 = vmul.f32 0.5, %v6624_v32  ;;  %9295 = vrsqrt.f32 %v6398_v62 }
 0xc8f   : > { %v6703_v59 = vmul.f32 %v6621_v16, %v14276_v48  ;;  %v6923_v33 = vpop.f32.mrf.mxu0 }
 0xc90   : > { %v14525_v4 = vadd.f32 %v14461_v53, %v6923_v33  ;;  %v6626_v31 = vsub.f32 1.5, %v6625_v18 }
 0xc91   : > { %v6734_v15 = vmul.f32 %v14303_v46, %v6703_v59 }
 0xc92   : > { %v7007_v6 = vand.u32 2147483647, %v14525_v4  ;;  %v6627_v25 = vmul.f32 %v9292_v51, %v6626_v31  ;;  %v6339_v17 = vpop.xlane.xlu1 %6338 }
 0xc93   : > { %v14530_v12 = vadd.f32 %v14312_v37, %v6734_v15  ;;  %v9294_v36 = vpop.eup %9293  ;;  %v6371_v38 = vmul.f32 %v6339_v17, %v13536_v2 }
 0xc94   : > { %v7035_v48 = vsub.f32 0.0, %v7007_v6  ;;  %v6631_v26 = vsel %vm6630_vm5, %v9292_v51, %v6627_v25  ;;  %v9296_v29 = vpop.eup %9295  ;;  %v6633_v41 = vmul.f32 %v9294_v36, %v6397_v7  ;;  %vm6639_vm6 = vweird.f32 %v9294_v36 }
 0xc95   : > { %8648 = vmatmul.msk.f32.gmra.mxu0 %vm588_vm0, %v14530_v12  ;;  %v6704_v44 = vmul.f32 %v6631_v26, %v14283_v34  ;;  %v6643_v3 = vmul.f32 %v9296_v29, %v6398_v62  ;;  %v14540_v60 = vadd.f32 1e-05, %v6371_v38  ;;  %vm6649_vm7 = vweird.f32 %v9296_v29  ;;  %vm6640_vm9 = vmor %vm6638_vm8, %vm6639_vm6 }
 0xc96   : > { %v7077_v23 = vmul.f32 1.442695, %v7035_v48  ;;  %v6634_v30 = vmul.f32 %v9294_v36, %v6633_v41  ;;  %vm6650_vm11 = vmor %vm6648_vm12, %vm6649_vm7 }
 0xc97   : > { %v6926_v10 = vpop.f32.mrf.mxu0  ;;  %v6735_v51 = vmul.f32 %v14303_v46, %v6704_v44  ;;  %v6644_v61 = vmul.f32 %v9296_v29, %v6643_v3  ;;  %vm6658_vm13 = vweird.f32 %v14540_v60 }
 0xc98   : > { %9297 = vpow2.f32 %v7077_v23  ;;  %v14537_v39 = vadd.f32 %v14461_v53, %v6926_v10  ;;  %v6635_v57 = vmul.f32 0.5, %v6634_v30  ;;  %v6345_v22 = vpop.xlane.xlu0 %6344  ;;  %v6342_v33 = vpop.xlane.xlu2 %6341 }
 0xc99   : > { %v14544_v54 = vadd.f32 %v14312_v37, %v6735_v51  ;;  %v6645_v32 = vmul.f32 0.5, %v6644_v61  ;;  %9299 = vrsqrt.f32 %v14540_v60  ;;  %v6373_v16 = vmul.f32 %v6345_v22, %v13536_v2 }
 0xc9a   : > { %v7008_v34 = vand.u32 2147483647, %v14537_v39  ;;  %v6636_v59 = vsub.f32 1.5, %v6635_v57  ;;  %v6372_v15 = vmul.f32 %v6342_v33, %v13536_v2 }
 0xc9b   : > { %v6646_v31 = vsub.f32 1.5, %v6645_v32  ;;  %v14549_v6 = vadd.f32 1e-05, %v6373_v16 }
 0xc9c   : > { %v7036_v18 = vsub.f32 0.0, %v7008_v34  ;;  %v6637_v48 = vmul.f32 %v9294_v36, %v6636_v59  ;;  %v14553_v23 = vadd.f32 1e-05, %v6372_v15  ;;  %v6979_v59 = vmax.f32 %v14525_v4, 0.0 }
 0xc9d   : > { %8649 = vmatmul.msk.f32.gmra.mxu0 %vm588_vm0, %v14544_v54  ;;  %v6647_v44 = vmul.f32 %v9296_v29, %v6646_v31  ;;  %9301 = vrsqrt.f32 %v14549_v6  ;;  %vm6678_vm5 = vweird.f32 %v14549_v6 }
 0xc9e   : > { %v9298_v25 = vpop.eup %9297  ;;  %v7079_v26 = vmul.f32 1.442695, %v7036_v18  ;;  %v6641_v17 = vsel %vm6640_vm9, %v9294_v36, %v6637_v48  ;;  %vm6668_vm2 = vweird.f32 %v14553_v23 }
 0xc9f   : > { %v7119_v41 = vadd.f32 1.0, %v9298_v25  ;;  %v9300_v3 = vpop.eup %9299  ;;  %v6705_v38 = vmul.f32 %v6641_v17, %v14318_v21  ;;  %v6651_v10 = vsel %vm6650_vm11, %v9296_v29, %v6647_v44  ;;  %v6929_v30 = vpop.f32.mrf.mxu0 }
 0xca0   : > { %9303 = vpow2.f32 %v7079_v26  ;;  %v6653_v7 = vmul.f32 %v9300_v3, %v14540_v60  ;;  %v14561_v62 = vadd.f32 %v14461_v53, %v6929_v30  ;;  %v6706_v36 = vmul.f32 %v6651_v10, %v14321_v63 }
 0xca1   : > { %9305 = vlog2.f32 %v7119_v41  ;;  %v6736_v51 = vmul.f32 %v14303_v46, %v6705_v38  ;;  %vm6659_vm10 = vweird.f32 %v9300_v3 }
 0xca2   : > { %9307 = vrsqrt.f32 %v14553_v23  ;;  %v6654_v61 = vmul.f32 %v9300_v3, %v6653_v7  ;;  %v7009_v34 = vand.u32 2147483647, %v14561_v62  ;;  %v6737_v25 = vmul.f32 %v14303_v46, %v6706_v36  ;;  %vm6660_vm14 = vmor %vm6658_vm13, %vm6659_vm10 }
 0xca3   : > { %v14565_v57 = vpop.eup %9301  ;;  %v14569_v21 = vadd.f32 %v14312_v37, %v6736_v51 }
 0xca4   : > { %v6655_v22 = vmul.f32 0.5, %v6654_v61  ;;  %v6673_v32 = vmul.f32 %v14565_v57, %v14549_v6  ;;  %v7037_v33 = vsub.f32 0.0, %v7009_v34  ;;  %v14584_v51 = vadd.f32 %v14312_v37, %v6737_v25 }
 0xca5   : > { %8650 = vmatmul.msk.f32.gmra.mxu0 %vm588_vm0, %v14569_v21  ;;  %vm6679_vm4 = vweird.f32 %v14565_v57 }
 0xca6   : > { %v9304_v29 = vpop.eup %9303  ;;  %v6656_v15 = vsub.f32 1.5, %v6655_v22  ;;  %v6674_v26 = vmul.f32 %v14565_v57, %v6673_v32  ;;  %v7081_v44 = vmul.f32 1.442695, %v7037_v33  ;;  %vm6680_vm6 = vmor %vm6678_vm5, %vm6679_vm4 }
 0xca7   : > { %v9306_v16 = vpop.eup %9305  ;;  %v7120_v18 = vadd.f32 1.0, %v9304_v29  ;;  %v6932_v41 = vpop.f32.mrf.mxu0 }
 0xca8   : > { %v9308_v63 = vpop.eup %9307  ;;  %v7162_v31 = vmul.f32 0.6931472, %v9306_v16  ;;  %v6657_v38 = vmul.f32 %v9300_v3, %v6656_v15  ;;  %v14581_v30 = vadd.f32 %v14461_v53, %v6932_v41  ;;  %v6675_v34 = vmul.f32 0.5, %v6674_v26 }
 0xca9   : > { %9309 = vlog2.f32 %v7120_v18  ;;  %v6663_v48 = vmul.f32 %v9308_v63, %v14553_v23  ;;  %vm6669_vm1 = vweird.f32 %v9308_v63 }
 0xcaa   : > { %v7203_v17 = vadd.f32 %v7162_v31, %v6979_v59  ;;  %9311 = vpow2.f32 %v7081_v44  ;;  %v6661_v7 = vsel %vm6660_vm14, %v9300_v3, %v6657_v38  ;;  %v7010_v29 = vand.u32 2147483647, %v14581_v30  ;;  %vm6670_vm3 = vmor %vm6668_vm2, %vm6669_vm1 }
 0xcab   : > { %v6664_v10 = vmul.f32 %v9308_v63, %v6663_v48  ;;  %v6707_v36 = vmul.f32 %v6661_v7, %v14361_v45  ;;  %v6980_v59 = vmax.f32 %v14537_v39, 0.0  ;;  %v6676_v31 = vsub.f32 1.5, %v6675_v34 }
 0xcac   : > { %9313 = vtanh.f32 %v7203_v17  ;;  %v7038_v60 = vsub.f32 0.0, %v7010_v29 }
 0xcad   : > { %v6665_v61 = vmul.f32 0.5, %v6664_v10  ;;  %8651 = vmatmul.msk.f32.gmra.mxu0 %vm588_vm0, %v14584_v51  ;;  %v6738_v48 = vmul.f32 %v14303_v46, %v6707_v36 }
 0xcae   : > { %v7083_v15 = vmul.f32 1.442695, %v7038_v60 }
 0xcaf   : > { %v9310_v22 = vpop.eup %9309  ;;  %v6666_v32 = vsub.f32 1.5, %v6665_v61  ;;  %v7401_v16 = vpop.f32.mrf.mxu1  ;;  %v14608_v34 = vadd.f32 %v14312_v37, %v6738_v48 }
 0xcb0   : > { %v7164_v3 = vmul.f32 0.6931472, %v9310_v22  ;;  %v7402_v18 = vadd.f32 %v14406_v8, %v7401_v16  ;;  %v9312_v45 = vpop.eup %9311  ;;  %v6935_v25 = vpop.f32.mrf.mxu0  ;;  %9315 = vpow2.f32 %v7083_v15 }
 0xcb1   : > { %v6667_v33 = vmul.f32 %v9308_v63, %v6666_v32  ;;  %v7121_v41 = vadd.f32 1.0, %v9312_v45  ;;  %v14596_v17 = vadd.f32 %v14461_v53, %v6935_v25  ;;  %v6981_v45 = vmax.f32 %v14561_v62, 0.0 }
 0xcb2   : > { %v9314_v26 = vpop.eup %9313  ;;  %v7204_v44 = vadd.f32 %v7164_v3, %v6980_v59  ;;  %v14599_v38 = vadd.f32 %v7402_v18, %v14031_v56  ;;  %v6677_v56 = vmul.f32 %v14565_v57, %v6676_v31 }
 0xcb3   : > { %v7259_v23 = vmul.f32 %v9314_v26, %v14525_v4  ;;  %v6671_v10 = vsel %vm6670_vm3, %v9308_v63, %v6667_v33  ;;  %v7011_v7 = vand.u32 2147483647, %v14596_v17 }
 0xcb4   : > { %9317 = vtanh.f32 %v7204_v44  ;;  %v6708_v36 = vmul.f32 %v6671_v10, %v14384_v5  ;;  %v7515_v61 = vsel %vm588_vm0, %v14599_v38, 0.0  ;;  %v6681_v60 = vsel %vm6680_vm6, %v14565_v57, %v6677_v56 }
 0xcb5   : > { %9319 = vlog2.f32 %v7121_v41  ;;  %8669 = vmatmul.msk.f32.gmra.mxu1 %vm7278_vm15, %v7259_v23  ;;  %v7039_v4 = vsub.f32 0.0, %v7011_v7  ;;  %7516 = vadd.xlane.f32.xlu2 %v7515_v61  ;;  %v6709_v31 = vmul.f32 %v6681_v60, %v14375_v58 }
 0xcb6   : > { %8652 = vmatmul.msk.f32.gmra.mxu0 %vm588_vm0, %v14608_v34  ;;  %v9316_v63 = vpop.eup %9315  ;;  %v6739_v22 = vmul.f32 %v14303_v46, %v6708_v36  ;;  %v6982_v36 = vmax.f32 %v14581_v30, 0.0 }
 0xcb7   : > { %v7085_v5 = vmul.f32 1.442695, %v7039_v4  ;;  %v7122_v16 = vadd.f32 1.0, %v9316_v63  ;;  %v6740_v58 = vmul.f32 %v14303_v46, %v6709_v31 }
 0xcb8   : > { %v6938_v29 = vpop.f32.mrf.mxu0  ;;  %v14626_v57 = vadd.f32 %v14312_v37, %v6739_v22 }
 0xcb9   : > { %9321 = vpow2.f32 %v7085_v5  ;;  %v14618_v59 = vadd.f32 %v14461_v53, %v6938_v29  ;;  %v14643_v46 = vadd.f32 %v14312_v37, %v6740_v58  ;;  %v6983_v37 = vmax.f32 %v14596_v17, 0.0 }
 0xcba   : > { %v9318_v32 = vpop.eup %9317  ;;  %9323 = vlog2.f32 %v7122_v16 }
 0xcbb   : > { %v9320_v3 = vpop.eup %9319  ;;  %v7260_v18 = vmul.f32 %v9318_v32, %v14537_v39  ;;  %v7012_v33 = vand.u32 2147483647, %v14618_v59 }
 0xcbc   : > { %v7166_v6 = vmul.f32 0.6931472, %v9320_v3  ;;  %v7404_v26 = vpop.f32.mrf.mxu1 }
 0xcbd   : > { %8670 = vmatmul.msk.f32.gmra.mxu1 %vm7278_vm15, %v7260_v18  ;;  %v7040_v25 = vsub.f32 0.0, %v7012_v33  ;;  %v7405_v41 = vadd.f32 %v14406_v8, %v7404_v26 }
 0xcbe   : > { %v7205_v15 = vadd.f32 %v7166_v6, %v6981_v45  ;;  %8653 = vmatmul.msk.f32.gmra.mxu0 %vm588_vm0, %v14626_v57 }
 0xcbf   : > { %v9322_v48 = vpop.eup %9321  ;;  %v7087_v39 = vmul.f32 1.442695, %v7040_v25  ;;  %v14637_v56 = vadd.f32 %v7405_v41, %v14129_v20 }
 0xcc0   : > { %9325 = vtanh.f32 %v7205_v15  ;;  %v7123_v44 = vadd.f32 1.0, %v9322_v48  ;;  %v6941_v23 = vpop.f32.mrf.mxu0  ;;  %v9324_v10 = vpop.eup %9323 }
 0xcc1   : > { %9327 = vpow2.f32 %v7087_v39  ;;  %v14633_v7 = vadd.f32 %v14461_v53, %v6941_v23  ;;  %v7168_v61 = vmul.f32 0.6931472, %v9324_v10  ;;  %v7518_v63 = vsel %vm588_vm0, %v14637_v56, 0.0 }
 0xcc2   : > { %9329 = vlog2.f32 %v7123_v44  ;;  %7519 = vadd.xlane.f32.xlu0 %v7518_v63 }
 0xcc3   : > { %v7013_v4 = vand.u32 2147483647, %v14633_v7  ;;  %v7206_v5 = vadd.f32 %v7168_v61, %v6982_v36 }
 0xcc4   : > { %v7407_v16 = vpop.f32.mrf.mxu1 }
 0xcc5   : > { %v7041_v22 = vsub.f32 0.0, %v7013_v4  ;;  %9331 = vtanh.f32 %v7206_v5  ;;  %v7408_v45 = vadd.f32 %v14406_v8, %v7407_v16 }
 0xcc6   : > { %v9326_v29 = vpop.eup %9325  ;;  %8654 = vmatmul.msk.f32.gmra.mxu0 %vm588_vm0, %v14643_v46 }
 0xcc7   : > { %v7261_v32 = vmul.f32 %v9326_v29, %v14561_v62  ;;  %v9328_v20 = vpop.eup %9327  ;;  %v7089_v60 = vmul.f32 1.442695, %v7041_v22  ;;  %v14652_v62 = vadd.f32 %v7408_v45, %v14170_v49  ;;  %v6984_v49 = vmax.f32 %v14618_v59, 0.0 }
 0xcc8   : > { %v9330_v3 = vpop.eup %9329  ;;  %v7124_v18 = vadd.f32 1.0, %v9328_v20  ;;  %v6985_v29 = vmax.f32 %v14633_v7, 0.0 }
 0xcc9   : > { %8671 = vmatmul.msk.f32.gmra.mxu1 %vm7278_vm15, %v7261_v32  ;;  %v7170_v6 = vmul.f32 0.6931472, %v9330_v3  ;;  %9333 = vpow2.f32 %v7089_v60  ;;  %v7521_v15 = vsel %vm588_vm0, %v14652_v62, 0.0 }
 0xcca   : > { %9335 = vlog2.f32 %v7124_v18  ;;  %7522 = vadd.xlane.f32.xlu1 %v7521_v15 }
 0xccb   : > { %v7207_v33 = vadd.f32 %v7170_v6, %v6983_v37  ;;  %v9332_v31 = vpop.eup %9331 }
 0xccc   : > { %v7262_v25 = vmul.f32 %v9332_v31, %v14581_v30  ;;  %v7410_v39 = vpop.f32.mrf.mxu1 }
 0xccd   : > { %9337 = vtanh.f32 %v7207_v33  ;;  %v7411_v41 = vadd.f32 %v14406_v8, %v7410_v39 }
 0xccf   : > { %v9334_v48 = vpop.eup %9333  ;;  %v14661_v58 = vadd.f32 %v7411_v41, %v14218_v9 }
 0xcd0   : > { %v9336_v26 = vpop.eup %9335  ;;  %v7125_v44 = vadd.f32 1.0, %v9334_v48 }
 0xcd1   : > { %8672 = vmatmul.msk.f32.gmra.mxu1 %vm7278_vm15, %v7262_v25  ;;  %v7172_v23 = vmul.f32 0.6931472, %v9336_v26  ;;  %v7524_v61 = vsel %vm588_vm0, %v14661_v58, 0.0 }
 0xcd2   : > { %9339 = vlog2.f32 %v7125_v44  ;;  %7525 = vadd.xlane.f32.xlu2 %v7524_v61 }
 0xcd3   : > { %v9338_v10 = vpop.eup %9337  ;;  %v7208_v36 = vadd.f32 %v7172_v23, %v6984_v49 }
 0xcd4   : > { %v7263_v30 = vmul.f32 %v9338_v10, %v14596_v17  ;;  %v7413_v4 = vpop.f32.mrf.mxu1 }
 0xcd5   : > { %9341 = vtanh.f32 %v7208_v36  ;;  %v7414_v63 = vadd.f32 %v14406_v8, %v7413_v4 }
 0xcd7   : > { %v14670_v9 = vadd.f32 %v7414_v63, %v14236_v13 }
 0xcd8   : > { %v9340_v5 = vpop.eup %9339 }
 0xcd9   : > { %8673 = vmatmul.msk.f32.gmra.mxu1 %vm7278_vm15, %v7263_v30  ;;  %v7174_v22 = vmul.f32 0.6931472, %v9340_v5  ;;  %v7527_v60 = vsel %vm588_vm0, %v14670_v9, 0.0 }
 0xcda   : > { %7528 = vadd.xlane.f32.xlu0 %v7527_v60 }
 0xcdb   : > { %v9342_v32 = vpop.eup %9341  ;;  %v7209_v20 = vadd.f32 %v7174_v22, %v6985_v29 }
 0xcdc   : > { %v7264_v17 = vmul.f32 %v9342_v32, %v14618_v59  ;;  %v7416_v16 = vpop.f32.mrf.mxu1 }
 0xcdd   : > { %9343 = vtanh.f32 %v7209_v20  ;;  %v7417_v3 = vadd.f32 %v14406_v8, %v7416_v16 }
 0xcdf   : > { %v14678_v18 = vadd.f32 %v7417_v3, %v14251_v55 }
 0xce1   : > { %8674 = vmatmul.msk.f32.gmra.mxu1 %vm7278_vm15, %v7264_v17  ;;  %v7530_v37 = vsel %vm588_vm0, %v14678_v18, 0.0 }
 0xce2   : > { %7531 = vadd.xlane.f32.xlu1 %v7530_v37 }
 0xce3   : > { %v9344_v45 = vpop.eup %9343 }
 0xce4   : > { %v7265_v13 = vmul.f32 %v9344_v45, %v14633_v7  ;;  %v7419_v59 = vpop.f32.mrf.mxu1 }
 0xce5   : > { %v7420_v6 = vadd.f32 %v14406_v8, %v7419_v59 }
 0xce7   : > { %v14686_v33 = vadd.f32 %v7420_v6, %v14260_v28 }
 0xce9   : > { %8675 = vmatmul.msk.f32.gmra.mxu1 %vm7278_vm15, %v7265_v13  ;;  %v7533_v31 = vsel %vm588_vm0, %v14686_v33, 0.0 }
 0xcea   : > { %7534 = vadd.xlane.f32.xlu2 %v7533_v31 }
 0xd12   : > { %v6944_v55 = vpop.f32.mrf.mxu0 }
 0xd13   : > { %v6945_v15 = vadd.f32 %v14461_v53, %v6944_v55 }
 0xd15   : > { %v7014_v7 = vand.u32 2147483647, %v6945_v15  ;;  %v6986_v29 = vmax.f32 %v6945_v15, 0.0 }
 0xd17   : > { %v7042_v25 = vsub.f32 0.0, %v7014_v7 }
 0xd19   : > { %v7091_v48 = vmul.f32 1.442695, %v7042_v25 }
 0xd1a   : > { %v6947_v39 = vpop.f32.mrf.mxu0 }
 0xd1b   : > { %9345 = vpow2.f32 %v7091_v48  ;;  %v14692_v26 = vadd.f32 %v14461_v53, %v6947_v39 }
 0xd1d   : > { %v7015_v44 = vand.u32 2147483647, %v14692_v26  ;;  %v6987_v59 = vmax.f32 %v14692_v26, 0.0 }
 0xd1f   : > { %v7043_v41 = vsub.f32 0.0, %v7015_v44 }
 0xd21   : > { %v9346_v28 = vpop.eup %9345  ;;  %v7093_v49 = vmul.f32 1.442695, %v7043_v41 }
 0xd22   : > { %v7126_v23 = vadd.f32 1.0, %v9346_v28  ;;  %v6950_v10 = vpop.f32.mrf.mxu0 }
 0xd23   : > { %9347 = vpow2.f32 %v7093_v49  ;;  %v14696_v36 = vadd.f32 %v14461_v53, %v6950_v10  ;;  %v7502_v10 = vpop.xlane.xlu0 %7501 }
 0xd24   : > { %9349 = vlog2.f32 %v7126_v23 }
 0xd25   : > { %v7016_v30 = vand.u32 2147483647, %v14696_v36 }
 0xd27   : > { %v7044_v4 = vsub.f32 0.0, %v7016_v30 }
 0xd29   : > { %v9348_v61 = vpop.eup %9347  ;;  %v7095_v32 = vmul.f32 1.442695, %v7044_v4 }
 0xd2a   : > { %v9350_v5 = vpop.eup %9349  ;;  %v7127_v63 = vadd.f32 1.0, %v9348_v61  ;;  %v6953_v20 = vpop.f32.mrf.mxu0 }
 0xd2b   : > { %v7176_v22 = vmul.f32 0.6931472, %v9350_v5  ;;  %v14700_v60 = vadd.f32 %v14461_v53, %v6953_v20  ;;  %v7580_v5 = vmul.f32 %v7502_v10, %v13536_v2 }
 0xd2c   : > { %9351 = vlog2.f32 %v7127_v63 }
 0xd2d   : > { %v7210_v17 = vadd.f32 %v7176_v22, %v6986_v29  ;;  %9353 = vpow2.f32 %v7095_v32  ;;  %v7017_v16 = vand.u32 2147483647, %v14700_v60  ;;  %v6988_v29 = vmax.f32 %v14696_v36, 0.0 }
 0xd2f   : > { %9355 = vtanh.f32 %v7210_v17  ;;  %v7045_v3 = vsub.f32 0.0, %v7017_v16 }
 0xd31   : > { %v7097_v31 = vmul.f32 1.442695, %v7045_v3 }
 0xd32   : > { %v9352_v45 = vpop.eup %9351  ;;  %v7422_v13 = vpop.f32.mrf.mxu1 }
 0xd33   : > { %v9354_v37 = vpop.eup %9353  ;;  %v7178_v6 = vmul.f32 0.6931472, %v9352_v45  ;;  %v7423_v55 = vadd.f32 %v14406_v8, %v7422_v13  ;;  %v6956_v25 = vpop.f32.mrf.mxu0  ;;  %9357 = vpow2.f32 %v7097_v31  ;;  %v14726_v13 = vsub.f32 %v14472_v19, %v7580_v5 }
 0xd34   : > { %v7128_v7 = vadd.f32 1.0, %v9354_v37  ;;  %v14706_v44 = vadd.f32 %v14461_v53, %v6956_v25 }
 0xd35   : > { %v9356_v48 = vpop.eup %9355  ;;  %v7211_v39 = vadd.f32 %v7178_v6, %v6987_v59  ;;  %v14709_v41 = vadd.f32 %v7423_v55, %v14315_v14 }
 0xd36   : > { %v7266_v28 = vmul.f32 %v9356_v48, %v6945_v15  ;;  %9359 = vlog2.f32 %v7128_v7  ;;  %v7018_v49 = vand.u32 2147483647, %v14706_v44  ;;  %v6989_v48 = vmax.f32 %v14700_v60, 0.0 }
 0xd37   : > { %9361 = vtanh.f32 %v7211_v39  ;;  %v7536_v23 = vsel %vm588_vm0, %v14709_v41, 0.0 }
 0xd38   : > { %8676 = vmatmul.msk.f32.gmra.mxu1 %vm7278_vm15, %v7266_v28  ;;  %7537 = vadd.xlane.f32.xlu0 %v7536_v23  ;;  %v7046_v30 = vsub.f32 0.0, %v7018_v49 }
 0xd39   : > { %v9358_v4 = vpop.eup %9357 }
 0xd3a   : > { %v7425_v61 = vpop.f32.mrf.mxu1  ;;  %v7099_v63 = vmul.f32 1.442695, %v7046_v30  ;;  %v7129_v22 = vadd.f32 1.0, %v9358_v4  ;;  %v14743_v4 = vld [vmem:[%s15378_s14] ss:$0 sm:$0xff] }
 0xd3b   : > { %v7426_v14 = vadd.f32 %v14406_v8, %v7425_v61  ;;  %v6959_v32 = vpop.f32.mrf.mxu0 }
 0xd3c   : > { %v9360_v15 = vpop.eup %9359  ;;  %9363 = vpow2.f32 %v7099_v63  ;;  %v14719_v16 = vadd.f32 %v14461_v53, %v6959_v32  ;;  %v7499_v32 = vpop.xlane.xlu2 %7498 }
 0xd3d   : > { %v9362_v20 = vpop.eup %9361  ;;  %v7180_v17 = vmul.f32 0.6931472, %v9360_v15  ;;  %v14722_v3 = vadd.f32 %v7426_v14, %v14339_v27  ;;  %9365 = vlog2.f32 %v7129_v22  ;;  %v7496_v27 = vpop.xlane.xlu1 %7495 }
 0xd3e   : > { %v7267_v45 = vmul.f32 %v9362_v20, %v14692_v26  ;;  %v7019_v37 = vand.u32 2147483647, %v14719_v16  ;;  %v7636_v26 = vmul.f32 %v14726_v13, %v14726_v13  ;;  %v7578_v49 = vmul.f32 %v7496_v27, %v13536_v2 }
 0xd3f   : > { %v7212_v8 = vadd.f32 %v7180_v17, %v6988_v29  ;;  %v7539_v59 = vsel %vm588_vm0, %v14722_v3, 0.0 }
 0xd40   : > { %7540 = vadd.xlane.f32.xlu1 %v7539_v59  ;;  %8677 = vmatmul.msk.f32.gmra.mxu1 %vm7278_vm15, %v7267_v45  ;;  %v7047_v6 = vsub.f32 0.0, %v7019_v37  ;;  %v7668_v63 = vsel %vm588_vm0, %v7636_v26, 0.0  ;;  %v14753_v22 = vsub.f32 %v14423_v50, %v7578_v49  ;;  %v6990_v37 = vmax.f32 %v14706_v44, 0.0 }
 0xd41   : > { %9367 = vtanh.f32 %v7212_v8 }
 0xd42   : > { %v9364_v31 = vpop.eup %9363  ;;  %v7101_v55 = vmul.f32 1.442695, %v7047_v6  ;;  %v7634_v26 = vmul.f32 %v14753_v22, %v14753_v22 }
 0xd43   : > { %v9366_v7 = vpop.eup %9365  ;;  %v7130_v19 = vadd.f32 1.0, %v9364_v31  ;;  %v6962_v25 = vpop.f32.mrf.mxu0 }
 0xd44   : > { %v7182_v39 = vmul.f32 0.6931472, %v9366_v7  ;;  %9369 = vpow2.f32 %v7101_v55  ;;  %v14736_v28 = vadd.f32 %v14461_v53, %v6962_v25  ;;  %v7662_v49 = vsel %vm588_vm0, %v7634_v26, 0.0 }
 0xd45   : > { %9371 = vlog2.f32 %v7130_v19  ;;  %v7505_v8 = vpop.xlane.xlu1 %7504 }
 0xd46   : > { %v7428_v23 = vpop.f32.mrf.mxu1  ;;  %v7213_v30 = vadd.f32 %v7182_v39, %v6989_v48  ;;  %v7020_v61 = vand.u32 2147483647, %v14736_v28  ;;  %v7581_v50 = vmul.f32 %v7505_v8, %v13536_v2 }
 0xd47   : > { %v9368_v10 = vpop.eup %9367  ;;  %v7429_v5 = vadd.f32 %v14743_v4, %v7428_v23 }
 0xd48   : > { %v7268_v53 = vmul.f32 %v9368_v10, %v14696_v36  ;;  %7669 = vadd.xlane.f32.xlu1 %v7668_v63  ;;  %9373 = vtanh.f32 %v7213_v30  ;;  %v7048_v14 = vsub.f32 0.0, %v7020_v61  ;;  %v14772_v39 = vsub.f32 %v14487_v24, %v7581_v50 }
 0xd49   : > { %v14749_v15 = vadd.f32 %v7429_v5, %v14378_v35  ;;  %v7579_v35 = vmul.f32 %v7499_v32, %v13536_v2 }
 0xd4a   : > { %8678 = vmatmul.msk.f32.gmra.mxu1 %vm7278_vm15, %v7268_v53  ;;  %v9370_v29 = vpop.eup %9369  ;;  %v7103_v20 = vmul.f32 1.442695, %v7048_v14  ;;  %v7637_v32 = vmul.f32 %v14772_v39, %v14772_v39 }
 0xd4b   : > { %v7542_v17 = vsel %vm588_vm0, %v14749_v15, 0.0  ;;  %v9372_v45 = vpop.eup %9371  ;;  %v7131_v36 = vadd.f32 1.0, %v9370_v29  ;;  %v14768_v25 = vsub.f32 %v14448_v0, %v7579_v35  ;;  %v6991_v0 = vmax.f32 %v14719_v16, 0.0 }
 0xd4c   : > { %7543 = vadd.xlane.f32.xlu2 %v7542_v17  ;;  %v7184_v59 = vmul.f32 0.6931472, %v9372_v45  ;;  %9375 = vpow2.f32 %v7103_v20 }
 0xd4d   : > { %9377 = vlog2.f32 %v7131_v36  ;;  %v7635_v24 = vmul.f32 %v14768_v25, %v14768_v25  ;;  %v7671_v36 = vsel %vm588_vm0, %v7637_v32, 0.0 }
 0xd4e   : > { %v7431_v6 = vpop.f32.mrf.mxu1  ;;  %v9374_v31 = vpop.eup %9373  ;;  %v7214_v27 = vadd.f32 %v7184_v59, %v6990_v37 }
 0xd4f   : > { %v7432_v55 = vadd.f32 %v14743_v4, %v7431_v6  ;;  %v7269_v7 = vmul.f32 %v9374_v31, %v14700_v60  ;;  %v7508_v60 = vpop.xlane.xlu2 %7507  ;;  %v7665_v37 = vsel %vm588_vm0, %v7635_v24, 0.0  ;;  %v6992_v31 = vmax.f32 %v14736_v28, 0.0 }
 0xd50   : > { %9379 = vtanh.f32 %v7214_v27  ;;  %v7582_v53 = vmul.f32 %v7508_v60, %v13536_v2 }
 0xd51   : > { %v14765_v19 = vadd.f32 %v7432_v55, %v14410_v40  ;;  %v7511_v40 = vpop.xlane.xlu0 %7510 }
 0xd52   : > { %8679 = vmatmul.msk.f32.gmra.mxu1 %vm7278_vm15, %v7269_v7  ;;  %v9376_v48 = vpop.eup %9375  ;;  %v7583_v20 = vmul.f32 %v7511_v40, %v13536_v2  ;;  %v14791_v8 = vsub.f32 %v14496_v1, %v7582_v53 }
 0xd53   : > { %v7545_v23 = vsel %vm588_vm0, %v14765_v19, 0.0  ;;  %v9378_v10 = vpop.eup %9377  ;;  %v7132_v30 = vadd.f32 1.0, %v9376_v48 }
 0xd54   : > { %7663 = vadd.xlane.f32.xlu2 %v7662_v49  ;;  %7546 = vadd.xlane.f32.xlu0 %v7545_v23  ;;  %v7186_v61 = vmul.f32 0.6931472, %v9378_v10  ;;  %v14798_v6 = vsub.f32 %v14505_v52, %v7583_v20  ;;  %v7638_v48 = vmul.f32 %v14791_v8, %v14791_v8 }
 0xd55   : > { %9381 = vlog2.f32 %v7132_v30 }
 0xd56   : > { %v7434_v5 = vpop.f32.mrf.mxu1  ;;  %v9380_v63 = vpop.eup %9379  ;;  %v7215_v14 = vadd.f32 %v7186_v61, %v6991_v0  ;;  %v7639_v23 = vmul.f32 %v14798_v6, %v14798_v6  ;;  %v7674_v40 = vsel %vm588_vm0, %v7638_v48, 0.0 }
 0xd57   : > { %v7435_v29 = vadd.f32 %v14743_v4, %v7434_v5  ;;  %v7270_v17 = vmul.f32 %v9380_v63, %v14706_v44  ;;  %v7514_v44 = vpop.xlane.xlu1 %7513  ;;  %v7517_v0 = vpop.xlane.xlu2 %7516 }
 0xd58   : > { %9383 = vtanh.f32 %v7215_v14  ;;  %v7584_v55 = vmul.f32 %v7514_v44, %v13536_v2 }
 0xd59   : > { %v14787_v45 = vadd.f32 %v7435_v29, %v14430_v43  ;;  %v7520_v43 = vpop.xlane.xlu0 %7519 }
 0xd5a   : > { %8680 = vmatmul.msk.f32.gmra.mxu1 %vm7278_vm15, %v7270_v17  ;;  %v7586_v52 = vmul.f32 %v7520_v43, %v13536_v2  ;;  %v14814_v60 = vsub.f32 %v14513_v42, %v7584_v55  ;;  %v7585_v42 = vmul.f32 %v7517_v0, %v13536_v2 }
 0xd5b   : > { %v7548_v59 = vsel %vm588_vm0, %v14787_v45, 0.0  ;;  %v9382_v35 = vpop.eup %9381 }
 0xd5c   : > { %7672 = vadd.xlane.f32.xlu2 %v7671_v36  ;;  %7666 = vadd.xlane.f32.xlu0 %v7665_v37  ;;  %v7188_v50 = vmul.f32 0.6931472, %v9382_v35  ;;  %v7640_v14 = vmul.f32 %v14814_v60, %v14814_v60  ;;  %v14836_v20 = vsub.f32 %v14599_v38, %v7585_v42 }
 0xd5d   : > { %7549 = vadd.xlane.f32.xlu1 %v7548_v59 }
 0xd5e   : > { %v7437_v1 = vpop.f32.mrf.mxu1  ;;  %v9384_v27 = vpop.eup %9383  ;;  %v7216_v26 = vadd.f32 %v7188_v50, %v6992_v31  ;;  %v7680_v36 = vsel %vm588_vm0, %v7640_v14, 0.0  ;;  %v7641_v38 = vmul.f32 %v14836_v20, %v14836_v20 }
 0xd5f   : > { %v7438_v7 = vadd.f32 %v14743_v4, %v7437_v1  ;;  %v7271_v49 = vmul.f32 %v9384_v27, %v14719_v16  ;;  %v14820_v16 = vsub.f32 %v14637_v56, %v7586_v52  ;;  %v7523_v61 = vpop.xlane.xlu1 %7522  ;;  %v7526_v44 = vpop.xlane.xlu2 %7525 }
 0xd60   : > { %9385 = vtanh.f32 %v7216_v26  ;;  %v7587_v63 = vmul.f32 %v7523_v61, %v13536_v2 }
 0xd61   : > { %v14810_v10 = vadd.f32 %v7438_v7, %v14454_v11  ;;  %v7677_v11 = vsel %vm588_vm0, %v7639_v23, 0.0  ;;  %v7642_v29 = vmul.f32 %v14820_v16, %v14820_v16  ;;  %v14854_v1 = vpop.xlane.xlu0 %7528 }
 0xd62   : > { %8681 = vmatmul.msk.f32.gmra.mxu1 %vm7278_vm15, %v7271_v49  ;;  %v14839_v17 = vsub.f32 %v14652_v62, %v7587_v63  ;;  %v7683_v62 = vsel %vm588_vm0, %v7641_v38, 0.0 }
 0xd63   : > { %v7551_v30 = vsel %vm588_vm0, %v14810_v10, 0.0 }
 0xd64   : > { %7552 = vadd.xlane.f32.xlu2 %v7551_v30  ;;  %7675 = vadd.xlane.f32.xlu0 %v7674_v40 }
 0xd65   : > { %7678 = vadd.xlane.f32.xlu1 %v7677_v11 }
 0xd66   : > { %v7440_v5 = vpop.f32.mrf.mxu1  ;;  %v9386_v24 = vpop.eup %9385 }
 0xd67   : > { %v7441_v53 = vadd.f32 %v14743_v4, %v7440_v5  ;;  %v7272_v56 = vmul.f32 %v9386_v24, %v14736_v28  ;;  %v7686_v28 = vsel %vm588_vm0, %v7642_v29, 0.0  ;;  %v7532_v35 = vpop.xlane.xlu1 %7531  ;;  %v14856_v27 = vpop.xlane.xlu2 %7534 }
 0xd69   : > { %v14832_v32 = vadd.f32 %v7441_v53, %v14475_v47  ;;  %v7643_v47 = vmul.f32 %v14839_v17, %v14839_v17 }
 0xd6a   : > { %8682 = vmatmul.msk.f32.gmra.mxu1 %vm7278_vm15, %v7272_v56 }
 0xd6b   : > { %v7554_v37 = vsel %vm588_vm0, %v14832_v32, 0.0  ;;  %v7689_v59 = vsel %vm588_vm0, %v7643_v47, 0.0 }
 0xd6c   : > { %7681 = vadd.xlane.f32.xlu2 %v7680_v36  ;;  %7555 = vadd.xlane.f32.xlu0 %v7554_v37 }
 0xd6d   : > { %7687 = vadd.xlane.f32.xlu1 %v7686_v28 }
 0xd74   : > { %7690 = vadd.xlane.f32.xlu2 %v7689_v59  ;;  %7684 = vadd.xlane.f32.xlu0 %v7683_v62  ;;  %v14886_v59 = vld [vmem:[%s15379_s15] ss:$0 sm:$0xff] }
 0xdab   : > { %v14865_v30 = vpop.xlane.xlu0 %7537 }
 0xdb3   : > { %v14851_v43 = vpop.xlane.xlu1 %7540 }
 0xdb5   : > { %v7443_v31 = vpop.f32.mrf.mxu1 }
 0xdb6   : > { %v7444_v50 = vadd.f32 %v14743_v4, %v7443_v31 }
 0xdb8   : > { %v14859_v55 = vadd.f32 %v7444_v50, %v14530_v12 }
 0xdba   : > { %v7557_v26 = vsel %vm588_vm0, %v14859_v55, 0.0 }
 0xdbb   : > { %v7670_v7 = vpop.xlane.xlu1 %7669  ;;  %7558 = vadd.xlane.f32.xlu1 %v7557_v26  ;;  %v7590_v26 = vmul.f32 %v7532_v35, %v13536_v2  ;;  %v7588_v35 = vmul.f32 %v7526_v44, %v13536_v2  ;;  %v7593_v44 = vmul.f32 %v14851_v43, %v13536_v2 }
 0xdbc   : > { %v7748_v48 = vmul.f32 %v7670_v7, %v13536_v2 }
 0xdbd   : > { %v7446_v52 = vpop.f32.mrf.mxu1 }
 0xdbe   : > { %v7776_v49 = vadd.f32 1e-05, %v7748_v48  ;;  %v7447_v23 = vadd.f32 %v14743_v4, %v7446_v52 }
 0xdbf   : > { %v14867_v40 = vpop.xlane.xlu2 %7543 }
 0xdc0   : > { %9387 = vrsqrt.f32 %v7776_v49  ;;  %v14870_v0 = vadd.f32 %v7447_v23, %v14544_v54  ;;  %vm7828_vm7 = vweird.f32 %v7776_v49 }
 0xdc2   : > { %v7560_v12 = vsel %vm588_vm0, %v14870_v0, 0.0 }
 0xdc3   : > { %7561 = vadd.xlane.f32.xlu2 %v7560_v12 }
 0xdc6   : > { %v9388_v61 = vpop.eup %9387 }
 0xdc7   : > { %v7823_v11 = vmul.f32 %v9388_v61, %v7776_v49  ;;  %v7664_v5 = vpop.xlane.xlu2 %7663  ;;  %v14874_v24 = vpop.xlane.xlu0 %7546  ;;  %vm7829_vm15 = vweird.f32 %v9388_v61  ;;  %v14897_v49 = vld [vmem:[%s15380_s16] ss:$0 sm:$0xff] }
 0xdc8   : > { %v7746_v42 = vmul.f32 %v7664_v5, %v13536_v2  ;;  %v7449_v63 = vpop.f32.mrf.mxu1  ;;  %vm7830_vm8 = vmor %vm7828_vm7, %vm7829_vm15 }
 0xdc9   : > { %v7824_v53 = vmul.f32 %v9388_v61, %v7823_v11  ;;  %v7450_v14 = vadd.f32 %v14743_v4, %v7449_v63 }
 0xdca   : > { %v7774_v56 = vadd.f32 1e-05, %v7746_v42 }
 0xdcb   : > { %v7825_v29 = vmul.f32 0.5, %v7824_v53  ;;  %v14879_v54 = vadd.f32 %v7450_v14, %v14569_v21 }
 0xdcc   : > { %9389 = vrsqrt.f32 %v7774_v56  ;;  %vm7808_vm9 = vweird.f32 %v7774_v56 }
 0xdcd   : > { %v7826_v36 = vsub.f32 1.5, %v7825_v29  ;;  %v7563_v37 = vsel %vm588_vm0, %v14879_v54, 0.0 }
 0xdce   : > { %7564 = vadd.xlane.f32.xlu0 %v7563_v37  ;;  %v14929_v37 = vsub.f32 %v14661_v58, %v7588_v35  ;;  %v7591_v58 = vmul.f32 %v14856_v27, %v13536_v2 }
 0xdcf   : > { %v7827_v28 = vmul.f32 %v9388_v61, %v7826_v36  ;;  %v7673_v47 = vpop.xlane.xlu2 %7672  ;;  %v7667_v38 = vpop.xlane.xlu0 %7666 }
 0xdd0   : > { %v7749_v21 = vmul.f32 %v7673_v47, %v13536_v2  ;;  %v14889_v62 = vpop.xlane.xlu1 %7549  ;;  %v7747_v31 = vmul.f32 %v7667_v38, %v13536_v2  ;;  %v7452_v50 = vpop.f32.mrf.mxu1 }
 0xdd1   : > { %v7831_v7 = vsel %vm7830_vm8, %v9388_v61, %v7827_v28  ;;  %v7453_v48 = vadd.f32 %v14743_v4, %v7452_v50 }
 0xdd2   : > { %v9390_v52 = vpop.eup %9389  ;;  %v8084_v23 = vmul.f32 %v7831_v7, %v14726_v13  ;;  %v14900_v12 = vadd.f32 1e-05, %v7749_v21  ;;  %v14902_v11 = vadd.f32 1e-05, %v7747_v31  ;;  %v14918_v13 = vsub.f32 %v14678_v18, %v7590_v26 }
 0xdd3   : > { %v7803_v5 = vmul.f32 %v9390_v52, %v7774_v56  ;;  %v14905_v42 = vadd.f32 %v7453_v48, %v14584_v51  ;;  %v7589_v18 = vmul.f32 %v14854_v1, %v13536_v2  ;;  %vm7809_vm12 = vweird.f32 %v9390_v52 }
 0xdd4   : > { %v8115_v61 = vmul.f32 %v14886_v59, %v8084_v23  ;;  %9391 = vrsqrt.f32 %v14900_v12  ;;  %v7646_v31 = vmul.f32 %v14918_v13, %v14918_v13  ;;  %v14942_v26 = vsub.f32 %v14722_v3, %v7593_v44  ;;  %vm7810_vm11 = vmor %vm7808_vm9, %vm7809_vm12 }
 0xdd5   : > { %v7804_v63 = vmul.f32 %v9390_v52, %v7803_v5  ;;  %9393 = vrsqrt.f32 %v14902_v11  ;;  %v7566_v51 = vsel %vm588_vm0, %v14905_v42, 0.0  ;;  %v14955_v3 = vmul.f32 %v14929_v37, %v14929_v37 }
 0xdd6   : > { %v8146_v53 = vadd.f32 %v14897_v49, %v8115_v61  ;;  %7567 = vadd.xlane.f32.xlu1 %v7566_v51  ;;  %v14958_v51 = vsub.f32 %v14670_v9, %v7589_v18  ;;  %vm7838_vm10 = vweird.f32 %v14900_v12  ;;  %vm7818_vm2 = vweird.f32 %v14902_v11 }
 0xdd7   : > { %v7805_v14 = vmul.f32 0.5, %v7804_v63  ;;  %v14926_v29 = vpop.xlane.xlu2 %7552  ;;  %v7676_v36 = vpop.xlane.xlu0 %7675 }
 0xdd8   : > { %8174 = vst.msk [vmem:[%s14915_s22 + $0x10] sm:$0xff] %vm588_vm0, %v8146_v53  ;;  %v7679_v28 = vpop.xlane.xlu1 %7678  ;;  %v7750_v47 = vmul.f32 %v7676_v36, %v13536_v2  ;;  %v7455_v38 = vpop.f32.mrf.mxu1 }
 0xdd9   : > { %v7806_v43 = vsub.f32 1.5, %v7805_v14  ;;  %v7751_v21 = vmul.f32 %v7679_v28, %v13536_v2  ;;  %v7456_v7 = vadd.f32 %v14743_v4, %v7455_v38  ;;  %v14965_v14 = vsub.f32 %v14686_v33, %v7591_v58 }
 0xdda   : > { %v9392_v50 = vpop.eup %9391  ;;  %v14944_v1 = vadd.f32 1e-05, %v7750_v47  ;;  %v7698_v47 = vsel %vm588_vm0, %v7646_v31, 0.0  ;;  %v14972_v38 = vmul.f32 %v14942_v26, %v14942_v26 }
 0xddb   : > { %v9394_v48 = vpop.eup %9393  ;;  %v7807_v23 = vmul.f32 %v9390_v52, %v7806_v43  ;;  %v7833_v5 = vmul.f32 %v9392_v50, %v14900_v12  ;;  %v14948_v35 = vadd.f32 1e-05, %v7751_v21  ;;  %v14962_v53 = vadd.f32 %v7456_v7, %v14608_v34 }
 0xddc   : > { %v7813_v61 = vmul.f32 %v9394_v48, %v14902_v11  ;;  %9395 = vrsqrt.f32 %v14944_v1  ;;  %vm7839_vm13 = vweird.f32 %v9392_v50  ;;  %vm7819_vm14 = vweird.f32 %v9394_v48 }
 0xddd   : > { %v7811_v27 = vsel %vm7810_vm11, %v9390_v52, %v7807_v23  ;;  %v7834_v63 = vmul.f32 %v9392_v50, %v7833_v5  ;;  %9397 = vrsqrt.f32 %v14948_v35  ;;  %v7569_v34 = vsel %vm588_vm0, %v14962_v53, 0.0  ;;  %vm7840_vm1 = vmor %vm7838_vm10, %vm7839_vm13 }
 0xdde   : > { %v8082_v56 = vmul.f32 %v7811_v27, %v14753_v22  ;;  %v7814_v44 = vmul.f32 %v9394_v48, %v7813_v61  ;;  %7570 = vadd.xlane.f32.xlu2 %v7569_v34  ;;  %vm7820_vm3 = vmor %vm7818_vm2, %vm7819_vm14  ;;  %vm7848_vm4 = vweird.f32 %v14944_v1  ;;  %vm7858_vm15 = vweird.f32 %v14948_v35 }
 0xddf   : > { %v7835_v52 = vmul.f32 0.5, %v7834_v63  ;;  %v7682_v36 = vpop.xlane.xlu2 %7681  ;;  %v14967_v28 = vpop.xlane.xlu0 %7555 }
 0xde0   : > { %v8113_v9 = vmul.f32 %v14886_v59, %v8082_v56  ;;  %v7815_v22 = vmul.f32 0.5, %v7814_v44  ;;  %v7752_v18 = vmul.f32 %v7682_v36, %v13536_v2  ;;  %v7688_v33 = vpop.xlane.xlu1 %7687  ;;  %v7458_v43 = vpop.f32.mrf.mxu1 }
 0xde1   : > { %v7836_v21 = vsub.f32 1.5, %v7835_v52  ;;  %v7754_v31 = vmul.f32 %v7688_v33, %v13536_v2  ;;  %v7459_v44 = vadd.f32 %v14743_v4, %v7458_v43 }
 0xde2   : > { %v14980_v58 = vpop.eup %9395  ;;  %v8144_v7 = vadd.f32 %v14897_v49, %v8113_v9  ;;  %v7816_v23 = vsub.f32 1.5, %v7815_v22  ;;  %v14983_v5 = vadd.f32 1e-05, %v7752_v18  ;;  %v7596_v22 = vmul.f32 %v14889_v62, %v13536_v2 }
 0xde3   : > { %v14985_v61 = vpop.eup %9397  ;;  %v7837_v27 = vmul.f32 %v9392_v50, %v7836_v21  ;;  %v7843_v63 = vmul.f32 %v14980_v58, %v14944_v1  ;;  %v14989_v56 = vadd.f32 1e-05, %v7754_v31  ;;  %vm7849_vm5 = vweird.f32 %v14980_v58 }
 0xde4   : > { %8172 = vst.msk [vmem:[%s14915_s22] sm:$0xff] %vm588_vm0, %v8144_v7  ;;  %v7817_v52 = vmul.f32 %v9394_v48, %v7816_v23  ;;  %v7853_v36 = vmul.f32 %v14985_v61, %v14948_v35  ;;  %9399 = vrsqrt.f32 %v14983_v5  ;;  %v15011_v62 = vadd.f32 %v7459_v44, %v14626_v57  ;;  %vm7850_vm7 = vmor %vm7848_vm4, %vm7849_vm5 }
 0xde5   : > { %v7841_v9 = vsel %vm7840_vm1, %v9392_v50, %v7837_v27  ;;  %v7844_v18 = vmul.f32 %v14980_v58, %v7843_v63  ;;  %9401 = vrsqrt.f32 %v14989_v56  ;;  %vm7859_vm6 = vweird.f32 %v14985_v61 }
 0xde6   : > { %v8085_v12 = vmul.f32 %v7841_v9, %v14772_v39  ;;  %v7821_v34 = vsel %vm7820_vm3, %v9394_v48, %v7817_v52  ;;  %v7854_v11 = vmul.f32 %v14985_v61, %v7853_v36  ;;  %v7572_v57 = vsel %vm588_vm0, %v15011_v62, 0.0  ;;  %7699 = vadd.xlane.f32.xlu2 %v7698_v47  ;;  %vm7860_vm8 = vmor %vm7858_vm15, %vm7859_vm6 }
 0xde7   : > { %v8083_v33 = vmul.f32 %v7821_v34, %v14768_v25  ;;  %v7845_v43 = vmul.f32 0.5, %v7844_v18  ;;  %v7691_v50 = vpop.xlane.xlu2 %7690  ;;  %v7685_v21 = vpop.xlane.xlu0 %7684  ;;  %7573 = vadd.xlane.f32.xlu0 %v7572_v57  ;;  %v7692_v35 = vsel %vm588_vm0, %v14955_v3, 0.0  ;;  %vm7868_vm11 = vweird.f32 %v14983_v5 }
 0xde8   : > { %v8116_v31 = vmul.f32 %v14886_v59, %v8085_v12  ;;  %v7855_v7 = vmul.f32 0.5, %v7854_v11  ;;  %v7755_v39 = vmul.f32 %v7691_v50, %v13536_v2  ;;  %v7753_v48 = vmul.f32 %v7685_v21, %v13536_v2  ;;  %v7461_v23 = vpop.f32.mrf.mxu1 }
 0xde9   : > { %v8114_v27 = vmul.f32 %v14886_v59, %v8083_v33  ;;  %v7846_v25 = vsub.f32 1.5, %v7845_v43  ;;  %v7462_v47 = vadd.f32 %v14743_v4, %v7461_v23  ;;  %v7647_v23 = vmul.f32 %v14965_v14, %v14965_v14 }
 0xdea   : > { %v15020_v63 = vpop.eup %9399  ;;  %v8147_v44 = vadd.f32 %v14897_v49, %v8116_v31  ;;  %v7856_v52 = vsub.f32 1.5, %v7855_v7  ;;  %v15023_v36 = vadd.f32 1e-05, %v7755_v39  ;;  %v15025_v9 = vadd.f32 1e-05, %v7753_v48 }
 0xdeb   : > { %v9402_v18 = vpop.eup %9401  ;;  %v8145_v12 = vadd.f32 %v14897_v49, %v8114_v27  ;;  %v7847_v34 = vmul.f32 %v14980_v58, %v7846_v25  ;;  %v7863_v11 = vmul.f32 %v15020_v63, %v14983_v5  ;;  %v7645_v7 = vmul.f32 %v14958_v51, %v14958_v51 }
 0xdec   : > { %8175 = vst.msk [vmem:[%s14915_s22 + $0x18] sm:$0xff] %vm588_vm0, %v8147_v44  ;;  %v7857_v33 = vmul.f32 %v14985_v61, %v7856_v52  ;;  %v7883_v43 = vmul.f32 %v9402_v18, %v14989_v56  ;;  %9403 = vrsqrt.f32 %v15023_v36  ;;  %v15062_v27 = vsub.f32 %v14787_v45, %v7596_v22 }
 0xded   : > { %8173 = vst.msk [vmem:[%s14915_s22 + $0x8] sm:$0xff] %vm588_vm0, %v8145_v12  ;;  %v7851_v4 = vsel %vm7850_vm7, %v14980_v58, %v7847_v34  ;;  %v7864_v50 = vmul.f32 %v15020_v63, %v7863_v11  ;;  %9405 = vrsqrt.f32 %v15025_v9  ;;  %v15057_v58 = vadd.f32 %v7462_v47, %v14643_v46 }
 0xdee   : > { %v7861_v1 = vsel %vm7860_vm8, %v14985_v61, %v7857_v33  ;;  %v8086_v21 = vmul.f32 %v7851_v4, %v14791_v8  ;;  %v7884_v31 = vmul.f32 %v9402_v18, %v7883_v43  ;;  %v7707_v8 = vsel %vm588_vm0, %v14972_v38, 0.0 }
 0xdef   : > { %v8087_v39 = vmul.f32 %v7861_v1, %v14798_v6  ;;  %v7865_v48 = vmul.f32 0.5, %v7864_v50  ;;  %vm7869_vm12 = vweird.f32 %v15020_v63  ;;  %7708 = vadd.xlane.f32.xlu2 %v7707_v8  ;;  %v7575_v46 = vsel %vm588_vm0, %v15057_v58, 0.0  ;;  %7693 = vadd.xlane.f32.xlu0 %v7692_v35 }
 0xdf0   : > { %v8117_v3 = vmul.f32 %v14886_v59, %v8086_v21  ;;  %v7885_v61 = vmul.f32 0.5, %v7884_v31  ;;  %v7592_v45 = vmul.f32 %v14865_v30, %v13536_v2  ;;  %vm7889_vm9 = vweird.f32 %v9402_v18  ;;  %7576 = vadd.xlane.f32.xlu1 %v7575_v46  ;;  %vm7870_vm10 = vmor %vm7868_vm11, %vm7869_vm12 }
 0xdf1   : > { %v8118_v25 = vmul.f32 %v14886_v59, %v8087_v39  ;;  %v7866_v57 = vsub.f32 1.5, %v7865_v48  ;;  %vm7888_vm13 = vweird.f32 %v14989_v56  ;;  %v7652_v47 = vmul.f32 %v15062_v27, %v15062_v27 }
 0xdf2   : > { %v9404_v6 = vpop.eup %9403  ;;  %v8148_v22 = vadd.f32 %v14897_v49, %v8117_v3  ;;  %v7886_v44 = vsub.f32 1.5, %v7885_v61  ;;  %v7594_v33 = vmul.f32 %v14867_v40, %v13536_v2  ;;  %vm7890_vm14 = vmor %vm7888_vm13, %vm7889_vm9  ;;  %v7701_v21 = vsel %vm588_vm0, %v7647_v23, 0.0 }
 0xdf3   : > { %v9406_v38 = vpop.eup %9405  ;;  %v8149_v52 = vadd.f32 %v14897_v49, %v8118_v25  ;;  %v7867_v12 = vmul.f32 %v15020_v63, %v7866_v57  ;;  %v7893_v34 = vmul.f32 %v9404_v6, %v15023_v36  ;;  %v7695_v31 = vsel %vm588_vm0, %v7645_v7, 0.0 }
 0xdf4   : > { %8176 = vst.msk [vmem:[%s14915_s22 + $0x20] sm:$0xff] %vm588_vm0, %v8148_v22  ;;  %v7887_v30 = vmul.f32 %v9402_v18, %v7886_v44  ;;  %v7873_v11 = vmul.f32 %v9406_v38, %v15025_v9  ;;  %v15097_v40 = vsub.f32 %v14709_v41, %v7592_v45  ;;  %v7716_v48 = vsel %vm588_vm0, %v7652_v47, 0.0 }
 0xdf5   : > { %8177 = vst.msk [vmem:[%s14915_s22 + $0x28] sm:$0xff] %vm588_vm0, %v8149_v52  ;;  %v7871_v5 = vsel %vm7870_vm10, %v15020_v63, %v7867_v12  ;;  %v7894_v43 = vmul.f32 %v9404_v6, %v7893_v34  ;;  %vm7899_vm1 = vweird.f32 %v9404_v6  ;;  %vm7879_vm2 = vweird.f32 %v9406_v38 }
 0xdf6   : > { %v8088_v4 = vmul.f32 %v7871_v5, %v14814_v60  ;;  %v7891_v50 = vsel %vm7890_vm14, %v9402_v18, %v7887_v30  ;;  %v7874_v35 = vmul.f32 %v9406_v38, %v7873_v11  ;;  %v15102_v60 = vsub.f32 %v14749_v15, %v7594_v33 }
 0xdf7   : > { %v8090_v56 = vmul.f32 %v7891_v50, %v14820_v16  ;;  %v7895_v1 = vmul.f32 0.5, %v7894_v43  ;;  %7717 = vadd.xlane.f32.xlu2 %v7716_v48  ;;  %7702 = vadd.xlane.f32.xlu0 %v7701_v21  ;;  %vm7898_vm3 = vweird.f32 %v15023_v36  ;;  %vm7878_vm5 = vweird.f32 %v15025_v9 }
 0xdf8   : > { %v8119_v39 = vmul.f32 %v14886_v59, %v8088_v4  ;;  %v7875_v63 = vmul.f32 0.5, %v7874_v35  ;;  %7696 = vadd.xlane.f32.xlu1 %v7695_v31  ;;  %vm7900_vm4 = vmor %vm7898_vm3, %vm7899_vm1  ;;  %v7648_v61 = vmul.f32 %v15097_v40, %v15097_v40  ;;  %v7595_v8 = vmul.f32 %v14874_v24, %v13536_v2 }
 0xdf9   : > { %v8121_v18 = vmul.f32 %v14886_v59, %v8090_v56  ;;  %v7896_v16 = vsub.f32 1.5, %v7895_v1  ;;  %v7597_v25 = vmul.f32 %v14926_v29, %v13536_v2  ;;  %vm7880_vm6 = vmor %vm7878_vm5, %vm7879_vm2  ;;  %v7650_v36 = vmul.f32 %v15102_v60, %v15102_v60 }
 0xdfa   : > { %v8150_v7 = vadd.f32 %v14897_v49, %v8119_v39  ;;  %v7876_v23 = vsub.f32 1.5, %v7875_v63  ;;  %v7704_v22 = vsel %vm588_vm0, %v7648_v61, 0.0  ;;  %v15127_v29 = vsub.f32 %v14765_v19, %v7595_v8 }
 0xdfb   : > { %v8152_v41 = vadd.f32 %v14897_v49, %v8121_v18  ;;  %v7897_v3 = vmul.f32 %v9404_v6, %v7896_v16  ;;  %v7710_v52 = vsel %vm588_vm0, %v7650_v36, 0.0 }
 0xdfc   : > { %8178 = vst.msk [vmem:[%s14915_s22 + $0x30] sm:$0xff] %vm588_vm0, %v8150_v7  ;;  %v7877_v15 = vmul.f32 %v9406_v38, %v7876_v23 }
 0xdfd   : > { %8180 = vst.msk [vmem:[%s14915_s22 + $0x40] sm:$0xff] %vm588_vm0, %v8152_v41  ;;  %v7901_v57 = vsel %vm7900_vm4, %v9404_v6, %v7897_v3  ;;  %v15130_v6 = vsub.f32 %v14810_v10, %v7597_v25  ;;  %v7651_v10 = vmul.f32 %v15127_v29, %v15127_v29 }
 0xdfe   : > { %v8091_v9 = vmul.f32 %v7901_v57, %v14839_v17  ;;  %v7881_v46 = vsel %vm7880_vm6, %v9406_v38, %v7877_v15  ;;  %v7598_v17 = vmul.f32 %v14967_v28, %v13536_v2 }
 0xdff   : > { %v8089_v45 = vmul.f32 %v7881_v46, %v14836_v20  ;;  %7711 = vadd.xlane.f32.xlu0 %v7710_v52  ;;  %v7653_v19 = vmul.f32 %v15130_v6, %v15130_v6  ;;  %v7713_v30 = vsel %vm588_vm0, %v7651_v10, 0.0 }
 0xe00   : > { %v8122_v24 = vmul.f32 %v14886_v59, %v8091_v9  ;;  %7705 = vadd.xlane.f32.xlu1 %v7704_v22  ;;  %v15147_v38 = vsub.f32 %v14832_v32, %v7598_v17 }
 0xe01   : > { %v8120_v44 = vmul.f32 %v14886_v59, %v8089_v45  ;;  %v7719_v34 = vsel %vm588_vm0, %v7653_v19, 0.0 }
 0xe02   : > { %v8153_v12 = vadd.f32 %v14897_v49, %v8122_v24  ;;  %v7654_v28 = vmul.f32 %v15147_v38, %v15147_v38 }
 0xe03   : > { %v8151_v20 = vadd.f32 %v14897_v49, %v8120_v44 }
 0xe04   : > { %8181 = vst.msk [vmem:[%s14915_s22 + $0x48] sm:$0xff] %vm588_vm0, %v8153_v12  ;;  %v7722_v11 = vsel %vm588_vm0, %v7654_v28, 0.0 }
 0xe05   : > { %8179 = vst.msk [vmem:[%s14915_s22 + $0x38] sm:$0xff] %vm588_vm0, %v8151_v20 }
 0xe07   : > { %7720 = vadd.xlane.f32.xlu0 %v7719_v34 }
 0xe08   : > { %7714 = vadd.xlane.f32.xlu1 %v7713_v30 }
 0xe10   : > { %7723 = vadd.xlane.f32.xlu1 %v7722_v11 }
 0xe2e   : > { %v7559_v47 = vpop.xlane.xlu1 %7558 }
 0xe2f   : > { %v7599_v33 = vmul.f32 %v7559_v47, %v13536_v2 }
 0xe31   : > { %v15156_v5 = vsub.f32 %v14859_v55, %v7599_v33 }
 0xe33   : > { %v7655_v32 = vmul.f32 %v15156_v5, %v15156_v5 }
 0xe35   : > { %v7725_v43 = vsel %vm588_vm0, %v7655_v32, 0.0 }
 0xe36   : > { %v7562_v4 = vpop.xlane.xlu2 %7561  ;;  %7726 = vadd.xlane.f32.xlu2 %v7725_v43 }
 0xe37   : > { %v7600_v50 = vmul.f32 %v7562_v4, %v13536_v2 }
 0xe39   : > { %v15163_v35 = vsub.f32 %v14870_v0, %v7600_v50 }
 0xe3b   : > { %v7656_v56 = vmul.f32 %v15163_v35, %v15163_v35 }
 0xe3d   : > { %v7728_v1 = vsel %vm588_vm0, %v7656_v56, 0.0 }
 0xe3e   : > { %7729 = vadd.xlane.f32.xlu0 %v7728_v1 }
 0xe41   : > { %v7565_v55 = vpop.xlane.xlu0 %7564 }
 0xe42   : > { %v7601_v21 = vmul.f32 %v7565_v55, %v13536_v2 }
 0xe44   : > { %v15170_v31 = vsub.f32 %v14879_v54, %v7601_v21 }
 0xe46   : > { %v7657_v39 = vmul.f32 %v15170_v31, %v15170_v31 }
 0xe48   : > { %v7731_v63 = vsel %vm588_vm0, %v7657_v39, 0.0 }
 0xe49   : > { %v7568_v48 = vpop.xlane.xlu1 %7567  ;;  %7732 = vadd.xlane.f32.xlu1 %v7731_v63 }
 0xe4a   : > { %v7602_v0 = vmul.f32 %v7568_v48, %v13536_v2 }
 0xe4c   : > { %v15177_v18 = vsub.f32 %v14905_v42, %v7602_v0 }
 0xe4e   : > { %v7658_v16 = vmul.f32 %v15177_v18, %v15177_v18 }
 0xe50   : > { %v7734_v7 = vsel %vm588_vm0, %v7658_v16, 0.0 }
 0xe51   : > { %7735 = vadd.xlane.f32.xlu2 %v7734_v7  ;;  %v7571_v54 = vpop.xlane.xlu2 %7570 }
 0xe52   : > { %v7603_v23 = vmul.f32 %v7571_v54, %v13536_v2 }
 0xe54   : > { %v15184_v41 = vsub.f32 %v14962_v53, %v7603_v23 }
 0xe56   : > { %v7659_v3 = vmul.f32 %v15184_v41, %v15184_v41 }
 0xe58   : > { %v7737_v15 = vsel %vm588_vm0, %v7659_v3, 0.0 }
 0xe59   : > { %7738 = vadd.xlane.f32.xlu0 %v7737_v15  ;;  %v7700_v42 = vpop.xlane.xlu2 %7699 }
 0xe5a   : > { %v7758_v61 = vmul.f32 %v7700_v42, %v13536_v2  ;;  %v7574_v8 = vpop.xlane.xlu0 %7573 }
 0xe5b   : > { %v7604_v25 = vmul.f32 %v7574_v8, %v13536_v2 }
 0xe5c   : > { %v7786_v57 = vadd.f32 1e-05, %v7758_v61 }
 0xe5d   : > { %v15192_v36 = vsub.f32 %v15011_v62, %v7604_v25 }
 0xe5e   : > { %9407 = vrsqrt.f32 %v7786_v57  ;;  %vm7928_vm7 = vweird.f32 %v7786_v57 }
 0xe5f   : > { %v7660_v53 = vmul.f32 %v15192_v36, %v15192_v36 }
 0xe61   : > { %v7740_v46 = vsel %vm588_vm0, %v7660_v53, 0.0 }
 0xe62   : > { %v7709_v9 = vpop.xlane.xlu2 %7708  ;;  %7741 = vadd.xlane.f32.xlu1 %v7740_v46  ;;  %v7694_v22 = vpop.xlane.xlu0 %7693 }
 0xe63   : > { %v7761_v45 = vmul.f32 %v7709_v9, %v13536_v2  ;;  %v7577_v24 = vpop.xlane.xlu1 %7576  ;;  %v7756_v52 = vmul.f32 %v7694_v22, %v13536_v2 }
 0xe64   : > { %v7605_v44 = vmul.f32 %v7577_v24, %v13536_v2  ;;  %v9408_v12 = vpop.eup %9407 }
 0xe65   : > { %v7789_v20 = vadd.f32 1e-05, %v7761_v45  ;;  %v7923_v62 = vmul.f32 %v9408_v12, %v7786_v57  ;;  %v7784_v19 = vadd.f32 1e-05, %v7756_v52  ;;  %vm7929_vm15 = vweird.f32 %v9408_v12 }
 0xe66   : > { %v15201_v17 = vsub.f32 %v15057_v58, %v7605_v44  ;;  %vm7930_vm8 = vmor %vm7928_vm7, %vm7929_vm15 }
 0xe67   : > { %9409 = vrsqrt.f32 %v7789_v20  ;;  %v7924_v10 = vmul.f32 %v9408_v12, %v7923_v62  ;;  %vm7958_vm11 = vweird.f32 %v7789_v20  ;;  %vm7908_vm13 = vweird.f32 %v7784_v19 }
 0xe68   : > { %9411 = vrsqrt.f32 %v7784_v19  ;;  %v7661_v34 = vmul.f32 %v15201_v17, %v15201_v17 }
 0xe69   : > { %v7925_v30 = vmul.f32 0.5, %v7924_v10 }
 0xe6a   : > { %v7718_v28 = vpop.xlane.xlu2 %7717  ;;  %v7743_v11 = vsel %vm588_vm0, %v7661_v34, 0.0  ;;  %v7703_v32 = vpop.xlane.xlu0 %7702 }
 0xe6b   : > { %v7764_v47 = vmul.f32 %v7718_v28, %v13536_v2  ;;  %7744 = vadd.xlane.f32.xlu2 %v7743_v11  ;;  %v7697_v33 = vpop.xlane.xlu1 %7696  ;;  %v7926_v43 = vsub.f32 1.5, %v7925_v30  ;;  %v7759_v56 = vmul.f32 %v7703_v32, %v13536_v2 }
 0xe6c   : > { %v7757_v58 = vmul.f32 %v7697_v33, %v13536_v2 }
 0xe6d   : > { %v9410_v4 = vpop.eup %9409  ;;  %v15208_v50 = vadd.f32 1e-05, %v7764_v47  ;;  %v7927_v55 = vmul.f32 %v9408_v12, %v7926_v43  ;;  %v15216_v54 = vadd.f32 1e-05, %v7759_v56 }
 0xe6e   : > { %v9412_v1 = vpop.eup %9411  ;;  %v7953_v21 = vmul.f32 %v9410_v4, %v7789_v20  ;;  %v15211_v39 = vadd.f32 1e-05, %v7757_v58  ;;  %vm7959_vm12 = vweird.f32 %v9410_v4 }
 0xe6f   : > { %v7903_v63 = vmul.f32 %v9412_v1, %v7784_v19  ;;  %9413 = vrsqrt.f32 %v15208_v50  ;;  %v7931_v48 = vsel %vm7930_vm8, %v9408_v12, %v7927_v55  ;;  %vm7909_vm9 = vweird.f32 %v9412_v1  ;;  %vm7960_vm10 = vmor %vm7958_vm11, %vm7959_vm12 }
 0xe70   : > { %v7954_v0 = vmul.f32 %v9410_v4, %v7953_v21  ;;  %9415 = vrsqrt.f32 %v15211_v39  ;;  %v8094_v16 = vmul.f32 %v7931_v48, %v14918_v13  ;;  %vm7910_vm14 = vmor %vm7908_vm13, %vm7909_vm9  ;;  %vm7988_vm1 = vweird.f32 %v15208_v50 }
 0xe71   : > { %v7904_v7 = vmul.f32 %v9412_v1, %v7903_v63  ;;  %9417 = vrsqrt.f32 %v15216_v54  ;;  %vm7918_vm5 = vweird.f32 %v15211_v39  ;;  %vm7938_vm7 = vweird.f32 %v15216_v54 }
 0xe72   : > { %v7955_v23 = vmul.f32 0.5, %v7954_v0  ;;  %v8125_v3 = vmul.f32 %v14886_v59, %v8094_v16  ;;  %v7712_v61 = vpop.xlane.xlu0 %7711 }
 0xe73   : > { %v7905_v15 = vmul.f32 0.5, %v7904_v7  ;;  %v7706_v42 = vpop.xlane.xlu1 %7705  ;;  %v7762_v57 = vmul.f32 %v7712_v61, %v13536_v2 }
 0xe74   : > { %v7956_v8 = vsub.f32 1.5, %v7955_v23  ;;  %v7760_v25 = vmul.f32 %v7706_v42, %v13536_v2  ;;  %v8156_v13 = vadd.f32 %v14897_v49, %v8125_v3 }
 0xe75   : > { %v9414_v53 = vpop.eup %9413  ;;  %v7906_v9 = vsub.f32 1.5, %v7905_v15  ;;  %v15229_v12 = vadd.f32 1e-05, %v7762_v57 }
 0xe76   : > { %v9416_v46 = vpop.eup %9415  ;;  %v7957_v45 = vmul.f32 %v9410_v4, %v7956_v8  ;;  %v7983_v24 = vmul.f32 %v9414_v53, %v15208_v50  ;;  %v15224_v22 = vadd.f32 1e-05, %v7760_v25  ;;  %8184 = vst.msk [vmem:[%s14915_s22 + $0x60] sm:$0xff] %vm588_vm0, %v8156_v13  ;;  %vm7989_vm2 = vweird.f32 %v9414_v53 }
 0xe77   : > { %v7907_v44 = vmul.f32 %v9412_v1, %v7906_v9  ;;  %v7913_v52 = vmul.f32 %v9416_v46, %v15211_v39  ;;  %v9418_v34 = vpop.eup %9417  ;;  %vm7919_vm3 = vweird.f32 %v9416_v46  ;;  %vm7990_vm4 = vmor %vm7988_vm1, %vm7989_vm2  ;;  %vm7968_vm13 = vweird.f32 %v15229_v12 }
 0xe78   : > { %v7961_v62 = vsel %vm7960_vm10, %v9410_v4, %v7957_v45  ;;  %v7984_v10 = vmul.f32 %v9414_v53, %v7983_v24  ;;  %9419 = vrsqrt.f32 %v15224_v22  ;;  %v7933_v19 = vmul.f32 %v9418_v34, %v15216_v54  ;;  %vm7920_vm6 = vmor %vm7918_vm5, %vm7919_vm3 }
 0xe79   : > { %v8097_v20 = vmul.f32 %v7961_v62, %v14942_v26  ;;  %v7911_v30 = vsel %vm7910_vm14, %v9412_v1, %v7907_v44  ;;  %v7914_v28 = vmul.f32 %v9416_v46, %v7913_v52  ;;  %9421 = vrsqrt.f32 %v15229_v12 }
 0xe7a   : > { %v8092_v11 = vmul.f32 %v7911_v30, %v14929_v37  ;;  %v7985_v47 = vmul.f32 0.5, %v7984_v10  ;;  %v7721_v58 = vpop.xlane.xlu0 %7720  ;;  %v7934_v56 = vmul.f32 %v9418_v34, %v7933_v19  ;;  %vm7939_vm15 = vweird.f32 %v9418_v34 }
 0xe7b   : > { %v8128_v33 = vmul.f32 %v14886_v59, %v8097_v20  ;;  %v7915_v32 = vmul.f32 0.5, %v7914_v28  ;;  %v7715_v43 = vpop.xlane.xlu1 %7714  ;;  %v7765_v21 = vmul.f32 %v7721_v58, %v13536_v2  ;;  %vm7940_vm8 = vmor %vm7938_vm7, %vm7939_vm15  ;;  %vm7948_vm11 = vweird.f32 %v15224_v22 }
 0xe7c   : > { %v8123_v26 = vmul.f32 %v14886_v59, %v8092_v11  ;;  %v7986_v4 = vsub.f32 1.5, %v7985_v47  ;;  %v7763_v1 = vmul.f32 %v7715_v43, %v13536_v2  ;;  %v7935_v16 = vmul.f32 0.5, %v7934_v56 }
 0xe7d   : > { %v8159_v37 = vadd.f32 %v14897_v49, %v8128_v33  ;;  %v7916_v55 = vsub.f32 1.5, %v7915_v32  ;;  %v15252_v42 = vadd.f32 1e-05, %v7765_v21 }
 0xe7e   : > { %v9420_v63 = vpop.eup %9419  ;;  %v8154_v48 = vadd.f32 %v14897_v49, %v8123_v26  ;;  %v7987_v0 = vmul.f32 %v9414_v53, %v7986_v4  ;;  %v15243_v7 = vadd.f32 1e-05, %v7763_v1  ;;  %v7936_v8 = vsub.f32 1.5, %v7935_v16 }
 0xe7f   : > { %v9422_v23 = vpop.eup %9421  ;;  %8187 = vst.msk [vmem:[%s14915_s22 + $0x78] sm:$0xff] %vm588_vm0, %v8159_v37  ;;  %v7917_v3 = vmul.f32 %v9416_v46, %v7916_v55  ;;  %v7943_v15 = vmul.f32 %v9420_v63, %v15224_v22  ;;  %vm7949_vm12 = vweird.f32 %v9420_v63  ;;  %vm7998_vm5 = vweird.f32 %v15252_v42 }
 0xe80   : > { %8182 = vst.msk [vmem:[%s14915_s22 + $0x50] sm:$0xff] %vm588_vm0, %v8154_v48  ;;  %v7991_v61 = vsel %vm7990_vm4, %v9414_v53, %v7987_v0  ;;  %v7963_v25 = vmul.f32 %v9422_v23, %v15229_v12  ;;  %9423 = vrsqrt.f32 %v15243_v7  ;;  %v7937_v9 = vmul.f32 %v9418_v34, %v7936_v8  ;;  %vm7950_vm10 = vmor %vm7948_vm11, %vm7949_vm12 }
 0xe81   : > { %v8100_v57 = vmul.f32 %v7991_v61, %v15062_v27  ;;  %v7921_v50 = vsel %vm7920_vm6, %v9416_v46, %v7917_v3  ;;  %v7944_v13 = vmul.f32 %v9420_v63, %v7943_v15  ;;  %9425 = vrsqrt.f32 %v15252_v42 }
 0xe82   : > { %v8093_v39 = vmul.f32 %v7921_v50, %v14958_v51  ;;  %v7964_v45 = vmul.f32 %v9422_v23, %v7963_v25  ;;  %v7941_v46 = vsel %vm7940_vm8, %v9418_v34, %v7937_v9  ;;  %vm7969_vm9 = vweird.f32 %v9422_v23 }
 0xe83   : > { %v8131_v53 = vmul.f32 %v14886_v59, %v8100_v57  ;;  %v7945_v24 = vmul.f32 0.5, %v7944_v13  ;;  %v7724_v44 = vpop.xlane.xlu1 %7723  ;;  %v8095_v54 = vmul.f32 %v7941_v46, %v14965_v14  ;;  %vm7970_vm14 = vmor %vm7968_vm13, %vm7969_vm9  ;;  %vm7978_vm2 = vweird.f32 %v15243_v7 }
 0xe84   : > { %v8124_v27 = vmul.f32 %v14886_v59, %v8093_v39  ;;  %v7965_v52 = vmul.f32 0.5, %v7964_v45  ;;  %v7766_v62 = vmul.f32 %v7724_v44, %v13536_v2 }
 0xe85   : > { %v8162_v51 = vadd.f32 %v14897_v49, %v8131_v53  ;;  %v7946_v10 = vsub.f32 1.5, %v7945_v24  ;;  %v8126_v34 = vmul.f32 %v14886_v59, %v8095_v54 }
 0xe86   : > { %v8155_v20 = vadd.f32 %v14897_v49, %v8124_v27  ;;  %v7966_v30 = vsub.f32 1.5, %v7965_v52  ;;  %v7794_v28 = vadd.f32 1e-05, %v7766_v62  ;;  %v9424_v11 = vpop.eup %9423 }
 0xe87   : > { %8190 = vst.msk [vmem:[%s14915_s22 + $0x90] sm:$0xff] %vm588_vm0, %v8162_v51  ;;  %v7947_v47 = vmul.f32 %v9420_v63, %v7946_v10  ;;  %v7973_v19 = vmul.f32 %v9424_v11, %v15243_v7  ;;  %v9426_v33 = vpop.eup %9425  ;;  %v8157_v32 = vadd.f32 %v14897_v49, %v8126_v34  ;;  %vm7979_vm1 = vweird.f32 %v9424_v11 }
 0xe88   : > { %8183 = vst.msk [vmem:[%s14915_s22 + $0x58] sm:$0xff] %vm588_vm0, %v8155_v20  ;;  %v7967_v14 = vmul.f32 %v9422_v23, %v7966_v30  ;;  %9427 = vrsqrt.f32 %v7794_v28  ;;  %v7993_v4 = vmul.f32 %v9426_v33, %v15252_v42  ;;  %vm7999_vm3 = vweird.f32 %v9426_v33  ;;  %vm7980_vm4 = vmor %vm7978_vm2, %vm7979_vm1 }
 0xe89   : > { %v7951_v43 = vsel %vm7950_vm10, %v9420_v63, %v7947_v47  ;;  %v7974_v22 = vmul.f32 %v9424_v11, %v7973_v19  ;;  %8185 = vst.msk [vmem:[%s14915_s22 + $0x68] sm:$0xff] %vm588_vm0, %v8157_v32  ;;  %vm8000_vm6 = vmor %vm7998_vm5, %vm7999_vm3  ;;  %vm8008_vm7 = vweird.f32 %v7794_v28 }
 0xe8a   : > { %v8096_v58 = vmul.f32 %v7951_v43, %v15097_v40  ;;  %v7971_v26 = vsel %vm7970_vm14, %v9422_v23, %v7967_v14  ;;  %v7994_v37 = vmul.f32 %v9426_v33, %v7993_v4 }
 0xe8b   : > { %v8098_v12 = vmul.f32 %v7971_v26, %v15102_v60  ;;  %v7975_v1 = vmul.f32 0.5, %v7974_v22 }
 0xe8c   : > { %v8127_v56 = vmul.f32 %v14886_v59, %v8096_v58  ;;  %v7995_v48 = vmul.f32 0.5, %v7994_v37 }
 0xe8d   : > { %v8129_v55 = vmul.f32 %v14886_v59, %v8098_v12  ;;  %v7976_v40 = vsub.f32 1.5, %v7975_v1 }
 0xe8e   : > { %v9428_v21 = vpop.eup %9427  ;;  %v8158_v63 = vadd.f32 %v14897_v49, %v8127_v56  ;;  %v7996_v60 = vsub.f32 1.5, %v7995_v48  ;;  %v15328_v48 = vld [vmem:[%s15380_s16] ss:$0 sm:$0xff] }
 0xe8f   : > { %v8160_v0 = vadd.f32 %v14897_v49, %v8129_v55  ;;  %v8003_v16 = vmul.f32 %v9428_v21, %v7794_v28  ;;  %v7977_v23 = vmul.f32 %v9424_v11, %v7976_v40  ;;  %vm8009_vm15 = vweird.f32 %v9428_v21 }
 0xe90   : > { %8186 = vst.msk [vmem:[%s14915_s22 + $0x70] sm:$0xff] %vm588_vm0, %v8158_v63  ;;  %v7997_v61 = vmul.f32 %v9426_v33, %v7996_v60  ;;  %vm8010_vm8 = vmor %vm8008_vm7, %vm8009_vm15 }
 0xe91   : > { %8188 = vst.msk [vmem:[%s14915_s22 + $0x80] sm:$0xff] %vm588_vm0, %v8160_v0  ;;  %v8004_v3 = vmul.f32 %v9428_v21, %v8003_v16  ;;  %v7981_v15 = vsel %vm7980_vm4, %v9424_v11, %v7977_v23 }
 0xe92   : > { %v8099_v8 = vmul.f32 %v7981_v15, %v15127_v29  ;;  %v8001_v57 = vsel %vm8000_vm6, %v9426_v33, %v7997_v61 }
 0xe93   : > { %v8005_v25 = vmul.f32 0.5, %v8004_v3  ;;  %v8101_v7 = vmul.f32 %v8001_v57, %v15130_v6 }
 0xe94   : > { %v8130_v50 = vmul.f32 %v14886_v59, %v8099_v8 }
 0xe95   : > { %v8006_v13 = vsub.f32 1.5, %v8005_v25  ;;  %v8132_v9 = vmul.f32 %v14886_v59, %v8101_v7 }
 0xe96   : > { %v8161_v39 = vadd.f32 %v14897_v49, %v8130_v50 }
 0xe97   : > { %v8007_v45 = vmul.f32 %v9428_v21, %v8006_v13  ;;  %v8163_v29 = vadd.f32 %v14897_v49, %v8132_v9 }
 0xe98   : > { %8189 = vst.msk [vmem:[%s14915_s22 + $0x88] sm:$0xff] %vm588_vm0, %v8161_v39 }
 0xe99   : > { %v8011_v42 = vsel %vm8010_vm8, %v9428_v21, %v8007_v45  ;;  %8191 = vst.msk [vmem:[%s14915_s22 + $0x98] sm:$0xff] %vm588_vm0, %v8163_v29 }
 0xe9a   : > { %v8102_v53 = vmul.f32 %v8011_v42, %v15147_v38 }
 0xe9c   : > { %v8133_v6 = vmul.f32 %v14886_v59, %v8102_v53 }
 0xe9e   : > { %v8164_v24 = vadd.f32 %v14897_v49, %v8133_v6 }
 0xea0   : > { %8192 = vst.msk [vmem:[%s14915_s22 + $0xa0] sm:$0xff] %vm588_vm0, %v8164_v24 }
 0xea9   : > { %v7727_v44 = vpop.xlane.xlu2 %7726 }
 0xeaa   : > { %v7767_v27 = vmul.f32 %v7727_v44, %v13536_v2 }
 0xeac   : > { %v7795_v46 = vadd.f32 1e-05, %v7767_v27 }
 0xeae   : > { %9429 = vrsqrt.f32 %v7795_v46  ;;  %vm8018_vm9 = vweird.f32 %v7795_v46 }
 0xeb1   : > { %v7730_v52 = vpop.xlane.xlu0 %7729 }
 0xeb2   : > { %v7768_v62 = vmul.f32 %v7730_v52, %v13536_v2 }
 0xeb4   : > { %v9430_v51 = vpop.eup %9429  ;;  %v7796_v54 = vadd.f32 1e-05, %v7768_v62 }
 0xeb5   : > { %v8013_v10 = vmul.f32 %v9430_v51, %v7795_v46  ;;  %vm8019_vm12 = vweird.f32 %v9430_v51 }
 0xeb6   : > { %9431 = vrsqrt.f32 %v7796_v54  ;;  %vm8020_vm11 = vmor %vm8018_vm9, %vm8019_vm12  ;;  %vm8028_vm13 = vweird.f32 %v7796_v54 }
 0xeb7   : > { %v8014_v38 = vmul.f32 %v9430_v51, %v8013_v10 }
 0xeb9   : > { %v8015_v20 = vmul.f32 0.5, %v8014_v38 }
 0xebb   : > { %v8016_v30 = vsub.f32 1.5, %v8015_v20 }
 0xebc   : > { %v9432_v28 = vpop.eup %9431  ;;  %v7733_v11 = vpop.xlane.xlu1 %7732 }
 0xebd   : > { %v8017_v34 = vmul.f32 %v9430_v51, %v8016_v30  ;;  %v8023_v47 = vmul.f32 %v9432_v28, %v7796_v54  ;;  %v7769_v14 = vmul.f32 %v7733_v11, %v13536_v2  ;;  %vm8029_vm10 = vweird.f32 %v9432_v28 }
 0xebe   : > { %vm8030_vm14 = vmor %vm8028_vm13, %vm8029_vm10 }
 0xebf   : > { %v8021_v19 = vsel %vm8020_vm11, %v9430_v51, %v8017_v34  ;;  %v8024_v33 = vmul.f32 %v9432_v28, %v8023_v47  ;;  %v7797_v32 = vadd.f32 1e-05, %v7769_v14 }
 0xec0   : > { %v8103_v43 = vmul.f32 %v8021_v19, %v15156_v5 }
 0xec1   : > { %v8025_v58 = vmul.f32 0.5, %v8024_v33  ;;  %9433 = vrsqrt.f32 %v7797_v32  ;;  %vm8038_vm2 = vweird.f32 %v7797_v32 }
 0xec2   : > { %v8134_v26 = vmul.f32 %v14886_v59, %v8103_v43  ;;  %v15322_v59 = vld [vmem:[%s15379_s15] ss:$0 sm:$0xff] }
 0xec3   : > { %v8026_v22 = vsub.f32 1.5, %v8025_v58 }
 0xec4   : > { %v8165_v4 = vadd.f32 %v14897_v49, %v8134_v26  ;;  %v7736_v12 = vpop.xlane.xlu2 %7735 }
 0xec5   : > { %v8027_v56 = vmul.f32 %v9432_v28, %v8026_v22  ;;  %v7770_v1 = vmul.f32 %v7736_v12, %v13536_v2 }
 0xec6   : > { %8193 = vst.msk [vmem:[%s14915_s22 + $0xa8] sm:$0xff] %vm588_vm0, %v8165_v4 }
 0xec7   : > { %v9434_v37 = vpop.eup %9433  ;;  %v8031_v55 = vsel %vm8030_vm14, %v9432_v28, %v8027_v56  ;;  %v7798_v5 = vadd.f32 1e-05, %v7770_v1 }
 0xec8   : > { %v8104_v21 = vmul.f32 %v8031_v55, %v15163_v35  ;;  %v8033_v63 = vmul.f32 %v9434_v37, %v7797_v32  ;;  %vm8039_vm1 = vweird.f32 %v9434_v37 }
 0xec9   : > { %9435 = vrsqrt.f32 %v7798_v5  ;;  %vm8040_vm3 = vmor %vm8038_vm2, %vm8039_vm1  ;;  %vm8048_vm5 = vweird.f32 %v7798_v5 }
 0xeca   : > { %v8135_v49 = vmul.f32 %v15322_v59, %v8104_v21  ;;  %v8034_v40 = vmul.f32 %v9434_v37, %v8033_v63 }
 0xecc   : > { %v8166_v0 = vadd.f32 %v15328_v48, %v8135_v49  ;;  %v8035_v16 = vmul.f32 0.5, %v8034_v40  ;;  %v7739_v60 = vpop.xlane.xlu0 %7738 }
 0xecd   : > { %v7771_v61 = vmul.f32 %v7739_v60, %v13536_v2 }
 0xece   : > { %8194 = vst.msk [vmem:[%s14915_s22 + $0xb0] sm:$0xff] %vm588_vm0, %v8166_v0  ;;  %v8036_v35 = vsub.f32 1.5, %v8035_v16 }
 0xecf   : > { %v9436_v23 = vpop.eup %9435  ;;  %v7799_v57 = vadd.f32 1e-05, %v7771_v61 }
 0xed0   : > { %v8037_v3 = vmul.f32 %v9434_v37, %v8036_v35  ;;  %v8043_v15 = vmul.f32 %v9436_v23, %v7798_v5  ;;  %vm8049_vm4 = vweird.f32 %v9436_v23 }
 0xed1   : > { %9437 = vrsqrt.f32 %v7799_v57  ;;  %vm8050_vm6 = vmor %vm8048_vm5, %vm8049_vm4  ;;  %vm8058_vm7 = vweird.f32 %v7799_v57 }
 0xed2   : > { %v8041_v8 = vsel %vm8040_vm3, %v9434_v37, %v8037_v3  ;;  %v8044_v25 = vmul.f32 %v9436_v23, %v8043_v15 }
 0xed3   : > { %v8105_v50 = vmul.f32 %v8041_v8, %v15170_v31 }
 0xed4   : > { %v8045_v7 = vmul.f32 0.5, %v8044_v25 }
 0xed5   : > { %v8136_v13 = vmul.f32 %v15322_v59, %v8105_v50  ;;  %v7742_v29 = vpop.xlane.xlu1 %7741 }
 0xed6   : > { %v8046_v39 = vsub.f32 1.5, %v8045_v7  ;;  %v7772_v42 = vmul.f32 %v7742_v29, %v13536_v2 }
 0xed7   : > { %v8167_v9 = vadd.f32 %v15328_v48, %v8136_v13  ;;  %v9438_v53 = vpop.eup %9437 }
 0xed8   : > { %v8047_v45 = vmul.f32 %v9436_v23, %v8046_v39  ;;  %v8053_v24 = vmul.f32 %v9438_v53, %v7799_v57  ;;  %v7800_v44 = vadd.f32 1e-05, %v7772_v42  ;;  %vm8059_vm15 = vweird.f32 %v9438_v53 }
 0xed9   : > { %8195 = vst.msk [vmem:[%s14915_s22 + $0xb8] sm:$0xff] %vm588_vm0, %v8167_v9  ;;  %vm8060_vm8 = vmor %vm8058_vm7, %vm8059_vm15 }
 0xeda   : > { %v8051_v6 = vsel %vm8050_vm6, %v9436_v23, %v8047_v45  ;;  %v8054_v46 = vmul.f32 %v9438_v53, %v8053_v24  ;;  %9439 = vrsqrt.f32 %v7800_v44  ;;  %vm8068_vm9 = vweird.f32 %v7800_v44 }
 0xedb   : > { %v8106_v31 = vmul.f32 %v8051_v6, %v15177_v18 }
 0xedc   : > { %v8055_v62 = vmul.f32 0.5, %v8054_v46 }
 0xedd   : > { %v8137_v27 = vmul.f32 %v15322_v59, %v8106_v31 }
 0xede   : > { %v7745_v51 = vpop.xlane.xlu2 %7744  ;;  %v8056_v54 = vsub.f32 1.5, %v8055_v62 }
 0xedf   : > { %v8168_v52 = vadd.f32 %v15328_v48, %v8137_v27  ;;  %v7773_v10 = vmul.f32 %v7745_v51, %v13536_v2 }
 0xee0   : > { %v9440_v38 = vpop.eup %9439  ;;  %v8057_v20 = vmul.f32 %v9438_v53, %v8056_v54 }
 0xee1   : > { %8196 = vst.msk [vmem:[%s14915_s22 + $0xc0] sm:$0xff] %vm588_vm0, %v8168_v52  ;;  %v7801_v18 = vadd.f32 1e-05, %v7773_v10  ;;  %v8063_v30 = vmul.f32 %v9440_v38, %v7800_v44  ;;  %vm8069_vm12 = vweird.f32 %v9440_v38 }
 0xee2   : > { %v8061_v28 = vsel %vm8060_vm8, %v9438_v53, %v8057_v20  ;;  %vm8070_vm11 = vmor %vm8068_vm9, %vm8069_vm12 }
 0xee3   : > { %9441 = vrsqrt.f32 %v7801_v18  ;;  %v8107_v11 = vmul.f32 %v8061_v28, %v15184_v41  ;;  %v8064_v34 = vmul.f32 %v9440_v38, %v8063_v30  ;;  %vm8078_vm13 = vweird.f32 %v7801_v18 }
 0xee5   : > { %v8138_v47 = vmul.f32 %v15322_v59, %v8107_v11  ;;  %v8065_v14 = vmul.f32 0.5, %v8064_v34 }
 0xee7   : > { %v8169_v19 = vadd.f32 %v15328_v48, %v8138_v47  ;;  %v8066_v33 = vsub.f32 1.5, %v8065_v14 }
 0xee9   : > { %v9442_v2 = vpop.eup %9441  ;;  %8197 = vst.msk [vmem:[%s14915_s22 + $0xc8] sm:$0xff] %vm588_vm0, %v8169_v19  ;;  %v8067_v32 = vmul.f32 %v9440_v38, %v8066_v33 }
 0xeea   : > { %v8073_v43 = vmul.f32 %v9442_v2, %v7801_v18  ;;  %vm8079_vm10 = vweird.f32 %v9442_v2 }
 0xeeb   : > { %v8071_v58 = vsel %vm8070_vm11, %v9440_v38, %v8067_v32  ;;  %vm8080_vm14 = vmor %vm8078_vm13, %vm8079_vm10 }
 0xeec   : > { %v8074_v26 = vmul.f32 %v9442_v2, %v8073_v43  ;;  %v8108_v41 = vmul.f32 %v8071_v58, %v15192_v36 }
 0xeee   : > { %v8075_v22 = vmul.f32 0.5, %v8074_v26  ;;  %v8139_v4 = vmul.f32 %v15322_v59, %v8108_v41 }
 0xef0   : > { %v8076_v12 = vsub.f32 1.5, %v8075_v22  ;;  %v8170_v56 = vadd.f32 %v15328_v48, %v8139_v4 }
 0xef2   : > { %v8077_v1 = vmul.f32 %v9442_v2, %v8076_v12  ;;  %8198 = vst.msk [vmem:[%s14915_s22 + $0xd0] sm:$0xff] %vm588_vm0, %v8170_v56 }
 0xef4   : > { %v8081_v37 = vsel %vm8080_vm14, %v9442_v2, %v8077_v1 }
 0xef5   : > { %v8109_v55 = vmul.f32 %v8081_v37, %v15201_v17 }
 0xef7   : > { %v8140_v5 = vmul.f32 %v15322_v59, %v8109_v55 }
 0xef9   : > { %v8171_v21 = vadd.f32 %v15328_v48, %v8140_v5 }
 0xefb   : > { %8199 = vst.msk [vmem:[%s14915_s22 + $0xd8] sm:$0xff] %vm588_vm0, %v8171_v21 }
 0xefc PF: > { %s27_s24 = sadd.s32 1, %s9491_s24  }
 0xefd   : > { %p24_p4 = scmp.ge.s32.totalorder %s27_s24, 4  }
 0xeff   :  { %26 = sbr.rel (!%p24_p4) target bundleno = 3 (0x3), region = 118 }

</bundles_post_ra>
